<compile_context>
chip_gen: v7x
topology: tpu7x:2x2x1
jax: 0.10.0
libtpu: 0.0.40
codegen_flags: <defaults>
</compile_context>

<pallas_src>
import functools

import jax
import jax.numpy as jnp
from jax.experimental import pallas as pl
from jax.experimental.pallas import tpu as pltpu

EPS = 1e-5
_VMEM_LIMIT = 32 * 1024 * 1024


# ---------------------------------------------------------------------------
# small helpers
# ---------------------------------------------------------------------------
def _row_tile(m, target):
    """Largest divisor of m that is <= target and a multiple of 8 (else m itself)."""
    t = min(m, max(1, target))
    for cand in range(t, 0, -1):
        if m % cand == 0 and (cand % 8 == 0 or cand == m):
            return cand
    return m


def _apply_act(y, activation, sol):
    if activation == "leaky":
        return jnp.where(y > 0, y, sol * y)
    if activation == "relu":
        return jnp.maximum(y, 0.0)
    return y


def im2col4x4s2(x):
    """Host prep for a 4x4/stride-2/pad-1 conv: pad + space-to-depth + 4-tap concat.

    x: (N, H, W, C) -> (N*Ho*Wo, 16*C) rows ordered (di, dj, r, s, c), plus geometry.
    Cheap XLA relayout (~4x the already-tiny activation bytes), stays in x.dtype.
    """
    N, H, W, C = x.shape
    Ho, Wo = H // 2, W // 2
    Hs, Ws = Ho + 1, Wo + 1
    xp = jnp.pad(x, ((0, 0), (1, 1), (1, 1), (0, 0)))
    s2d = xp.reshape(N, Hs, 2, Ws, 2, C).transpose(0, 1, 3, 2, 4, 5)
    s2d = s2d.reshape(N, Hs, Ws, 4 * C)                       # per-row layout (r, s, c)
    taps = [s2d[:, di:di + Ho, dj:dj + Wo, :] for di in (0, 1) for dj in (0, 1)]
    cols = jnp.concatenate(taps, axis=-1)                     # (N, Ho, Wo, 16*C)
    return cols.reshape(N * Ho * Wo, 16 * C), (N, Ho, Wo)


# ---------------------------------------------------------------------------
# Pallas kernels
# ---------------------------------------------------------------------------
def matmul_bias_act_kernel(x_ref, w_ref, b_ref, o_ref, *, activation, sol):
    """conv1: merged-K matmul + bias + activation, bf16 output."""
    acc = jnp.dot(x_ref[...], w_ref[...], preferred_element_type=jnp.float32)
    acc = acc + b_ref[...]
    o_ref[...] = _apply_act(acc, activation, sol).astype(o_ref.dtype)


def conv_bn_kernel(x_ref, w_ref, b_ref, g_ref, be_ref, o_ref,
                   ybuf_ref, s_ref, q_ref, *, count, activation, sol):
    """Fused conv + BatchNorm(batch stats) + activation, two-phase grid (2, n_tiles).

    Phase 0 (p==0): per-tile conv -> f32 VMEM scratch, accumulate sum / sum-sq.
    Phase 1 (p==1): scale/shift from accumulated stats, apply + activation -> bf16 out.
    The pre-BN activations never leave VMEM.
    """
    p = pl.program_id(0)
    i = pl.program_id(1)

    @pl.when(jnp.logical_and(p == 0, i == 0))
    def _():
        s_ref[...] = jnp.zeros_like(s_ref)
        q_ref[...] = jnp.zeros_like(q_ref)

    @pl.when(p == 0)
    def _():
        acc = jnp.dot(x_ref[...], w_ref[...], preferred_element_type=jnp.float32)
        acc = acc + b_ref[...]
        ybuf_ref[i] = acc
        s_ref[...] += jnp.sum(acc, axis=0, keepdims=True)
        q_ref[...] += jnp.sum(acc * acc, axis=0, keepdims=True)

    @pl.when(p == 1)
    def _():
        inv_n = 1.0 / count
        mean = s_ref[...] * inv_n
        var = jnp.maximum(q_ref[...] * inv_n - mean * mean, 0.0)   # biased (BN train)
        scale = g_ref[...] * jax.lax.rsqrt(var + EPS)
        shift = be_ref[...] - mean * scale
        y = ybuf_ref[i] * scale + shift
        o_ref[...] = _apply_act(y, activation, sol).astype(o_ref.dtype)


def heads_kernel(x_ref, wh_ref, bh_ref, we_ref, be_ref, wl_ref, bl_ref,
                 hair_ref, eye_ref, logit_ref, sig_ref):
    """Fused heads: (folded conv_h+linear_h) softmax, (folded conv_e+linear_e) softmax,
    real/fake linear + sigmoid — all from the NHWC-flattened conv4 features."""
    x = x_ref[...].astype(jnp.float32)

    def softmax(z):
        m = jnp.max(z, axis=-1, keepdims=True)
        ez = jnp.exp(z - m)
        return ez * pl.reciprocal(jnp.sum(ez, axis=-1, keepdims=True), approx=True)

    hl = jnp.dot(x, wh_ref[...], preferred_element_type=jnp.float32) + bh_ref[...]
    el = jnp.dot(x, we_ref[...], preferred_element_type=jnp.float32) + be_ref[...]
    xl = jnp.dot(x, wl_ref[...], preferred_element_type=jnp.float32) + bl_ref[...]

    hair_ref[...] = softmax(hl).astype(hair_ref.dtype)
    eye_ref[...] = softmax(el).astype(eye_ref.dtype)
    logit_ref[...] = xl.astype(logit_ref.dtype)
    z = jnp.exp(-jnp.abs(xl))                                  # overflow-safe sigmoid
    s = 1.0 / (1.0 + z)
    sig_ref[...] = jnp.where(xl >= 0, s, 1.0 - s).astype(sig_ref.dtype)


# ---------------------------------------------------------------------------
# pallas_call wrappers
# ---------------------------------------------------------------------------
def conv_act(cols, w, b, *, activation, sol, target_rows=512):
    """conv1: im2col rows (M, K) bf16 x (K, Cout) bf16 + bias + act -> (M, Cout) bf16."""
    M, K = cols.shape
    Cout = w.shape[1]
    tr = _row_tile(M, target_rows)          # multi-image row tiles, grid >= 2 here
    kern = functools.partial(matmul_bias_act_kernel, activation=activation, sol=sol)
    return pl.pallas_call(
        kern,
        grid=(M // tr,),
        in_specs=[pl.BlockSpec((tr, K), lambda i: (i, 0)),
                  pl.BlockSpec((K, Cout), lambda i: (0, 0)),
                  pl.BlockSpec((1, Cout), lambda i: (0, 0))],
        out_shape=jax.ShapeDtypeStruct((M, Cout), jnp.bfloat16),
        out_specs=pl.BlockSpec((tr, Cout), lambda i: (i, 0)),
        compiler_params=pltpu.CompilerParams(
            dimension_semantics=("parallel",),
            vmem_limit_bytes=_VMEM_LIMIT),
        cost_estimate=pl.CostEstimate(
            flops=2 * M * K * Cout, transcendentals=0,
            bytes_accessed=M * K * 2 + K * Cout * 2 + Cout * 4 + M * Cout * 2),
    )(cols, w, b.reshape(1, Cout))


def conv_bn_act(cols, w, b, gamma, beta, *, activation, sol, target_rows=512):
    """Fused conv + BN(batch stats) + activation in a single pallas_call (2-phase grid)."""
    M, K = cols.shape
    Cout = w.shape[1]
    tr = _row_tile(M, target_rows)
    n_tiles = M // tr
    kern = functools.partial(conv_bn_kernel, count=float(M),
                             activation=activation, sol=sol)
    return pl.pallas_call(
        kern,
        grid=(2, n_tiles),
        in_specs=[
            # phase 0 streams tile i; phase 1 pins tile 0 (data unused there)
            pl.BlockSpec((tr, K), lambda p, i: ((1 - p) * i, 0)),
            pl.BlockSpec((K, Cout), lambda p, i: (0, 0)),
            pl.BlockSpec((1, Cout), lambda p, i: (0, 0)),
            pl.BlockSpec((1, Cout), lambda p, i: (0, 0)),
            pl.BlockSpec((1, Cout), lambda p, i: (0, 0)),
        ],
        out_shape=jax.ShapeDtypeStruct((M, Cout), jnp.bfloat16),
        # output block index is 0 during phase 0 (never written back with garbage:
        # the block only leaves VMEM after phase-1 tile 0 has filled it), tile i in phase 1
        out_specs=pl.BlockSpec((tr, Cout), lambda p, i: (p * i, 0)),
        scratch_shapes=[pltpu.VMEM((n_tiles, tr, Cout), jnp.float32),   # pre-BN conv
                        pltpu.VMEM((1, Cout), jnp.float32),             # sum
                        pltpu.VMEM((1, Cout), jnp.float32)],            # sum of squares
        compiler_params=pltpu.CompilerParams(
            # phase 1 depends on all phase-0 steps -> strictly sequential grid
            dimension_semantics=("arbitrary", "arbitrary"),
            vmem_limit_bytes=_VMEM_LIMIT),
        cost_estimate=pl.CostEstimate(
            flops=2 * M * K * Cout + 6 * M * Cout, transcendentals=0,
            bytes_accessed=M * K * 2 + K * Cout * 2 + 3 * Cout * 4 + M * Cout * 2),
    )(cols, w, b.reshape(1, Cout), gamma.reshape(1, Cout), beta.reshape(1, Cout))


def heads_call(x_flat, p):
    """Single fused heads pallas_call on the NHWC-flattened conv4 features."""
    N, K = x_flat.shape
    hair_len = p["w_h"].shape[1]
    eye_len = p["w_e"].shape[1]
    tr = _row_tile(N, 128)

    def row_spec(cols):
        return pl.BlockSpec((tr, cols), lambda i: (i, 0))

    def const_spec(arr):
        return pl.BlockSpec(arr.shape, lambda i: (0,) * arr.ndim)

    bh = p["b_h"].reshape(1, hair_len)
    be = p["b_e"].reshape(1, eye_len)
    bl = p["b_l"].reshape(1, 1)

    hair, eye, logit, sig = pl.pallas_call(
        heads_kernel,
        grid=(N // tr,),
        in_specs=[row_spec(K),
                  const_spec(p["w_h"]), const_spec(bh),
                  const_spec(p["w_e"]), const_spec(be),
                  const_spec(p["w_l"]), const_spec(bl)],
        out_shape=(jax.ShapeDtypeStruct((N, hair_len), jnp.float32),
                   jax.ShapeDtypeStruct((N, eye_len), jnp.float32),
                   jax.ShapeDtypeStruct((N, 1), jnp.float32),
                   jax.ShapeDtypeStruct((N, 1), jnp.float32)),
        out_specs=(row_spec(hair_len), row_spec(eye_len), row_spec(1), row_spec(1)),
        compiler_params=pltpu.CompilerParams(
            dimension_semantics=("parallel",),
            vmem_limit_bytes=_VMEM_LIMIT),
    )(x_flat, p["w_h"], bh, p["w_e"], be, p["w_l"], bl)
    return logit, sig, hair, eye


# ---------------------------------------------------------------------------
# Parameters: PyTorch-layout synthetic init + kernel-layout preparation
# ---------------------------------------------------------------------------
def init_torch_params(key, ndf, hair_len, eye_len):
    p = {}

    def nxt():
        nonlocal key
        key, sub = jax.random.split(key)
        return sub

    def uni(shape, fan_in):
        b = float(fan_in) ** -0.5
        return jax.random.uniform(nxt(), shape, jnp.float32, -b, b)

    def conv(name, cin, cout, k):
        p[f"{name}.w"] = uni((cout, cin, k, k), cin * k * k)
        p[f"{name}.b"] = uni((cout,), cin * k * k)

    def bn(name, c):
        p[f"{name}.g"] = jnp.ones((c,), jnp.float32)
        p[f"{name}.b"] = jnp.zeros((c,), jnp.float32)

    def lin(name, fin, fout):
        p[f"{name}.w"] = uni((fout, fin), fin)
        p[f"{name}.b"] = uni((fout,), fin)

    conv("conv1", 3, ndf, 4)
    conv("conv2", ndf, ndf * 2, 4); bn("bn2", ndf * 2)
    conv("conv3", ndf * 2, ndf * 4, 4); bn("bn3", ndf * 4)
    conv("conv4", ndf * 4, ndf * 8, 4); bn("bn4", ndf * 8)
    conv("conv_h", ndf * 8, 100, 1)
    conv("conv_e", ndf * 8, 100, 1)
    lin("linear_h", 100 * 4 * 4, hair_len)
    lin("linear_e", 100 * 4 * 4, eye_len)
    lin("linear", ndf * 8 * 4 * 4, 1)
    return p


def _conv_w_mat(w_pt):
    """(Cout, Cin, 4, 4) PyTorch conv weight -> (16*Cin, Cout) merged im2col weight
    matching the (di, dj, r, s, c) row ordering of im2col4x4s2."""
    cout, cin = w_pt.shape[0], w_pt.shape[1]
    w = w_pt.reshape(cout, cin, 2, 2, 2, 2)                   # (co, ci, di, r, dj, s)
    w = jnp.transpose(w, (2, 4, 3, 5, 1, 0))                  # (di, dj, r, s, ci, co)
    return w.reshape(16 * cin, cout)


def prepare_params(tp, ndf):
    p = {}
    c8 = ndf * 8
    for i, name in ((1, "conv1"), (2, "conv2"), (3, "conv3"), (4, "conv4")):
        p[f"w_c{i}"] = _conv_w_mat(tp[f"{name}.w"]).astype(jnp.bfloat16)
        p[f"b_c{i}"] = tp[f"{name}.b"]
    for i in (2, 3, 4):
        p[f"g_bn{i}"] = tp[f"bn{i}.g"]
        p[f"be_bn{i}"] = tp[f"bn{i}.b"]

    # Fold the 1x1 head convs into the head linears (exact):
    #   linear(conv1x1(x)) == combined_linear(x_flat_NHWC)
    def fold(lin_w, lin_b, conv_w, conv_b):
        out_len = lin_w.shape[0]
        wl = lin_w.reshape(out_len, 100, 4, 4)                # (k, m, i, j)
        wc = conv_w.reshape(100, c8)                          # (m, c)
        w = jnp.einsum("kmij,mc->ijck", wl, wc).reshape(16 * c8, out_len)
        b = lin_b + jnp.einsum("kmij,m->k", wl, conv_b)
        return w, b

    p["w_h"], p["b_h"] = fold(tp["linear_h.w"], tp["linear_h.b"],
                              tp["conv_h.w"], tp["conv_h.b"])
    p["w_e"], p["b_e"] = fold(tp["linear_e.w"], tp["linear_e.b"],
                              tp["conv_e.w"], tp["conv_e.b"])
    # real/fake linear: permute rows from NCHW-flatten to NHWC-flatten order
    wl = tp["linear.w"].reshape(1, c8, 4, 4)
    p["w_l"] = jnp.transpose(wl, (2, 3, 1, 0)).reshape(16 * c8, 1)
    p["b_l"] = tp["linear.b"]
    return p


# ---------------------------------------------------------------------------
# Forward pass
# ---------------------------------------------------------------------------
def discriminator_forward(imgs_nchw, params, *, d_leaky=True, sol=0.2):
    act = "leaky" if d_leaky else "relu"
    x = jnp.transpose(imgs_nchw, (0, 2, 3, 1)).astype(jnp.bfloat16)     # NHWC bf16

    # conv1 + activation (fused matmul)
    cols, (N, Ho, Wo) = im2col4x4s2(x)
    y = conv_act(cols, params["w_c1"], params["b_c1"], activation=act, sol=sol)
    x = y.reshape(N, Ho, Wo, -1)                                        # bf16

    # conv2..4: fused conv + BatchNorm(batch stats) + activation, one call each
    for i in (2, 3, 4):
        cols, (N, Ho, Wo) = im2col4x4s2(x)
        y = conv_bn_act(cols, params[f"w_c{i}"], params[f"b_c{i}"],
                        params[f"g_bn{i}"], params[f"be_bn{i}"],
                        activation=act, sol=sol)
        x = y.reshape(N, Ho, Wo, -1)                                    # bf16

    # heads: folded 1x1 convs + linears + softmax + sigmoid (single pallas_call)
    x_flat = x.reshape(N, Ho * Wo * x.shape[-1])                        # NHWC flatten
    return heads_call(x_flat, params)


# ---------------------------------------------------------------------------
# Pure-XLA reference (mirrors the PyTorch module exactly) for validation
# ---------------------------------------------------------------------------
def reference_forward(imgs, tp, *, d_leaky=True, sol=0.2):
    act = (lambda v: jnp.where(v > 0, v, sol * v)) if d_leaky else (
        lambda v: jnp.maximum(v, 0.0))

    def conv(x, w, b, stride, pad):
        y = jax.lax.conv_general_dilated(
            x, w, (stride, stride), [(pad, pad), (pad, pad)],
            dimension_numbers=("NCHW", "OIHW", "NCHW"))
        return y + b.reshape(1, -1, 1, 1)

    def bnorm(x, g, be):
        m = jnp.mean(x, axis=(0, 2, 3), keepdims=True)
        v = jnp.mean((x - m) ** 2, axis=(0, 2, 3), keepdims=True)
        return (x - m) * jax.lax.rsqrt(v + EPS) * g.reshape(1, -1, 1, 1) + \
            be.reshape(1, -1, 1, 1)

    x = act(conv(imgs, tp["conv1.w"], tp["conv1.b"], 2, 1))
    x = act(bnorm(conv(x, tp["conv2.w"], tp["conv2.b"], 2, 1), tp["bn2.g"], tp["bn2.b"]))
    x = act(bnorm(conv(x, tp["conv3.w"], tp["conv3.b"], 2, 1), tp["bn3.g"], tp["bn3.b"]))
    x = act(bnorm(conv(x, tp["conv4.w"], tp["conv4.b"], 2, 1), tp["bn4.g"], tp["bn4.b"]))
    n = imgs.shape[0]
    h = conv(x, tp["conv_h.w"], tp["conv_h.b"], 1, 0).reshape(n, -1)
    hair = jax.nn.softmax(h @ tp["linear_h.w"].T + tp["linear_h.b"], axis=1)
    e = conv(x, tp["conv_e.w"], tp["conv_e.b"], 1, 0).reshape(n, -1)
    eye = jax.nn.softmax(e @ tp["linear_e.w"].T + tp["linear_e.b"], axis=1)
    xf = x.reshape(n, -1)
    logit = xf @ tp["linear.w"].T + tp["linear.b"]
    return logit, jax.nn.sigmoid(logit), hair, eye


# ---------------------------------------------------------------------------
if __name__ == "__main__":
    ndf, hair_len, eye_len = 8, 12, 10
    d_leaky, sol = True, 0.2

    key = jax.random.PRNGKey(0)
    k_img, k_par = jax.random.split(key)
    # The module hard-codes the 4x4 bottleneck -> 64x64 input.
    imgs = jax.random.normal(k_img, (2, 3, 64, 64), dtype=jnp.float32)
    torch_params = init_torch_params(k_par, ndf, hair_len, eye_len)
    params = prepare_params(torch_params, ndf)

    fwd = jax.jit(functools.partial(discriminator_forward, d_leaky=d_leaky, sol=sol))
    x_logit, x_sig, hair, eye = fwd(imgs, params)
    jax.block_until_ready((x_logit, x_sig, hair, eye))

    assert x_logit.shape == (2, 1) and x_sig.shape == (2, 1)
    assert hair.shape == (2, hair_len) and eye.shape == (2, eye_len)

    # Validate against the pure-XLA reference (f32); bf16 matmul inputs + approx
    # reciprocal introduce only small numerical differences.
    ref = jax.jit(functools.partial(reference_forward, d_leaky=d_leaky, sol=sol))(
        imgs, torch_params)
    for got, want, name in ((x_logit, ref[0], "logit"), (x_sig, ref[1], "sigmoid"),
                            (hair, ref[2], "hair"), (eye, ref[3], "eye")):
        err = float(jnp.max(jnp.abs(got - want)))
        assert err < 5e-2, f"{name} mismatch vs reference: max abs err {err}"

    print("KERNEL_OK")
</pallas_src>

<mosaic_0001>
module attributes {stable_mosaic.version = 11 : i64} {
  func.func @matmul_bias_act_kernel(%arg0: i32, %arg1: memref<512x48xbf16, #tpu.memory_space<vmem>>, %arg2: memref<48x8xbf16, #tpu.memory_space<vmem>>, %arg3: memref<1x8xf32, #tpu.memory_space<vmem>>, %arg4: memref<512x8xbf16, #tpu.memory_space<vmem>>) attributes {dimension_semantics = [#tpu.dimension_semantics<parallel>], iteration_bounds = array<i64: 4>, scalar_prefetch = 0 : i64, scratch_operands = 0 : i64, tpu.core_type = #tpu.core_type<tc>, window_params = [{transform_indices = @transform_0, window_bounds = array<i64: 512, 48>}, {pipeline_mode = #tpu.pipeline_mode<synchronous>, transform_indices = @transform_1, window_bounds = array<i64: 48, 8>}, {pipeline_mode = #tpu.pipeline_mode<synchronous>, transform_indices = @transform_2, window_bounds = array<i64: 1, 8>}, {transform_indices = @transform_3, window_bounds = array<i64: 512, 8>}]} {
    %c0 = arith.constant 0 : index
    %c0_0 = arith.constant 0 : index
    %0 = vector.load %arg1[%c0, %c0_0] : memref<512x48xbf16, #tpu.memory_space<vmem>>, vector<512x48xbf16>
    %c0_1 = arith.constant 0 : index
    %c0_2 = arith.constant 0 : index
    %1 = vector.load %arg2[%c0_1, %c0_2] : memref<48x8xbf16, #tpu.memory_space<vmem>>, vector<48x8xbf16>
    %cst = arith.constant dense<0.000000e+00> : vector<512x8xf32>
    %2 = tpu.matmul %0, %1, %cst {dimension_numbers = #tpu.dot_dimension_numbers<[1], [0], [0], [1], [0, 0, 1, 1], [], []>} : vector<512x48xbf16>, vector<48x8xbf16>, vector<512x8xf32> -> vector<512x8xf32>
    %c0_3 = arith.constant 0 : index
    %c0_4 = arith.constant 0 : index
    %3 = vector.load %arg3[%c0_3, %c0_4] : memref<1x8xf32, #tpu.memory_space<vmem>>, vector<1x8xf32>
    %4 = vector.broadcast %3 : vector<1x8xf32> to vector<512x8xf32>
    %5 = arith.addf %2, %4 : vector<512x8xf32>
    %cst_5 = arith.constant 0.000000e+00 : f32
    %6 = vector.broadcast %cst_5 : f32 to vector<512x8xf32>
    %7 = arith.cmpf ogt, %5, %6 : vector<512x8xf32>
    %cst_6 = arith.constant 2.000000e-01 : f32
    %8 = vector.broadcast %cst_6 : f32 to vector<512x8xf32>
    %9 = arith.mulf %8, %5 : vector<512x8xf32>
    %10 = arith.select %7, %5, %9 : vector<512x8xi1>, vector<512x8xf32>
    %11 = arith.truncf %10 : vector<512x8xf32> to vector<512x8xbf16>
    %c0_7 = arith.constant 0 : index
    %c0_8 = arith.constant 0 : index
    %12 = vector.load %arg4[%c0_7, %c0_8] : memref<512x8xbf16, #tpu.memory_space<vmem>>, vector<512x8xbf16>
    tpu.vector_store %arg4[%c0_7, %c0_8], %11 {strides = array<i32>} : memref<512x8xbf16, #tpu.memory_space<vmem>>, vector<512x8xbf16>,
    return
  }
  func.func @transform_0(%arg0: i32) -> (i32, i32) {
    %c0_i32 = arith.constant 0 : i32
    %c0_i32_0 = arith.constant 0 : i32
    return %arg0, %c0_i32 : i32, i32
  }
  func.func @transform_1(%arg0: i32) -> (i32, i32) {
    %c0_i32 = arith.constant 0 : i32
    %c0_i32_0 = arith.constant 0 : i32
    %c0_i32_1 = arith.constant 0 : i32
    return %c0_i32, %c0_i32_0 : i32, i32
  }
  func.func @transform_2(%arg0: i32) -> (i32, i32) {
    %c0_i32 = arith.constant 0 : i32
    %c0_i32_0 = arith.constant 0 : i32
    %c0_i32_1 = arith.constant 0 : i32
    return %c0_i32, %c0_i32_0 : i32, i32
  }
  func.func @transform_3(%arg0: i32) -> (i32, i32) {
    %c0_i32 = arith.constant 0 : i32
    %c0_i32_0 = arith.constant 0 : i32
    return %arg0, %c0_i32 : i32, i32
  }
}

module attributes {stable_mosaic.version = 11 : i64} {
  func.func @conv_bn_kernel(%arg0: i32, %arg1: i32, %arg2: memref<512x128xbf16, #tpu.memory_space<vmem>>, %arg3: memref<128x16xbf16, #tpu.memory_space<vmem>>, %arg4: memref<1x16xf32, #tpu.memory_space<vmem>>, %arg5: memref<1x16xf32, #tpu.memory_space<vmem>>, %arg6: memref<1x16xf32, #tpu.memory_space<vmem>>, %arg7: memref<512x16xbf16, #tpu.memory_space<vmem>>, %arg8: memref<1x512x16xf32, #tpu.memory_space<vmem>>, %arg9: memref<1x16xf32, #tpu.memory_space<vmem>>, %arg10: memref<1x16xf32, #tpu.memory_space<vmem>>) attributes {dimension_semantics = [#tpu.dimension_semantics<arbitrary>, #tpu.dimension_semantics<arbitrary>], iteration_bounds = array<i64: 2, 1>, scalar_prefetch = 0 : i64, scratch_operands = 3 : i64, tpu.core_type = #tpu.core_type<tc>, window_params = [{transform_indices = @transform_0, window_bounds = array<i64: 512, 128>}, {pipeline_mode = #tpu.pipeline_mode<synchronous>, transform_indices = @transform_1, window_bounds = array<i64: 128, 16>}, {pipeline_mode = #tpu.pipeline_mode<synchronous>, transform_indices = @transform_2, window_bounds = array<i64: 1, 16>}, {pipeline_mode = #tpu.pipeline_mode<synchronous>, transform_indices = @transform_3, window_bounds = array<i64: 1, 16>}, {pipeline_mode = #tpu.pipeline_mode<synchronous>, transform_indices = @transform_4, window_bounds = array<i64: 1, 16>}, {transform_indices = @transform_5, window_bounds = array<i64: 512, 16>}]} {
    %c0_i32 = arith.constant 0 : i32
    %0 = arith.cmpi eq, %arg0, %c0_i32 : i32
    %c0_i32_0 = arith.constant 0 : i32
    %1 = arith.cmpi eq, %arg1, %c0_i32_0 : i32
    %2 = arith.andi %0, %1 : i1
    %3 = arith.extui %2 : i1 to i32
    %c0_i32_1 = arith.constant 0 : i32
    %4 = arith.cmpi ne, %3, %c0_i32_1 : i32
    scf.if %4 {
      %cst = arith.constant 0.000000e+00 : f32
      %11 = vector.broadcast %cst : f32 to vector<1x16xf32>
      %c0 = arith.constant 0 : index
      %c0_5 = arith.constant 0 : index
      %12 = vector.load %arg9[%c0, %c0_5] : memref<1x16xf32, #tpu.memory_space<vmem>>, vector<1x16xf32>
      tpu.vector_store %arg9[%c0, %c0_5], %11 {strides = array<i32>} : memref<1x16xf32, #tpu.memory_space<vmem>>, vector<1x16xf32>,
      %cst_6 = arith.constant 0.000000e+00 : f32
      %13 = vector.broadcast %cst_6 : f32 to vector<1x16xf32>
      %c0_7 = arith.constant 0 : index
      %c0_8 = arith.constant 0 : index
      %14 = vector.load %arg10[%c0_7, %c0_8] : memref<1x16xf32, #tpu.memory_space<vmem>>, vector<1x16xf32>
      tpu.vector_store %arg10[%c0_7, %c0_8], %13 {strides = array<i32>} : memref<1x16xf32, #tpu.memory_space<vmem>>, vector<1x16xf32>,
    } else {
    }
    %c0_i32_2 = arith.constant 0 : i32
    %5 = arith.cmpi eq, %arg0, %c0_i32_2 : i32
    %6 = arith.extui %5 : i1 to i32
    %c0_i32_3 = arith.constant 0 : i32
    %7 = arith.cmpi ne, %6, %c0_i32_3 : i32
    scf.if %7 {
      %c0 = arith.constant 0 : index
      %c0_5 = arith.constant 0 : index
      %11 = vector.load %arg2[%c0, %c0_5] : memref<512x128xbf16, #tpu.memory_space<vmem>>, vector<512x128xbf16>
      %c0_6 = arith.constant 0 : index
      %c0_7 = arith.constant 0 : index
      %12 = vector.load %arg3[%c0_6, %c0_7] : memref<128x16xbf16, #tpu.memory_space<vmem>>, vector<128x16xbf16>
      %cst = arith.constant dense<0.000000e+00> : vector<512x16xf32>
      %13 = tpu.matmul %11, %12, %cst {dimension_numbers = #tpu.dot_dimension_numbers<[1], [0], [0], [1], [0, 0, 1, 1], [], []>} : vector<512x128xbf16>, vector<128x16xbf16>, vector<512x16xf32> -> vector<512x16xf32>
      %c0_8 = arith.constant 0 : index
      %c0_9 = arith.constant 0 : index
      %14 = vector.load %arg4[%c0_8, %c0_9] : memref<1x16xf32, #tpu.memory_space<vmem>>, vector<1x16xf32>
      %15 = vector.broadcast %14 : vector<1x16xf32> to vector<512x16xf32>
      %16 = arith.addf %13, %15 : vector<512x16xf32>
      %17 = arith.index_cast %arg1 : i32 to index
      %c0_10 = arith.constant 0 : index
      %c0_11 = arith.constant 0 : index
      %18 = vector.load %arg8[%17, %c0_10, %c0_11] : memref<1x512x16xf32, #tpu.memory_space<vmem>>, vector<1x512x16xf32>
      %19 = vector.shape_cast %18 : vector<1x512x16xf32> to vector<512x16xf32>
      %20 = vector.shape_cast %16 : vector<512x16xf32> to vector<1x512x16xf32>
      tpu.vector_store %arg8[%17, %c0_10, %c0_11], %20 {strides = array<i32>} : memref<1x512x16xf32, #tpu.memory_space<vmem>>, vector<1x512x16xf32>,
      %c0_12 = arith.constant 0 : index
      %c0_13 = arith.constant 0 : index
      %21 = vector.load %arg9[%c0_12, %c0_13] : memref<1x16xf32, #tpu.memory_space<vmem>>, vector<1x16xf32>
      %cst_14 = arith.constant dense<0.000000e+00> : vector<16xf32>
      %22 = vector.multi_reduction <add>, %16, %cst_14 [0] : vector<512x16xf32> to vector<16xf32>
      %23 = vector.shape_cast %22 : vector<16xf32> to vector<1x16xf32>
      %24 = arith.addf %21, %23 : vector<1x16xf32>
      %c0_15 = arith.constant 0 : index
      %c0_16 = arith.constant 0 : index
      %25 = vector.load %arg9[%c0_15, %c0_16] : memref<1x16xf32, #tpu.memory_space<vmem>>, vector<1x16xf32>
      tpu.vector_store %arg9[%c0_15, %c0_16], %24 {strides = array<i32>} : memref<1x16xf32, #tpu.memory_space<vmem>>, vector<1x16xf32>,
      %c0_17 = arith.constant 0 : index
      %c0_18 = arith.constant 0 : index
      %26 = vector.load %arg10[%c0_17, %c0_18] : memref<1x16xf32, #tpu.memory_space<vmem>>, vector<1x16xf32>
      %27 = arith.mulf %16, %16 : vector<512x16xf32>
      %cst_19 = arith.constant dense<0.000000e+00> : vector<16xf32>
      %28 = vector.multi_reduction <add>, %27, %cst_19 [0] : vector<512x16xf32> to vector<16xf32>
      %29 = vector.shape_cast %28 : vector<16xf32> to vector<1x16xf32>
      %30 = arith.addf %26, %29 : vector<1x16xf32>
      %c0_20 = arith.constant 0 : index
      %c0_21 = arith.constant 0 : index
      %31 = vector.load %arg10[%c0_20, %c0_21] : memref<1x16xf32, #tpu.memory_space<vmem>>, vector<1x16xf32>
      tpu.vector_store %arg10[%c0_20, %c0_21], %30 {strides = array<i32>} : memref<1x16xf32, #tpu.memory_space<vmem>>, vector<1x16xf32>,
    } else {
    }
    %c1_i32 = arith.constant 1 : i32
    %8 = arith.cmpi eq, %arg0, %c1_i32 : i32
    %9 = arith.extui %8 : i1 to i32
    %c0_i32_4 = arith.constant 0 : i32
    %10 = arith.cmpi ne, %9, %c0_i32_4 : i32
    scf.if %10 {
      %c0 = arith.constant 0 : index
      %c0_5 = arith.constant 0 : index
      %11 = vector.load %arg9[%c0, %c0_5] : memref<1x16xf32, #tpu.memory_space<vmem>>, vector<1x16xf32>
      %cst = arith.constant 0.001953125 : f32
      %12 = vector.broadcast %cst : f32 to vector<1x16xf32>
      %13 = arith.mulf %11, %12 : vector<1x16xf32>
      %c0_6 = arith.constant 0 : index
      %c0_7 = arith.constant 0 : index
      %14 = vector.load %arg10[%c0_6, %c0_7] : memref<1x16xf32, #tpu.memory_space<vmem>>, vector<1x16xf32>
      %cst_8 = arith.constant 0.001953125 : f32
      %15 = vector.broadcast %cst_8 : f32 to vector<1x16xf32>
      %16 = arith.mulf %14, %15 : vector<1x16xf32>
      %17 = arith.mulf %13, %13 : vector<1x16xf32>
      %18 = arith.subf %16, %17 : vector<1x16xf32>
      %cst_9 = arith.constant 0.000000e+00 : f32
      %19 = vector.broadcast %cst_9 : f32 to vector<1x16xf32>
      %20 = arith.maximumf %18, %19 : vector<1x16xf32>
      %c0_10 = arith.constant 0 : index
      %c0_11 = arith.constant 0 : index
      %21 = vector.load %arg5[%c0_10, %c0_11] : memref<1x16xf32, #tpu.memory_space<vmem>>, vector<1x16xf32>
      %cst_12 = arith.constant 9.99999974E-6 : f32
      %22 = vector.broadcast %cst_12 : f32 to vector<1x16xf32>
      %23 = arith.addf %20, %22 : vector<1x16xf32>
      %24 = math.rsqrt %23 : vector<1x16xf32>
      %25 = arith.mulf %21, %24 : vector<1x16xf32>
      %c0_13 = arith.constant 0 : index
      %c0_14 = arith.constant 0 : index
      %26 = vector.load %arg6[%c0_13, %c0_14] : memref<1x16xf32, #tpu.memory_space<vmem>>, vector<1x16xf32>
      %27 = arith.mulf %13, %25 : vector<1x16xf32>
      %28 = arith.subf %26, %27 : vector<1x16xf32>
      %29 = arith.index_cast %arg1 : i32 to index
      %c0_15 = arith.constant 0 : index
      %c0_16 = arith.constant 0 : index
      %30 = vector.load %arg8[%29, %c0_15, %c0_16] : memref<1x512x16xf32, #tpu.memory_space<vmem>>, vector<1x512x16xf32>
      %31 = vector.shape_cast %30 : vector<1x512x16xf32> to vector<512x16xf32>
      %32 = vector.broadcast %25 : vector<1x16xf32> to vector<512x16xf32>
      %33 = arith.mulf %31, %32 : vector<512x16xf32>
      %34 = vector.broadcast %28 : vector<1x16xf32> to vector<512x16xf32>
      %35 = arith.addf %33, %34 : vector<512x16xf32>
      %cst_17 = arith.constant 0.000000e+00 : f32
      %36 = vector.broadcast %cst_17 : f32 to vector<512x16xf32>
      %37 = arith.cmpf ogt, %35, %36 : vector<512x16xf32>
      %cst_18 = arith.constant 2.000000e-01 : f32
      %38 = vector.broadcast %cst_18 : f32 to vector<512x16xf32>
      %39 = arith.mulf %38, %35 : vector<512x16xf32>
      %40 = arith.select %37, %35, %39 : vector<512x16xi1>, vector<512x16xf32>
      %41 = arith.truncf %40 : vector<512x16xf32> to vector<512x16xbf16>
      %c0_19 = arith.constant 0 : index
      %c0_20 = arith.constant 0 : index
      %42 = vector.load %arg7[%c0_19, %c0_20] : memref<512x16xbf16, #tpu.memory_space<vmem>>, vector<512x16xbf16>
      tpu.vector_store %arg7[%c0_19, %c0_20], %41 {strides = array<i32>} : memref<512x16xbf16, #tpu.memory_space<vmem>>, vector<512x16xbf16>,
    } else {
    }
    return
  }
  func.func @transform_0(%arg0: i32, %arg1: i32) -> (i32, i32) {
    %c1_i32 = arith.constant 1 : i32
    %0 = arith.subi %c1_i32, %arg0 : i32
    %1 = arith.muli %0, %arg1 : i32
    %c0_i32 = arith.constant 0 : i32
    %c0_i32_0 = arith.constant 0 : i32
    return %1, %c0_i32 : i32, i32
  }
  func.func @transform_1(%arg0: i32, %arg1: i32) -> (i32, i32) {
    %c0_i32 = arith.constant 0 : i32
    %c0_i32_0 = arith.constant 0 : i32
    %c0_i32_1 = arith.constant 0 : i32
    return %c0_i32, %c0_i32_0 : i32, i32
  }
  func.func @transform_2(%arg0: i32, %arg1: i32) -> (i32, i32) {
    %c0_i32 = arith.constant 0 : i32
    %c0_i32_0 = arith.constant 0 : i32
    %c0_i32_1 = arith.constant 0 : i32
    return %c0_i32, %c0_i32_0 : i32, i32
  }
  func.func @transform_3(%arg0: i32, %arg1: i32) -> (i32, i32) {
    %c0_i32 = arith.constant 0 : i32
    %c0_i32_0 = arith.constant 0 : i32
    %c0_i32_1 = arith.constant 0 : i32
    return %c0_i32, %c0_i32_0 : i32, i32
  }
  func.func @transform_4(%arg0: i32, %arg1: i32) -> (i32, i32) {
    %c0_i32 = arith.constant 0 : i32
    %c0_i32_0 = arith.constant 0 : i32
    %c0_i32_1 = arith.constant 0 : i32
    return %c0_i32, %c0_i32_0 : i32, i32
  }
  func.func @transform_5(%arg0: i32, %arg1: i32) -> (i32, i32) {
    %0 = arith.muli %arg0, %arg1 : i32
    %c0_i32 = arith.constant 0 : i32
    %c0_i32_0 = arith.constant 0 : i32
    return %0, %c0_i32 : i32, i32
  }
}

module attributes {stable_mosaic.version = 11 : i64} {
  func.func @conv_bn_kernel(%arg0: i32, %arg1: i32, %arg2: memref<128x256xbf16, #tpu.memory_space<vmem>>, %arg3: memref<256x32xbf16, #tpu.memory_space<vmem>>, %arg4: memref<1x32xf32, #tpu.memory_space<vmem>>, %arg5: memref<1x32xf32, #tpu.memory_space<vmem>>, %arg6: memref<1x32xf32, #tpu.memory_space<vmem>>, %arg7: memref<128x32xbf16, #tpu.memory_space<vmem>>, %arg8: memref<1x128x32xf32, #tpu.memory_space<vmem>>, %arg9: memref<1x32xf32, #tpu.memory_space<vmem>>, %arg10: memref<1x32xf32, #tpu.memory_space<vmem>>) attributes {dimension_semantics = [#tpu.dimension_semantics<arbitrary>, #tpu.dimension_semantics<arbitrary>], iteration_bounds = array<i64: 2, 1>, scalar_prefetch = 0 : i64, scratch_operands = 3 : i64, tpu.core_type = #tpu.core_type<tc>, window_params = [{transform_indices = @transform_0, window_bounds = array<i64: 128, 256>}, {pipeline_mode = #tpu.pipeline_mode<synchronous>, transform_indices = @transform_1, window_bounds = array<i64: 256, 32>}, {pipeline_mode = #tpu.pipeline_mode<synchronous>, transform_indices = @transform_2, window_bounds = array<i64: 1, 32>}, {pipeline_mode = #tpu.pipeline_mode<synchronous>, transform_indices = @transform_3, window_bounds = array<i64: 1, 32>}, {pipeline_mode = #tpu.pipeline_mode<synchronous>, transform_indices = @transform_4, window_bounds = array<i64: 1, 32>}, {transform_indices = @transform_5, window_bounds = array<i64: 128, 32>}]} {
    %c0_i32 = arith.constant 0 : i32
    %0 = arith.cmpi eq, %arg0, %c0_i32 : i32
    %c0_i32_0 = arith.constant 0 : i32
    %1 = arith.cmpi eq, %arg1, %c0_i32_0 : i32
    %2 = arith.andi %0, %1 : i1
    %3 = arith.extui %2 : i1 to i32
    %c0_i32_1 = arith.constant 0 : i32
    %4 = arith.cmpi ne, %3, %c0_i32_1 : i32
    scf.if %4 {
      %cst = arith.constant 0.000000e+00 : f32
      %11 = vector.broadcast %cst : f32 to vector<1x32xf32>
      %c0 = arith.constant 0 : index
      %c0_5 = arith.constant 0 : index
      %12 = vector.load %arg9[%c0, %c0_5] : memref<1x32xf32, #tpu.memory_space<vmem>>, vector<1x32xf32>
      tpu.vector_store %arg9[%c0, %c0_5], %11 {strides = array<i32>} : memref<1x32xf32, #tpu.memory_space<vmem>>, vector<1x32xf32>,
      %cst_6 = arith.constant 0.000000e+00 : f32
      %13 = vector.broadcast %cst_6 : f32 to vector<1x32xf32>
      %c0_7 = arith.constant 0 : index
      %c0_8 = arith.constant 0 : index
      %14 = vector.load %arg10[%c0_7, %c0_8] : memref<1x32xf32, #tpu.memory_space<vmem>>, vector<1x32xf32>
      tpu.vector_store %arg10[%c0_7, %c0_8], %13 {strides = array<i32>} : memref<1x32xf32, #tpu.memory_space<vmem>>, vector<1x32xf32>,
    } else {
    }
    %c0_i32_2 = arith.constant 0 : i32
    %5 = arith.cmpi eq, %arg0, %c0_i32_2 : i32
    %6 = arith.extui %5 : i1 to i32
    %c0_i32_3 = arith.constant 0 : i32
    %7 = arith.cmpi ne, %6, %c0_i32_3 : i32
    scf.if %7 {
      %c0 = arith.constant 0 : index
      %c0_5 = arith.constant 0 : index
      %11 = vector.load %arg2[%c0, %c0_5] : memref<128x256xbf16, #tpu.memory_space<vmem>>, vector<128x256xbf16>
      %c0_6 = arith.constant 0 : index
      %c0_7 = arith.constant 0 : index
      %12 = vector.load %arg3[%c0_6, %c0_7] : memref<256x32xbf16, #tpu.memory_space<vmem>>, vector<256x32xbf16>
      %cst = arith.constant dense<0.000000e+00> : vector<128x32xf32>
      %13 = tpu.matmul %11, %12, %cst {dimension_numbers = #tpu.dot_dimension_numbers<[1], [0], [0], [1], [0, 0, 1, 1], [], []>} : vector<128x256xbf16>, vector<256x32xbf16>, vector<128x32xf32> -> vector<128x32xf32>
      %c0_8 = arith.constant 0 : index
      %c0_9 = arith.constant 0 : index
      %14 = vector.load %arg4[%c0_8, %c0_9] : memref<1x32xf32, #tpu.memory_space<vmem>>, vector<1x32xf32>
      %15 = vector.broadcast %14 : vector<1x32xf32> to vector<128x32xf32>
      %16 = arith.addf %13, %15 : vector<128x32xf32>
      %17 = arith.index_cast %arg1 : i32 to index
      %c0_10 = arith.constant 0 : index
      %c0_11 = arith.constant 0 : index
      %18 = vector.load %arg8[%17, %c0_10, %c0_11] : memref<1x128x32xf32, #tpu.memory_space<vmem>>, vector<1x128x32xf32>
      %19 = vector.shape_cast %18 : vector<1x128x32xf32> to vector<128x32xf32>
      %20 = vector.shape_cast %16 : vector<128x32xf32> to vector<1x128x32xf32>
      tpu.vector_store %arg8[%17, %c0_10, %c0_11], %20 {strides = array<i32>} : memref<1x128x32xf32, #tpu.memory_space<vmem>>, vector<1x128x32xf32>,
      %c0_12 = arith.constant 0 : index
      %c0_13 = arith.constant 0 : index
      %21 = vector.load %arg9[%c0_12, %c0_13] : memref<1x32xf32, #tpu.memory_space<vmem>>, vector<1x32xf32>
      %cst_14 = arith.constant dense<0.000000e+00> : vector<32xf32>
      %22 = vector.multi_reduction <add>, %16, %cst_14 [0] : vector<128x32xf32> to vector<32xf32>
      %23 = vector.shape_cast %22 : vector<32xf32> to vector<1x32xf32>
      %24 = arith.addf %21, %23 : vector<1x32xf32>
      %c0_15 = arith.constant 0 : index
      %c0_16 = arith.constant 0 : index
      %25 = vector.load %arg9[%c0_15, %c0_16] : memref<1x32xf32, #tpu.memory_space<vmem>>, vector<1x32xf32>
      tpu.vector_store %arg9[%c0_15, %c0_16], %24 {strides = array<i32>} : memref<1x32xf32, #tpu.memory_space<vmem>>, vector<1x32xf32>,
      %c0_17 = arith.constant 0 : index
      %c0_18 = arith.constant 0 : index
      %26 = vector.load %arg10[%c0_17, %c0_18] : memref<1x32xf32, #tpu.memory_space<vmem>>, vector<1x32xf32>
      %27 = arith.mulf %16, %16 : vector<128x32xf32>
      %cst_19 = arith.constant dense<0.000000e+00> : vector<32xf32>
      %28 = vector.multi_reduction <add>, %27, %cst_19 [0] : vector<128x32xf32> to vector<32xf32>
      %29 = vector.shape_cast %28 : vector<32xf32> to vector<1x32xf32>
      %30 = arith.addf %26, %29 : vector<1x32xf32>
      %c0_20 = arith.constant 0 : index
      %c0_21 = arith.constant 0 : index
      %31 = vector.load %arg10[%c0_20, %c0_21] : memref<1x32xf32, #tpu.memory_space<vmem>>, vector<1x32xf32>
      tpu.vector_store %arg10[%c0_20, %c0_21], %30 {strides = array<i32>} : memref<1x32xf32, #tpu.memory_space<vmem>>, vector<1x32xf32>,
    } else {
    }
    %c1_i32 = arith.constant 1 : i32
    %8 = arith.cmpi eq, %arg0, %c1_i32 : i32
    %9 = arith.extui %8 : i1 to i32
    %c0_i32_4 = arith.constant 0 : i32
    %10 = arith.cmpi ne, %9, %c0_i32_4 : i32
    scf.if %10 {
      %c0 = arith.constant 0 : index
      %c0_5 = arith.constant 0 : index
      %11 = vector.load %arg9[%c0, %c0_5] : memref<1x32xf32, #tpu.memory_space<vmem>>, vector<1x32xf32>
      %cst = arith.constant 7.812500e-03 : f32
      %12 = vector.broadcast %cst : f32 to vector<1x32xf32>
      %13 = arith.mulf %11, %12 : vector<1x32xf32>
      %c0_6 = arith.constant 0 : index
      %c0_7 = arith.constant 0 : index
      %14 = vector.load %arg10[%c0_6, %c0_7] : memref<1x32xf32, #tpu.memory_space<vmem>>, vector<1x32xf32>
      %cst_8 = arith.constant 7.812500e-03 : f32
      %15 = vector.broadcast %cst_8 : f32 to vector<1x32xf32>
      %16 = arith.mulf %14, %15 : vector<1x32xf32>
      %17 = arith.mulf %13, %13 : vector<1x32xf32>
      %18 = arith.subf %16, %17 : vector<1x32xf32>
      %cst_9 = arith.constant 0.000000e+00 : f32
      %19 = vector.broadcast %cst_9 : f32 to vector<1x32xf32>
      %20 = arith.maximumf %18, %19 : vector<1x32xf32>
      %c0_10 = arith.constant 0 : index
      %c0_11 = arith.constant 0 : index
      %21 = vector.load %arg5[%c0_10, %c0_11] : memref<1x32xf32, #tpu.memory_space<vmem>>, vector<1x32xf32>
      %cst_12 = arith.constant 9.99999974E-6 : f32
      %22 = vector.broadcast %cst_12 : f32 to vector<1x32xf32>
      %23 = arith.addf %20, %22 : vector<1x32xf32>
      %24 = math.rsqrt %23 : vector<1x32xf32>
      %25 = arith.mulf %21, %24 : vector<1x32xf32>
      %c0_13 = arith.constant 0 : index
      %c0_14 = arith.constant 0 : index
      %26 = vector.load %arg6[%c0_13, %c0_14] : memref<1x32xf32, #tpu.memory_space<vmem>>, vector<1x32xf32>
      %27 = arith.mulf %13, %25 : vector<1x32xf32>
      %28 = arith.subf %26, %27 : vector<1x32xf32>
      %29 = arith.index_cast %arg1 : i32 to index
      %c0_15 = arith.constant 0 : index
      %c0_16 = arith.constant 0 : index
      %30 = vector.load %arg8[%29, %c0_15, %c0_16] : memref<1x128x32xf32, #tpu.memory_space<vmem>>, vector<1x128x32xf32>
      %31 = vector.shape_cast %30 : vector<1x128x32xf32> to vector<128x32xf32>
      %32 = vector.broadcast %25 : vector<1x32xf32> to vector<128x32xf32>
      %33 = arith.mulf %31, %32 : vector<128x32xf32>
      %34 = vector.broadcast %28 : vector<1x32xf32> to vector<128x32xf32>
      %35 = arith.addf %33, %34 : vector<128x32xf32>
      %cst_17 = arith.constant 0.000000e+00 : f32
      %36 = vector.broadcast %cst_17 : f32 to vector<128x32xf32>
      %37 = arith.cmpf ogt, %35, %36 : vector<128x32xf32>
      %cst_18 = arith.constant 2.000000e-01 : f32
      %38 = vector.broadcast %cst_18 : f32 to vector<128x32xf32>
      %39 = arith.mulf %38, %35 : vector<128x32xf32>
      %40 = arith.select %37, %35, %39 : vector<128x32xi1>, vector<128x32xf32>
      %41 = arith.truncf %40 : vector<128x32xf32> to vector<128x32xbf16>
      %c0_19 = arith.constant 0 : index
      %c0_20 = arith.constant 0 : index
      %42 = vector.load %arg7[%c0_19, %c0_20] : memref<128x32xbf16, #tpu.memory_space<vmem>>, vector<128x32xbf16>
      tpu.vector_store %arg7[%c0_19, %c0_20], %41 {strides = array<i32>} : memref<128x32xbf16, #tpu.memory_space<vmem>>, vector<128x32xbf16>,
    } else {
    }
    return
  }
  func.func @transform_0(%arg0: i32, %arg1: i32) -> (i32, i32) {
    %c1_i32 = arith.constant 1 : i32
    %0 = arith.subi %c1_i32, %arg0 : i32
    %1 = arith.muli %0, %arg1 : i32
    %c0_i32 = arith.constant 0 : i32
    %c0_i32_0 = arith.constant 0 : i32
    return %1, %c0_i32 : i32, i32
  }
  func.func @transform_1(%arg0: i32, %arg1: i32) -> (i32, i32) {
    %c0_i32 = arith.constant 0 : i32
    %c0_i32_0 = arith.constant 0 : i32
    %c0_i32_1 = arith.constant 0 : i32
    return %c0_i32, %c0_i32_0 : i32, i32
  }
  func.func @transform_2(%arg0: i32, %arg1: i32) -> (i32, i32) {
    %c0_i32 = arith.constant 0 : i32
    %c0_i32_0 = arith.constant 0 : i32
    %c0_i32_1 = arith.constant 0 : i32
    return %c0_i32, %c0_i32_0 : i32, i32
  }
  func.func @transform_3(%arg0: i32, %arg1: i32) -> (i32, i32) {
    %c0_i32 = arith.constant 0 : i32
    %c0_i32_0 = arith.constant 0 : i32
    %c0_i32_1 = arith.constant 0 : i32
    return %c0_i32, %c0_i32_0 : i32, i32
  }
  func.func @transform_4(%arg0: i32, %arg1: i32) -> (i32, i32) {
    %c0_i32 = arith.constant 0 : i32
    %c0_i32_0 = arith.constant 0 : i32
    %c0_i32_1 = arith.constant 0 : i32
    return %c0_i32, %c0_i32_0 : i32, i32
  }
  func.func @transform_5(%arg0: i32, %arg1: i32) -> (i32, i32) {
    %0 = arith.muli %arg0, %arg1 : i32
    %c0_i32 = arith.constant 0 : i32
    %c0_i32_0 = arith.constant 0 : i32
    return %0, %c0_i32 : i32, i32
  }
}

module attributes {stable_mosaic.version = 11 : i64} {
  func.func @conv_bn_kernel(%arg0: i32, %arg1: i32, %arg2: memref<32x512xbf16, #tpu.memory_space<vmem>>, %arg3: memref<512x64xbf16, #tpu.memory_space<vmem>>, %arg4: memref<1x64xf32, #tpu.memory_space<vmem>>, %arg5: memref<1x64xf32, #tpu.memory_space<vmem>>, %arg6: memref<1x64xf32, #tpu.memory_space<vmem>>, %arg7: memref<32x64xbf16, #tpu.memory_space<vmem>>, %arg8: memref<1x32x64xf32, #tpu.memory_space<vmem>>, %arg9: memref<1x64xf32, #tpu.memory_space<vmem>>, %arg10: memref<1x64xf32, #tpu.memory_space<vmem>>) attributes {dimension_semantics = [#tpu.dimension_semantics<arbitrary>, #tpu.dimension_semantics<arbitrary>], iteration_bounds = array<i64: 2, 1>, scalar_prefetch = 0 : i64, scratch_operands = 3 : i64, tpu.core_type = #tpu.core_type<tc>, window_params = [{transform_indices = @transform_0, window_bounds = array<i64: 32, 512>}, {pipeline_mode = #tpu.pipeline_mode<synchronous>, transform_indices = @transform_1, window_bounds = array<i64: 512, 64>}, {pipeline_mode = #tpu.pipeline_mode<synchronous>, transform_indices = @transform_2, window_bounds = array<i64: 1, 64>}, {pipeline_mode = #tpu.pipeline_mode<synchronous>, transform_indices = @transform_3, window_bounds = array<i64: 1, 64>}, {pipeline_mode = #tpu.pipeline_mode<synchronous>, transform_indices = @transform_4, window_bounds = array<i64: 1, 64>}, {transform_indices = @transform_5, window_bounds = array<i64: 32, 64>}]} {
    %c0_i32 = arith.constant 0 : i32
    %0 = arith.cmpi eq, %arg0, %c0_i32 : i32
    %c0_i32_0 = arith.constant 0 : i32
    %1 = arith.cmpi eq, %arg1, %c0_i32_0 : i32
    %2 = arith.andi %0, %1 : i1
    %3 = arith.extui %2 : i1 to i32
    %c0_i32_1 = arith.constant 0 : i32
    %4 = arith.cmpi ne, %3, %c0_i32_1 : i32
    scf.if %4 {
      %cst = arith.constant 0.000000e+00 : f32
      %11 = vector.broadcast %cst : f32 to vector<1x64xf32>
      %c0 = arith.constant 0 : index
      %c0_5 = arith.constant 0 : index
      %12 = vector.load %arg9[%c0, %c0_5] : memref<1x64xf32, #tpu.memory_space<vmem>>, vector<1x64xf32>
      tpu.vector_store %arg9[%c0, %c0_5], %11 {strides = array<i32>} : memref<1x64xf32, #tpu.memory_space<vmem>>, vector<1x64xf32>,
      %cst_6 = arith.constant 0.000000e+00 : f32
      %13 = vector.broadcast %cst_6 : f32 to vector<1x64xf32>
      %c0_7 = arith.constant 0 : index
      %c0_8 = arith.constant 0 : index
      %14 = vector.load %arg10[%c0_7, %c0_8] : memref<1x64xf32, #tpu.memory_space<vmem>>, vector<1x64xf32>
      tpu.vector_store %arg10[%c0_7, %c0_8], %13 {strides = array<i32>} : memref<1x64xf32, #tpu.memory_space<vmem>>, vector<1x64xf32>,
    } else {
    }
    %c0_i32_2 = arith.constant 0 : i32
    %5 = arith.cmpi eq, %arg0, %c0_i32_2 : i32
    %6 = arith.extui %5 : i1 to i32
    %c0_i32_3 = arith.constant 0 : i32
    %7 = arith.cmpi ne, %6, %c0_i32_3 : i32
    scf.if %7 {
      %c0 = arith.constant 0 : index
      %c0_5 = arith.constant 0 : index
      %11 = vector.load %arg2[%c0, %c0_5] : memref<32x512xbf16, #tpu.memory_space<vmem>>, vector<32x512xbf16>
      %c0_6 = arith.constant 0 : index
      %c0_7 = arith.constant 0 : index
      %12 = vector.load %arg3[%c0_6, %c0_7] : memref<512x64xbf16, #tpu.memory_space<vmem>>, vector<512x64xbf16>
      %cst = arith.constant dense<0.000000e+00> : vector<32x64xf32>
      %13 = tpu.matmul %11, %12, %cst {dimension_numbers = #tpu.dot_dimension_numbers<[1], [0], [0], [1], [0, 0, 1, 1], [], []>} : vector<32x512xbf16>, vector<512x64xbf16>, vector<32x64xf32> -> vector<32x64xf32>
      %c0_8 = arith.constant 0 : index
      %c0_9 = arith.constant 0 : index
      %14 = vector.load %arg4[%c0_8, %c0_9] : memref<1x64xf32, #tpu.memory_space<vmem>>, vector<1x64xf32>
      %15 = vector.broadcast %14 : vector<1x64xf32> to vector<32x64xf32>
      %16 = arith.addf %13, %15 : vector<32x64xf32>
      %17 = arith.index_cast %arg1 : i32 to index
      %c0_10 = arith.constant 0 : index
      %c0_11 = arith.constant 0 : index
      %18 = vector.load %arg8[%17, %c0_10, %c0_11] : memref<1x32x64xf32, #tpu.memory_space<vmem>>, vector<1x32x64xf32>
      %19 = vector.shape_cast %18 : vector<1x32x64xf32> to vector<32x64xf32>
      %20 = vector.shape_cast %16 : vector<32x64xf32> to vector<1x32x64xf32>
      tpu.vector_store %arg8[%17, %c0_10, %c0_11], %20 {strides = array<i32>} : memref<1x32x64xf32, #tpu.memory_space<vmem>>, vector<1x32x64xf32>,
      %c0_12 = arith.constant 0 : index
      %c0_13 = arith.constant 0 : index
      %21 = vector.load %arg9[%c0_12, %c0_13] : memref<1x64xf32, #tpu.memory_space<vmem>>, vector<1x64xf32>
      %cst_14 = arith.constant dense<0.000000e+00> : vector<64xf32>
      %22 = vector.multi_reduction <add>, %16, %cst_14 [0] : vector<32x64xf32> to vector<64xf32>
      %23 = vector.shape_cast %22 : vector<64xf32> to vector<1x64xf32>
      %24 = arith.addf %21, %23 : vector<1x64xf32>
      %c0_15 = arith.constant 0 : index
      %c0_16 = arith.constant 0 : index
      %25 = vector.load %arg9[%c0_15, %c0_16] : memref<1x64xf32, #tpu.memory_space<vmem>>, vector<1x64xf32>
      tpu.vector_store %arg9[%c0_15, %c0_16], %24 {strides = array<i32>} : memref<1x64xf32, #tpu.memory_space<vmem>>, vector<1x64xf32>,
      %c0_17 = arith.constant 0 : index
      %c0_18 = arith.constant 0 : index
      %26 = vector.load %arg10[%c0_17, %c0_18] : memref<1x64xf32, #tpu.memory_space<vmem>>, vector<1x64xf32>
      %27 = arith.mulf %16, %16 : vector<32x64xf32>
      %cst_19 = arith.constant dense<0.000000e+00> : vector<64xf32>
      %28 = vector.multi_reduction <add>, %27, %cst_19 [0] : vector<32x64xf32> to vector<64xf32>
      %29 = vector.shape_cast %28 : vector<64xf32> to vector<1x64xf32>
      %30 = arith.addf %26, %29 : vector<1x64xf32>
      %c0_20 = arith.constant 0 : index
      %c0_21 = arith.constant 0 : index
      %31 = vector.load %arg10[%c0_20, %c0_21] : memref<1x64xf32, #tpu.memory_space<vmem>>, vector<1x64xf32>
      tpu.vector_store %arg10[%c0_20, %c0_21], %30 {strides = array<i32>} : memref<1x64xf32, #tpu.memory_space<vmem>>, vector<1x64xf32>,
    } else {
    }
    %c1_i32 = arith.constant 1 : i32
    %8 = arith.cmpi eq, %arg0, %c1_i32 : i32
    %9 = arith.extui %8 : i1 to i32
    %c0_i32_4 = arith.constant 0 : i32
    %10 = arith.cmpi ne, %9, %c0_i32_4 : i32
    scf.if %10 {
      %c0 = arith.constant 0 : index
      %c0_5 = arith.constant 0 : index
      %11 = vector.load %arg9[%c0, %c0_5] : memref<1x64xf32, #tpu.memory_space<vmem>>, vector<1x64xf32>
      %cst = arith.constant 3.125000e-02 : f32
      %12 = vector.broadcast %cst : f32 to vector<1x64xf32>
      %13 = arith.mulf %11, %12 : vector<1x64xf32>
      %c0_6 = arith.constant 0 : index
      %c0_7 = arith.constant 0 : index
      %14 = vector.load %arg10[%c0_6, %c0_7] : memref<1x64xf32, #tpu.memory_space<vmem>>, vector<1x64xf32>
      %cst_8 = arith.constant 3.125000e-02 : f32
      %15 = vector.broadcast %cst_8 : f32 to vector<1x64xf32>
      %16 = arith.mulf %14, %15 : vector<1x64xf32>
      %17 = arith.mulf %13, %13 : vector<1x64xf32>
      %18 = arith.subf %16, %17 : vector<1x64xf32>
      %cst_9 = arith.constant 0.000000e+00 : f32
      %19 = vector.broadcast %cst_9 : f32 to vector<1x64xf32>
      %20 = arith.maximumf %18, %19 : vector<1x64xf32>
      %c0_10 = arith.constant 0 : index
      %c0_11 = arith.constant 0 : index
      %21 = vector.load %arg5[%c0_10, %c0_11] : memref<1x64xf32, #tpu.memory_space<vmem>>, vector<1x64xf32>
      %cst_12 = arith.constant 9.99999974E-6 : f32
      %22 = vector.broadcast %cst_12 : f32 to vector<1x64xf32>
      %23 = arith.addf %20, %22 : vector<1x64xf32>
      %24 = math.rsqrt %23 : vector<1x64xf32>
      %25 = arith.mulf %21, %24 : vector<1x64xf32>
      %c0_13 = arith.constant 0 : index
      %c0_14 = arith.constant 0 : index
      %26 = vector.load %arg6[%c0_13, %c0_14] : memref<1x64xf32, #tpu.memory_space<vmem>>, vector<1x64xf32>
      %27 = arith.mulf %13, %25 : vector<1x64xf32>
      %28 = arith.subf %26, %27 : vector<1x64xf32>
      %29 = arith.index_cast %arg1 : i32 to index
      %c0_15 = arith.constant 0 : index
      %c0_16 = arith.constant 0 : index
      %30 = vector.load %arg8[%29, %c0_15, %c0_16] : memref<1x32x64xf32, #tpu.memory_space<vmem>>, vector<1x32x64xf32>
      %31 = vector.shape_cast %30 : vector<1x32x64xf32> to vector<32x64xf32>
      %32 = vector.broadcast %25 : vector<1x64xf32> to vector<32x64xf32>
      %33 = arith.mulf %31, %32 : vector<32x64xf32>
      %34 = vector.broadcast %28 : vector<1x64xf32> to vector<32x64xf32>
      %35 = arith.addf %33, %34 : vector<32x64xf32>
      %cst_17 = arith.constant 0.000000e+00 : f32
      %36 = vector.broadcast %cst_17 : f32 to vector<32x64xf32>
      %37 = arith.cmpf ogt, %35, %36 : vector<32x64xf32>
      %cst_18 = arith.constant 2.000000e-01 : f32
      %38 = vector.broadcast %cst_18 : f32 to vector<32x64xf32>
      %39 = arith.mulf %38, %35 : vector<32x64xf32>
      %40 = arith.select %37, %35, %39 : vector<32x64xi1>, vector<32x64xf32>
      %41 = arith.truncf %40 : vector<32x64xf32> to vector<32x64xbf16>
      %c0_19 = arith.constant 0 : index
      %c0_20 = arith.constant 0 : index
      %42 = vector.load %arg7[%c0_19, %c0_20] : memref<32x64xbf16, #tpu.memory_space<vmem>>, vector<32x64xbf16>
      tpu.vector_store %arg7[%c0_19, %c0_20], %41 {strides = array<i32>} : memref<32x64xbf16, #tpu.memory_space<vmem>>, vector<32x64xbf16>,
    } else {
    }
    return
  }
  func.func @transform_0(%arg0: i32, %arg1: i32) -> (i32, i32) {
    %c1_i32 = arith.constant 1 : i32
    %0 = arith.subi %c1_i32, %arg0 : i32
    %1 = arith.muli %0, %arg1 : i32
    %c0_i32 = arith.constant 0 : i32
    %c0_i32_0 = arith.constant 0 : i32
    return %1, %c0_i32 : i32, i32
  }
  func.func @transform_1(%arg0: i32, %arg1: i32) -> (i32, i32) {
    %c0_i32 = arith.constant 0 : i32
    %c0_i32_0 = arith.constant 0 : i32
    %c0_i32_1 = arith.constant 0 : i32
    return %c0_i32, %c0_i32_0 : i32, i32
  }
  func.func @transform_2(%arg0: i32, %arg1: i32) -> (i32, i32) {
    %c0_i32 = arith.constant 0 : i32
    %c0_i32_0 = arith.constant 0 : i32
    %c0_i32_1 = arith.constant 0 : i32
    return %c0_i32, %c0_i32_0 : i32, i32
  }
  func.func @transform_3(%arg0: i32, %arg1: i32) -> (i32, i32) {
    %c0_i32 = arith.constant 0 : i32
    %c0_i32_0 = arith.constant 0 : i32
    %c0_i32_1 = arith.constant 0 : i32
    return %c0_i32, %c0_i32_0 : i32, i32
  }
  func.func @transform_4(%arg0: i32, %arg1: i32) -> (i32, i32) {
    %c0_i32 = arith.constant 0 : i32
    %c0_i32_0 = arith.constant 0 : i32
    %c0_i32_1 = arith.constant 0 : i32
    return %c0_i32, %c0_i32_0 : i32, i32
  }
  func.func @transform_5(%arg0: i32, %arg1: i32) -> (i32, i32) {
    %0 = arith.muli %arg0, %arg1 : i32
    %c0_i32 = arith.constant 0 : i32
    %c0_i32_0 = arith.constant 0 : i32
    return %0, %c0_i32 : i32, i32
  }
}

module attributes {stable_mosaic.version = 11 : i64} {
  func.func @heads_kernel(%arg0: i32, %arg1: memref<2x1024xbf16, #tpu.memory_space<vmem>>, %arg2: memref<1024x12xf32, #tpu.memory_space<vmem>>, %arg3: memref<1x12xf32, #tpu.memory_space<vmem>>, %arg4: memref<1024x10xf32, #tpu.memory_space<vmem>>, %arg5: memref<1x10xf32, #tpu.memory_space<vmem>>, %arg6: memref<1024x1xf32, #tpu.memory_space<vmem>>, %arg7: memref<1x1xf32, #tpu.memory_space<vmem>>, %arg8: memref<2x12xf32, #tpu.memory_space<vmem>>, %arg9: memref<2x10xf32, #tpu.memory_space<vmem>>, %arg10: memref<2x1xf32, #tpu.memory_space<vmem>>, %arg11: memref<2x1xf32, #tpu.memory_space<vmem>>) attributes {dimension_semantics = [#tpu.dimension_semantics<parallel>], iteration_bounds = array<i64: 1>, scalar_prefetch = 0 : i64, scratch_operands = 0 : i64, tpu.core_type = #tpu.core_type<tc>, window_params = [{transform_indices = @transform_0, window_bounds = array<i64: 2, 1024>}, {pipeline_mode = #tpu.pipeline_mode<synchronous>, transform_indices = @transform_1, window_bounds = array<i64: 1024, 12>}, {pipeline_mode = #tpu.pipeline_mode<synchronous>, transform_indices = @transform_2, window_bounds = array<i64: 1, 12>}, {pipeline_mode = #tpu.pipeline_mode<synchronous>, transform_indices = @transform_3, window_bounds = array<i64: 1024, 10>}, {pipeline_mode = #tpu.pipeline_mode<synchronous>, transform_indices = @transform_4, window_bounds = array<i64: 1, 10>}, {pipeline_mode = #tpu.pipeline_mode<synchronous>, transform_indices = @transform_5, window_bounds = array<i64: 1024, 1>}, {pipeline_mode = #tpu.pipeline_mode<synchronous>, transform_indices = @transform_6, window_bounds = array<i64: 1, 1>}, {transform_indices = @transform_7, window_bounds = array<i64: 2, 12>}, {transform_indices = @transform_8, window_bounds = array<i64: 2, 10>}, {transform_indices = @transform_9, window_bounds = array<i64: 2, 1>}, {transform_indices = @transform_10, window_bounds = array<i64: 2, 1>}]} {
    %c0 = arith.constant 0 : index
    %c0_0 = arith.constant 0 : index
    %0 = vector.load %arg1[%c0, %c0_0] : memref<2x1024xbf16, #tpu.memory_space<vmem>>, vector<2x1024xbf16>
    %1 = arith.extf %0 : vector<2x1024xbf16> to vector<2x1024xf32>
    %c0_1 = arith.constant 0 : index
    %c0_2 = arith.constant 0 : index
    %2 = vector.load %arg2[%c0_1, %c0_2] : memref<1024x12xf32, #tpu.memory_space<vmem>>, vector<1024x12xf32>
    %cst = arith.constant dense<0.000000e+00> : vector<2x12xf32>
    %3 = tpu.matmul %1, %2, %cst {dimension_numbers = #tpu.dot_dimension_numbers<[1], [0], [0], [1], [0, 0, 1, 1], [], []>} : vector<2x1024xf32>, vector<1024x12xf32>, vector<2x12xf32> -> vector<2x12xf32>
    %c0_3 = arith.constant 0 : index
    %c0_4 = arith.constant 0 : index
    %4 = vector.load %arg3[%c0_3, %c0_4] : memref<1x12xf32, #tpu.memory_space<vmem>>, vector<1x12xf32>
    %5 = vector.broadcast %4 : vector<1x12xf32> to vector<2x12xf32>
    %6 = arith.addf %3, %5 : vector<2x12xf32>
    %c0_5 = arith.constant 0 : index
    %c0_6 = arith.constant 0 : index
    %7 = vector.load %arg4[%c0_5, %c0_6] : memref<1024x10xf32, #tpu.memory_space<vmem>>, vector<1024x10xf32>
    %cst_7 = arith.constant dense<0.000000e+00> : vector<2x10xf32>
    %8 = tpu.matmul %1, %7, %cst_7 {dimension_numbers = #tpu.dot_dimension_numbers<[1], [0], [0], [1], [0, 0, 1, 1], [], []>} : vector<2x1024xf32>, vector<1024x10xf32>, vector<2x10xf32> -> vector<2x10xf32>
    %c0_8 = arith.constant 0 : index
    %c0_9 = arith.constant 0 : index
    %9 = vector.load %arg5[%c0_8, %c0_9] : memref<1x10xf32, #tpu.memory_space<vmem>>, vector<1x10xf32>
    %10 = vector.broadcast %9 : vector<1x10xf32> to vector<2x10xf32>
    %11 = arith.addf %8, %10 : vector<2x10xf32>
    %c0_10 = arith.constant 0 : index
    %c0_11 = arith.constant 0 : index
    %12 = vector.load %arg6[%c0_10, %c0_11] : memref<1024x1xf32, #tpu.memory_space<vmem>>, vector<1024x1xf32>
    %cst_12 = arith.constant dense<0.000000e+00> : vector<2x1xf32>
    %13 = tpu.matmul %1, %12, %cst_12 {dimension_numbers = #tpu.dot_dimension_numbers<[1], [0], [0], [1], [0, 0, 1, 1], [], []>} : vector<2x1024xf32>, vector<1024x1xf32>, vector<2x1xf32> -> vector<2x1xf32>
    %c0_13 = arith.constant 0 : index
    %c0_14 = arith.constant 0 : index
    %14 = vector.load %arg7[%c0_13, %c0_14] : memref<1x1xf32, #tpu.memory_space<vmem>>, vector<1x1xf32>
    %15 = vector.broadcast %14 : vector<1x1xf32> to vector<2x1xf32>
    %16 = arith.addf %13, %15 : vector<2x1xf32>
    %cst_15 = arith.constant dense<0xFF800000> : vector<2xf32>
    %17 = vector.multi_reduction <maximumf>, %6, %cst_15 [1] : vector<2x12xf32> to vector<2xf32>
    %18 = vector.shape_cast %17 : vector<2xf32> to vector<2x1xf32>
    %19 = vector.broadcast %18 : vector<2x1xf32> to vector<2x12xf32>
    %20 = arith.subf %6, %19 : vector<2x12xf32>
    %21 = math.exp %20 : vector<2x12xf32>
    %cst_16 = arith.constant dense<0.000000e+00> : vector<2xf32>
    %22 = vector.multi_reduction <add>, %21, %cst_16 [1] : vector<2x12xf32> to vector<2xf32>
    %23 = vector.shape_cast %22 : vector<2xf32> to vector<2x1xf32>
    %24 = tpu.reciprocal %23 {approx = true} : vector<2x1xf32> -> vector<2x1xf32>
    %25 = vector.broadcast %24 : vector<2x1xf32> to vector<2x12xf32>
    %26 = arith.mulf %21, %25 : vector<2x12xf32>
    %c0_17 = arith.constant 0 : index
    %c0_18 = arith.constant 0 : index
    %27 = vector.load %arg8[%c0_17, %c0_18] : memref<2x12xf32, #tpu.memory_space<vmem>>, vector<2x12xf32>
    tpu.vector_store %arg8[%c0_17, %c0_18], %26 {strides = array<i32>} : memref<2x12xf32, #tpu.memory_space<vmem>>, vector<2x12xf32>,
    %cst_19 = arith.constant dense<0xFF800000> : vector<2xf32>
    %28 = vector.multi_reduction <maximumf>, %11, %cst_19 [1] : vector<2x10xf32> to vector<2xf32>
    %29 = vector.shape_cast %28 : vector<2xf32> to vector<2x1xf32>
    %30 = vector.broadcast %29 : vector<2x1xf32> to vector<2x10xf32>
    %31 = arith.subf %11, %30 : vector<2x10xf32>
    %32 = math.exp %31 : vector<2x10xf32>
    %cst_20 = arith.constant dense<0.000000e+00> : vector<2xf32>
    %33 = vector.multi_reduction <add>, %32, %cst_20 [1] : vector<2x10xf32> to vector<2xf32>
    %34 = vector.shape_cast %33 : vector<2xf32> to vector<2x1xf32>
    %35 = tpu.reciprocal %34 {approx = true} : vector<2x1xf32> -> vector<2x1xf32>
    %36 = vector.broadcast %35 : vector<2x1xf32> to vector<2x10xf32>
    %37 = arith.mulf %32, %36 : vector<2x10xf32>
    %c0_21 = arith.constant 0 : index
    %c0_22 = arith.constant 0 : index
    %38 = vector.load %arg9[%c0_21, %c0_22] : memref<2x10xf32, #tpu.memory_space<vmem>>, vector<2x10xf32>
    tpu.vector_store %arg9[%c0_21, %c0_22], %37 {strides = array<i32>} : memref<2x10xf32, #tpu.memory_space<vmem>>, vector<2x10xf32>,
    %c0_23 = arith.constant 0 : index
    %c0_24 = arith.constant 0 : index
    %39 = vector.load %arg10[%c0_23, %c0_24] : memref<2x1xf32, #tpu.memory_space<vmem>>, vector<2x1xf32>
    tpu.vector_store %arg10[%c0_23, %c0_24], %16 {strides = array<i32>} : memref<2x1xf32, #tpu.memory_space<vmem>>, vector<2x1xf32>,
    %40 = math.absf %16 : vector<2x1xf32>
    %cst_25 = arith.constant 0.000000e+00 : f32
    %41 = vector.broadcast %cst_25 : f32 to vector<2x1xf32>
    %42 = arith.subf %41, %40 : vector<2x1xf32>
    %43 = math.exp %42 : vector<2x1xf32>
    %cst_26 = arith.constant 1.000000e+00 : f32
    %44 = vector.broadcast %cst_26 : f32 to vector<2x1xf32>
    %45 = arith.addf %44, %43 : vector<2x1xf32>
    %cst_27 = arith.constant 1.000000e+00 : f32
    %46 = vector.broadcast %cst_27 : f32 to vector<2x1xf32>
    %47 = arith.divf %46, %45 : vector<2x1xf32>
    %cst_28 = arith.constant 0.000000e+00 : f32
    %48 = vector.broadcast %cst_28 : f32 to vector<2x1xf32>
    %49 = arith.cmpf oge, %16, %48 : vector<2x1xf32>
    %cst_29 = arith.constant 1.000000e+00 : f32
    %50 = vector.broadcast %cst_29 : f32 to vector<2x1xf32>
    %51 = arith.subf %50, %47 : vector<2x1xf32>
    %52 = arith.select %49, %47, %51 : vector<2x1xi1>, vector<2x1xf32>
    %c0_30 = arith.constant 0 : index
    %c0_31 = arith.constant 0 : index
    %53 = vector.load %arg11[%c0_30, %c0_31] : memref<2x1xf32, #tpu.memory_space<vmem>>, vector<2x1xf32>
    tpu.vector_store %arg11[%c0_30, %c0_31], %52 {strides = array<i32>} : memref<2x1xf32, #tpu.memory_space<vmem>>, vector<2x1xf32>,
    return
  }
  func.func @transform_0(%arg0: i32) -> (i32, i32) {
    %c0_i32 = arith.constant 0 : i32
    %c0_i32_0 = arith.constant 0 : i32
    return %arg0, %c0_i32 : i32, i32
  }
  func.func @transform_1(%arg0: i32) -> (i32, i32) {
    %c0_i32 = arith.constant 0 : i32
    %c0_i32_0 = arith.constant 0 : i32
    %c0_i32_1 = arith.constant 0 : i32
    return %c0_i32, %c0_i32_0 : i32, i32
  }
  func.func @transform_2(%arg0: i32) -> (i32, i32) {
    %c0_i32 = arith.constant 0 : i32
    %c0_i32_0 = arith.constant 0 : i32
    %c0_i32_1 = arith.constant 0 : i32
    return %c0_i32, %c0_i32_0 : i32, i32
  }
  func.func @transform_3(%arg0: i32) -> (i32, i32) {
    %c0_i32 = arith.constant 0 : i32
    %c0_i32_0 = arith.constant 0 : i32
    %c0_i32_1 = arith.constant 0 : i32
    return %c0_i32, %c0_i32_0 : i32, i32
  }
  func.func @transform_4(%arg0: i32) -> (i32, i32) {
    %c0_i32 = arith.constant 0 : i32
    %c0_i32_0 = arith.constant 0 : i32
    %c0_i32_1 = arith.constant 0 : i32
    return %c0_i32, %c0_i32_0 : i32, i32
  }
  func.func @transform_5(%arg0: i32) -> (i32, i32) {
    %c0_i32 = arith.constant 0 : i32
    %c0_i32_0 = arith.constant 0 : i32
    %c0_i32_1 = arith.constant 0 : i32
    return %c0_i32, %c0_i32_0 : i32, i32
  }
  func.func @transform_6(%arg0: i32) -> (i32, i32) {
    %c0_i32 = arith.constant 0 : i32
    %c0_i32_0 = arith.constant 0 : i32
    %c0_i32_1 = arith.constant 0 : i32
    return %c0_i32, %c0_i32_0 : i32, i32
  }
  func.func @transform_7(%arg0: i32) -> (i32, i32) {
    %c0_i32 = arith.constant 0 : i32
    %c0_i32_0 = arith.constant 0 : i32
    return %arg0, %c0_i32 : i32, i32
  }
  func.func @transform_8(%arg0: i32) -> (i32, i32) {
    %c0_i32 = arith.constant 0 : i32
    %c0_i32_0 = arith.constant 0 : i32
    return %arg0, %c0_i32 : i32, i32
  }
  func.func @transform_9(%arg0: i32) -> (i32, i32) {
    %c0_i32 = arith.constant 0 : i32
    %c0_i32_0 = arith.constant 0 : i32
    return %arg0, %c0_i32 : i32, i32
  }
  func.func @transform_10(%arg0: i32) -> (i32, i32) {
    %c0_i32 = arith.constant 0 : i32
    %c0_i32_0 = arith.constant 0 : i32
    return %arg0, %c0_i32 : i32, i32
  }
}

</mosaic_0001>

<bundles_post_ra>
// kernel: discriminator_forward.5
= control target key start
LH: loop header
LB: loop body
LE: loop exit
PB: predicated region body
PF: predicated region fallthrough
CT: control target
= control target key end

     0   :  { %s1774_s12 = smov 0   ;;  %s2151_s0 = inlined_call_operand.vmem [shape: bf16[2048,48], index: 0, kind: input, shape index: {}]   ;;  %s2152_s1 = inlined_call_operand.vmem [shape: bf16[48,8], index: 1, kind: input, shape index: {}]   ;;  %s2153_s2 = inlined_call_operand.vmem [shape: f32[1,8], index: 2, kind: input, shape index: {}]   ;;  %s2154_s3 = inlined_call_operand.vmem [shape: bf16[2048,8], index: 3, kind: output, shape index: {}]  }
   0x1 LB: > { %s1385_s13 = sadd.s32 4294967295, %s1752_s12   ;;  %p1389_p0 = scmp.ge.s32.totalorder %s1752_s12, 1  ;;  %s1752_s12 = sphi %s1774_s12, %s13_s12  }
   0x2   : > { %p138_p1 = scmp.lt.s32.totalorder %s1752_s12, 5 }
   0x4   : > { %p139_p2 = pnand %p1389_p0, %p138_p1 }
   0x5   : > { %v1711_v0 = vld [vmem:[%s2152_s1] sm:$0xff] (!%p139_p2)   ;;  %s1390_s16 = sshll.u32 (!%p139_p2), %s1385_s13, 6  ;;  %v1712_v1 = vld [vmem:[%s2152_s1 + $0x8] sm:$0xff] (!%p139_p2)   ;;  %v1713_v2 = vld [vmem:[%s2152_s1 + $0x10] sm:$0xff] (!%p139_p2)   ;;  %vm430_vm0 = vcmask (!%p139_p2), 392192   ;;  %vm1264_vm1 = vcmask (!%p139_p2), 60416  }
   0x6   : > { %142 = sbr.rel (%p139_p2) target bundleno = 316 (0x13c), region = 32  ;;  %p163_p3 = scmp.lt.s32.totalorder (!%p139_p2), %s1390_s16, 255  ;;  %1627 = vmatprep.subr.bf16.mxu0 (!%p139_p2), %v1711_v0  ;;  %1697 = vmatprep.subr.bf16.mxu1 (!%p139_p2), %v1711_v0  ;;  %v1868_v35 = vld [vmem:[%s2153_s2] ss:$0 sm:$0xff] (!%p139_p2) }
   0x7   : > { %1628 = vmatpush3.bf16.msra.mxu0 (!%p139_p2), %v1711_v0  ;;  %1700 = vmatpush3.bf16.msra.mxu1 (!%p139_p2), %v1711_v0 }
   0x8   : > { %1629 = vmatprep.subr.bf16.mxu0 (!%p139_p2), %v1712_v1  ;;  %1698 = vmatprep.subr.bf16.mxu1 (!%p139_p2), %v1712_v1 }
   0xb   : > { %1630 = vmatpush3.bf16.msra.mxu0 (!%p139_p2), %v1712_v1  ;;  %1701 = vmatpush3.bf16.msra.mxu1 (!%p139_p2), %v1712_v1 }
   0xc   : > { %1631 = vmatprep.subr.bf16.mxu0 (!%p139_p2), %v1713_v2  ;;  %1699 = vmatprep.subr.bf16.mxu1 (!%p139_p2), %v1713_v2 }
   0xd   : > { %s2156_s16 = smov (!%p163_p3, %s1390_s16), 255 }
   0xe   : > { %s1391_s21 = sshll.u32 %s2156_s16, 2 }
   0xf   : > { %s1799_s24 = scalar_lea.vmem %s2151_s0, %s1391_s21  ;;  %1632 = vmatpush3.bf16.msra.mxu0 %v1713_v2  ;;  %1702 = vmatpush3.bf16.msra.mxu1 %v1713_v2  ;;  %s1879_s29 = scalar_lea.vmem %s2154_s3, %s1391_s21 }
  0x10   : > { %v1714_v3 = vld [vmem:[%s1799_s24] sm:$0xff]   ;;  %v1716_v5 = vld [vmem:[%s1799_s24 + $0x8] sm:$0xff]   ;;  %v1718_v7 = vld [vmem:[%s1799_s24 + $0x10] sm:$0xff]  }
  0x11   : > { %v1715_v4 = vld [vmem:[%s1799_s24 + $0x80] sm:$0xff]   ;;  %1633 = vmatprep.mubr.msk.bf16.mxu0 %vm430_vm0, %v1714_v3  ;;  %v1717_v6 = vld [vmem:[%s1799_s24 + $0x88] sm:$0xff]   ;;  %v1719_v8 = vld [vmem:[%s1799_s24 + $0x90] sm:$0xff]  }
  0x12   : > { %1665 = vmatprep.mubr.msk.bf16.mxu1 %vm430_vm0, %v1715_v4  ;;  %1634 = vmatmul.mubr.msk.bf16.vlgmr.msra.gmra.mrb[0].mxu0 %vm430_vm0, %v1716_v5  ;;  %v1720_v9 = vld [vmem:[%s1799_s24 + $0x18] sm:$0xff]   ;;  %v1722_v11 = vld [vmem:[%s1799_s24 + $0x20] sm:$0xff]   ;;  %v1724_v13 = vld [vmem:[%s1799_s24 + $0x28] sm:$0xff]  }
  0x13   : > { %1666 = vmatmul.mubr.msk.bf16.vlgmr.msra.gmra.mrb[0].mxu1 %vm430_vm0, %v1717_v6  ;;  %1637 = vmatprep.mubr.msk.bf16.mxu0 %vm430_vm0, %v1718_v7  ;;  %v1721_v10 = vld [vmem:[%s1799_s24 + $0x98] sm:$0xff]   ;;  %v1723_v12 = vld [vmem:[%s1799_s24 + $0xa0] sm:$0xff]   ;;  %v1725_v14 = vld [vmem:[%s1799_s24 + $0xa8] sm:$0xff]  }
  0x14   : > { %1669 = vmatprep.mubr.msk.bf16.mxu1 %vm430_vm0, %v1719_v8  ;;  %v1726_v15 = vld [vmem:[%s1799_s24 + $0x30] sm:$0xff]   ;;  %v1728_v17 = vld [vmem:[%s1799_s24 + $0x38] sm:$0xff]   ;;  %v1730_v19 = vld [vmem:[%s1799_s24 + $0x40] sm:$0xff]  }
  0x15   : > { %v1727_v16 = vld [vmem:[%s1799_s24 + $0xb0] sm:$0xff]   ;;  %v1729_v18 = vld [vmem:[%s1799_s24 + $0xb8] sm:$0xff]   ;;  %v1731_v20 = vld [vmem:[%s1799_s24 + $0xc0] sm:$0xff]  }
  0x16   : > { %v1732_v21 = vld [vmem:[%s1799_s24 + $0x48] sm:$0xff]   ;;  %v1734_v23 = vld [vmem:[%s1799_s24 + $0x50] sm:$0xff]   ;;  %v1736_v25 = vld [vmem:[%s1799_s24 + $0x58] sm:$0xff]  }
  0x17   : > { %v1733_v22 = vld [vmem:[%s1799_s24 + $0xc8] sm:$0xff]   ;;  %v1735_v24 = vld [vmem:[%s1799_s24 + $0xd0] sm:$0xff]   ;;  %v1737_v26 = vld [vmem:[%s1799_s24 + $0xd8] sm:$0xff]  }
  0x18   : > { %v1738_v27 = vld [vmem:[%s1799_s24 + $0x60] sm:$0xff]   ;;  %v1740_v29 = vld [vmem:[%s1799_s24 + $0x68] sm:$0xff]   ;;  %v1742_v31 = vld [vmem:[%s1799_s24 + $0x70] sm:$0xff]  }
  0x19   : > { %v1739_v28 = vld [vmem:[%s1799_s24 + $0xe0] sm:$0xff]   ;;  %v1741_v30 = vld [vmem:[%s1799_s24 + $0xe8] sm:$0xff]   ;;  %v1743_v32 = vld [vmem:[%s1799_s24 + $0xf0] sm:$0xff]  }
  0x1a   : > { %1638 = vmatmul.mubr.msk.bf16.gmra.mrb[4].mxu0 %vm430_vm0, %v1720_v9  ;;  %v1744_v33 = vld [vmem:[%s1799_s24 + $0x78] sm:$0xff]  }
  0x1b   : > { %1670 = vmatmul.mubr.msk.bf16.gmra.mrb[4].mxu1 %vm430_vm0, %v1721_v10  ;;  %1641 = vmatprep.mubr.msk.bf16.mxu0 %vm430_vm0, %v1722_v11  ;;  %v1745_v34 = vld [vmem:[%s1799_s24 + $0xf8] sm:$0xff]  }
  0x1c   : > { %1673 = vmatprep.mubr.msk.bf16.mxu1 %vm430_vm0, %v1723_v12 }
  0x22   : > { %1642 = vmatmul.mubr.msk.bf16.gmra.mrb[8].mxu0 %vm430_vm0, %v1724_v13 }
  0x23   : > { %1674 = vmatmul.mubr.msk.bf16.gmra.mrb[8].mxu1 %vm430_vm0, %v1725_v14  ;;  %1645 = vmatprep.mubr.msk.bf16.mxu0 %vm430_vm0, %v1726_v15 }
  0x24   : > { %1677 = vmatprep.mubr.msk.bf16.mxu1 %vm430_vm0, %v1727_v16 }
  0x2a   : > { %1646 = vmatmul.mubr.msk.bf16.gmra.mrb[12].mxu0 %vm430_vm0, %v1728_v17 }
  0x2b   : > { %1678 = vmatmul.mubr.msk.bf16.gmra.mrb[12].mxu1 %vm430_vm0, %v1729_v18  ;;  %1649 = vmatprep.mubr.msk.bf16.mxu0 %vm430_vm0, %v1730_v19 }
  0x2c   : > { %1681 = vmatprep.mubr.msk.bf16.mxu1 %vm430_vm0, %v1731_v20 }
  0x32   : > { %1650 = vmatmul.mubr.msk.bf16.gmra.mrb[16].mxu0 %vm430_vm0, %v1732_v21 }
  0x33   : > { %1682 = vmatmul.mubr.msk.bf16.gmra.mrb[16].mxu1 %vm430_vm0, %v1733_v22  ;;  %1653 = vmatprep.mubr.msk.bf16.mxu0 %vm430_vm0, %v1734_v23 }
  0x34   : > { %1685 = vmatprep.mubr.msk.bf16.mxu1 %vm430_vm0, %v1735_v24 }
  0x3a   : > { %1654 = vmatmul.mubr.msk.bf16.gmra.mrb[20].mxu0 %vm430_vm0, %v1736_v25 }
  0x3b   : > { %1686 = vmatmul.mubr.msk.bf16.gmra.mrb[20].mxu1 %vm430_vm0, %v1737_v26  ;;  %1657 = vmatprep.mubr.msk.bf16.mxu0 %vm430_vm0, %v1738_v27 }
  0x3c   : > { %1689 = vmatprep.mubr.msk.bf16.mxu1 %vm430_vm0, %v1739_v28 }
  0x42   : > { %1658 = vmatmul.mubr.msk.bf16.gmra.mrb[24].mxu0 %vm430_vm0, %v1740_v29 }
  0x43   : > { %1690 = vmatmul.mubr.msk.bf16.gmra.mrb[24].mxu1 %vm430_vm0, %v1741_v30  ;;  %1661 = vmatprep.mubr.msk.bf16.mxu0 %vm430_vm0, %v1742_v31 }
  0x44   : > { %1693 = vmatprep.mubr.msk.bf16.mxu1 %vm430_vm0, %v1743_v32 }
  0x4a   : > { %1662 = vmatmul.mubr.msk.bf16.gmra.mrb[28].mxu0 %vm430_vm0, %v1744_v33 }
  0x4b   : > { %1694 = vmatmul.mubr.msk.bf16.gmra.mrb[28].mxu1 %vm430_vm0, %v1745_v34 }
  0xe5   : > { %v1635_v36 = vpop.f32.mrb[0].mxu0 }
  0xe6   : > { %v1667_v37 = vpop.f32.mrb[0].mxu1  ;;  %v570_v38 = vadd.f32 %v1635_v36, %v1868_v35  ;;  %v561_v40 = vpop.f32.mrb[1].mxu0 }
  0xe7   : > { %v698_v39 = vadd.f32 %v1667_v37, %v1868_v35  ;;  %v689_v41 = vpop.f32.mrb[1].mxu1  ;;  %v562_v42 = vadd.f32 %v1868_v35, %v561_v40  ;;  %v1636_v44 = vpop.f32.mrb[2].mxu0 }
  0xe8   : > { %v690_v43 = vadd.f32 %v1868_v35, %v689_v41  ;;  %v1668_v45 = vpop.f32.mrb[2].mxu1  ;;  %vm818_vm2 = vcmp.gt.f32.partialorder %v570_v38, 0.0  ;;  %v882_v46 = vmul.f32 0.2, %v570_v38  ;;  %v573_v52 = vadd.f32 %v1636_v44, %v1868_v35  ;;  %v564_v54 = vpop.f32.mrb[3].mxu0 }
  0xe9   : > { %vm850_vm3 = vcmp.gt.f32.partialorder %v698_v39, 0.0  ;;  %v914_v47 = vmul.f32 0.2, %v698_v39  ;;  %vm816_vm4 = vcmp.gt.f32.partialorder %v562_v42, 0.0  ;;  %v880_v48 = vmul.f32 0.2, %v562_v42 }
  0xea   : > { %vm848_vm5 = vcmp.gt.f32.partialorder %v690_v43, 0.0  ;;  %v912_v49 = vmul.f32 0.2, %v690_v43  ;;  %v946_v50 = vsel %vm818_vm2, %v570_v38, %v882_v46  ;;  %v701_v53 = vadd.f32 %v1668_v45, %v1868_v35  ;;  %v692_v55 = vpop.f32.mrb[3].mxu1 }
  0xeb   : > { %v978_v51 = vsel %vm850_vm3, %v698_v39, %v914_v47  ;;  %v1530_v56 = vpack.c.bf16 %v946_v50, %v946_v50  ;;  %v944_v58 = vsel %vm816_vm4, %v562_v42, %v880_v48  ;;  %vm819_vm6 = vcmp.gt.f32.partialorder %v573_v52, 0.0 }
  0xec   : > { %v1562_v57 = vpack.c.bf16 %v978_v51, %v978_v51  ;;  %v976_v59 = vsel %vm848_vm5, %v690_v43, %v912_v49  ;;  %v1528_v60 = vpack.c.bf16 %v944_v58, %v944_v58  ;;  %v883_v62 = vmul.f32 0.2, %v573_v52 }
  0xed   : > { %v1560_v61 = vpack.c.bf16 %v976_v59, %v976_v59  ;;  %1267 = vst.msk [vmem:[%s1879_s29 + $0x8] sm:$0xf] %vm1264_vm1, %v1530_v56  ;;  %vm851_vm7 = vcmp.gt.f32.partialorder %v701_v53, 0.0  ;;  %v915_v63 = vmul.f32 0.2, %v701_v53  ;;  %v565_v0 = vadd.f32 %v1868_v35, %v564_v54  ;;  %v1639_v2 = vpop.f32.mrb[4].mxu0 }
  0xee   : > { %1299 = vst.msk [vmem:[%s1879_s29 + $0x88] sm:$0xf] %vm1264_vm1, %v1562_v57  ;;  %v693_v1 = vadd.f32 %v1868_v35, %v692_v55  ;;  %v1671_v3 = vpop.f32.mrb[4].mxu1  ;;  %1265 = vst.msk [vmem:[%s1879_s29] sm:$0xf] %vm1264_vm1, %v1528_v60  ;;  %v947_v4 = vsel %vm819_vm6, %v573_v52, %v883_v62  ;;  %v586_v5 = vadd.f32 %v1639_v2, %v1868_v35  ;;  %v577_v7 = vpop.f32.mrb[5].mxu0 }
  0xef   : > { %1297 = vst.msk [vmem:[%s1879_s29 + $0x80] sm:$0xf] %vm1264_vm1, %v1560_v61  ;;  %v714_v6 = vadd.f32 %v1671_v3, %v1868_v35  ;;  %v705_v8 = vpop.f32.mrb[5].mxu1  ;;  %v1531_v9 = vpack.c.bf16 %v947_v4, %v947_v4  ;;  %v979_v10 = vsel %vm851_vm7, %v701_v53, %v915_v63  ;;  %vm817_vm8 = vcmp.gt.f32.partialorder %v565_v0, 0.0  ;;  %v1640_v12 = vpop.f32.mrb[6].mxu0 }
  0xf0   : > { %v881_v11 = vmul.f32 0.2, %v565_v0  ;;  %v1672_v13 = vpop.f32.mrb[6].mxu1  ;;  %v1563_v14 = vpack.c.bf16 %v979_v10, %v979_v10  ;;  %vm849_vm9 = vcmp.gt.f32.partialorder %v693_v1, 0.0  ;;  %v913_v15 = vmul.f32 0.2, %v693_v1 }
  0xf1   : > { %vm822_vm10 = vcmp.gt.f32.partialorder %v586_v5, 0.0  ;;  %v580_v16 = vpop.f32.mrb[7].mxu0  ;;  %v708_v17 = vpop.f32.mrb[7].mxu1  ;;  %1268 = vst.msk [vmem:[%s1879_s29 + $0xc] sm:$0xf] %vm1264_vm1, %v1531_v9  ;;  %vm854_vm11 = vcmp.gt.f32.partialorder %v714_v6, 0.0  ;;  %v578_v23 = vadd.f32 %v1868_v35, %v577_v7  ;;  %v706_v24 = vadd.f32 %v1868_v35, %v705_v8 }
  0xf2   : > { %v945_v18 = vsel %vm817_vm8, %v565_v0, %v881_v11  ;;  %v886_v19 = vmul.f32 0.2, %v586_v5  ;;  %v918_v20 = vmul.f32 0.2, %v714_v6  ;;  %1300 = vst.msk [vmem:[%s1879_s29 + $0x8c] sm:$0xf] %vm1264_vm1, %v1563_v14  ;;  %v977_v22 = vsel %vm849_vm9, %v693_v1, %v913_v15 }
  0xf3   : > { %v1529_v21 = vpack.c.bf16 %v945_v18, %v945_v18  ;;  %v1561_v25 = vpack.c.bf16 %v977_v22, %v977_v22  ;;  %v589_v28 = vadd.f32 %v1640_v12, %v1868_v35  ;;  %vm820_vm12 = vcmp.gt.f32.partialorder %v578_v23, 0.0 }
  0xf4   : > { %v950_v26 = vsel %vm822_vm10, %v586_v5, %v886_v19  ;;  %v982_v27 = vsel %vm854_vm11, %v714_v6, %v918_v20  ;;  %v884_v31 = vmul.f32 0.2, %v578_v23  ;;  %vm852_vm13 = vcmp.gt.f32.partialorder %v706_v24, 0.0 }
  0xf5   : > { %1266 = vst.msk [vmem:[%s1879_s29 + $0x4] sm:$0xf] %vm1264_vm1, %v1529_v21  ;;  %v1534_v29 = vpack.c.bf16 %v950_v26, %v950_v26  ;;  %v1566_v30 = vpack.c.bf16 %v982_v27, %v982_v27  ;;  %1298 = vst.msk [vmem:[%s1879_s29 + $0x84] sm:$0xf] %vm1264_vm1, %v1561_v25  ;;  %v916_v32 = vmul.f32 0.2, %v706_v24  ;;  %v717_v36 = vadd.f32 %v1672_v13, %v1868_v35 }
  0xf6   : > { %vm823_vm14 = vcmp.gt.f32.partialorder %v589_v28, 0.0  ;;  %v887_v33 = vmul.f32 0.2, %v589_v28  ;;  %v948_v34 = vsel %vm820_vm12, %v578_v23, %v884_v31  ;;  %v581_v37 = vadd.f32 %v1868_v35, %v580_v16  ;;  %v1643_v39 = vpop.f32.mrb[8].mxu0  ;;  %v1675_v40 = vpop.f32.mrb[8].mxu1 }
  0xf7   : > { %1271 = vst.msk [vmem:[%s1879_s29 + $0x18] sm:$0xf] %vm1264_vm1, %v1534_v29  ;;  %1303 = vst.msk [vmem:[%s1879_s29 + $0x98] sm:$0xf] %vm1264_vm1, %v1566_v30  ;;  %v709_v38 = vadd.f32 %v1868_v35, %v708_v17  ;;  %v1532_v41 = vpack.c.bf16 %v948_v34, %v948_v34  ;;  %v980_v42 = vsel %vm852_vm13, %v706_v24, %v916_v32  ;;  %v593_v45 = vpop.f32.mrb[9].mxu0  ;;  %v721_v46 = vpop.f32.mrb[9].mxu1 }
  0xf8   : > { %v951_v43 = vsel %vm823_vm14, %v589_v28, %v887_v33  ;;  %v602_v44 = vadd.f32 %v1643_v39, %v1868_v35  ;;  %v1564_v47 = vpack.c.bf16 %v980_v42, %v980_v42  ;;  %vm855_vm15 = vcmp.gt.f32.partialorder %v717_v36, 0.0  ;;  %v1644_v50 = vpop.f32.mrb[10].mxu0  ;;  %v1676_v51 = vpop.f32.mrb[10].mxu1 }
  0xf9   : > { %v1535_v48 = vpack.c.bf16 %v951_v43, %v951_v43  ;;  %v919_v49 = vmul.f32 0.2, %v717_v36  ;;  %1269 = vst.msk [vmem:[%s1879_s29 + $0x10] sm:$0xf] %vm1264_vm1, %v1532_v41  ;;  %vm821_vm0 = vcmp.gt.f32.partialorder %v581_v37, 0.0  ;;  %vm853_vm2 = vcmp.gt.f32.partialorder %v709_v38, 0.0 }
  0xfa   : > { %v885_v52 = vmul.f32 0.2, %v581_v37  ;;  %v917_v53 = vmul.f32 0.2, %v709_v38  ;;  %1301 = vst.msk [vmem:[%s1879_s29 + $0x90] sm:$0xf] %vm1264_vm1, %v1564_v47  ;;  %v730_v56 = vadd.f32 %v1675_v40, %v1868_v35  ;;  %v594_v62 = vadd.f32 %v1868_v35, %v593_v45 }
  0xfb   : > { %1272 = vst.msk [vmem:[%s1879_s29 + $0x1c] sm:$0xf] %vm1264_vm1, %v1535_v48  ;;  %v983_v54 = vsel %vm855_vm15, %v717_v36, %v919_v49  ;;  %vm826_vm3 = vcmp.gt.f32.partialorder %v602_v44, 0.0  ;;  %v890_v55 = vmul.f32 0.2, %v602_v44  ;;  %v596_v57 = vpop.f32.mrb[11].mxu0  ;;  %v722_v6 = vadd.f32 %v1868_v35, %v721_v46 }
  0xfc   : > { %v724_v58 = vpop.f32.mrb[11].mxu1  ;;  %v1567_v59 = vpack.c.bf16 %v983_v54, %v983_v54  ;;  %v949_v60 = vsel %vm821_vm0, %v581_v37, %v885_v52  ;;  %v981_v61 = vsel %vm853_vm2, %v709_v38, %v917_v53  ;;  %vm858_vm4 = vcmp.gt.f32.partialorder %v730_v56, 0.0 }
  0xfd   : > { %v1533_v63 = vpack.c.bf16 %v949_v60, %v949_v60  ;;  %v1565_v0 = vpack.c.bf16 %v981_v61, %v981_v61  ;;  %v954_v1 = vsel %vm826_vm3, %v602_v44, %v890_v55  ;;  %v922_v3 = vmul.f32 0.2, %v730_v56  ;;  %v1647_v5 = vpop.f32.mrb[12].mxu0 }
  0xfe   : > { %1304 = vst.msk [vmem:[%s1879_s29 + $0x9c] sm:$0xf] %vm1264_vm1, %v1567_v59  ;;  %v1538_v2 = vpack.c.bf16 %v954_v1, %v954_v1  ;;  %vm824_vm5 = vcmp.gt.f32.partialorder %v594_v62, 0.0  ;;  %v888_v4 = vmul.f32 0.2, %v594_v62  ;;  %v605_v7 = vadd.f32 %v1644_v50, %v1868_v35  ;;  %v1679_v10 = vpop.f32.mrb[12].mxu1 }
  0xff   : > { %1270 = vst.msk [vmem:[%s1879_s29 + $0x14] sm:$0xf] %vm1264_vm1, %v1533_v63  ;;  %1302 = vst.msk [vmem:[%s1879_s29 + $0x94] sm:$0xf] %vm1264_vm1, %v1565_v0  ;;  %v733_v8 = vadd.f32 %v1676_v51, %v1868_v35  ;;  %v597_v9 = vadd.f32 %v1868_v35, %v596_v57  ;;  %v609_v11 = vpop.f32.mrb[13].mxu0  ;;  %v986_v12 = vsel %vm858_vm4, %v730_v56, %v922_v3  ;;  %v737_v16 = vpop.f32.mrb[13].mxu1 }
 0x100   : > { %1275 = vst.msk [vmem:[%s1879_s29 + $0x28] sm:$0xf] %vm1264_vm1, %v1538_v2  ;;  %v952_v13 = vsel %vm824_vm5, %v594_v62, %v888_v4  ;;  %v725_v14 = vadd.f32 %v1868_v35, %v724_v58  ;;  %v618_v15 = vadd.f32 %v1647_v5, %v1868_v35  ;;  %v1648_v17 = vpop.f32.mrb[14].mxu0  ;;  %v1570_v18 = vpack.c.bf16 %v986_v12, %v986_v12  ;;  %v1680_v21 = vpop.f32.mrb[14].mxu1 }
 0x101   : > { %v1536_v19 = vpack.c.bf16 %v952_v13, %v952_v13  ;;  %vm856_vm6 = vcmp.gt.f32.partialorder %v722_v6, 0.0  ;;  %v920_v20 = vmul.f32 0.2, %v722_v6  ;;  %v612_v22 = vpop.f32.mrb[15].mxu0  ;;  %vm827_vm7 = vcmp.gt.f32.partialorder %v605_v7, 0.0  ;;  %v740_v27 = vpop.f32.mrb[15].mxu1 }
 0x102   : > { %v891_v23 = vmul.f32 0.2, %v605_v7  ;;  %vm859_vm8 = vcmp.gt.f32.partialorder %v733_v8, 0.0  ;;  %v923_v24 = vmul.f32 0.2, %v733_v8  ;;  %vm825_vm9 = vcmp.gt.f32.partialorder %v597_v9, 0.0 }
 0x103   : > { %1307 = vst.msk [vmem:[%s1879_s29 + $0xa8] sm:$0xf] %vm1264_vm1, %v1570_v18  ;;  %1273 = vst.msk [vmem:[%s1879_s29 + $0x20] sm:$0xf] %vm1264_vm1, %v1536_v19  ;;  %v984_v25 = vsel %vm856_vm6, %v722_v6, %v920_v20  ;;  %v889_v26 = vmul.f32 0.2, %v597_v9  ;;  %v746_v39 = vadd.f32 %v1679_v10, %v1868_v35  ;;  %v610_v43 = vadd.f32 %v1868_v35, %v609_v11 }
 0x104   : > { %vm857_vm10 = vcmp.gt.f32.partialorder %v725_v14, 0.0  ;;  %v1568_v28 = vpack.c.bf16 %v984_v25, %v984_v25  ;;  %v955_v29 = vsel %vm827_vm7, %v605_v7, %v891_v23  ;;  %v987_v30 = vsel %vm859_vm8, %v733_v8, %v923_v24 }
 0x105   : > { %v921_v31 = vmul.f32 0.2, %v725_v14  ;;  %v1539_v32 = vpack.c.bf16 %v955_v29, %v955_v29  ;;  %v1571_v33 = vpack.c.bf16 %v987_v30, %v987_v30  ;;  %v953_v34 = vsel %vm825_vm9, %v597_v9, %v889_v26  ;;  %v1651_v40 = vpop.f32.mrb[16].mxu0 }
 0x106   : > { %vm830_vm11 = vcmp.gt.f32.partialorder %v618_v15, 0.0  ;;  %1305 = vst.msk [vmem:[%s1879_s29 + $0xa0] sm:$0xf] %vm1264_vm1, %v1568_v28  ;;  %v1537_v36 = vpack.c.bf16 %v953_v34, %v953_v34  ;;  %v894_v38 = vmul.f32 0.2, %v618_v15  ;;  %v1683_v41 = vpop.f32.mrb[16].mxu1  ;;  %v738_v44 = vadd.f32 %v1868_v35, %v737_v16 }
 0x107   : > { %v985_v37 = vsel %vm857_vm10, %v725_v14, %v921_v31  ;;  %1276 = vst.msk [vmem:[%s1879_s29 + $0x2c] sm:$0xf] %vm1264_vm1, %v1539_v32  ;;  %1308 = vst.msk [vmem:[%s1879_s29 + $0xac] sm:$0xf] %vm1264_vm1, %v1571_v33  ;;  %v621_v45 = vadd.f32 %v1648_v17, %v1868_v35  ;;  %v625_v46 = vpop.f32.mrb[17].mxu0  ;;  %v753_v47 = vpop.f32.mrb[17].mxu1  ;;  %v749_v50 = vadd.f32 %v1680_v21, %v1868_v35 }
 0x108   : > { %v1569_v42 = vpack.c.bf16 %v985_v37, %v985_v37  ;;  %1274 = vst.msk [vmem:[%s1879_s29 + $0x24] sm:$0xf] %vm1264_vm1, %v1537_v36  ;;  %v958_v48 = vsel %vm830_vm11, %v618_v15, %v894_v38  ;;  %vm862_vm12 = vcmp.gt.f32.partialorder %v746_v39, 0.0  ;;  %v926_v49 = vmul.f32 0.2, %v746_v39  ;;  %v1955_v51 = vpop.f32.mrb[18].mxu0 }
 0x109   : > { %v1957_v52 = vpop.f32.mrb[18].mxu1  ;;  %v1542_v53 = vpack.c.bf16 %v958_v48, %v958_v48  ;;  %vm828_vm13 = vcmp.gt.f32.partialorder %v610_v43, 0.0  ;;  %v892_v54 = vmul.f32 0.2, %v610_v43  ;;  %vm860_vm14 = vcmp.gt.f32.partialorder %v738_v44, 0.0  ;;  %v1961_v55 = vpop.f32.mrb[19].mxu0 }
 0x10a   : > { %1306 = vst.msk [vmem:[%s1879_s29 + $0xa4] sm:$0xf] %vm1264_vm1, %v1569_v42  ;;  %v1963_v56 = vpop.f32.mrb[19].mxu1  ;;  %v990_v57 = vsel %vm862_vm12, %v746_v39, %v926_v49  ;;  %v924_v58 = vmul.f32 0.2, %v738_v44  ;;  %vm831_vm15 = vcmp.gt.f32.partialorder %v621_v45, 0.0  ;;  %v613_v2 = vadd.f32 %v1868_v35, %v612_v22 }
 0x10b   : > { %v895_v59 = vmul.f32 0.2, %v621_v45  ;;  %1279 = vst.msk [vmem:[%s1879_s29 + $0x38] sm:$0xf] %vm1264_vm1, %v1542_v53  ;;  %v1574_v60 = vpack.c.bf16 %v990_v57, %v990_v57  ;;  %v956_v61 = vsel %vm828_vm13, %v610_v43, %v892_v54  ;;  %vm863_vm0 = vcmp.gt.f32.partialorder %v749_v50, 0.0 }
 0x10c   : > { %v927_v62 = vmul.f32 0.2, %v749_v50  ;;  %v1540_v63 = vpack.c.bf16 %v956_v61, %v956_v61  ;;  %v988_v0 = vsel %vm860_vm14, %v738_v44, %v924_v58  ;;  %v741_v6 = vadd.f32 %v1868_v35, %v740_v27 }
 0x10d   : > { %v959_v1 = vsel %vm831_vm15, %v621_v45, %v895_v59  ;;  %1311 = vst.msk [vmem:[%s1879_s29 + $0xb8] sm:$0xf] %vm1264_vm1, %v1574_v60  ;;  %v1572_v3 = vpack.c.bf16 %v988_v0, %v988_v0  ;;  %vm829_vm2 = vcmp.gt.f32.partialorder %v613_v2, 0.0  ;;  %v893_v8 = vmul.f32 0.2, %v613_v2  ;;  %v1655_v10 = vpop.f32.mrb[20].mxu0 }
 0x10e   : > { %v1543_v4 = vpack.c.bf16 %v959_v1, %v959_v1  ;;  %v991_v5 = vsel %vm863_vm0, %v749_v50, %v927_v62  ;;  %1277 = vst.msk [vmem:[%s1879_s29 + $0x30] sm:$0xf] %vm1264_vm1, %v1540_v63  ;;  %v634_v9 = vadd.f32 %v1651_v40, %v1868_v35  ;;  %v1687_v11 = vpop.f32.mrb[20].mxu1  ;;  %vm861_vm3 = vcmp.gt.f32.partialorder %v741_v6, 0.0  ;;  %v641_v15 = vpop.f32.mrb[21].mxu0 }
 0x10f   : > { %v1575_v7 = vpack.c.bf16 %v991_v5, %v991_v5  ;;  %1309 = vst.msk [vmem:[%s1879_s29 + $0xb0] sm:$0xf] %vm1264_vm1, %v1572_v3  ;;  %v925_v12 = vmul.f32 0.2, %v741_v6  ;;  %v762_v13 = vadd.f32 %v1683_v41, %v1868_v35  ;;  %v626_v14 = vadd.f32 %v1868_v35, %v625_v46  ;;  %v1980_v16 = vpop.f32.mrb[21].mxu1  ;;  %v1985_v20 = vpop.f32.mrb[22].mxu0 }
 0x110   : > { %1280 = vst.msk [vmem:[%s1879_s29 + $0x3c] sm:$0xf] %vm1264_vm1, %v1543_v4  ;;  %v957_v17 = vsel %vm829_vm2, %v613_v2, %v893_v8  ;;  %vm834_vm4 = vcmp.gt.f32.partialorder %v634_v9, 0.0  ;;  %v898_v18 = vmul.f32 0.2, %v634_v9  ;;  %v754_v19 = vadd.f32 %v1868_v35, %v753_v47  ;;  %v1987_v21 = vpop.f32.mrb[22].mxu1 }
 0x111   : > { %1312 = vst.msk [vmem:[%s1879_s29 + $0xbc] sm:$0xf] %vm1264_vm1, %v1575_v7  ;;  %v1541_v22 = vpack.c.bf16 %v957_v17, %v957_v17  ;;  %v989_v23 = vsel %vm861_vm3, %v741_v6, %v925_v12  ;;  %vm866_vm5 = vcmp.gt.f32.partialorder %v762_v13, 0.0  ;;  %v930_v24 = vmul.f32 0.2, %v762_v13  ;;  %v1989_v25 = vpop.f32.mrb[23].mxu0 }
 0x112   : > { %v1991_v26 = vpop.f32.mrb[23].mxu1  ;;  %v1573_v27 = vpack.c.bf16 %v989_v23, %v989_v23  ;;  %v962_v28 = vsel %vm834_vm4, %v634_v9, %v898_v18  ;;  %vm832_vm6 = vcmp.gt.f32.partialorder %v626_v14, 0.0  ;;  %v896_v29 = vmul.f32 0.2, %v626_v14 }
 0x113   : > { %1278 = vst.msk [vmem:[%s1879_s29 + $0x34] sm:$0xf] %vm1264_vm1, %v1541_v22  ;;  %v1546_v30 = vpack.c.bf16 %v962_v28, %v962_v28  ;;  %v994_v31 = vsel %vm866_vm5, %v762_v13, %v930_v24  ;;  %vm864_vm7 = vcmp.gt.f32.partialorder %v754_v19, 0.0  ;;  %v928_v32 = vmul.f32 0.2, %v754_v19 }
 0x114   : > { %1310 = vst.msk [vmem:[%s1879_s29 + $0xb4] sm:$0xf] %vm1264_vm1, %v1573_v27  ;;  %v1578_v33 = vpack.c.bf16 %v994_v31, %v994_v31  ;;  %v960_v34 = vsel %vm832_vm6, %v626_v14, %v896_v29  ;;  %v637_v36 = vadd.f32 %v1955_v51, %v1868_v35  ;;  %v765_v37 = vadd.f32 %v1957_v52, %v1868_v35 }
 0x115   : > { %1283 = vst.msk [vmem:[%s1879_s29 + $0x48] sm:$0xf] %vm1264_vm1, %v1546_v30  ;;  %v1544_v38 = vpack.c.bf16 %v960_v34, %v960_v34  ;;  %v992_v39 = vsel %vm864_vm7, %v754_v19, %v928_v32  ;;  %v629_v40 = vadd.f32 %v1868_v35, %v1961_v55  ;;  %v757_v41 = vadd.f32 %v1868_v35, %v1963_v56  ;;  %v2009_v44 = vpop.f32.mrb[24].mxu0 }
 0x116   : > { %1315 = vst.msk [vmem:[%s1879_s29 + $0xc8] sm:$0xf] %vm1264_vm1, %v1578_v33  ;;  %v1576_v42 = vpack.c.bf16 %v992_v39, %v992_v39  ;;  %vm835_vm8 = vcmp.gt.f32.partialorder %v637_v36, 0.0  ;;  %v899_v43 = vmul.f32 0.2, %v637_v36  ;;  %vm867_vm9 = vcmp.gt.f32.partialorder %v765_v37, 0.0 }
 0x117   : > { %v2011_v45 = vpop.f32.mrb[24].mxu1  ;;  %1281 = vst.msk [vmem:[%s1879_s29 + $0x40] sm:$0xf] %vm1264_vm1, %v1544_v38  ;;  %v931_v46 = vmul.f32 0.2, %v765_v37  ;;  %vm833_vm10 = vcmp.gt.f32.partialorder %v629_v40, 0.0  ;;  %v650_v50 = vadd.f32 %v1655_v10, %v1868_v35  ;;  %v778_v51 = vadd.f32 %v1687_v11, %v1868_v35 }
 0x118   : > { %v897_v47 = vmul.f32 0.2, %v629_v40  ;;  %vm865_vm11 = vcmp.gt.f32.partialorder %v757_v41, 0.0  ;;  %1313 = vst.msk [vmem:[%s1879_s29 + $0xc0] sm:$0xf] %vm1264_vm1, %v1576_v42  ;;  %v963_v48 = vsel %vm835_vm8, %v637_v36, %v899_v43  ;;  %v2019_v52 = vpop.f32.mrb[25].mxu0  ;;  %v642_v57 = vadd.f32 %v1868_v35, %v641_v15 }
 0x119   : > { %v929_v49 = vmul.f32 0.2, %v757_v41  ;;  %v2021_v53 = vpop.f32.mrb[25].mxu1  ;;  %v1547_v54 = vpack.c.bf16 %v963_v48, %v963_v48  ;;  %v995_v55 = vsel %vm867_vm9, %v765_v37, %v931_v46  ;;  %v2025_v58 = vpop.f32.mrb[26].mxu0  ;;  %vm838_vm12 = vcmp.gt.f32.partialorder %v650_v50, 0.0 }
 0x11a   : > { %v961_v56 = vsel %vm833_vm10, %v629_v40, %v897_v47  ;;  %v2027_v59 = vpop.f32.mrb[26].mxu1  ;;  %v1579_v60 = vpack.c.bf16 %v995_v55, %v995_v55  ;;  %v2030_v63 = vpop.f32.mrb[27].mxu0  ;;  %v902_v2 = vmul.f32 0.2, %v650_v50  ;;  %vm870_vm13 = vcmp.gt.f32.partialorder %v778_v51, 0.0 }
 0x11b   : > { %v1545_v61 = vpack.c.bf16 %v961_v56, %v961_v56  ;;  %v993_v62 = vsel %vm865_vm11, %v757_v41, %v929_v49  ;;  %v2032_v0 = vpop.f32.mrb[27].mxu1  ;;  %1284 = vst.msk [vmem:[%s1879_s29 + $0x4c] sm:$0xf] %vm1264_vm1, %v1547_v54  ;;  %v934_v3 = vmul.f32 0.2, %v778_v51  ;;  %vm836_vm14 = vcmp.gt.f32.partialorder %v642_v57, 0.0 }
 0x11c   : > { %v1577_v1 = vpack.c.bf16 %v993_v62, %v993_v62  ;;  %1316 = vst.msk [vmem:[%s1879_s29 + $0xcc] sm:$0xf] %vm1264_vm1, %v1579_v60  ;;  %v900_v4 = vmul.f32 0.2, %v642_v57  ;;  %v770_v5 = vadd.f32 %v1868_v35, %v1980_v16  ;;  %v653_v6 = vadd.f32 %v1985_v20, %v1868_v35 }
 0x11d   : > { %1282 = vst.msk [vmem:[%s1879_s29 + $0x44] sm:$0xf] %vm1264_vm1, %v1545_v61  ;;  %v966_v7 = vsel %vm838_vm12, %v650_v50, %v902_v2  ;;  %v998_v8 = vsel %vm870_vm13, %v778_v51, %v934_v3  ;;  %v781_v9 = vadd.f32 %v1987_v21, %v1868_v35  ;;  %v645_v10 = vadd.f32 %v1868_v35, %v1989_v25  ;;  %v2050_v14 = vpop.f32.mrb[28].mxu0 }
 0x11e   : > { %1314 = vst.msk [vmem:[%s1879_s29 + $0xc4] sm:$0xf] %vm1264_vm1, %v1577_v1  ;;  %v1550_v11 = vpack.c.bf16 %v966_v7, %v966_v7  ;;  %v1582_v12 = vpack.c.bf16 %v998_v8, %v998_v8  ;;  %v964_v13 = vsel %vm836_vm14, %v642_v57, %v900_v4  ;;  %vm868_vm15 = vcmp.gt.f32.partialorder %v770_v5, 0.0  ;;  %v2052_v15 = vpop.f32.mrb[28].mxu1  ;;  %v2054_v19 = vpop.f32.mrb[29].mxu0 }
 0x11f   : > { %v1548_v16 = vpack.c.bf16 %v964_v13, %v964_v13  ;;  %v932_v17 = vmul.f32 0.2, %v770_v5  ;;  %vm839_vm0 = vcmp.gt.f32.partialorder %v653_v6, 0.0  ;;  %v903_v18 = vmul.f32 0.2, %v653_v6  ;;  %v2066_v27 = vpop.f32.mrb[29].mxu1 }
 0x120   : > { %1287 = vst.msk [vmem:[%s1879_s29 + $0x58] sm:$0xf] %vm1264_vm1, %v1550_v11  ;;  %1319 = vst.msk [vmem:[%s1879_s29 + $0xd8] sm:$0xf] %vm1264_vm1, %v1582_v12  ;;  %vm871_vm2 = vcmp.gt.f32.partialorder %v781_v9, 0.0  ;;  %vm837_vm3 = vcmp.gt.f32.partialorder %v645_v10, 0.0  ;;  %v773_v24 = vadd.f32 %v1868_v35, %v1991_v26  ;;  %v666_v25 = vadd.f32 %v2009_v44, %v1868_v35 }
 0x121   : > { %v935_v20 = vmul.f32 0.2, %v781_v9  ;;  %v901_v21 = vmul.f32 0.2, %v645_v10  ;;  %1285 = vst.msk [vmem:[%s1879_s29 + $0x50] sm:$0xf] %vm1264_vm1, %v1548_v16  ;;  %v996_v22 = vsel %vm868_vm15, %v770_v5, %v932_v17  ;;  %v967_v23 = vsel %vm839_vm0, %v653_v6, %v903_v18 }
 0x122   : > { %v2068_v28 = vpop.f32.mrb[30].mxu0  ;;  %v1580_v29 = vpack.c.bf16 %v996_v22, %v996_v22  ;;  %v1551_v30 = vpack.c.bf16 %v967_v23, %v967_v23  ;;  %v2070_v33 = vpop.f32.mrb[30].mxu1  ;;  %vm869_vm4 = vcmp.gt.f32.partialorder %v773_v24, 0.0  ;;  %v933_v37 = vmul.f32 0.2, %v773_v24 }
 0x123   : > { %v999_v31 = vsel %vm871_vm2, %v781_v9, %v935_v20  ;;  %v965_v32 = vsel %vm837_vm3, %v645_v10, %v901_v21  ;;  %v2072_v34 = vpop.f32.mrb[31].mxu0  ;;  %v2074_v38 = vpop.f32.mrb[31].mxu1  ;;  %vm842_vm5 = vcmp.gt.f32.partialorder %v666_v25, 0.0  ;;  %v906_v39 = vmul.f32 0.2, %v666_v25 }
 0x124   : > { %v1583_v36 = vpack.c.bf16 %v999_v31, %v999_v31  ;;  %v1549_v26 = vpack.c.bf16 %v965_v32, %v965_v32  ;;  %1317 = vst.msk [vmem:[%s1879_s29 + $0xd0] sm:$0xf] %vm1264_vm1, %v1580_v29  ;;  %1288 = vst.msk [vmem:[%s1879_s29 + $0x5c] sm:$0xf] %vm1264_vm1, %v1551_v30  ;;  %v794_v40 = vadd.f32 %v2011_v45, %v1868_v35 }
 0x125   : > { %v658_v41 = vadd.f32 %v1868_v35, %v2019_v52  ;;  %v997_v42 = vsel %vm869_vm4, %v773_v24, %v933_v37  ;;  %v786_v43 = vadd.f32 %v1868_v35, %v2021_v53  ;;  %v669_v44 = vadd.f32 %v2025_v58, %v1868_v35 }
 0x126   : > { %1320 = vst.msk [vmem:[%s1879_s29 + $0xdc] sm:$0xf] %vm1264_vm1, %v1583_v36  ;;  %1286 = vst.msk [vmem:[%s1879_s29 + $0x54] sm:$0xf] %vm1264_vm1, %v1549_v26  ;;  %v797_v46 = vadd.f32 %v2027_v59, %v1868_v35  ;;  %v1581_v45 = vpack.c.bf16 %v997_v42, %v997_v42  ;;  %v970_v47 = vsel %vm842_vm5, %v666_v25, %v906_v39  ;;  %vm874_vm6 = vcmp.gt.f32.partialorder %v794_v40, 0.0 }
 0x127   : > { %v938_v48 = vmul.f32 0.2, %v794_v40  ;;  %v1554_v49 = vpack.c.bf16 %v970_v47, %v970_v47  ;;  %vm840_vm7 = vcmp.gt.f32.partialorder %v658_v41, 0.0  ;;  %v904_v50 = vmul.f32 0.2, %v658_v41 }
 0x128   : > { %vm872_vm8 = vcmp.gt.f32.partialorder %v786_v43, 0.0  ;;  %1318 = vst.msk [vmem:[%s1879_s29 + $0xd4] sm:$0xf] %vm1264_vm1, %v1581_v45  ;;  %v936_v52 = vmul.f32 0.2, %v786_v43  ;;  %vm843_vm9 = vcmp.gt.f32.partialorder %v669_v44, 0.0  ;;  %v661_v60 = vadd.f32 %v1868_v35, %v2030_v63 }
 0x129   : > { %v1002_v51 = vsel %vm874_vm6, %v794_v40, %v938_v48  ;;  %v907_v53 = vmul.f32 0.2, %v669_v44  ;;  %1291 = vst.msk [vmem:[%s1879_s29 + $0x68] sm:$0xf] %vm1264_vm1, %v1554_v49  ;;  %v968_v55 = vsel %vm840_vm7, %v658_v41, %v904_v50  ;;  %vm875_vm10 = vcmp.gt.f32.partialorder %v797_v46, 0.0 }
 0x12a   : > { %v1586_v54 = vpack.c.bf16 %v1002_v51, %v1002_v51  ;;  %v939_v56 = vmul.f32 0.2, %v797_v46  ;;  %v1552_v57 = vpack.c.bf16 %v968_v55, %v968_v55  ;;  %v1000_v58 = vsel %vm872_vm8, %v786_v43, %v936_v52 }
 0x12b   : > { %v971_v59 = vsel %vm843_vm9, %v669_v44, %v907_v53  ;;  %v1584_v61 = vpack.c.bf16 %v1000_v58, %v1000_v58  ;;  %v789_v2 = vadd.f32 %v1868_v35, %v2032_v0  ;;  %vm841_vm11 = vcmp.gt.f32.partialorder %v661_v60, 0.0 }
 0x12c   : > { %1323 = vst.msk [vmem:[%s1879_s29 + $0xe8] sm:$0xf] %vm1264_vm1, %v1586_v54  ;;  %v1555_v62 = vpack.c.bf16 %v971_v59, %v971_v59  ;;  %v1003_v1 = vsel %vm875_vm10, %v797_v46, %v939_v56  ;;  %1289 = vst.msk [vmem:[%s1879_s29 + $0x60] sm:$0xf] %vm1264_vm1, %v1552_v57  ;;  %v905_v4 = vmul.f32 0.2, %v661_v60  ;;  %v682_v5 = vadd.f32 %v2050_v14, %v1868_v35 }
 0x12d   : > { %v1587_v3 = vpack.c.bf16 %v1003_v1, %v1003_v1  ;;  %1321 = vst.msk [vmem:[%s1879_s29 + $0xe0] sm:$0xf] %vm1264_vm1, %v1584_v61  ;;  %vm873_vm12 = vcmp.gt.f32.partialorder %v789_v2, 0.0  ;;  %v937_v63 = vmul.f32 0.2, %v789_v2  ;;  %v810_v6 = vadd.f32 %v2052_v15, %v1868_v35 }
 0x12e   : > { %1292 = vst.msk [vmem:[%s1879_s29 + $0x6c] sm:$0xf] %vm1264_vm1, %v1555_v62  ;;  %v674_v0 = vadd.f32 %v1868_v35, %v2054_v19  ;;  %v969_v7 = vsel %vm841_vm11, %v661_v60, %v905_v4  ;;  %vm846_vm13 = vcmp.gt.f32.partialorder %v682_v5, 0.0  ;;  %v910_v8 = vmul.f32 0.2, %v682_v5 }
 0x12f   : > { %1324 = vst.msk [vmem:[%s1879_s29 + $0xec] sm:$0xf] %vm1264_vm1, %v1587_v3  ;;  %v802_v9 = vadd.f32 %v1868_v35, %v2066_v27  ;;  %v1553_v10 = vpack.c.bf16 %v969_v7, %v969_v7  ;;  %v1001_v11 = vsel %vm873_vm12, %v789_v2, %v937_v63  ;;  %vm878_vm14 = vcmp.gt.f32.partialorder %v810_v6, 0.0 }
 0x130   : > { %v942_v12 = vmul.f32 0.2, %v810_v6  ;;  %v1585_v13 = vpack.c.bf16 %v1001_v11, %v1001_v11  ;;  %v974_v14 = vsel %vm846_vm13, %v682_v5, %v910_v8  ;;  %vm844_vm15 = vcmp.gt.f32.partialorder %v674_v0, 0.0 }
 0x131   : > { %v908_v15 = vmul.f32 0.2, %v674_v0  ;;  %1290 = vst.msk [vmem:[%s1879_s29 + $0x64] sm:$0xf] %vm1264_vm1, %v1553_v10  ;;  %v1558_v16 = vpack.c.bf16 %v974_v14, %v974_v14  ;;  %vm876_vm0 = vcmp.gt.f32.partialorder %v802_v9, 0.0  ;;  %v685_v21 = vadd.f32 %v2068_v28, %v1868_v35 }
 0x132   : > { %v1006_v17 = vsel %vm878_vm14, %v810_v6, %v942_v12  ;;  %v940_v18 = vmul.f32 0.2, %v802_v9  ;;  %1322 = vst.msk [vmem:[%s1879_s29 + $0xe4] sm:$0xf] %vm1264_vm1, %v1585_v13  ;;  %v813_v22 = vadd.f32 %v2070_v33, %v1868_v35  ;;  %v677_v25 = vadd.f32 %v1868_v35, %v2072_v34 }
 0x133   : > { %v1590_v19 = vpack.c.bf16 %v1006_v17, %v1006_v17  ;;  %v972_v20 = vsel %vm844_vm15, %v674_v0, %v908_v15  ;;  %1295 = vst.msk [vmem:[%s1879_s29 + $0x78] sm:$0xf] %vm1264_vm1, %v1558_v16  ;;  %v805_v27 = vadd.f32 %v1868_v35, %v2074_v38  ;;  %vm847_vm2 = vcmp.gt.f32.partialorder %v685_v21, 0.0 }
 0x134   : > { %v1556_v23 = vpack.c.bf16 %v972_v20, %v972_v20  ;;  %v1004_v24 = vsel %vm876_vm0, %v802_v9, %v940_v18  ;;  %v911_v30 = vmul.f32 0.2, %v685_v21  ;;  %vm879_vm3 = vcmp.gt.f32.partialorder %v813_v22, 0.0 }
 0x135   : > { %1327 = vst.msk [vmem:[%s1879_s29 + $0xf8] sm:$0xf] %vm1264_vm1, %v1590_v19  ;;  %v1588_v29 = vpack.c.bf16 %v1004_v24, %v1004_v24  ;;  %v943_v28 = vmul.f32 0.2, %v813_v22  ;;  %vm845_vm4 = vcmp.gt.f32.partialorder %v677_v25, 0.0  ;;  %vm877_vm5 = vcmp.gt.f32.partialorder %v805_v27, 0.0 }
 0x136   : > { %1293 = vst.msk [vmem:[%s1879_s29 + $0x70] sm:$0xf] %vm1264_vm1, %v1556_v23  ;;  %v909_v31 = vmul.f32 0.2, %v677_v25  ;;  %v975_v32 = vsel %vm847_vm2, %v685_v21, %v911_v30  ;;  %v941_v35 = vmul.f32 0.2, %v805_v27 }
 0x137   : > { %1325 = vst.msk [vmem:[%s1879_s29 + $0xf0] sm:$0xf] %vm1264_vm1, %v1588_v29  ;;  %v1559_v33 = vpack.c.bf16 %v975_v32, %v975_v32  ;;  %v1007_v34 = vsel %vm879_vm3, %v813_v22, %v943_v28 }
 0x138   : > { %v973_v36 = vsel %vm845_vm4, %v677_v25, %v909_v31  ;;  %v1591_v26 = vpack.c.bf16 %v1007_v34, %v1007_v34  ;;  %v1005_v38 = vsel %vm877_vm5, %v805_v27, %v941_v35 }
 0x139   : > { %v1557_v37 = vpack.c.bf16 %v973_v36, %v973_v36  ;;  %1296 = vst.msk [vmem:[%s1879_s29 + $0x7c] sm:$0xf] %vm1264_vm1, %v1559_v33  ;;  %v1589_v39 = vpack.c.bf16 %v1005_v38, %v1005_v38 }
 0x13a   : > { %1328 = vst.msk [vmem:[%s1879_s29 + $0xfc] sm:$0xf] %vm1264_vm1, %v1591_v26 }
 0x13b   : > { %1294 = vst.msk [vmem:[%s1879_s29 + $0x74] sm:$0xf] %vm1264_vm1, %v1557_v37  ;;  %1326 = vst.msk [vmem:[%s1879_s29 + $0xf4] sm:$0xf] %vm1264_vm1, %v1589_v39 }
 0x13c PF: > { %s13_s12 = sadd.s32 1, %s1752_s12  }
 0x13d   : > { %p10_p4 = scmp.ge.s32.totalorder %s13_s12, 6  }
 0x13f   :  { %12 = sbr.rel (!%p10_p4) target bundleno = 1 (0x1), region = 62 }

// kernel: discriminator_forward.6
= control target key start
LH: loop header
LB: loop body
LE: loop exit
PB: predicated region body
PF: predicated region fallthrough
CT: control target
= control target key end

     0   :  { %s2542_s18 = smov 0   ;;  %s2544_s19 = smov 0   ;;  %s3619_s0 = inlined_call_operand.vmem [shape: bf16[512,128], index: 0, kind: input, shape index: {}]   ;;  %s3620_s1 = inlined_call_operand.vmem [shape: bf16[128,16], index: 1, kind: input, shape index: {}]   ;;  %s3621_s2 = inlined_call_operand.vmem [shape: f32[1,16], index: 2, kind: input, shape index: {}]   ;;  %s3622_s3 = inlined_call_operand.vmem [shape: f32[1,16], index: 3, kind: input, shape index: {}]   ;;  %s3623_s4 = inlined_call_operand.vmem [shape: f32[1,16], index: 4, kind: input, shape index: {}]   ;;  %s3624_s5 = inlined_call_operand.vmem [shape: bf16[512,16], index: 5, kind: output, shape index: {}]  }
   0x1   :  { %s2546_s20 = smov 0  }
   0x2 LB: > { %s27_s21 = sadd.s32 1, %s2505_s19  ;;  %p2106_p0 = scmp.ge.s32.totalorder %s2509_s20, 1  ;;  %s2509_s20 = sphi %s2546_s20, %s15_s20   ;;  %s2505_s19 = sphi %s2544_s19, %s3626_s19   ;;  %s2501_s18 = sphi %s2542_s18, %s3625_s18  }
   0x3   : > { %p29_p1 = scmp.ge.s32.totalorder %s27_s21, 2  ;;  %p210_p2 = scmp.lt.s32.totalorder %s2509_s20, 3 }
   0x5   : > { %s3628_s21 = smov (%p29_p1, %s27_s21), 0  ;;  %p211_p3 = pnand %p2106_p0, %p210_p2 }
   0x6   : > { %p260_p4 = scmp.eq.s32.totalorder (!%p211_p3), %s2501_s18, 0 }
   0x7   : > { %214 = sbr.rel (%p211_p3) target bundleno = 547 (0x223), region = 40 }
   0xe   : > { %265 = sbr.rel (!%p260_p4) target bundleno = 21 (0x15), region = 44  ;;  %vm266_vm0 = vcmask (%p260_p4), 122880   ;;  %v2511_v0 = vmov (%p260_p4), 0.0  }
   0xf   : > { %267 = vst.msk [vmem:[#allocation3] sm:$0x1] (%p260_p4), %vm266_vm0, %v2511_v0  ;;  %268 = vst.msk [vmem:[#allocation4] sm:$0x1] (%p260_p4), %vm266_vm0, %v2511_v0 }
  0x15 PF: > { %p2108_p5 = scmp.ne.s32.totalorder %s2501_s18, 0 }
  0x16   : > { %v2445_v1 = vld [vmem:[%s3620_s1] sm:$0xff] (!%p2108_p5)   ;;  %v2446_v2 = vld [vmem:[%s3620_s1 + $0x8] sm:$0xff] (!%p2108_p5)   ;;  %v2447_v3 = vld [vmem:[%s3620_s1 + $0x10] sm:$0xff] (!%p2108_p5)   ;;  %vm890_vm1 = vcmask (!%p2108_p5), 130048   ;;  %vm1090_vm2 = vcmask (!%p2108_p5), 122880  }
  0x17   : > { %271 = sbr.rel (%p2108_p5) target bundleno = 416 (0x1a0), region = 48  ;;  %2324 = vmatprep.subr.bf16.mxu0 (!%p2108_p5), %v2445_v1  ;;  %2404 = vmatprep.subr.bf16.mxu1 (!%p2108_p5), %v2445_v1  ;;  %v2448_v4 = vld [vmem:[%s3620_s1 + $0x18] sm:$0xff] (!%p2108_p5)   ;;  %v2453_v5 = vld [vmem:[%s3619_s0] sm:$0xff] (!%p2108_p5)   ;;  %v2450_v7 = vld [vmem:[%s3620_s1 + $0x28] sm:$0xff] (!%p2108_p5)  }
  0x18   : > { %2325 = vmatpush3.bf16.msra.mxu0 (!%p2108_p5), %v2445_v1  ;;  %2412 = vmatpush3.bf16.msra.mxu1 (!%p2108_p5), %v2445_v1  ;;  %v2449_v6 = vld [vmem:[%s3620_s1 + $0x20] sm:$0xff] (!%p2108_p5)   ;;  %v2451_v8 = vld [vmem:[%s3620_s1 + $0x30] sm:$0xff] (!%p2108_p5)   ;;  %v2452_v9 = vld [vmem:[%s3620_s1 + $0x38] sm:$0xff] (!%p2108_p5)  }
  0x19   : > { %2326 = vmatprep.subr.bf16.mxu0 (!%p2108_p5), %v2446_v2  ;;  %2405 = vmatprep.subr.bf16.mxu1 (!%p2108_p5), %v2446_v2  ;;  %v2469_v10 = vld [vmem:[%s3619_s0 + $0x80] sm:$0xff] (!%p2108_p5)   ;;  %v2454_v11 = vld [vmem:[%s3619_s0 + $0x8] sm:$0xff] (!%p2108_p5)   ;;  %v2455_v12 = vld [vmem:[%s3619_s0 + $0x10] sm:$0xff] (!%p2108_p5)  }
  0x1a   : > { %2340 = vmatprep.mubr.bf16.mxu0 (!%p2108_p5), %v2453_v5  ;;  %2372 = vmatprep.mubr.bf16.mxu1 (!%p2108_p5), %v2469_v10  ;;  %v2470_v13 = vld [vmem:[%s3619_s0 + $0x88] sm:$0xff] (!%p2108_p5)   ;;  %v2471_v14 = vld [vmem:[%s3619_s0 + $0x90] sm:$0xff] (!%p2108_p5)   ;;  %v2456_v15 = vld [vmem:[%s3619_s0 + $0x18] sm:$0xff] (!%p2108_p5)  }
  0x1b   : > { %v2457_v16 = vld [vmem:[%s3619_s0 + $0x20] sm:$0xff] (!%p2108_p5)   ;;  %v2472_v17 = vld [vmem:[%s3619_s0 + $0x98] sm:$0xff] (!%p2108_p5)   ;;  %v2458_v19 = vld [vmem:[%s3619_s0 + $0x28] sm:$0xff] (!%p2108_p5)  }
  0x1c   : > { %2327 = vmatpush3.bf16.msra.mxu0 (!%p2108_p5), %v2446_v2  ;;  %2413 = vmatpush3.bf16.msra.mxu1 (!%p2108_p5), %v2446_v2  ;;  %v2473_v18 = vld [vmem:[%s3619_s0 + $0xa0] sm:$0xff] (!%p2108_p5)   ;;  %v2474_v20 = vld [vmem:[%s3619_s0 + $0xa8] sm:$0xff] (!%p2108_p5)   ;;  %v2459_v21 = vld [vmem:[%s3619_s0 + $0x30] sm:$0xff] (!%p2108_p5)  }
  0x1d   : > { %2328 = vmatprep.subr.bf16.mxu0 (!%p2108_p5), %v2447_v3  ;;  %2406 = vmatprep.subr.bf16.mxu1 (!%p2108_p5), %v2447_v3  ;;  %v2475_v22 = vld [vmem:[%s3619_s0 + $0xb0] sm:$0xff] (!%p2108_p5)   ;;  %v2460_v23 = vld [vmem:[%s3619_s0 + $0x38] sm:$0xff] (!%p2108_p5)   ;;  %v2461_v25 = vld [vmem:[%s3619_s0 + $0x40] sm:$0xff] (!%p2108_p5)  }
  0x1e   : > { %v2476_v24 = vld [vmem:[%s3619_s0 + $0xb8] sm:$0xff]   ;;  %v2477_v26 = vld [vmem:[%s3619_s0 + $0xc0] sm:$0xff]   ;;  %v2462_v27 = vld [vmem:[%s3619_s0 + $0x48] sm:$0xff]  }
  0x1f   : > { %v2478_v28 = vld [vmem:[%s3619_s0 + $0xc8] sm:$0xff]   ;;  %v2463_v29 = vld [vmem:[%s3619_s0 + $0x50] sm:$0xff]   ;;  %v2464_v31 = vld [vmem:[%s3619_s0 + $0x58] sm:$0xff]  }
  0x20   : > { %2329 = vmatpush3.bf16.msra.mxu0 %v2447_v3  ;;  %2414 = vmatpush3.bf16.msra.mxu1 %v2447_v3  ;;  %v2479_v30 = vld [vmem:[%s3619_s0 + $0xd0] sm:$0xff]   ;;  %v2480_v32 = vld [vmem:[%s3619_s0 + $0xd8] sm:$0xff]   ;;  %v2465_v33 = vld [vmem:[%s3619_s0 + $0x60] sm:$0xff]  }
  0x21   : > { %2330 = vmatprep.subr.bf16.mxu0 %v2448_v4  ;;  %2407 = vmatprep.subr.bf16.mxu1 %v2448_v4  ;;  %v2481_v34 = vld [vmem:[%s3619_s0 + $0xe0] sm:$0xff]   ;;  %v2466_v35 = vld [vmem:[%s3619_s0 + $0x68] sm:$0xff]   ;;  %v2467_v37 = vld [vmem:[%s3619_s0 + $0x70] sm:$0xff]  }
  0x22   : > { %v2482_v36 = vld [vmem:[%s3619_s0 + $0xe8] sm:$0xff]   ;;  %v2483_v38 = vld [vmem:[%s3619_s0 + $0xf0] sm:$0xff]   ;;  %v2468_v39 = vld [vmem:[%s3619_s0 + $0x78] sm:$0xff]  }
  0x23   : > { %v2484_v40 = vld [vmem:[%s3619_s0 + $0xf8] sm:$0xff]   ;;  %v2687_v41 = vld [vmem:[%s3621_s2] ss:$0 sm:$0xff] }
  0x24   : > { %2331 = vmatpush3.bf16.msra.mxu0 %v2448_v4  ;;  %2415 = vmatpush3.bf16.msra.mxu1 %v2448_v4 }
  0x25   : > { %2332 = vmatprep.subr.bf16.mxu0 %v2449_v6  ;;  %2408 = vmatprep.subr.bf16.mxu1 %v2449_v6 }
  0x28   : > { %2333 = vmatpush3.bf16.msra.mxu0 %v2449_v6  ;;  %2416 = vmatpush3.bf16.msra.mxu1 %v2449_v6 }
  0x29   : > { %2334 = vmatprep.subr.bf16.mxu0 %v2450_v7  ;;  %2409 = vmatprep.subr.bf16.mxu1 %v2450_v7 }
  0x2c   : > { %2335 = vmatpush3.bf16.msra.mxu0 %v2450_v7  ;;  %2417 = vmatpush3.bf16.msra.mxu1 %v2450_v7 }
  0x2d   : > { %2336 = vmatprep.subr.bf16.mxu0 %v2451_v8  ;;  %2410 = vmatprep.subr.bf16.mxu1 %v2451_v8 }
  0x30   : > { %2337 = vmatpush3.bf16.msra.mxu0 %v2451_v8  ;;  %2418 = vmatpush3.bf16.msra.mxu1 %v2451_v8 }
  0x31   : > { %2338 = vmatprep.subr.bf16.mxu0 %v2452_v9  ;;  %2411 = vmatprep.subr.bf16.mxu1 %v2452_v9 }
  0x34   : > { %2339 = vmatpush3.bf16.msra.mxu0 %v2452_v9  ;;  %2419 = vmatpush3.bf16.msra.mxu1 %v2452_v9 }
  0x37   : > { %2341 = vmatmul.mubr.bf16.vlgmr.msra.gmra.mrb[0].mxu0 %v2454_v11  ;;  %2373 = vmatmul.mubr.bf16.vlgmr.msra.gmra.mrb[0].mxu1 %v2470_v13 }
  0x38   : > { %2344 = vmatprep.mubr.bf16.mxu0 %v2455_v12  ;;  %2376 = vmatprep.mubr.bf16.mxu1 %v2471_v14 }
  0x3f   : > { %2345 = vmatmul.mubr.bf16.gmra.mrb[4].mxu0 %v2456_v15  ;;  %2377 = vmatmul.mubr.bf16.gmra.mrb[4].mxu1 %v2472_v17 }
  0x40   : > { %2348 = vmatprep.mubr.bf16.mxu0 %v2457_v16  ;;  %2380 = vmatprep.mubr.bf16.mxu1 %v2473_v18 }
  0x47   : > { %2349 = vmatmul.mubr.bf16.gmra.mrb[8].mxu0 %v2458_v19  ;;  %2381 = vmatmul.mubr.bf16.gmra.mrb[8].mxu1 %v2474_v20 }
  0x48   : > { %2352 = vmatprep.mubr.bf16.mxu0 %v2459_v21  ;;  %2384 = vmatprep.mubr.bf16.mxu1 %v2475_v22 }
  0x4f   : > { %2353 = vmatmul.mubr.bf16.gmra.mrb[12].mxu0 %v2460_v23  ;;  %2385 = vmatmul.mubr.bf16.gmra.mrb[12].mxu1 %v2476_v24 }
  0x50   : > { %2356 = vmatprep.mubr.bf16.mxu0 %v2461_v25  ;;  %2388 = vmatprep.mubr.bf16.mxu1 %v2477_v26 }
  0x57   : > { %2357 = vmatmul.mubr.bf16.gmra.mrb[16].mxu0 %v2462_v27  ;;  %2389 = vmatmul.mubr.bf16.gmra.mrb[16].mxu1 %v2478_v28 }
  0x58   : > { %2360 = vmatprep.mubr.bf16.mxu0 %v2463_v29  ;;  %2392 = vmatprep.mubr.bf16.mxu1 %v2479_v30 }
  0x5f   : > { %2361 = vmatmul.mubr.bf16.gmra.mrb[20].mxu0 %v2464_v31  ;;  %2393 = vmatmul.mubr.bf16.gmra.mrb[20].mxu1 %v2480_v32 }
  0x60   : > { %2364 = vmatprep.mubr.bf16.mxu0 %v2465_v33  ;;  %2396 = vmatprep.mubr.bf16.mxu1 %v2481_v34 }
  0x67   : > { %2365 = vmatmul.mubr.bf16.gmra.mrb[24].mxu0 %v2466_v35  ;;  %2397 = vmatmul.mubr.bf16.gmra.mrb[24].mxu1 %v2482_v36 }
  0x68   : > { %2368 = vmatprep.mubr.bf16.mxu0 %v2467_v37  ;;  %2400 = vmatprep.mubr.bf16.mxu1 %v2483_v38 }
  0x6f   : > { %2369 = vmatmul.mubr.bf16.gmra.mrb[28].mxu0 %v2468_v39  ;;  %2401 = vmatmul.mubr.bf16.gmra.mrb[28].mxu1 %v2484_v40 }
 0x10a   : > { %v2342_v42 = vpop.f32.mrb[0].mxu0  ;;  %v2374_v43 = vpop.f32.mrb[0].mxu1 }
 0x10b   : > { %v642_v44 = vadd.f32 %v2342_v42, %v2687_v41  ;;  %v633_v45 = vpop.f32.mrb[1].mxu0  ;;  %v2691_v46 = vadd.f32 %v2374_v43, %v2687_v41  ;;  %v761_v47 = vpop.f32.mrb[1].mxu1 }
 0x10c   : > { %v634_v48 = vadd.f32 %v2687_v41, %v633_v45  ;;  %v2343_v49 = vpop.f32.mrb[2].mxu0  ;;  %v2695_v50 = vadd.f32 %v2687_v41, %v761_v47  ;;  %v2375_v51 = vpop.f32.mrb[2].mxu1 }
 0x10d   : > { %893 = vst.msk [vmem:[#allocation2 + $0x10] sm:$0xff] %vm890_vm1, %v642_v44  ;;  %v645_v52 = vadd.f32 %v2343_v49, %v2687_v41  ;;  %v636_v53 = vpop.f32.mrb[3].mxu0  ;;  %925 = vst.msk [vmem:[#allocation2 + $0x110] sm:$0xff] %vm890_vm1, %v2691_v46  ;;  %v764_v54 = vpop.f32.mrb[3].mxu1  ;;  %v1095_v57 = vmul.f32 %v642_v44, %v642_v44  ;;  %v2710_v63 = vadd.f32 %v2375_v51, %v2687_v41  ;;  %v959_v0 = vsel %vm890_vm1, %v642_v44, 0.0 }
 0x10e   : > { %891 = vst.msk [vmem:[#allocation2] sm:$0xff] %vm890_vm1, %v634_v48  ;;  %v1093_v55 = vmul.f32 %v634_v48, %v634_v48  ;;  %v637_v56 = vadd.f32 %v2687_v41, %v636_v53  ;;  %923 = vst.msk [vmem:[#allocation2 + $0x100] sm:$0xff] %vm890_vm1, %v2695_v50  ;;  %v956_v58 = vsel %vm890_vm1, %v634_v48, 0.0  ;;  %v2716_v4 = vadd.f32 %v2687_v41, %v764_v54 }
 0x10f   : > { %894 = vst.msk [vmem:[#allocation2 + $0x18] sm:$0xff] %vm890_vm1, %v645_v52  ;;  %v1096_v61 = vmul.f32 %v645_v52, %v645_v52  ;;  %926 = vst.msk [vmem:[#allocation2 + $0x118] sm:$0xff] %vm890_vm1, %v2710_v63  ;;  %v1160_v11 = vsel %vm890_vm1, %v1095_v57, 0.0  ;;  %v961_v12 = vsel %vm890_vm1, %v645_v52, 0.0 }
 0x110   : > { %892 = vst.msk [vmem:[#allocation2 + $0x8] sm:$0xff] %vm890_vm1, %v637_v56  ;;  %v957_v59 = vsel %vm890_vm1, %v637_v56, 0.0  ;;  %v1094_v60 = vmul.f32 %v637_v56, %v637_v56  ;;  %v1157_v1 = vsel %vm890_vm1, %v1093_v55, 0.0  ;;  %924 = vst.msk [vmem:[#allocation2 + $0x108] sm:$0xff] %vm890_vm1, %v2716_v4 }
 0x111   : > { %v958_v62 = vadd.f32 %v957_v59, %v956_v58  ;;  %v1162_v16 = vsel %vm890_vm1, %v1096_v61, 0.0 }
 0x112   : > { %v1158_v2 = vsel %vm890_vm1, %v1094_v60, 0.0  ;;  %v2346_v3 = vpop.f32.mrb[4].mxu0  ;;  %v2378_v5 = vpop.f32.mrb[4].mxu1 }
 0x113   : > { %v960_v6 = vadd.f32 %v959_v0, %v958_v62  ;;  %v1159_v7 = vadd.f32 %v1158_v2, %v1157_v1  ;;  %v658_v8 = vadd.f32 %v2346_v3, %v2687_v41  ;;  %v649_v9 = vpop.f32.mrb[5].mxu0  ;;  %v777_v10 = vpop.f32.mrb[5].mxu1  ;;  %v2740_v35 = vadd.f32 %v2378_v5, %v2687_v41 }
 0x114   : > { %v650_v13 = vadd.f32 %v2687_v41, %v649_v9  ;;  %v2347_v14 = vpop.f32.mrb[6].mxu0  ;;  %v2379_v15 = vpop.f32.mrb[6].mxu1  ;;  %v2743_v36 = vadd.f32 %v2687_v41, %v777_v10 }
 0x115   : > { %v1161_v17 = vadd.f32 %v1160_v11, %v1159_v7  ;;  %897 = vst.msk [vmem:[#allocation2 + $0x30] sm:$0xff] %vm890_vm1, %v658_v8  ;;  %v962_v18 = vadd.f32 %v961_v12, %v960_v6  ;;  %v652_v19 = vpop.f32.mrb[7].mxu0  ;;  %v2728_v20 = vpop.f32.mrb[7].mxu1  ;;  %v661_v23 = vadd.f32 %v2347_v14, %v2687_v41  ;;  %v1099_v29 = vmul.f32 %v658_v8, %v658_v8 }
 0x116   : > { %895 = vst.msk [vmem:[#allocation2 + $0x20] sm:$0xff] %vm890_vm1, %v650_v13  ;;  %v963_v21 = vsel %vm890_vm1, %v650_v13, 0.0  ;;  %v1097_v22 = vmul.f32 %v650_v13, %v650_v13  ;;  %v653_v24 = vadd.f32 %v2687_v41, %v652_v19  ;;  %v967_v33 = vsel %vm890_vm1, %v658_v8, 0.0  ;;  %929 = vst.msk [vmem:[#allocation2 + $0x130] sm:$0xff] %vm890_vm1, %v2740_v35 }
 0x117   : > { %v964_v25 = vadd.f32 %v963_v21, %v962_v18  ;;  %v1163_v26 = vadd.f32 %v1162_v16, %v1161_v17  ;;  %898 = vst.msk [vmem:[#allocation2 + $0x38] sm:$0xff] %vm890_vm1, %v661_v23  ;;  %v2746_v37 = vadd.f32 %v2379_v15, %v2687_v41  ;;  %v1100_v39 = vmul.f32 %v661_v23, %v661_v23 }
 0x118   : > { %v1164_v27 = vsel %vm890_vm1, %v1097_v22, 0.0  ;;  %896 = vst.msk [vmem:[#allocation2 + $0x28] sm:$0xff] %vm890_vm1, %v653_v24  ;;  %v965_v28 = vsel %vm890_vm1, %v653_v24, 0.0  ;;  %v1098_v32 = vmul.f32 %v653_v24, %v653_v24  ;;  %v969_v47 = vsel %vm890_vm1, %v661_v23, 0.0  ;;  %927 = vst.msk [vmem:[#allocation2 + $0x120] sm:$0xff] %vm890_vm1, %v2743_v36 }
 0x119   : > { %v1165_v30 = vadd.f32 %v1164_v27, %v1163_v26  ;;  %v966_v31 = vadd.f32 %v965_v28, %v964_v25  ;;  %930 = vst.msk [vmem:[#allocation2 + $0x138] sm:$0xff] %vm890_vm1, %v2746_v37  ;;  %v1168_v53 = vsel %vm890_vm1, %v1099_v29, 0.0  ;;  %v1170_v62 = vsel %vm890_vm1, %v1100_v39, 0.0 }
 0x11a   : > { %v2350_v34 = vpop.f32.mrb[8].mxu0  ;;  %v2382_v38 = vpop.f32.mrb[8].mxu1  ;;  %v1166_v42 = vsel %vm890_vm1, %v1098_v32, 0.0  ;;  %v2782_v17 = vadd.f32 %v2687_v41, %v2728_v20 }
 0x11b   : > { %v968_v40 = vadd.f32 %v967_v33, %v966_v31  ;;  %v674_v43 = vadd.f32 %v2350_v34, %v2687_v41  ;;  %v665_v44 = vpop.f32.mrb[9].mxu0  ;;  %v2750_v45 = vpop.f32.mrb[9].mxu1  ;;  %v1167_v48 = vadd.f32 %v1166_v42, %v1165_v30  ;;  %v2789_v24 = vadd.f32 %v2382_v38, %v2687_v41 }
 0x11c   : > { %v666_v49 = vadd.f32 %v2687_v41, %v665_v44  ;;  %v2351_v51 = vpop.f32.mrb[10].mxu0  ;;  %v2760_v52 = vpop.f32.mrb[10].mxu1  ;;  %928 = vst.msk [vmem:[#allocation2 + $0x128] sm:$0xff] %vm890_vm1, %v2782_v17 }
 0x11d   : > { %901 = vst.msk [vmem:[#allocation2 + $0x50] sm:$0xff] %vm890_vm1, %v674_v43  ;;  %v970_v54 = vadd.f32 %v969_v47, %v968_v40  ;;  %v677_v55 = vadd.f32 %v2351_v51, %v2687_v41  ;;  %v668_v56 = vpop.f32.mrb[11].mxu0  ;;  %v2765_v57 = vpop.f32.mrb[11].mxu1  ;;  %v1169_v58 = vadd.f32 %v1168_v53, %v1167_v48  ;;  %v1103_v6 = vmul.f32 %v674_v43, %v674_v43 }
 0x11e   : > { %899 = vst.msk [vmem:[#allocation2 + $0x40] sm:$0xff] %vm890_vm1, %v666_v49  ;;  %v971_v59 = vsel %vm890_vm1, %v666_v49, 0.0  ;;  %v1101_v60 = vmul.f32 %v666_v49, %v666_v49  ;;  %v669_v61 = vadd.f32 %v2687_v41, %v668_v56  ;;  %v975_v8 = vsel %vm890_vm1, %v674_v43, 0.0  ;;  %933 = vst.msk [vmem:[#allocation2 + $0x150] sm:$0xff] %vm890_vm1, %v2789_v24 }
 0x11f   : > { %v972_v0 = vadd.f32 %v971_v59, %v970_v54  ;;  %902 = vst.msk [vmem:[#allocation2 + $0x58] sm:$0xff] %vm890_vm1, %v677_v55  ;;  %v1171_v1 = vadd.f32 %v1170_v62, %v1169_v58  ;;  %v1104_v13 = vmul.f32 %v677_v55, %v677_v55  ;;  %v977_v19 = vsel %vm890_vm1, %v677_v55, 0.0 }
 0x120   : > { %v1172_v2 = vsel %vm890_vm1, %v1101_v60, 0.0  ;;  %900 = vst.msk [vmem:[#allocation2 + $0x48] sm:$0xff] %vm890_vm1, %v669_v61  ;;  %v973_v3 = vsel %vm890_vm1, %v669_v61, 0.0  ;;  %v1102_v5 = vmul.f32 %v669_v61, %v669_v61  ;;  %v1176_v26 = vsel %vm890_vm1, %v1103_v6, 0.0 }
 0x121   : > { %v974_v7 = vadd.f32 %v973_v3, %v972_v0  ;;  %v1173_v9 = vadd.f32 %v1172_v2, %v1171_v1  ;;  %v1178_v34 = vsel %vm890_vm1, %v1104_v13, 0.0  ;;  %v2817_v60 = vadd.f32 %v2687_v41, %v2750_v45 }
 0x122   : > { %v1174_v10 = vsel %vm890_vm1, %v1102_v5, 0.0  ;;  %v2354_v11 = vpop.f32.mrb[12].mxu0  ;;  %v2777_v12 = vpop.f32.mrb[12].mxu1  ;;  %v2825_v3 = vadd.f32 %v2760_v52, %v2687_v41 }
 0x123   : > { %v976_v14 = vadd.f32 %v975_v8, %v974_v7  ;;  %v690_v15 = vadd.f32 %v2354_v11, %v2687_v41  ;;  %v681_v16 = vpop.f32.mrb[13].mxu0  ;;  %v2784_v18 = vpop.f32.mrb[13].mxu1  ;;  %v1175_v21 = vadd.f32 %v1174_v10, %v1173_v9  ;;  %931 = vst.msk [vmem:[#allocation2 + $0x140] sm:$0xff] %vm890_vm1, %v2817_v60 }
 0x124   : > { %v682_v22 = vadd.f32 %v2687_v41, %v681_v16  ;;  %v2355_v23 = vpop.f32.mrb[14].mxu0  ;;  %v2791_v25 = vpop.f32.mrb[14].mxu1  ;;  %934 = vst.msk [vmem:[#allocation2 + $0x158] sm:$0xff] %vm890_vm1, %v2825_v3 }
 0x125   : > { %905 = vst.msk [vmem:[#allocation2 + $0x70] sm:$0xff] %vm890_vm1, %v690_v15  ;;  %v978_v27 = vadd.f32 %v977_v19, %v976_v14  ;;  %v693_v20 = vadd.f32 %v2355_v23, %v2687_v41  ;;  %v684_v28 = vpop.f32.mrb[15].mxu0  ;;  %v2798_v29 = vpop.f32.mrb[15].mxu1  ;;  %v1177_v30 = vadd.f32 %v1176_v26, %v1175_v21  ;;  %v1107_v44 = vmul.f32 %v690_v15, %v690_v15 }
 0x126   : > { %903 = vst.msk [vmem:[#allocation2 + $0x60] sm:$0xff] %vm890_vm1, %v682_v22  ;;  %v979_v31 = vsel %vm890_vm1, %v682_v22, 0.0  ;;  %v1105_v32 = vmul.f32 %v682_v22, %v682_v22  ;;  %v685_v33 = vadd.f32 %v2687_v41, %v684_v28  ;;  %v983_v48 = vsel %vm890_vm1, %v690_v15, 0.0 }
 0x127   : > { %v980_v38 = vadd.f32 %v979_v31, %v978_v27  ;;  %906 = vst.msk [vmem:[#allocation2 + $0x78] sm:$0xff] %vm890_vm1, %v693_v20  ;;  %v1179_v39 = vadd.f32 %v1178_v34, %v1177_v30  ;;  %v1108_v55 = vmul.f32 %v693_v20, %v693_v20  ;;  %v985_v62 = vsel %vm890_vm1, %v693_v20, 0.0 }
 0x128   : > { %v1180_v40 = vsel %vm890_vm1, %v1105_v32, 0.0  ;;  %904 = vst.msk [vmem:[#allocation2 + $0x68] sm:$0xff] %vm890_vm1, %v685_v33  ;;  %v981_v42 = vsel %vm890_vm1, %v685_v33, 0.0  ;;  %v1106_v43 = vmul.f32 %v685_v33, %v685_v33  ;;  %v1184_v6 = vsel %vm890_vm1, %v1107_v44, 0.0 }
 0x129   : > { %v982_v47 = vadd.f32 %v981_v42, %v980_v38  ;;  %v1181_v49 = vadd.f32 %v1180_v40, %v1179_v39  ;;  %v1186_v14 = vsel %vm890_vm1, %v1108_v55, 0.0  ;;  %v2853_v39 = vadd.f32 %v2687_v41, %v2765_v57 }
 0x12a   : > { %v1182_v51 = vsel %vm890_vm1, %v1106_v43, 0.0  ;;  %v2358_v53 = vpop.f32.mrb[16].mxu0  ;;  %v2812_v54 = vpop.f32.mrb[16].mxu1 }
 0x12b   : > { %v984_v56 = vadd.f32 %v983_v48, %v982_v47  ;;  %v706_v58 = vadd.f32 %v2358_v53, %v2687_v41  ;;  %v697_v59 = vpop.f32.mrb[17].mxu0  ;;  %v2819_v61 = vpop.f32.mrb[17].mxu1  ;;  %v1183_v0 = vadd.f32 %v1182_v51, %v1181_v49  ;;  %v2861_v48 = vadd.f32 %v2777_v12, %v2687_v41  ;;  %932 = vst.msk [vmem:[#allocation2 + $0x148] sm:$0xff] %vm890_vm1, %v2853_v39 }
 0x12c   : > { %v698_v1 = vadd.f32 %v2687_v41, %v697_v59  ;;  %v2359_v2 = vpop.f32.mrb[18].mxu0  ;;  %v2827_v5 = vpop.f32.mrb[18].mxu1 }
 0x12d   : > { %909 = vst.msk [vmem:[#allocation2 + $0x90] sm:$0xff] %vm890_vm1, %v706_v58  ;;  %v986_v45 = vadd.f32 %v985_v62, %v984_v56  ;;  %v709_v7 = vadd.f32 %v2359_v2, %v2687_v41  ;;  %v700_v8 = vpop.f32.mrb[19].mxu0  ;;  %v2834_v9 = vpop.f32.mrb[19].mxu1  ;;  %v1185_v10 = vadd.f32 %v1184_v6, %v1183_v0  ;;  %v1111_v23 = vmul.f32 %v706_v58, %v706_v58 }
 0x12e   : > { %907 = vst.msk [vmem:[#allocation2 + $0x80] sm:$0xff] %vm890_vm1, %v698_v1  ;;  %v987_v52 = vsel %vm890_vm1, %v698_v1, 0.0  ;;  %v1109_v11 = vmul.f32 %v698_v1, %v698_v1  ;;  %v701_v13 = vadd.f32 %v2687_v41, %v700_v8  ;;  %v991_v27 = vsel %vm890_vm1, %v706_v58, 0.0  ;;  %937 = vst.msk [vmem:[#allocation2 + $0x170] sm:$0xff] %vm890_vm1, %v2861_v48 }
 0x12f   : > { %v988_v15 = vadd.f32 %v987_v52, %v986_v45  ;;  %910 = vst.msk [vmem:[#allocation2 + $0x98] sm:$0xff] %vm890_vm1, %v709_v7  ;;  %v1187_v16 = vadd.f32 %v1186_v14, %v1185_v10  ;;  %v1112_v32 = vmul.f32 %v709_v7, %v709_v7  ;;  %v993_v42 = vsel %vm890_vm1, %v709_v7, 0.0 }
 0x130   : > { %v1188_v19 = vsel %vm890_vm1, %v1109_v11, 0.0  ;;  %908 = vst.msk [vmem:[#allocation2 + $0x88] sm:$0xff] %vm890_vm1, %v701_v13  ;;  %v989_v21 = vsel %vm890_vm1, %v701_v13, 0.0  ;;  %v1110_v22 = vmul.f32 %v701_v13, %v701_v13  ;;  %v1192_v51 = vsel %vm890_vm1, %v1111_v23, 0.0 }
 0x131   : > { %v990_v26 = vadd.f32 %v989_v21, %v988_v15  ;;  %v1189_v20 = vadd.f32 %v1188_v19, %v1187_v16  ;;  %v1194_v0 = vsel %vm890_vm1, %v1112_v32, 0.0  ;;  %v2889_v23 = vadd.f32 %v2687_v41, %v2784_v18 }
 0x132   : > { %v1190_v28 = vsel %vm890_vm1, %v1110_v22, 0.0  ;;  %v2362_v30 = vpop.f32.mrb[20].mxu0  ;;  %v2848_v31 = vpop.f32.mrb[20].mxu1  ;;  %v2897_v32 = vadd.f32 %v2791_v25, %v2687_v41 }
 0x133   : > { %v992_v33 = vadd.f32 %v991_v27, %v990_v26  ;;  %v722_v34 = vadd.f32 %v2362_v30, %v2687_v41  ;;  %v713_v38 = vpop.f32.mrb[21].mxu0  ;;  %v2855_v40 = vpop.f32.mrb[21].mxu1  ;;  %v1191_v43 = vadd.f32 %v1190_v28, %v1189_v20  ;;  %935 = vst.msk [vmem:[#allocation2 + $0x160] sm:$0xff] %vm890_vm1, %v2889_v23 }
 0x134   : > { %v714_v44 = vadd.f32 %v2687_v41, %v713_v38  ;;  %v2363_v47 = vpop.f32.mrb[22].mxu0  ;;  %v2863_v49 = vpop.f32.mrb[22].mxu1  ;;  %938 = vst.msk [vmem:[#allocation2 + $0x178] sm:$0xff] %vm890_vm1, %v2897_v32 }
 0x135   : > { %913 = vst.msk [vmem:[#allocation2 + $0xb0] sm:$0xff] %vm890_vm1, %v722_v34  ;;  %v994_v57 = vadd.f32 %v993_v42, %v992_v33  ;;  %v725_v53 = vadd.f32 %v2363_v47, %v2687_v41  ;;  %v716_v55 = vpop.f32.mrb[23].mxu0  ;;  %v2870_v56 = vpop.f32.mrb[23].mxu1  ;;  %v1193_v58 = vadd.f32 %v1192_v51, %v1191_v43  ;;  %v1115_v8 = vmul.f32 %v722_v34, %v722_v34 }
 0x136   : > { %911 = vst.msk [vmem:[#allocation2 + $0xa0] sm:$0xff] %vm890_vm1, %v714_v44  ;;  %v995_v12 = vsel %vm890_vm1, %v714_v44, 0.0  ;;  %v1113_v59 = vmul.f32 %v714_v44, %v714_v44  ;;  %v717_v62 = vadd.f32 %v2687_v41, %v716_v55  ;;  %v999_v52 = vsel %vm890_vm1, %v722_v34, 0.0 }
 0x137   : > { %v996_v1 = vadd.f32 %v995_v12, %v994_v57  ;;  %914 = vst.msk [vmem:[#allocation2 + $0xb8] sm:$0xff] %vm890_vm1, %v725_v53  ;;  %v1195_v2 = vadd.f32 %v1194_v0, %v1193_v58  ;;  %v1116_v16 = vmul.f32 %v725_v53, %v725_v53  ;;  %v1001_v27 = vsel %vm890_vm1, %v725_v53, 0.0 }
 0x138   : > { %v1196_v6 = vsel %vm890_vm1, %v1113_v59, 0.0  ;;  %912 = vst.msk [vmem:[#allocation2 + $0xa8] sm:$0xff] %vm890_vm1, %v717_v62  ;;  %v997_v45 = vsel %vm890_vm1, %v717_v62, 0.0  ;;  %v1114_v7 = vmul.f32 %v717_v62, %v717_v62  ;;  %v1200_v34 = vsel %vm890_vm1, %v1115_v8, 0.0 }
 0x139   : > { %v998_v10 = vadd.f32 %v997_v45, %v996_v1  ;;  %v1197_v11 = vadd.f32 %v1196_v6, %v1195_v2  ;;  %v1202_v57 = vsel %vm890_vm1, %v1116_v16, 0.0 }
 0x13a   : > { %v1198_v13 = vsel %vm890_vm1, %v1114_v7, 0.0  ;;  %v2366_v14 = vpop.f32.mrb[24].mxu0  ;;  %v2884_v15 = vpop.f32.mrb[24].mxu1 }
 0x13b   : > { %v1000_v19 = vadd.f32 %v999_v52, %v998_v10  ;;  %v738_v21 = vadd.f32 %v2366_v14, %v2687_v41  ;;  %v729_v22 = vpop.f32.mrb[25].mxu0  ;;  %v2891_v26 = vpop.f32.mrb[25].mxu1  ;;  %v1199_v20 = vadd.f32 %v1198_v13, %v1197_v11  ;;  %v2925_v13 = vadd.f32 %v2687_v41, %v2798_v29 }
 0x13c   : > { %v730_v28 = vadd.f32 %v2687_v41, %v729_v22  ;;  %v2367_v30 = vpop.f32.mrb[26].mxu0  ;;  %v2899_v33 = vpop.f32.mrb[26].mxu1 }
 0x13d   : > { %917 = vst.msk [vmem:[#allocation2 + $0xd0] sm:$0xff] %vm890_vm1, %v738_v21  ;;  %v1002_v18 = vadd.f32 %v1001_v27, %v1000_v19  ;;  %v741_v38 = vadd.f32 %v2367_v30, %v2687_v41  ;;  %v732_v42 = vpop.f32.mrb[27].mxu0  ;;  %v2906_v43 = vpop.f32.mrb[27].mxu1  ;;  %v1201_v44 = vadd.f32 %v1200_v34, %v1199_v20  ;;  %v1119_v62 = vmul.f32 %v738_v21, %v738_v21 }
 0x13e   : > { %915 = vst.msk [vmem:[#allocation2 + $0xc0] sm:$0xff] %vm890_vm1, %v730_v28  ;;  %v1003_v25 = vsel %vm890_vm1, %v730_v28, 0.0  ;;  %v1117_v47 = vmul.f32 %v730_v28, %v730_v28  ;;  %v733_v51 = vadd.f32 %v2687_v41, %v732_v42  ;;  %v1007_v1 = vsel %vm890_vm1, %v738_v21, 0.0  ;;  %936 = vst.msk [vmem:[#allocation2 + $0x168] sm:$0xff] %vm890_vm1, %v2925_v13 }
 0x13f   : > { %v1004_v53 = vadd.f32 %v1003_v25, %v1002_v18  ;;  %918 = vst.msk [vmem:[#allocation2 + $0xd8] sm:$0xff] %vm890_vm1, %v741_v38  ;;  %v1203_v55 = vadd.f32 %v1202_v57, %v1201_v44  ;;  %v1120_v8 = vmul.f32 %v741_v38, %v741_v38  ;;  %v1009_v16 = vsel %vm890_vm1, %v741_v38, 0.0 }
 0x140   : > { %v1204_v58 = vsel %vm890_vm1, %v1117_v47, 0.0  ;;  %916 = vst.msk [vmem:[#allocation2 + $0xc8] sm:$0xff] %vm890_vm1, %v733_v51  ;;  %v1005_v12 = vsel %vm890_vm1, %v733_v51, 0.0  ;;  %v1118_v59 = vmul.f32 %v733_v51, %v733_v51  ;;  %v2933_v27 = vadd.f32 %v2812_v54, %v2687_v41 }
 0x141   : > { %v1006_v0 = vadd.f32 %v1005_v12, %v1004_v53  ;;  %v1205_v2 = vadd.f32 %v1204_v58, %v1203_v55  ;;  %v1208_v28 = vsel %vm890_vm1, %v1119_v62, 0.0  ;;  %v1210_v25 = vsel %vm890_vm1, %v1120_v8, 0.0 }
 0x142   : > { %v1206_v6 = vsel %vm890_vm1, %v1118_v59, 0.0  ;;  %v2370_v45 = vpop.f32.mrb[28].mxu0  ;;  %v2920_v7 = vpop.f32.mrb[28].mxu1  ;;  %941 = vst.msk [vmem:[#allocation2 + $0x190] sm:$0xff] %vm890_vm1, %v2933_v27  ;;  %v1019_v59 = vsel %vm890_vm1, %v2695_v50, 0.0  ;;  %v2962_v8 = vadd.f32 %v2687_v41, %v2819_v61 }
 0x143   : > { %v1008_v10 = vadd.f32 %v1007_v1, %v1006_v0  ;;  %v754_v52 = vadd.f32 %v2370_v45, %v2687_v41  ;;  %v745_v11 = vpop.f32.mrb[29].mxu0  ;;  %v2927_v14 = vpop.f32.mrb[29].mxu1  ;;  %v1207_v19 = vadd.f32 %v1206_v6, %v1205_v2  ;;  %v1125_v2 = vmul.f32 %v2695_v50, %v2695_v50 }
 0x144   : > { %v746_v21 = vadd.f32 %v2687_v41, %v745_v11  ;;  %v2371_v22 = vpop.f32.mrb[30].mxu0  ;;  %v2935_v20 = vpop.f32.mrb[30].mxu1  ;;  %v2975_v50 = vadd.f32 %v2848_v31, %v2687_v41  ;;  %939 = vst.msk [vmem:[#allocation2 + $0x180] sm:$0xff] %vm890_vm1, %v2962_v8 }
 0x145   : > { %921 = vst.msk [vmem:[#allocation2 + $0xf0] sm:$0xff] %vm890_vm1, %v754_v52  ;;  %v1010_v29 = vadd.f32 %v1009_v16, %v1008_v10  ;;  %v757_v30 = vadd.f32 %v2371_v22, %v2687_v41  ;;  %v748_v34 = vpop.f32.mrb[31].mxu0  ;;  %v2942_v18 = vpop.f32.mrb[31].mxu1  ;;  %v1209_v38 = vadd.f32 %v1208_v28, %v1207_v19  ;;  %v1123_v58 = vmul.f32 %v754_v52, %v754_v52 }
 0x146   : > { %919 = vst.msk [vmem:[#allocation2 + $0xe0] sm:$0xff] %vm890_vm1, %v746_v21  ;;  %v1011_v54 = vsel %vm890_vm1, %v746_v21, 0.0  ;;  %v1121_v42 = vmul.f32 %v746_v21, %v746_v21  ;;  %v749_v44 = vadd.f32 %v2687_v41, %v748_v34  ;;  %v1015_v62 = vsel %vm890_vm1, %v754_v52, 0.0  ;;  %945 = vst.msk [vmem:[#allocation2 + $0x1b0] sm:$0xff] %vm890_vm1, %v2975_v50 }
 0x147   : > { %v1012_v47 = vadd.f32 %v1011_v54, %v1010_v29  ;;  %922 = vst.msk [vmem:[#allocation2 + $0xf8] sm:$0xff] %vm890_vm1, %v757_v30  ;;  %v1211_v51 = vadd.f32 %v1210_v25, %v1209_v38  ;;  %v1124_v6 = vmul.f32 %v757_v30, %v757_v30  ;;  %v2966_v10 = vadd.f32 %v2827_v5, %v2687_v41 }
 0x148   : > { %v1212_v57 = vsel %vm890_vm1, %v1121_v42, 0.0  ;;  %920 = vst.msk [vmem:[#allocation2 + $0xe8] sm:$0xff] %vm890_vm1, %v749_v44  ;;  %v1013_v53 = vsel %vm890_vm1, %v749_v44, 0.0  ;;  %v1122_v55 = vmul.f32 %v749_v44, %v749_v44  ;;  %v1017_v11 = vsel %vm890_vm1, %v757_v30, 0.0 }
 0x149   : > { %v1014_v12 = vadd.f32 %v1013_v53, %v1012_v47  ;;  %v1213_v0 = vadd.f32 %v1212_v57, %v1211_v51  ;;  %v2971_v52 = vadd.f32 %v2687_v41, %v2834_v9  ;;  %v1216_v19 = vsel %vm890_vm1, %v1123_v58, 0.0  ;;  %942 = vst.msk [vmem:[#allocation2 + $0x198] sm:$0xff] %vm890_vm1, %v2966_v10 }
 0x14a   : > { %v1214_v1 = vsel %vm890_vm1, %v1122_v55, 0.0  ;;  %v1218_v5 = vsel %vm890_vm1, %v1124_v6, 0.0  ;;  %v1220_v31 = vsel %vm890_vm1, %v1125_v2, 0.0  ;;  %v1126_v22 = vmul.f32 %v2716_v4, %v2716_v4 }
 0x14b   : > { %v1016_v45 = vadd.f32 %v1015_v62, %v1014_v12  ;;  %v1215_v16 = vadd.f32 %v1214_v1, %v1213_v0  ;;  %940 = vst.msk [vmem:[#allocation2 + $0x188] sm:$0xff] %vm890_vm1, %v2971_v52  ;;  %v1021_v29 = vsel %vm890_vm1, %v2716_v4, 0.0  ;;  %v2994_v30 = vadd.f32 %v2687_v41, %v2855_v40 }
 0x14c   : > { %v1127_v34 = vmul.f32 %v2691_v46, %v2691_v46  ;;  %v3000_v54 = vadd.f32 %v2863_v49, %v2687_v41  ;;  %v3004_v42 = vadd.f32 %v2687_v41, %v2870_v56  ;;  %v1023_v44 = vsel %vm890_vm1, %v2691_v46, 0.0 }
 0x14d   : > { %v1018_v21 = vadd.f32 %v1017_v11, %v1016_v45  ;;  %v1217_v61 = vadd.f32 %v1216_v19, %v1215_v16  ;;  %943 = vst.msk [vmem:[#allocation2 + $0x1a0] sm:$0xff] %vm890_vm1, %v2994_v30  ;;  %v1128_v40 = vmul.f32 %v2710_v63, %v2710_v63  ;;  %v1222_v47 = vsel %vm890_vm1, %v1126_v22, 0.0 }
 0x14e   : > { %v1129_v49 = vmul.f32 %v2743_v36, %v2743_v36  ;;  %946 = vst.msk [vmem:[#allocation2 + $0x1b8] sm:$0xff] %vm890_vm1, %v3000_v54  ;;  %944 = vst.msk [vmem:[#allocation2 + $0x1a8] sm:$0xff] %vm890_vm1, %v3004_v42  ;;  %v1025_v46 = vsel %vm890_vm1, %v2710_v63, 0.0  ;;  %v1027_v51 = vsel %vm890_vm1, %v2743_v36, 0.0  ;;  %v3025_v57 = vadd.f32 %v2884_v15, %v2687_v41 }
 0x14f   : > { %v1020_v9 = vadd.f32 %v1019_v59, %v1018_v21  ;;  %v1219_v28 = vadd.f32 %v1218_v5, %v1217_v61  ;;  %v1224_v53 = vsel %vm890_vm1, %v1127_v34, 0.0  ;;  %v3030_v58 = vadd.f32 %v2687_v41, %v2891_v26 }
 0x150   : > { %v3034_v12 = vadd.f32 %v2899_v33, %v2687_v41  ;;  %949 = vst.msk [vmem:[#allocation2 + $0x1d0] sm:$0xff] %vm890_vm1, %v3025_v57  ;;  %v1226_v36 = vsel %vm890_vm1, %v1128_v40, 0.0  ;;  %v1228_v15 = vsel %vm890_vm1, %v1129_v49, 0.0  ;;  %v1130_v62 = vmul.f32 %v2782_v17, %v2782_v17 }
 0x151   : > { %v1022_v38 = vadd.f32 %v1021_v29, %v1020_v9  ;;  %v1221_v4 = vadd.f32 %v1220_v31, %v1219_v28  ;;  %947 = vst.msk [vmem:[#allocation2 + $0x1c0] sm:$0xff] %vm890_vm1, %v3030_v58  ;;  %v1029_v33 = vsel %vm890_vm1, %v2782_v17, 0.0  ;;  %v3050_v0 = vadd.f32 %v2687_v41, %v2906_v43 }
 0x152   : > { %950 = vst.msk [vmem:[#allocation2 + $0x1d8] sm:$0xff] %vm890_vm1, %v3034_v12  ;;  %v1131_v1 = vmul.f32 %v2740_v35, %v2740_v35  ;;  %v3056_v6 = vadd.f32 %v2920_v7, %v2687_v41  ;;  %v3060_v45 = vadd.f32 %v2687_v41, %v2927_v14  ;;  %v1031_v11 = vsel %vm890_vm1, %v2740_v35, 0.0 }
 0x153   : > { %v1024_v25 = vadd.f32 %v1023_v44, %v1022_v38  ;;  %v1223_v56 = vadd.f32 %v1222_v47, %v1221_v4  ;;  %948 = vst.msk [vmem:[#allocation2 + $0x1c8] sm:$0xff] %vm890_vm1, %v3050_v0  ;;  %v1132_v43 = vmul.f32 %v2746_v37, %v2746_v37  ;;  %v1230_v19 = vsel %vm890_vm1, %v1130_v62, 0.0 }
 0x154   : > { %v1133_v7 = vmul.f32 %v2817_v60, %v2817_v60  ;;  %953 = vst.msk [vmem:[#allocation2 + $0x1f0] sm:$0xff] %vm890_vm1, %v3056_v6  ;;  %951 = vst.msk [vmem:[#allocation2 + $0x1e0] sm:$0xff] %vm890_vm1, %v3060_v45  ;;  %v1033_v35 = vsel %vm890_vm1, %v2746_v37, 0.0  ;;  %v1035_v21 = vsel %vm890_vm1, %v2817_v60, 0.0  ;;  %v3081_v61 = vadd.f32 %v2935_v20, %v2687_v41 }
 0x155   : > { %v1026_v55 = vadd.f32 %v1025_v46, %v1024_v25  ;;  %v1225_v63 = vadd.f32 %v1224_v53, %v1223_v56  ;;  %v1232_v5 = vsel %vm890_vm1, %v1131_v1, 0.0  ;;  %v3086_v31 = vadd.f32 %v2687_v41, %v2942_v18 }
 0x156   : > { %954 = vst.msk [vmem:[#allocation2 + $0x1f8] sm:$0xff] %vm890_vm1, %v3081_v61  ;;  %v1234_v37 = vsel %vm890_vm1, %v1132_v43, 0.0  ;;  %v1236_v60 = vsel %vm890_vm1, %v1133_v7, 0.0  ;;  %v1134_v20 = vmul.f32 %v2853_v39, %v2853_v39  ;;  %v1037_v41 = vsel %vm890_vm1, %v2853_v39, 0.0 }
 0x157   : > { %v1028_v59 = vadd.f32 %v1027_v51, %v1026_v55  ;;  %v1227_v26 = vadd.f32 %v1226_v36, %v1225_v63  ;;  %952 = vst.msk [vmem:[#allocation2 + $0x1e8] sm:$0xff] %vm890_vm1, %v3086_v31  ;;  %v1135_v18 = vmul.f32 %v2789_v24, %v2789_v24  ;;  %v1039_v38 = vsel %vm890_vm1, %v2789_v24, 0.0 }
 0x158   : > { %v1136_v4 = vmul.f32 %v2825_v3, %v2825_v3  ;;  %v1238_v25 = vsel %vm890_vm1, %v1134_v20, 0.0  ;;  %v1137_v47 = vmul.f32 %v2889_v23, %v2889_v23  ;;  %v1041_v39 = vsel %vm890_vm1, %v2825_v3, 0.0 }
 0x159   : > { %v1030_v2 = vadd.f32 %v1029_v33, %v1028_v59  ;;  %v1229_v17 = vadd.f32 %v1228_v15, %v1227_v26  ;;  %v1043_v46 = vsel %vm890_vm1, %v2889_v23, 0.0  ;;  %v1240_v56 = vsel %vm890_vm1, %v1135_v18, 0.0 }
 0x15a   : > { %v1242_v53 = vsel %vm890_vm1, %v1136_v4, 0.0  ;;  %v1244_v63 = vsel %vm890_vm1, %v1137_v47, 0.0  ;;  %v1138_v36 = vmul.f32 %v2925_v13, %v2925_v13  ;;  %v1045_v3 = vsel %vm890_vm1, %v2925_v13, 0.0 }
 0x15b   : > { %v1032_v16 = vadd.f32 %v1031_v11, %v1030_v2  ;;  %v1231_v14 = vadd.f32 %v1230_v19, %v1229_v17  ;;  %v1139_v15 = vmul.f32 %v2861_v48, %v2861_v48  ;;  %v1047_v62 = vsel %vm890_vm1, %v2861_v48, 0.0 }
 0x15c   : > { %v1140_v33 = vmul.f32 %v2897_v32, %v2897_v32  ;;  %v1246_v2 = vsel %vm890_vm1, %v1138_v36, 0.0  ;;  %v1141_v11 = vmul.f32 %v2962_v8, %v2962_v8  ;;  %v1049_v13 = vsel %vm890_vm1, %v2897_v32, 0.0 }
 0x15d   : > { %v1034_v9 = vadd.f32 %v1033_v35, %v1032_v16  ;;  %v1233_v22 = vadd.f32 %v1232_v5, %v1231_v14  ;;  %v1051_v43 = vsel %vm890_vm1, %v2962_v8, 0.0  ;;  %v1248_v16 = vsel %vm890_vm1, %v1139_v15, 0.0 }
 0x15e   : > { %v1250_v7 = vsel %vm890_vm1, %v1140_v33, 0.0  ;;  %v1252_v14 = vsel %vm890_vm1, %v1141_v11, 0.0  ;;  %v1053_v32 = vsel %vm890_vm1, %v2971_v52, 0.0  ;;  %v1059_v18 = vsel %vm890_vm1, %v2994_v30, 0.0 }
 0x15f   : > { %v1036_v28 = vadd.f32 %v1035_v21, %v1034_v9  ;;  %v1235_v29 = vadd.f32 %v1234_v37, %v1233_v22  ;;  %v1142_v21 = vmul.f32 %v2971_v52, %v2971_v52  ;;  %v1143_v9 = vmul.f32 %v2933_v27, %v2933_v27 }
 0x160   : > { %v1055_v22 = vsel %vm890_vm1, %v2933_v27, 0.0  ;;  %v1057_v52 = vsel %vm890_vm1, %v2966_v10, 0.0  ;;  %v1151_v33 = vmul.f32 %v3025_v57, %v3025_v57  ;;  %v1152_v11 = vmul.f32 %v3034_v12, %v3034_v12 }
 0x161   : > { %v1038_v34 = vadd.f32 %v1037_v41, %v1036_v28  ;;  %v1237_v44 = vadd.f32 %v1236_v60, %v1235_v29  ;;  %v1144_v28 = vmul.f32 %v2966_v10, %v2966_v10  ;;  %v1254_v20 = vsel %vm890_vm1, %v1142_v21, 0.0 }
 0x162   : > { %v1145_v29 = vmul.f32 %v2994_v30, %v2994_v30  ;;  %v1061_v10 = vsel %vm890_vm1, %v3004_v42, 0.0 }
 0x163   : > { %v1040_v40 = vadd.f32 %v1039_v38, %v1038_v34  ;;  %v1239_v49 = vadd.f32 %v1238_v25, %v1237_v44  ;;  %v1256_v34 = vsel %vm890_vm1, %v1143_v9, 0.0  ;;  %v1258_v44 = vsel %vm890_vm1, %v1144_v28, 0.0 }
 0x164   : > { %v1146_v25 = vmul.f32 %v3004_v42, %v3004_v42  ;;  %v1065_v42 = vsel %vm890_vm1, %v3000_v54, 0.0  ;;  %v1155_v9 = vmul.f32 %v3056_v6, %v3056_v6 }
 0x165   : > { %v1042_v24 = vadd.f32 %v1041_v39, %v1040_v40  ;;  %v1241_v51 = vadd.f32 %v1240_v56, %v1239_v49  ;;  %v1260_v40 = vsel %vm890_vm1, %v1145_v29, 0.0  ;;  %v1147_v39 = vmul.f32 %v2975_v50, %v2975_v50 }
 0x166   : > { %v1063_v49 = vsel %vm890_vm1, %v2975_v50, 0.0  ;;  %v1148_v56 = vmul.f32 %v3000_v54, %v3000_v54  ;;  %v1069_v54 = vsel %vm890_vm1, %v3050_v0, 0.0 }
 0x167   : > { %v1044_v55 = vadd.f32 %v1043_v46, %v1042_v24  ;;  %v1243_v59 = vadd.f32 %v1242_v53, %v1241_v51  ;;  %v1262_v51 = vsel %vm890_vm1, %v1146_v25, 0.0  ;;  %v1149_v53 = vmul.f32 %v3030_v58, %v3030_v58 }
 0x168   : > { %v1264_v36 = vsel %vm890_vm1, %v1147_v39, 0.0 }
 0x169   : > { %v1046_v23 = vadd.f32 %v1045_v3, %v1044_v55  ;;  %v1245_v26 = vadd.f32 %v1244_v63, %v1243_v59  ;;  %v1067_v63 = vsel %vm890_vm1, %v3030_v58, 0.0  ;;  %v1266_v3 = vsel %vm890_vm1, %v1148_v56, 0.0 }
 0x16b   : > { %v1048_v1 = vadd.f32 %v1047_v62, %v1046_v23  ;;  %v1247_v17 = vadd.f32 %v1246_v2, %v1245_v26  ;;  %v1268_v23 = vsel %vm890_vm1, %v1149_v53, 0.0  ;;  %v1150_v62 = vmul.f32 %v3050_v0, %v3050_v0 }
 0x16c   : > { %v1073_v0 = vsel %vm890_vm1, %v3034_v12, 0.0  ;;  %v1077_v12 = vsel %vm890_vm1, %v3086_v31, 0.0 }
 0x16d   : > { %v1050_v48 = vadd.f32 %v1049_v13, %v1048_v1  ;;  %v1249_v19 = vadd.f32 %v1248_v16, %v1247_v17  ;;  %v1071_v1 = vsel %vm890_vm1, %v3025_v57, 0.0  ;;  %v1270_v17 = vsel %vm890_vm1, %v1150_v62, 0.0 }
 0x16f   : > { %v1052_v35 = vadd.f32 %v1051_v43, %v1050_v48  ;;  %v1251_v5 = vadd.f32 %v1250_v7, %v1249_v19  ;;  %v1153_v43 = vmul.f32 %v3060_v45, %v3060_v45  ;;  %v1075_v48 = vsel %vm890_vm1, %v3060_v45, 0.0 }
 0x170   : > { %v1272_v19 = vsel %vm890_vm1, %v1151_v33, 0.0 }
 0x171   : > { %v1054_v8 = vadd.f32 %v1053_v32, %v1052_v35  ;;  %v1253_v37 = vadd.f32 %v1252_v14, %v1251_v5  ;;  %v1274_v35 = vsel %vm890_vm1, %v1152_v11, 0.0  ;;  %v1276_v21 = vsel %vm890_vm1, %v1153_v43, 0.0 }
 0x172   : > { %v1154_v5 = vmul.f32 %v3086_v31, %v3086_v31  ;;  %v1280_v31 = vsel %vm890_vm1, %v1155_v9, 0.0 }
 0x173   : > { %v1056_v60 = vadd.f32 %v1055_v22, %v1054_v8  ;;  %v1255_v41 = vadd.f32 %v1254_v20, %v1253_v37  ;;  %v1079_v8 = vsel %vm890_vm1, %v3056_v6, 0.0  ;;  %v1156_v37 = vmul.f32 %v3081_v61, %v3081_v61 }
 0x174   : > { %v1081_v20 = vsel %vm890_vm1, %v3081_v61, 0.0 }
 0x175   : > { %v1058_v27 = vadd.f32 %v1057_v52, %v1056_v60  ;;  %v1257_v38 = vadd.f32 %v1256_v34, %v1255_v41  ;;  %v1278_v60 = vsel %vm890_vm1, %v1154_v5, 0.0 }
 0x177   : > { %v1060_v4 = vadd.f32 %v1059_v18, %v1058_v27  ;;  %v1259_v47 = vadd.f32 %v1258_v44, %v1257_v38  ;;  %v1282_v18 = vsel %vm890_vm1, %v1156_v37, 0.0 }
 0x179   : > { %v1062_v30 = vadd.f32 %v1061_v10, %v1060_v4  ;;  %v1261_v46 = vadd.f32 %v1260_v40, %v1259_v47  ;;  %v955_v10 = vld [vmem:[#allocation3] sm:$0x1] }
 0x17b   : > { %v1064_v24 = vadd.f32 %v1063_v49, %v1062_v30  ;;  %v1263_v55 = vadd.f32 %v1262_v51, %v1261_v46  ;;  %v1092_v46 = vld [vmem:[#allocation4] sm:$0x1] }
 0x17d   : > { %v1066_v50 = vadd.f32 %v1065_v42, %v1064_v24  ;;  %v1265_v59 = vadd.f32 %v1264_v36, %v1263_v55 }
 0x17f   : > { %v1068_v15 = vadd.f32 %v1067_v63, %v1066_v50  ;;  %v1267_v26 = vadd.f32 %v1266_v3, %v1265_v59 }
 0x181   : > { %v1070_v58 = vadd.f32 %v1069_v54, %v1068_v15  ;;  %v1269_v2 = vadd.f32 %v1268_v23, %v1267_v26 }
 0x183   : > { %v1072_v13 = vadd.f32 %v1071_v1, %v1070_v58  ;;  %v1271_v16 = vadd.f32 %v1270_v17, %v1269_v2 }
 0x185   : > { %v1074_v57 = vadd.f32 %v1073_v0, %v1072_v13  ;;  %v1273_v7 = vadd.f32 %v1272_v19, %v1271_v16 }
 0x187   : > { %v1076_v14 = vadd.f32 %v1075_v48, %v1074_v57  ;;  %v1275_v32 = vadd.f32 %v1274_v35, %v1273_v7 }
 0x189   : > { %v1078_v45 = vadd.f32 %v1077_v12, %v1076_v14  ;;  %v1277_v22 = vadd.f32 %v1276_v21, %v1275_v32 }
 0x18b   : > { %v1080_v28 = vadd.f32 %v1079_v8, %v1078_v45  ;;  %v1279_v29 = vadd.f32 %v1278_v60, %v1277_v22 }
 0x18d   : > { %v1082_v52 = vadd.f32 %v1081_v20, %v1080_v28  ;;  %v1281_v41 = vadd.f32 %v1280_v31, %v1279_v29 }
 0x18f   : > { %v1083_v34 = vrot.slane %v1082_v52, 4  ;;  %v1283_v27 = vadd.f32 %v1282_v18, %v1281_v41 }
 0x191   : > { %v1084_v6 = vadd.f32 %v1083_v34, %v1082_v52  ;;  %v1284_v38 = vrot.slane %v1283_v27, 4 }
 0x193   : > { %v1085_v44 = vrot.slane %v1084_v6, 2  ;;  %v1285_v4 = vadd.f32 %v1284_v38, %v1283_v27 }
 0x195   : > { %v1086_v40 = vadd.f32 %v1085_v44, %v1084_v6  ;;  %v1286_v25 = vrot.slane %v1285_v4, 2 }
 0x197   : > { %v1087_v47 = vrot.slane %v1086_v40, 1  ;;  %v1287_v39 = vadd.f32 %v1286_v25, %v1285_v4 }
 0x199   : > { %v1088_v30 = vadd.f32 %v1087_v47, %v1086_v40  ;;  %v1288_v61 = vrot.slane %v1287_v39, 1 }
 0x19b   : > { %v1089_v49 = vadd.f32 %v1088_v30, %v955_v10  ;;  %v1289_v56 = vadd.f32 %v1288_v61, %v1287_v39 }
 0x19d   : > { %1091 = vst.msk [vmem:[#allocation3] sm:$0x1] %vm1090_vm2, %v1089_v49  ;;  %v1290_v24 = vadd.f32 %v1289_v56, %v1092_v46 }
 0x19f   : > { %1291 = vst.msk [vmem:[#allocation4] sm:$0x1] %vm1090_vm2, %v1290_v24 }
 0x1a0 PF: > { %p2150_p6 = scmp.ne.s32.totalorder %s2501_s18, 1 }
 0x1a1   : > { %v1377_v3 = vlaneseq (!%p2150_p6)  ;;  %v1303_v23 = vld [vmem:[%s3622_s3] sm:$0x1] (!%p2150_p6)  ;;  %v1313_v1 = vld [vmem:[#allocation2 + $0x8] sm:$0xff] (!%p2150_p6)  ;;  %v1314_v2 = vld [vmem:[#allocation2 + $0x10] sm:$0xff] (!%p2150_p6)  ;;  %vm1964_vm3 = vcmask (!%p2150_p6), 125952  }
 0x1a2   : > { %1295 = sbr.rel (%p2150_p6) target bundleno = 547 (0x223), region = 52  ;;  %v1307_v33 = vld [vmem:[%s3623_s4] sm:$0x1] (!%p2150_p6)  ;;  %v1315_v11 = vld [vmem:[#allocation2 + $0x18] sm:$0xff] (!%p2150_p6)  ;;  %v1317_v0 = vld [vmem:[#allocation2 + $0x28] sm:$0xff] (!%p2150_p6) }
 0x1a3   : > { %v1378_v15 = vshrl.u32 (!%p2150_p6), %v1377_v3, 7  ;;  %v1312_v58 = vld [vmem:[#allocation2] sm:$0xff] (!%p2150_p6)  ;;  %v1318_v16 = vld [vmem:[#allocation2 + $0x30] sm:$0xff] (!%p2150_p6)  ;;  %v1319_v48 = vld [vmem:[#allocation2 + $0x38] sm:$0xff] (!%p2150_p6) }
 0x1a4   : > { %v1296_v51 = vld [vmem:[#allocation3] sm:$0x1] (!%p2150_p6)  ;;  %v1321_v57 = vld [vmem:[#allocation2 + $0x48] sm:$0xff] (!%p2150_p6)  ;;  %v1322_v7 = vld [vmem:[#allocation2 + $0x50] sm:$0xff] (!%p2150_p6) }
 0x1a5   : > { %v1297_v42 = vmul.f32 (!%p2150_p6), 0.001953125, %v1296_v51  ;;  %v1379_v62 = vsub.s32 (!%p2150_p6), 0, %v1378_v15  ;;  %v1316_v13 = vld [vmem:[#allocation2 + $0x20] sm:$0xff] (!%p2150_p6)  ;;  %v1323_v32 = vld [vmem:[#allocation2 + $0x58] sm:$0xff] (!%p2150_p6)  ;;  %v1325_v9 = vld [vmem:[#allocation2 + $0x68] sm:$0xff] (!%p2150_p6) }
 0x1a6   : > { %v1298_v53 = vld [vmem:[#allocation4] sm:$0x1] (!%p2150_p6) }
 0x1a7   : > { %v1299_v55 = vmul.f32 (!%p2150_p6), 0.001953125, %v1298_v53  ;;  %v1300_v63 = vmul.f32 (!%p2150_p6), %v1297_v42, %v1297_v42  ;;  %v1320_v19 = vld [vmem:[#allocation2 + $0x40] sm:$0xff] (!%p2150_p6) }
 0x1a8   : > { %v1324_v12 = vld [vmem:[#allocation2 + $0x60] sm:$0xff] (!%p2150_p6) }
 0x1a9   : > { %v1301_v36 = vsub.f32 %v1299_v55, %v1300_v63 }
 0x1ab   : > { %v1302_v50 = vmax.f32 %v1301_v36, 0.0 }
 0x1ad   : > { %v1304_v59 = vadd.f32 1e-05, %v1302_v50 }
 0x1af   : > { %2485 = vrsqrt.f32 %v1304_v59 }
 0x1b9   : > { %v2486_v26 = vpop.eup %2485 }
 0x1ba   : > { %v1306_v54 = vmul.f32 %v2486_v26, %v1303_v23 }
 0x1bc   : > { %v1308_v17 = vmul.f32 %v1306_v54, %v1297_v42  ;;  %v3216_v43 = vrot.slane %v1306_v54, %v1379_v62 }
 0x1be   : > { %v1309_v35 = vsub.f32 %v1307_v33, %v1308_v17  ;;  %v1382_v14 = vmul.f32 %v3216_v43, %v1312_v58  ;;  %v1383_v21 = vmul.f32 %v3216_v43, %v1313_v1  ;;  %v1384_v5 = vmul.f32 %v3216_v43, %v1314_v2 }
 0x1bf   : > { %v1385_v45 = vmul.f32 %v3216_v43, %v1315_v11  ;;  %v1386_v8 = vmul.f32 %v3216_v43, %v1316_v13  ;;  %v1387_v22 = vmul.f32 %v3216_v43, %v1317_v0  ;;  %v1388_v37 = vmul.f32 %v3216_v43, %v1318_v16 }
 0x1c0   : > { %v3225_v28 = vrot.slane %v1309_v35, %v1379_v62  ;;  %v1389_v60 = vmul.f32 %v3216_v43, %v1319_v48  ;;  %v1390_v20 = vmul.f32 %v3216_v43, %v1320_v19  ;;  %v1391_v29 = vmul.f32 %v3216_v43, %v1321_v57  ;;  %v1326_v35 = vld [vmem:[#allocation2 + $0x70] sm:$0xff] }
 0x1c1   : > { %v1392_v31 = vmul.f32 %v3216_v43, %v1322_v7  ;;  %v1393_v52 = vmul.f32 %v3216_v43, %v1323_v32  ;;  %v3233_v41 = vmul.f32 %v3216_v43, %v1324_v12  ;;  %v3236_v18 = vmul.f32 %v3216_v43, %v1325_v9  ;;  %v1328_v9 = vld [vmem:[#allocation2 + $0x80] sm:$0xff] }
 0x1c2   : > { %v1452_v34 = vadd.f32 %v3225_v28, %v1382_v14  ;;  %v1453_v27 = vadd.f32 %v3225_v28, %v1383_v21  ;;  %v1454_v6 = vadd.f32 %v3225_v28, %v1384_v5  ;;  %v1455_v38 = vadd.f32 %v3225_v28, %v1385_v45  ;;  %v1327_v14 = vld [vmem:[#allocation2 + $0x78] sm:$0xff]  ;;  %v1329_v45 = vld [vmem:[#allocation2 + $0x88] sm:$0xff] }
 0x1c3   : > { %v1456_v44 = vadd.f32 %v3225_v28, %v1386_v8  ;;  %v1457_v4 = vadd.f32 %v3225_v28, %v1387_v22  ;;  %v1458_v40 = vadd.f32 %v3225_v28, %v1388_v37  ;;  %v1459_v25 = vadd.f32 %v3225_v28, %v1389_v60  ;;  %v1330_v8 = vld [vmem:[#allocation2 + $0x90] sm:$0xff] }
 0x1c4   : > { %vm1516_vm4 = vcmp.gt.f32.partialorder %v1452_v34, 0.0  ;;  %v1580_v47 = vmul.f32 0.2, %v1452_v34  ;;  %vm1517_vm5 = vcmp.gt.f32.partialorder %v1453_v27, 0.0  ;;  %v1581_v10 = vmul.f32 0.2, %v1453_v27 }
 0x1c5   : > { %vm1518_vm6 = vcmp.gt.f32.partialorder %v1454_v6, 0.0  ;;  %v1582_v39 = vmul.f32 0.2, %v1454_v6  ;;  %vm1519_vm7 = vcmp.gt.f32.partialorder %v1455_v38, 0.0  ;;  %v1583_v30 = vmul.f32 0.2, %v1455_v38 }
 0x1c6   : > { %v1644_v61 = vsel %vm1516_vm4, %v1452_v34, %v1580_v47  ;;  %v1645_v49 = vsel %vm1517_vm5, %v1453_v27, %v1581_v10  ;;  %vm1520_vm8 = vcmp.gt.f32.partialorder %v1456_v44, 0.0  ;;  %v1584_v46 = vmul.f32 0.2, %v1456_v44  ;;  %v1331_v10 = vld [vmem:[#allocation2 + $0x98] sm:$0xff] }
 0x1c7   : > { %v2220_v56 = vpack.c.bf16 %v1644_v61, %v1644_v61  ;;  %v2221_v24 = vpack.c.bf16 %v1645_v49, %v1645_v49  ;;  %v1646_v51 = vsel %vm1518_vm6, %v1454_v6, %v1582_v39  ;;  %v1647_v53 = vsel %vm1519_vm7, %v1455_v38, %v1583_v30 }
 0x1c8   : > { %v2222_v42 = vpack.c.bf16 %v1646_v51, %v1646_v51  ;;  %v2223_v55 = vpack.c.bf16 %v1647_v53, %v1647_v53  ;;  %v1648_v63 = vsel %vm1520_vm8, %v1456_v44, %v1584_v46  ;;  %vm1521_vm9 = vcmp.gt.f32.partialorder %v1457_v4, 0.0  ;;  %v1332_v51 = vld [vmem:[#allocation2 + $0xa0] sm:$0xff]  ;;  %v1333_v53 = vld [vmem:[#allocation2 + $0xa8] sm:$0xff] }
 0x1c9   : > { %1965 = vst.msk [vmem:[%s3624_s5] sm:$0xf] %vm1964_vm3, %v2220_v56  ;;  %1966 = vst.msk [vmem:[%s3624_s5 + $0x4] sm:$0xf] %vm1964_vm3, %v2221_v24  ;;  %v2224_v36 = vpack.c.bf16 %v1648_v63, %v1648_v63  ;;  %v1585_v50 = vmul.f32 0.2, %v1457_v4  ;;  %v1460_v15 = vadd.f32 %v3225_v28, %v1390_v20  ;;  %v1461_v23 = vadd.f32 %v3225_v28, %v1391_v29 }
 0x1ca   : > { %vm1522_vm10 = vcmp.gt.f32.partialorder %v1458_v40, 0.0  ;;  %v1586_v59 = vmul.f32 0.2, %v1458_v40  ;;  %1967 = vst.msk [vmem:[%s3624_s5 + $0x8] sm:$0xf] %vm1964_vm3, %v2222_v42  ;;  %vm1523_vm11 = vcmp.gt.f32.partialorder %v1459_v25, 0.0  ;;  %v1462_v54 = vadd.f32 %v3225_v28, %v1392_v31 }
 0x1cb   : > { %1968 = vst.msk [vmem:[%s3624_s5 + $0xc] sm:$0xf] %vm1964_vm3, %v2223_v55  ;;  %v1587_v3 = vmul.f32 0.2, %v1459_v25  ;;  %1969 = vst.msk [vmem:[%s3624_s5 + $0x10] sm:$0xf] %vm1964_vm3, %v2224_v36  ;;  %v1649_v62 = vsel %vm1521_vm9, %v1457_v4, %v1585_v50  ;;  %v1463_v33 = vadd.f32 %v3225_v28, %v1393_v52  ;;  %v1464_v57 = vadd.f32 %v3225_v28, %v3233_v41 }
 0x1cc   : > { %v1650_v26 = vsel %vm1522_vm10, %v1458_v40, %v1586_v59  ;;  %v2225_v58 = vpack.c.bf16 %v1649_v62, %v1649_v62  ;;  %vm1524_vm12 = vcmp.gt.f32.partialorder %v1460_v15, 0.0  ;;  %v1588_v13 = vmul.f32 0.2, %v1460_v15  ;;  %v1334_v42 = vld [vmem:[#allocation2 + $0xb0] sm:$0xff]  ;;  %v1335_v59 = vld [vmem:[#allocation2 + $0xb8] sm:$0xff] }
 0x1cd   : > { %v2226_v1 = vpack.c.bf16 %v1650_v26, %v1650_v26  ;;  %v1651_v2 = vsel %vm1523_vm11, %v1459_v25, %v1587_v3  ;;  %vm1525_vm13 = vcmp.gt.f32.partialorder %v1461_v23, 0.0  ;;  %v1589_v17 = vmul.f32 0.2, %v1461_v23  ;;  %v1336_v3 = vld [vmem:[#allocation2 + $0xc0] sm:$0xff] }
 0x1ce   : > { %v2227_v11 = vpack.c.bf16 %v1651_v2, %v1651_v2  ;;  %1970 = vst.msk [vmem:[%s3624_s5 + $0x14] sm:$0xf] %vm1964_vm3, %v2225_v58  ;;  %vm1526_vm14 = vcmp.gt.f32.partialorder %v1462_v54, 0.0  ;;  %v1590_v0 = vmul.f32 0.2, %v1462_v54  ;;  %vm1527_vm15 = vcmp.gt.f32.partialorder %v1463_v33, 0.0 }
 0x1cf   : > { %1971 = vst.msk [vmem:[%s3624_s5 + $0x18] sm:$0xf] %vm1964_vm3, %v2226_v1  ;;  %v1591_v16 = vmul.f32 0.2, %v1463_v33  ;;  %v1652_v48 = vsel %vm1524_vm12, %v1460_v15, %v1588_v13  ;;  %v1653_v19 = vsel %vm1525_vm13, %v1461_v23, %v1589_v17  ;;  %v1465_v7 = vadd.f32 %v3225_v28, %v3236_v18  ;;  %v1337_v15 = vld [vmem:[#allocation2 + $0xc8] sm:$0xff] }
 0x1d0   : > { %1972 = vst.msk [vmem:[%s3624_s5 + $0x1c] sm:$0xf] %vm1964_vm3, %v2227_v11  ;;  %v2228_v21 = vpack.c.bf16 %v1652_v48, %v1652_v48  ;;  %v2229_v5 = vpack.c.bf16 %v1653_v19, %v1653_v19  ;;  %v1654_v32 = vsel %vm1526_vm14, %v1462_v54, %v1590_v0  ;;  %vm1528_vm0 = vcmp.gt.f32.partialorder %v1464_v57, 0.0 }
 0x1d1   : > { %v1655_v12 = vsel %vm1527_vm15, %v1463_v33, %v1591_v16  ;;  %v2230_v22 = vpack.c.bf16 %v1654_v32, %v1654_v32  ;;  %v1592_v60 = vmul.f32 0.2, %v1464_v57  ;;  %vm1529_vm1 = vcmp.gt.f32.partialorder %v1465_v7, 0.0  ;;  %v1338_v33 = vld [vmem:[#allocation2 + $0xd0] sm:$0xff] }
 0x1d2   : > { %v2231_v37 = vpack.c.bf16 %v1655_v12, %v1655_v12  ;;  %1973 = vst.msk [vmem:[%s3624_s5 + $0x20] sm:$0xf] %vm1964_vm3, %v2228_v21  ;;  %1974 = vst.msk [vmem:[%s3624_s5 + $0x24] sm:$0xf] %vm1964_vm3, %v2229_v5  ;;  %v1593_v20 = vmul.f32 0.2, %v1465_v7  ;;  %v1396_v29 = vmul.f32 %v3216_v43, %v1326_v35  ;;  %v1397_v31 = vmul.f32 %v3216_v43, %v1327_v14 }
 0x1d3   : > { %1975 = vst.msk [vmem:[%s3624_s5 + $0x28] sm:$0xf] %vm1964_vm3, %v2230_v22  ;;  %v1656_v52 = vsel %vm1528_vm0, %v1464_v57, %v1592_v60  ;;  %v1398_v41 = vmul.f32 %v3216_v43, %v1328_v9  ;;  %v1399_v18 = vmul.f32 %v3216_v43, %v1329_v45  ;;  %v1400_v34 = vmul.f32 %v3216_v43, %v1330_v8  ;;  %v1339_v60 = vld [vmem:[#allocation2 + $0xd8] sm:$0xff] }
 0x1d4   : > { %1976 = vst.msk [vmem:[%s3624_s5 + $0x2c] sm:$0xf] %vm1964_vm3, %v2231_v37  ;;  %v2232_v27 = vpack.c.bf16 %v1656_v52, %v1656_v52  ;;  %v1657_v6 = vsel %vm1529_vm1, %v1465_v7, %v1593_v20  ;;  %v1466_v38 = vadd.f32 %v3225_v28, %v1396_v29  ;;  %v1467_v44 = vadd.f32 %v3225_v28, %v1397_v31  ;;  %v1340_v20 = vld [vmem:[#allocation2 + $0xe0] sm:$0xff] }
 0x1d5   : > { %v2233_v4 = vpack.c.bf16 %v1657_v6, %v1657_v6  ;;  %v1468_v40 = vadd.f32 %v3225_v28, %v1398_v41  ;;  %v1469_v25 = vadd.f32 %v3225_v28, %v1399_v18  ;;  %v1470_v47 = vadd.f32 %v3225_v28, %v1400_v34  ;;  %v1341_v41 = vld [vmem:[#allocation2 + $0xe8] sm:$0xff] }
 0x1d6   : > { %1977 = vst.msk [vmem:[%s3624_s5 + $0x30] sm:$0xf] %vm1964_vm3, %v2232_v27  ;;  %vm1530_vm2 = vcmp.gt.f32.partialorder %v1466_v38, 0.0  ;;  %v1594_v39 = vmul.f32 0.2, %v1466_v38  ;;  %vm1531_vm4 = vcmp.gt.f32.partialorder %v1467_v44, 0.0  ;;  %v1401_v54 = vmul.f32 %v3216_v43, %v1331_v10 }
 0x1d7   : > { %v1595_v30 = vmul.f32 0.2, %v1467_v44  ;;  %1978 = vst.msk [vmem:[%s3624_s5 + $0x34] sm:$0xf] %vm1964_vm3, %v2233_v4  ;;  %vm1532_vm5 = vcmp.gt.f32.partialorder %v1468_v40, 0.0  ;;  %vm1533_vm6 = vcmp.gt.f32.partialorder %v1469_v25, 0.0  ;;  %v1402_v1 = vmul.f32 %v3216_v43, %v1332_v51 }
 0x1d8   : > { %v1596_v61 = vmul.f32 0.2, %v1468_v40  ;;  %v1597_v49 = vmul.f32 0.2, %v1469_v25  ;;  %v1658_v46 = vsel %vm1530_vm2, %v1466_v38, %v1594_v39  ;;  %vm1534_vm7 = vcmp.gt.f32.partialorder %v1470_v47, 0.0 }
 0x1d9   : > { %v1659_v56 = vsel %vm1531_vm4, %v1467_v44, %v1595_v30  ;;  %v1598_v24 = vmul.f32 0.2, %v1470_v47  ;;  %v2234_v55 = vpack.c.bf16 %v1658_v46, %v1658_v46  ;;  %v1403_v2 = vmul.f32 %v3216_v43, %v1333_v53  ;;  %v1343_v53 = vld [vmem:[#allocation2 + $0xf8] sm:$0xff] }
 0x1da   : > { %v2235_v63 = vpack.c.bf16 %v1659_v56, %v1659_v56  ;;  %v1660_v36 = vsel %vm1532_vm5, %v1468_v40, %v1596_v61  ;;  %v1661_v50 = vsel %vm1533_vm6, %v1469_v25, %v1597_v49  ;;  %v1404_v11 = vmul.f32 %v3216_v43, %v1334_v42  ;;  %v1342_v25 = vld [vmem:[#allocation2 + $0xf0] sm:$0xff] }
 0x1db   : > { %v2236_v23 = vpack.c.bf16 %v1660_v36, %v1660_v36  ;;  %v2237_v62 = vpack.c.bf16 %v1661_v50, %v1661_v50  ;;  %v1662_v26 = vsel %vm1534_vm7, %v1470_v47, %v1598_v24  ;;  %1979 = vst.msk [vmem:[%s3624_s5 + $0x38] sm:$0xf] %vm1964_vm3, %v2234_v55  ;;  %v1471_v13 = vadd.f32 %v3225_v28, %v1401_v54  ;;  %v1344_v36 = vld [vmem:[#allocation2 + $0x100] sm:$0xff]  ;;  %v1345_v50 = vld [vmem:[#allocation2 + $0x108] sm:$0xff] }
 0x1dc   : > { %1980 = vst.msk [vmem:[%s3624_s5 + $0x3c] sm:$0xf] %vm1964_vm3, %v2235_v63  ;;  %v2238_v58 = vpack.c.bf16 %v1662_v26, %v1662_v26  ;;  %v1405_v17 = vmul.f32 %v3216_v43, %v1335_v59  ;;  %v1406_v0 = vmul.f32 %v3216_v43, %v1336_v3  ;;  %v1407_v16 = vmul.f32 %v3216_v43, %v1337_v15 }
 0x1dd   : > { %1981 = vst.msk [vmem:[%s3624_s5 + $0x40] sm:$0xf] %vm1964_vm3, %v2236_v23  ;;  %1982 = vst.msk [vmem:[%s3624_s5 + $0x44] sm:$0xf] %vm1964_vm3, %v2237_v62  ;;  %v1472_v48 = vadd.f32 %v3225_v28, %v1402_v1  ;;  %v1473_v19 = vadd.f32 %v3225_v28, %v1403_v2  ;;  %v1474_v57 = vadd.f32 %v3225_v28, %v1404_v11  ;;  %vm1535_vm8 = vcmp.gt.f32.partialorder %v1471_v13, 0.0  ;;  %v1346_v2 = vld [vmem:[#allocation2 + $0x110] sm:$0xff] }
 0x1de   : > { %1983 = vst.msk [vmem:[%s3624_s5 + $0x48] sm:$0xf] %vm1964_vm3, %v2238_v58  ;;  %v1408_v7 = vmul.f32 %v3216_v43, %v1338_v33  ;;  %v1599_v35 = vmul.f32 0.2, %v1471_v13  ;;  %v1475_v14 = vadd.f32 %v3225_v28, %v1405_v17  ;;  %v1476_v21 = vadd.f32 %v3225_v28, %v1406_v0  ;;  %v1347_v11 = vld [vmem:[#allocation2 + $0x118] sm:$0xff] }
 0x1df   : > { %vm1536_vm9 = vcmp.gt.f32.partialorder %v1472_v48, 0.0  ;;  %v1600_v5 = vmul.f32 0.2, %v1472_v48  ;;  %vm1537_vm10 = vcmp.gt.f32.partialorder %v1473_v19, 0.0  ;;  %v1601_v32 = vmul.f32 0.2, %v1473_v19 }
 0x1e0   : > { %v1663_v12 = vsel %vm1535_vm8, %v1471_v13, %v1599_v35  ;;  %vm1538_vm11 = vcmp.gt.f32.partialorder %v1474_v57, 0.0  ;;  %v1602_v9 = vmul.f32 0.2, %v1474_v57  ;;  %vm1539_vm12 = vcmp.gt.f32.partialorder %v1475_v14, 0.0  ;;  %v1348_v13 = vld [vmem:[#allocation2 + $0x120] sm:$0xff] }
 0x1e1   : > { %v2239_v45 = vpack.c.bf16 %v1663_v12, %v1663_v12  ;;  %v1664_v8 = vsel %vm1536_vm9, %v1472_v48, %v1600_v5  ;;  %v1665_v22 = vsel %vm1537_vm10, %v1473_v19, %v1601_v32  ;;  %v1603_v37 = vmul.f32 0.2, %v1475_v14  ;;  %v1349_v32 = vld [vmem:[#allocation2 + $0x128] sm:$0xff] }
 0x1e2   : > { %v2240_v29 = vpack.c.bf16 %v1664_v8, %v1664_v8  ;;  %v2241_v31 = vpack.c.bf16 %v1665_v22, %v1665_v22  ;;  %v1666_v52 = vsel %vm1538_vm11, %v1474_v57, %v1602_v9  ;;  %vm1540_vm13 = vcmp.gt.f32.partialorder %v1476_v21, 0.0 }
 0x1e3   : > { %1984 = vst.msk [vmem:[%s3624_s5 + $0x4c] sm:$0xf] %vm1964_vm3, %v2239_v45  ;;  %v2242_v18 = vpack.c.bf16 %v1666_v52, %v1666_v52  ;;  %v1667_v34 = vsel %vm1539_vm12, %v1475_v14, %v1603_v37  ;;  %v1604_v27 = vmul.f32 0.2, %v1476_v21  ;;  %v1477_v6 = vadd.f32 %v3225_v28, %v1407_v16 }
 0x1e4   : > { %1985 = vst.msk [vmem:[%s3624_s5 + $0x50] sm:$0xf] %vm1964_vm3, %v2240_v29  ;;  %1986 = vst.msk [vmem:[%s3624_s5 + $0x54] sm:$0xf] %vm1964_vm3, %v2241_v31  ;;  %v2243_v38 = vpack.c.bf16 %v1667_v34, %v1667_v34  ;;  %v1478_v44 = vadd.f32 %v3225_v28, %v1408_v7  ;;  %v1409_v4 = vmul.f32 %v3216_v43, %v1339_v60  ;;  %v1351_v34 = vld [vmem:[#allocation2 + $0x138] sm:$0xff] }
 0x1e5   : > { %v1410_v40 = vmul.f32 %v3216_v43, %v1340_v20  ;;  %1987 = vst.msk [vmem:[%s3624_s5 + $0x58] sm:$0xf] %vm1964_vm3, %v2242_v18  ;;  %v1668_v47 = vsel %vm1540_vm13, %v1476_v21, %v1604_v27  ;;  %vm1541_vm14 = vcmp.gt.f32.partialorder %v1477_v6, 0.0  ;;  %v1605_v10 = vmul.f32 0.2, %v1477_v6  ;;  %v1350_v18 = vld [vmem:[#allocation2 + $0x130] sm:$0xff] }
 0x1e6   : > { %v1411_v39 = vmul.f32 %v3216_v43, %v1341_v41  ;;  %1988 = vst.msk [vmem:[%s3624_s5 + $0x5c] sm:$0xf] %vm1964_vm3, %v2243_v38  ;;  %v2244_v30 = vpack.c.bf16 %v1668_v47, %v1668_v47  ;;  %vm1542_vm15 = vcmp.gt.f32.partialorder %v1478_v44, 0.0  ;;  %v1606_v61 = vmul.f32 0.2, %v1478_v44  ;;  %v1352_v27 = vld [vmem:[#allocation2 + $0x140] sm:$0xff] }
 0x1e7   : > { %v1479_v49 = vadd.f32 %v3225_v28, %v1409_v4  ;;  %v1669_v46 = vsel %vm1541_vm14, %v1477_v6, %v1605_v10  ;;  %v1480_v56 = vadd.f32 %v3225_v28, %v1410_v40  ;;  %v1412_v51 = vmul.f32 %v3216_v43, %v1342_v25 }
 0x1e8   : > { %v1481_v24 = vadd.f32 %v3225_v28, %v1411_v39  ;;  %1989 = vst.msk [vmem:[%s3624_s5 + $0x60] sm:$0xf] %vm1964_vm3, %v2244_v30  ;;  %v2245_v42 = vpack.c.bf16 %v1669_v46, %v1669_v46  ;;  %v1670_v55 = vsel %vm1542_vm15, %v1478_v44, %v1606_v61  ;;  %v1413_v26 = vmul.f32 %v3216_v43, %v1343_v53  ;;  %v1353_v61 = vld [vmem:[#allocation2 + $0x148] sm:$0xff] }
 0x1e9   : > { %vm1543_vm0 = vcmp.gt.f32.partialorder %v1479_v49, 0.0  ;;  %v1607_v63 = vmul.f32 0.2, %v1479_v49  ;;  %v2246_v59 = vpack.c.bf16 %v1670_v55, %v1670_v55  ;;  %vm1544_vm1 = vcmp.gt.f32.partialorder %v1480_v56, 0.0 }
 0x1ea   : > { %v1608_v3 = vmul.f32 0.2, %v1480_v56  ;;  %vm1545_vm2 = vcmp.gt.f32.partialorder %v1481_v24, 0.0  ;;  %1990 = vst.msk [vmem:[%s3624_s5 + $0x64] sm:$0xf] %vm1964_vm3, %v2245_v42  ;;  %v1482_v62 = vadd.f32 %v3225_v28, %v1412_v51  ;;  %v1414_v58 = vmul.f32 %v3216_v43, %v1344_v36  ;;  %v1355_v51 = vld [vmem:[#allocation2 + $0x158] sm:$0xff] }
 0x1eb   : > { %v1671_v15 = vsel %vm1543_vm0, %v1479_v49, %v1607_v63  ;;  %v1609_v23 = vmul.f32 0.2, %v1481_v24  ;;  %1991 = vst.msk [vmem:[%s3624_s5 + $0x68] sm:$0xf] %vm1964_vm3, %v2246_v59  ;;  %v1415_v1 = vmul.f32 %v3216_v43, %v1345_v50  ;;  %v1483_v19 = vadd.f32 %v3225_v28, %v1413_v26  ;;  %v1354_v49 = vld [vmem:[#allocation2 + $0x150] sm:$0xff]  ;;  %v1356_v26 = vld [vmem:[#allocation2 + $0x160] sm:$0xff] }
 0x1ec   : > { %v2247_v54 = vpack.c.bf16 %v1671_v15, %v1671_v15  ;;  %v1672_v33 = vsel %vm1544_vm1, %v1480_v56, %v1608_v3  ;;  %vm1546_vm4 = vcmp.gt.f32.partialorder %v1482_v62, 0.0  ;;  %v1610_v16 = vmul.f32 0.2, %v1482_v62 }
 0x1ed   : > { %v2248_v17 = vpack.c.bf16 %v1672_v33, %v1672_v33  ;;  %v1673_v0 = vsel %vm1545_vm2, %v1481_v24, %v1609_v23  ;;  %v1484_v57 = vadd.f32 %v3225_v28, %v1414_v58  ;;  %v1485_v7 = vadd.f32 %v3225_v28, %v1415_v1 }
 0x1ee   : > { %1992 = vst.msk [vmem:[%s3624_s5 + $0x6c] sm:$0xf] %vm1964_vm3, %v2247_v54  ;;  %v2249_v48 = vpack.c.bf16 %v1673_v0, %v1673_v0  ;;  %v1674_v35 = vsel %vm1546_vm4, %v1482_v62, %v1610_v16  ;;  %v1416_v14 = vmul.f32 %v3216_v43, %v1346_v2  ;;  %v1417_v21 = vmul.f32 %v3216_v43, %v1347_v11 }
 0x1ef   : > { %1993 = vst.msk [vmem:[%s3624_s5 + $0x70] sm:$0xf] %vm1964_vm3, %v2248_v17  ;;  %v1418_v5 = vmul.f32 %v3216_v43, %v1348_v13  ;;  %v2250_v12 = vpack.c.bf16 %v1674_v35, %v1674_v35  ;;  %vm1547_vm5 = vcmp.gt.f32.partialorder %v1483_v19, 0.0  ;;  %v1611_v9 = vmul.f32 0.2, %v1483_v19  ;;  %v1358_v35 = vld [vmem:[#allocation2 + $0x170] sm:$0xff] }
 0x1f0   : > { %1994 = vst.msk [vmem:[%s3624_s5 + $0x74] sm:$0xf] %vm1964_vm3, %v2249_v48  ;;  %vm1548_vm6 = vcmp.gt.f32.partialorder %v1484_v57, 0.0  ;;  %v1612_v45 = vmul.f32 0.2, %v1484_v57  ;;  %vm1549_vm7 = vcmp.gt.f32.partialorder %v1485_v7, 0.0  ;;  %v1486_v22 = vadd.f32 %v3225_v28, %v1416_v14 }
 0x1f1   : > { %v1613_v8 = vmul.f32 0.2, %v1485_v7  ;;  %1995 = vst.msk [vmem:[%s3624_s5 + $0x78] sm:$0xf] %vm1964_vm3, %v2250_v12  ;;  %v1675_v37 = vsel %vm1547_vm5, %v1483_v19, %v1611_v9  ;;  %v1487_v60 = vadd.f32 %v3225_v28, %v1417_v21  ;;  %v1488_v20 = vadd.f32 %v3225_v28, %v1418_v5  ;;  %v1357_v48 = vld [vmem:[#allocation2 + $0x168] sm:$0xff]  ;;  %v1359_v14 = vld [vmem:[#allocation2 + $0x178] sm:$0xff] }
 0x1f2   : > { %v1419_v29 = vmul.f32 %v3216_v43, %v1349_v32  ;;  %v2251_v31 = vpack.c.bf16 %v1675_v37, %v1675_v37  ;;  %v1676_v52 = vsel %vm1548_vm6, %v1484_v57, %v1612_v45  ;;  %vm1550_vm8 = vcmp.gt.f32.partialorder %v1486_v22, 0.0 }
 0x1f3   : > { %v1677_v41 = vsel %vm1549_vm7, %v1485_v7, %v1613_v8  ;;  %v2252_v6 = vpack.c.bf16 %v1676_v52, %v1676_v52  ;;  %v1614_v44 = vmul.f32 0.2, %v1486_v22  ;;  %vm1551_vm9 = vcmp.gt.f32.partialorder %v1487_v60, 0.0 }
 0x1f4   : > { %v2253_v38 = vpack.c.bf16 %v1677_v41, %v1677_v41  ;;  %1996 = vst.msk [vmem:[%s3624_s5 + $0x7c] sm:$0xf] %vm1964_vm3, %v2251_v31  ;;  %v1615_v4 = vmul.f32 0.2, %v1487_v60  ;;  %vm1552_vm10 = vcmp.gt.f32.partialorder %v1488_v20, 0.0  ;;  %v1489_v25 = vadd.f32 %v3225_v28, %v1419_v29  ;;  %v1361_v29 = vld [vmem:[#allocation2 + $0x188] sm:$0xff] }
 0x1f5   : > { %v1616_v40 = vmul.f32 0.2, %v1488_v20  ;;  %1997 = vst.msk [vmem:[%s3624_s5 + $0x80] sm:$0xf] %vm1964_vm3, %v2252_v6  ;;  %v1678_v47 = vsel %vm1550_vm8, %v1486_v22, %v1614_v44  ;;  %v1420_v10 = vmul.f32 %v3216_v43, %v1350_v18  ;;  %v1421_v39 = vmul.f32 %v3216_v43, %v1351_v34  ;;  %v1362_v31 = vld [vmem:[#allocation2 + $0x190] sm:$0xff] }
 0x1f6   : > { %1998 = vst.msk [vmem:[%s3624_s5 + $0x84] sm:$0xf] %vm1964_vm3, %v2253_v38  ;;  %v1422_v30 = vmul.f32 %v3216_v43, %v1352_v27  ;;  %v2254_v46 = vpack.c.bf16 %v1678_v47, %v1678_v47  ;;  %v1679_v56 = vsel %vm1551_vm9, %v1487_v60, %v1615_v4  ;;  %vm1553_vm11 = vcmp.gt.f32.partialorder %v1489_v25, 0.0  ;;  %v1363_v47 = vld [vmem:[#allocation2 + $0x198] sm:$0xff] }
 0x1f7   : > { %v1680_v24 = vsel %vm1552_vm10, %v1488_v20, %v1616_v40  ;;  %v2255_v53 = vpack.c.bf16 %v1679_v56, %v1679_v56  ;;  %v1617_v55 = vmul.f32 0.2, %v1489_v25  ;;  %v1490_v63 = vadd.f32 %v3225_v28, %v1420_v10  ;;  %v1360_v20 = vld [vmem:[#allocation2 + $0x180] sm:$0xff] }
 0x1f8   : > { %v2256_v42 = vpack.c.bf16 %v1680_v24, %v1680_v24  ;;  %1999 = vst.msk [vmem:[%s3624_s5 + $0x88] sm:$0xf] %vm1964_vm3, %v2254_v46  ;;  %v1491_v36 = vadd.f32 %v3225_v28, %v1421_v39  ;;  %v1492_v50 = vadd.f32 %v3225_v28, %v1422_v30  ;;  %v1423_v59 = vmul.f32 %v3216_v43, %v1353_v61 }
 0x1f9   : > { %v1424_v3 = vmul.f32 %v3216_v43, %v1354_v49  ;;  %2000 = vst.msk [vmem:[%s3624_s5 + $0x8c] sm:$0xf] %vm1964_vm3, %v2255_v53  ;;  %v1681_v15 = vsel %vm1553_vm11, %v1489_v25, %v1617_v55  ;;  %vm1554_vm12 = vcmp.gt.f32.partialorder %v1490_v63, 0.0  ;;  %v1618_v23 = vmul.f32 0.2, %v1490_v63 }
 0x1fa   : > { %2001 = vst.msk [vmem:[%s3624_s5 + $0x90] sm:$0xf] %vm1964_vm3, %v2256_v42  ;;  %v1425_v62 = vmul.f32 %v3216_v43, %v1355_v51  ;;  %v2257_v54 = vpack.c.bf16 %v1681_v15, %v1681_v15  ;;  %vm1555_vm13 = vcmp.gt.f32.partialorder %v1491_v36, 0.0  ;;  %v1619_v33 = vmul.f32 0.2, %v1491_v36 }
 0x1fb   : > { %vm1556_vm14 = vcmp.gt.f32.partialorder %v1492_v50, 0.0  ;;  %v1682_v58 = vsel %vm1554_vm12, %v1490_v63, %v1618_v23  ;;  %v1620_v1 = vmul.f32 0.2, %v1492_v50  ;;  %v1493_v2 = vadd.f32 %v3225_v28, %v1423_v59  ;;  %v1364_v63 = vld [vmem:[#allocation2 + $0x1a0] sm:$0xff] }
 0x1fc   : > { %v1494_v11 = vadd.f32 %v3225_v28, %v1424_v3  ;;  %2002 = vst.msk [vmem:[%s3624_s5 + $0x94] sm:$0xf] %vm1964_vm3, %v2257_v54  ;;  %v2258_v13 = vpack.c.bf16 %v1682_v58, %v1682_v58  ;;  %v1683_v17 = vsel %vm1555_vm13, %v1491_v36, %v1619_v33  ;;  %v1495_v0 = vadd.f32 %v3225_v28, %v1425_v62  ;;  %v1365_v36 = vld [vmem:[#allocation2 + $0x1a8] sm:$0xff] }
 0x1fd   : > { %v1426_v16 = vmul.f32 %v3216_v43, %v1356_v26  ;;  %v2259_v19 = vpack.c.bf16 %v1683_v17, %v1683_v17  ;;  %v1684_v57 = vsel %vm1556_vm14, %v1492_v50, %v1620_v1  ;;  %vm1557_vm15 = vcmp.gt.f32.partialorder %v1493_v2, 0.0  ;;  %v1366_v50 = vld [vmem:[#allocation2 + $0x1b0] sm:$0xff] }
 0x1fe   : > { %v1621_v7 = vmul.f32 0.2, %v1493_v2  ;;  %2003 = vst.msk [vmem:[%s3624_s5 + $0x98] sm:$0xf] %vm1964_vm3, %v2258_v13  ;;  %v2260_v21 = vpack.c.bf16 %v1684_v57, %v1684_v57  ;;  %vm1558_vm0 = vcmp.gt.f32.partialorder %v1494_v11, 0.0  ;;  %vm1559_vm1 = vcmp.gt.f32.partialorder %v1495_v0, 0.0 }
 0x1ff   : > { %v1622_v5 = vmul.f32 0.2, %v1494_v11  ;;  %2004 = vst.msk [vmem:[%s3624_s5 + $0x9c] sm:$0xf] %vm1964_vm3, %v2259_v19  ;;  %v1623_v12 = vmul.f32 0.2, %v1495_v0  ;;  %v1496_v9 = vadd.f32 %v3225_v28, %v1426_v16  ;;  %v1427_v45 = vmul.f32 %v3216_v43, %v1357_v48 }
 0x200   : > { %v1685_v32 = vsel %vm1557_vm15, %v1493_v2, %v1621_v7  ;;  %2005 = vst.msk [vmem:[%s3624_s5 + $0xa0] sm:$0xf] %vm1964_vm3, %v2260_v21  ;;  %v1428_v37 = vmul.f32 %v3216_v43, %v1358_v35  ;;  %v1429_v60 = vmul.f32 %v3216_v43, %v1359_v14  ;;  %v1430_v4 = vmul.f32 %v3216_v43, %v1360_v20  ;;  %v1367_v2 = vld [vmem:[#allocation2 + $0x1b8] sm:$0xff]  ;;  %v1369_v16 = vld [vmem:[#allocation2 + $0x1c8] sm:$0xff] }
 0x201   : > { %v2261_v8 = vpack.c.bf16 %v1685_v32, %v1685_v32  ;;  %v1686_v22 = vsel %vm1558_vm0, %v1494_v11, %v1622_v5  ;;  %v1687_v41 = vsel %vm1559_vm1, %v1495_v0, %v1623_v12  ;;  %vm1560_vm2 = vcmp.gt.f32.partialorder %v1496_v9, 0.0  ;;  %v1368_v11 = vld [vmem:[#allocation2 + $0x1c0] sm:$0xff] }
 0x202   : > { %v2262_v52 = vpack.c.bf16 %v1686_v22, %v1686_v22  ;;  %v1624_v18 = vmul.f32 0.2, %v1496_v9  ;;  %v2263_v34 = vpack.c.bf16 %v1687_v41, %v1687_v41  ;;  %v1497_v27 = vadd.f32 %v3225_v28, %v1427_v45  ;;  %v1370_v45 = vld [vmem:[#allocation2 + $0x1d0] sm:$0xff] }
 0x203   : > { %2006 = vst.msk [vmem:[%s3624_s5 + $0xa4] sm:$0xf] %vm1964_vm3, %v2261_v8  ;;  %v1498_v6 = vadd.f32 %v3225_v28, %v1428_v37  ;;  %v1499_v38 = vadd.f32 %v3225_v28, %v1429_v60  ;;  %v1431_v40 = vmul.f32 %v3216_v43, %v1361_v29  ;;  %v1432_v25 = vmul.f32 %v3216_v43, %v1362_v31 }
 0x204   : > { %2007 = vst.msk [vmem:[%s3624_s5 + $0xa8] sm:$0xf] %vm1964_vm3, %v2262_v52  ;;  %v1688_v44 = vsel %vm1560_vm2, %v1496_v9, %v1624_v18  ;;  %2008 = vst.msk [vmem:[%s3624_s5 + $0xac] sm:$0xf] %vm1964_vm3, %v2263_v34  ;;  %vm1561_vm4 = vcmp.gt.f32.partialorder %v1497_v27, 0.0  ;;  %v1500_v49 = vadd.f32 %v3225_v28, %v1430_v4  ;;  %v1433_v51 = vmul.f32 %v3216_v43, %v1363_v47  ;;  %v1371_v34 = vld [vmem:[#allocation2 + $0x1d8] sm:$0xff] }
 0x205   : > { %v2264_v10 = vpack.c.bf16 %v1688_v44, %v1688_v44  ;;  %v1625_v39 = vmul.f32 0.2, %v1497_v27  ;;  %vm1562_vm5 = vcmp.gt.f32.partialorder %v1498_v6, 0.0  ;;  %v1626_v30 = vmul.f32 0.2, %v1498_v6  ;;  %v1372_v44 = vld [vmem:[#allocation2 + $0x1e0] sm:$0xff] }
 0x206   : > { %vm1563_vm6 = vcmp.gt.f32.partialorder %v1499_v38, 0.0  ;;  %v1627_v61 = vmul.f32 0.2, %v1499_v38  ;;  %v1501_v56 = vadd.f32 %v3225_v28, %v1431_v40  ;;  %v1502_v24 = vadd.f32 %v3225_v28, %v1432_v25  ;;  %v1373_v4 = vld [vmem:[#allocation2 + $0x1e8] sm:$0xff] }
 0x207   : > { %2009 = vst.msk [vmem:[%s3624_s5 + $0xb0] sm:$0xf] %vm1964_vm3, %v2264_v10  ;;  %v1689_v46 = vsel %vm1561_vm4, %v1497_v27, %v1625_v39  ;;  %v1690_v42 = vsel %vm1562_vm5, %v1498_v6, %v1626_v30  ;;  %vm1564_vm7 = vcmp.gt.f32.partialorder %v1500_v49, 0.0  ;;  %v1628_v15 = vmul.f32 0.2, %v1500_v49 }
 0x208   : > { %v2265_v53 = vpack.c.bf16 %v1689_v46, %v1689_v46  ;;  %v1691_v55 = vsel %vm1563_vm6, %v1499_v38, %v1627_v61  ;;  %v2266_v59 = vpack.c.bf16 %v1690_v42, %v1690_v42  ;;  %vm1565_vm8 = vcmp.gt.f32.partialorder %v1501_v56, 0.0 }
 0x209   : > { %v2267_v3 = vpack.c.bf16 %v1691_v55, %v1691_v55  ;;  %v1629_v23 = vmul.f32 0.2, %v1501_v56  ;;  %vm1566_vm9 = vcmp.gt.f32.partialorder %v1502_v24, 0.0  ;;  %v1630_v62 = vmul.f32 0.2, %v1502_v24 }
 0x20a   : > { %2010 = vst.msk [vmem:[%s3624_s5 + $0xb4] sm:$0xf] %vm1964_vm3, %v2265_v53  ;;  %v1503_v26 = vadd.f32 %v3225_v28, %v1433_v51  ;;  %2011 = vst.msk [vmem:[%s3624_s5 + $0xb8] sm:$0xf] %vm1964_vm3, %v2266_v59  ;;  %v1692_v54 = vsel %vm1564_vm7, %v1500_v49, %v1628_v15  ;;  %v1434_v33 = vmul.f32 %v3216_v43, %v1364_v63  ;;  %v1375_v51 = vld [vmem:[#allocation2 + $0x1f8] sm:$0xff] }
 0x20b   : > { %2012 = vst.msk [vmem:[%s3624_s5 + $0xbc] sm:$0xf] %vm1964_vm3, %v2267_v3  ;;  %v1435_v58 = vmul.f32 %v3216_v43, %v1365_v36  ;;  %v1436_v1 = vmul.f32 %v3216_v43, %v1366_v50  ;;  %v2268_v13 = vpack.c.bf16 %v1692_v54, %v1692_v54  ;;  %v1693_v17 = vsel %vm1565_vm8, %v1501_v56, %v1629_v23 }
 0x20c   : > { %v1694_v0 = vsel %vm1566_vm9, %v1502_v24, %v1630_v62  ;;  %vm1567_vm10 = vcmp.gt.f32.partialorder %v1503_v26, 0.0  ;;  %v2269_v48 = vpack.c.bf16 %v1693_v17, %v1693_v17  ;;  %v1631_v57 = vmul.f32 0.2, %v1503_v26  ;;  %v1374_v24 = vld [vmem:[#allocation2 + $0x1f0] sm:$0xff] }
 0x20d   : > { %v2270_v19 = vpack.c.bf16 %v1694_v0, %v1694_v0  ;;  %v1504_v7 = vadd.f32 %v3225_v28, %v1434_v33  ;;  %2013 = vst.msk [vmem:[%s3624_s5 + $0xc0] sm:$0xf] %vm1964_vm3, %v2268_v13  ;;  %v1505_v35 = vadd.f32 %v3225_v28, %v1435_v58  ;;  %v1506_v14 = vadd.f32 %v3225_v28, %v1436_v1 }
 0x20e   : > { %v1437_v21 = vmul.f32 %v3216_v43, %v1367_v2  ;;  %v1438_v5 = vmul.f32 %v3216_v43, %v1368_v11  ;;  %2014 = vst.msk [vmem:[%s3624_s5 + $0xc4] sm:$0xf] %vm1964_vm3, %v2269_v48  ;;  %v1695_v32 = vsel %vm1567_vm10, %v1503_v26, %v1631_v57  ;;  %v1439_v9 = vmul.f32 %v3216_v43, %v1369_v16 }
 0x20f   : > { %2015 = vst.msk [vmem:[%s3624_s5 + $0xc8] sm:$0xf] %vm1964_vm3, %v2270_v19  ;;  %vm1568_vm11 = vcmp.gt.f32.partialorder %v1504_v7, 0.0  ;;  %v1632_v12 = vmul.f32 0.2, %v1504_v7  ;;  %v2271_v8 = vpack.c.bf16 %v1695_v32, %v1695_v32  ;;  %vm1569_vm12 = vcmp.gt.f32.partialorder %v1505_v35, 0.0 }
 0x210   : > { %v1633_v22 = vmul.f32 0.2, %v1505_v35  ;;  %vm1570_vm13 = vcmp.gt.f32.partialorder %v1506_v14, 0.0  ;;  %v1634_v60 = vmul.f32 0.2, %v1506_v14  ;;  %v1507_v20 = vadd.f32 %v3225_v28, %v1437_v21 }
 0x211   : > { %v1696_v37 = vsel %vm1568_vm11, %v1504_v7, %v1632_v12  ;;  %v1508_v29 = vadd.f32 %v3225_v28, %v1438_v5  ;;  %2016 = vst.msk [vmem:[%s3624_s5 + $0xcc] sm:$0xf] %vm1964_vm3, %v2271_v8  ;;  %v1509_v41 = vadd.f32 %v3225_v28, %v1439_v9  ;;  %v1440_v18 = vmul.f32 %v3216_v43, %v1370_v45 }
 0x212   : > { %v2272_v31 = vpack.c.bf16 %v1696_v37, %v1696_v37  ;;  %v1697_v52 = vsel %vm1569_vm12, %v1505_v35, %v1633_v22  ;;  %v1698_v6 = vsel %vm1570_vm13, %v1506_v14, %v1634_v60  ;;  %vm1571_vm14 = vcmp.gt.f32.partialorder %v1507_v20, 0.0 }
 0x213   : > { %v2273_v27 = vpack.c.bf16 %v1697_v52, %v1697_v52  ;;  %v1635_v38 = vmul.f32 0.2, %v1507_v20  ;;  %v2274_v40 = vpack.c.bf16 %v1698_v6, %v1698_v6  ;;  %vm1572_vm15 = vcmp.gt.f32.partialorder %v1508_v29, 0.0 }
 0x214   : > { %2017 = vst.msk [vmem:[%s3624_s5 + $0xd0] sm:$0xf] %vm1964_vm3, %v2272_v31  ;;  %v1636_v25 = vmul.f32 0.2, %v1508_v29  ;;  %vm1573_vm0 = vcmp.gt.f32.partialorder %v1509_v41, 0.0  ;;  %v1510_v39 = vadd.f32 %v3225_v28, %v1440_v18  ;;  %v1441_v30 = vmul.f32 %v3216_v43, %v1371_v34 }
 0x215   : > { %2018 = vst.msk [vmem:[%s3624_s5 + $0xd4] sm:$0xf] %vm1964_vm3, %v2273_v27  ;;  %v1699_v47 = vsel %vm1571_vm14, %v1507_v20, %v1635_v38  ;;  %v1637_v10 = vmul.f32 0.2, %v1509_v41  ;;  %2019 = vst.msk [vmem:[%s3624_s5 + $0xd8] sm:$0xf] %vm1964_vm3, %v2274_v40  ;;  %v1442_v46 = vmul.f32 %v3216_v43, %v1372_v44  ;;  %v1443_v56 = vmul.f32 %v3216_v43, %v1373_v4 }
 0x216   : > { %v2275_v61 = vpack.c.bf16 %v1699_v47, %v1699_v47  ;;  %v1700_v49 = vsel %vm1572_vm15, %v1508_v29, %v1636_v25  ;;  %vm1574_vm1 = vcmp.gt.f32.partialorder %v1510_v39, 0.0  ;;  %v1638_v55 = vmul.f32 0.2, %v1510_v39 }
 0x217   : > { %v2276_v53 = vpack.c.bf16 %v1700_v49, %v1700_v49  ;;  %v1701_v42 = vsel %vm1573_vm0, %v1509_v41, %v1637_v10  ;;  %v1511_v36 = vadd.f32 %v3225_v28, %v1441_v30  ;;  %v1512_v50 = vadd.f32 %v3225_v28, %v1442_v46 }
 0x218   : > { %2020 = vst.msk [vmem:[%s3624_s5 + $0xdc] sm:$0xf] %vm1964_vm3, %v2275_v61  ;;  %v2277_v63 = vpack.c.bf16 %v1701_v42, %v1701_v42  ;;  %v1513_v59 = vadd.f32 %v3225_v28, %v1443_v56  ;;  %v1702_v3 = vsel %vm1574_vm1, %v1510_v39, %v1638_v55  ;;  %v1444_v15 = vmul.f32 %v3216_v43, %v1374_v24 }
 0x219   : > { %2021 = vst.msk [vmem:[%s3624_s5 + $0xe0] sm:$0xf] %vm1964_vm3, %v2276_v53  ;;  %v1445_v23 = vmul.f32 %v3216_v43, %v1375_v51  ;;  %v2278_v62 = vpack.c.bf16 %v1702_v3, %v1702_v3  ;;  %vm1575_vm2 = vcmp.gt.f32.partialorder %v1511_v36, 0.0  ;;  %v1639_v26 = vmul.f32 0.2, %v1511_v36 }
 0x21a   : > { %2022 = vst.msk [vmem:[%s3624_s5 + $0xe4] sm:$0xf] %vm1964_vm3, %v2277_v63  ;;  %vm1576_vm4 = vcmp.gt.f32.partialorder %v1512_v50, 0.0  ;;  %v1640_v54 = vmul.f32 0.2, %v1512_v50  ;;  %vm1577_vm5 = vcmp.gt.f32.partialorder %v1513_v59, 0.0  ;;  %v1514_v58 = vadd.f32 %v3225_v28, %v1444_v15 }
 0x21b   : > { %v1641_v33 = vmul.f32 0.2, %v1513_v59  ;;  %2023 = vst.msk [vmem:[%s3624_s5 + $0xe8] sm:$0xf] %vm1964_vm3, %v2278_v62  ;;  %v1703_v43 = vsel %vm1575_vm2, %v1511_v36, %v1639_v26  ;;  %v1515_v1 = vadd.f32 %v3225_v28, %v1445_v23 }
 0x21c   : > { %v2279_v2 = vpack.c.bf16 %v1703_v43, %v1703_v43  ;;  %v1704_v11 = vsel %vm1576_vm4, %v1512_v50, %v1640_v54  ;;  %vm1578_vm6 = vcmp.gt.f32.partialorder %v1514_v58, 0.0  ;;  %v1642_v16 = vmul.f32 0.2, %v1514_v58 }
 0x21d   : > { %v1705_v13 = vsel %vm1577_vm5, %v1513_v59, %v1641_v33  ;;  %v2280_v17 = vpack.c.bf16 %v1704_v11, %v1704_v11  ;;  %vm1579_vm7 = vcmp.gt.f32.partialorder %v1515_v1, 0.0  ;;  %v1643_v48 = vmul.f32 0.2, %v1515_v1 }
 0x21e   : > { %v2281_v0 = vpack.c.bf16 %v1705_v13, %v1705_v13  ;;  %2024 = vst.msk [vmem:[%s3624_s5 + $0xec] sm:$0xf] %vm1964_vm3, %v2279_v2  ;;  %v1706_v28 = vsel %vm1578_vm6, %v1514_v58, %v1642_v16 }
 0x21f   : > { %2025 = vst.msk [vmem:[%s3624_s5 + $0xf0] sm:$0xf] %vm1964_vm3, %v2280_v17  ;;  %v2282_v19 = vpack.c.bf16 %v1706_v28, %v1706_v28  ;;  %v1707_v57 = vsel %vm1579_vm7, %v1515_v1, %v1643_v48 }
 0x220   : > { %2026 = vst.msk [vmem:[%s3624_s5 + $0xf4] sm:$0xf] %vm1964_vm3, %v2281_v0  ;;  %v2283_v7 = vpack.c.bf16 %v1707_v57, %v1707_v57 }
 0x221   : > { %2027 = vst.msk [vmem:[%s3624_s5 + $0xf8] sm:$0xf] %vm1964_vm3, %v2282_v19 }
 0x222   : > { %2028 = vst.msk [vmem:[%s3624_s5 + $0xfc] sm:$0xf] %vm1964_vm3, %v2283_v7 }
 0x223 PF: > { %s15_s20 = sadd.s32 1, %s2509_s20   ;;  %s3625_s18 = smov %s2505_s19 }
 0x224   : > { %p12_p7 = scmp.ge.s32.totalorder %s15_s20, 4   ;;  %s3626_s19 = smov %s3628_s21 }
 0x226   :  { %14 = sbr.rel (!%p12_p7) target bundleno = 2 (0x2), region = 84 }

// kernel: discriminator_forward.7
= control target key start
LH: loop header
LB: loop body
LE: loop exit
PB: predicated region body
PF: predicated region fallthrough
CT: control target
= control target key end

     0   :  { %s1281_s18 = smov 0   ;;  %s1283_s19 = smov 0   ;;  %s1626_s0 = inlined_call_operand.vmem [shape: bf16[128,256], index: 0, kind: input, shape index: {}]   ;;  %s1627_s1 = inlined_call_operand.vmem [shape: bf16[256,32], index: 1, kind: input, shape index: {}]   ;;  %s1628_s2 = inlined_call_operand.vmem [shape: f32[1,32], index: 2, kind: input, shape index: {}]   ;;  %s1629_s3 = inlined_call_operand.vmem [shape: f32[1,32], index: 3, kind: input, shape index: {}]   ;;  %s1630_s4 = inlined_call_operand.vmem [shape: f32[1,32], index: 4, kind: input, shape index: {}]   ;;  %s1631_s5 = inlined_call_operand.vmem [shape: bf16[128,32], index: 5, kind: output, shape index: {}]  }
   0x1   :  { %s1285_s20 = smov 0  }
   0x2 LB: > { %s27_s21 = sadd.s32 1, %s1244_s19  ;;  %p1005_p0 = scmp.ge.s32.totalorder %s1248_s20, 1  ;;  %s1248_s20 = sphi %s1285_s20, %s15_s20   ;;  %s1244_s19 = sphi %s1283_s19, %s1633_s19   ;;  %s1240_s18 = sphi %s1281_s18, %s1632_s18  }
   0x3   : > { %p29_p1 = scmp.ge.s32.totalorder %s27_s21, 2  ;;  %p211_p2 = scmp.lt.s32.totalorder %s1248_s20, 3 }
   0x5   : > { %s1635_s21 = smov (%p29_p1, %s27_s21), 0  ;;  %p212_p3 = pnand %p1005_p0, %p211_p2 }
   0x6   : > { %p263_p4 = scmp.eq.s32.totalorder (!%p212_p3), %s1240_s18, 0 }
   0x7   : > { %215 = sbr.rel (%p212_p3) target bundleno = 395 (0x18b), region = 40 }
   0xe   : > { %268 = sbr.rel (!%p263_p4) target bundleno = 21 (0x15), region = 44  ;;  %vm269_vm0 = vcmask (%p263_p4), 253952   ;;  %v1250_v0 = vmov (%p263_p4), 0.0  }
   0xf   : > { %270 = vst.msk [vmem:[#allocation3] sm:$0x1] (%p263_p4), %vm269_vm0, %v1250_v0  ;;  %271 = vst.msk [vmem:[#allocation4] sm:$0x1] (%p263_p4), %vm269_vm0, %v1250_v0 }
  0x15 PF: > { %p1007_p5 = scmp.ne.s32.totalorder %s1240_s18, 0 }
  0x16   : > { %v1184_v1 = vld [vmem:[%s1627_s1 + $0x40] sm:$0xff] (!%p1007_p5)   ;;  %v1186_v3 = vld [vmem:[%s1627_s1 + $0x48] sm:$0xff] (!%p1007_p5)   ;;  %v1188_v5 = vld [vmem:[%s1627_s1 + $0x50] sm:$0xff] (!%p1007_p5)   ;;  %vm605_vm1 = vcmask (!%p1007_p5), 261120   ;;  %vm661_vm2 = vcmask (!%p1007_p5), 253952  }
  0x17   : > { %274 = sbr.rel (%p1007_p5) target bundleno = 334 (0x14e), region = 48  ;;  %v1185_v2 = vld [vmem:[%s1627_s1] sm:$0xff] (!%p1007_p5)   ;;  %1079 = vmatprep.subr.bf16.mxu0 (!%p1007_p5), %v1184_v1  ;;  %1143 = vmatprep.subr.bf16.mxu1 (!%p1007_p5), %v1184_v1  ;;  %v1187_v4 = vld [vmem:[%s1627_s1 + $0x8] sm:$0xff] (!%p1007_p5)   ;;  %v1189_v6 = vld [vmem:[%s1627_s1 + $0x10] sm:$0xff] (!%p1007_p5)  }
  0x18   : > { %1080 = vmatpush3.bf16.msra.mxu0 (!%p1007_p5), %v1185_v2  ;;  %1151 = vmatpush3.bf16.msra.mxu1 (!%p1007_p5), %v1185_v2  ;;  %v1190_v7 = vld [vmem:[%s1627_s1 + $0x58] sm:$0xff] (!%p1007_p5)   ;;  %v1192_v9 = vld [vmem:[%s1627_s1 + $0x60] sm:$0xff] (!%p1007_p5)   ;;  %v1194_v11 = vld [vmem:[%s1627_s1 + $0x68] sm:$0xff] (!%p1007_p5)  }
  0x19   : > { %1081 = vmatprep.subr.bf16.mxu0 (!%p1007_p5), %v1186_v3  ;;  %1144 = vmatprep.subr.bf16.mxu1 (!%p1007_p5), %v1186_v3  ;;  %v1191_v8 = vld [vmem:[%s1627_s1 + $0x18] sm:$0xff] (!%p1007_p5)   ;;  %v1193_v10 = vld [vmem:[%s1627_s1 + $0x20] sm:$0xff] (!%p1007_p5)   ;;  %v1195_v13 = vld [vmem:[%s1627_s1 + $0x28] sm:$0xff] (!%p1007_p5)  }
  0x1a   : > { %v1202_v12 = vld [vmem:[%s1626_s0 + $0x4] ss:$8 sps:$4 sm:$0xff] (!%p1007_p5)   ;;  %v1196_v15 = vld [vmem:[%s1627_s1 + $0x70] sm:$0xff] (!%p1007_p5)   ;;  %v1198_v17 = vld [vmem:[%s1627_s1 + $0x78] sm:$0xff] (!%p1007_p5)  }
  0x1b   : > { %v1208_v14 = vld [vmem:[%s1626_s0 + $0x44] ss:$8 sps:$4 sm:$0xff] (!%p1007_p5)   ;;  %538 = vmatprep.mubr.bf16.mxu0 (!%p1007_p5), %v1202_v12  ;;  %v1197_v16 = vld [vmem:[%s1627_s1 + $0x30] sm:$0xff] (!%p1007_p5)   ;;  %v1199_v18 = vld [vmem:[%s1627_s1 + $0x38] sm:$0xff] (!%p1007_p5)  }
  0x1c   : > { %1082 = vmatpush3.bf16.msra.mxu0 (!%p1007_p5), %v1187_v4  ;;  %1152 = vmatpush3.bf16.msra.mxu1 (!%p1007_p5), %v1187_v4  ;;  %v1200_v19 = vld [vmem:[%s1626_s0] ss:$8 sps:$4 sm:$0xff] (!%p1007_p5)   ;;  %v1203_v21 = vld [vmem:[%s1626_s0 + $0x14] ss:$8 sps:$4 sm:$0xff] (!%p1007_p5)   ;;  %v1205_v23 = vld [vmem:[%s1626_s0 + $0x10] ss:$8 sps:$4 sm:$0xff] (!%p1007_p5)  }
  0x1d   : > { %1083 = vmatprep.subr.bf16.mxu0 (!%p1007_p5), %v1188_v5  ;;  %1145 = vmatprep.subr.bf16.mxu1 (!%p1007_p5), %v1188_v5  ;;  %v1206_v20 = vld [vmem:[%s1626_s0 + $0x40] ss:$8 sps:$4 sm:$0xff] (!%p1007_p5)   ;;  %v1212_v22 = vld [vmem:[%s1626_s0 + $0x54] ss:$8 sps:$4 sm:$0xff] (!%p1007_p5)   ;;  %v1214_v24 = vld [vmem:[%s1626_s0 + $0x50] ss:$8 sps:$4 sm:$0xff] (!%p1007_p5)  }
  0x1e   : > { %570 = vmatprep.mubr.bf16.mxu1 %v1208_v14  ;;  %v1209_v25 = vld [vmem:[%s1626_s0 + $0x24] ss:$8 sps:$4 sm:$0xff]   ;;  %v1211_v27 = vld [vmem:[%s1626_s0 + $0x20] ss:$8 sps:$4 sm:$0xff]   ;;  %v1215_v29 = vld [vmem:[%s1626_s0 + $0x34] ss:$8 sps:$4 sm:$0xff]  }
  0x1f   : > { %v1218_v26 = vld [vmem:[%s1626_s0 + $0x64] ss:$8 sps:$4 sm:$0xff]   ;;  %v1220_v28 = vld [vmem:[%s1626_s0 + $0x60] ss:$8 sps:$4 sm:$0xff]   ;;  %v1221_v30 = vld [vmem:[%s1626_s0 + $0x74] ss:$8 sps:$4 sm:$0xff]  }
  0x20   : > { %1084 = vmatpush3.bf16.msra.mxu0 %v1189_v6  ;;  %1153 = vmatpush3.bf16.msra.mxu1 %v1189_v6  ;;  %v1217_v31 = vld [vmem:[%s1626_s0 + $0x30] ss:$8 sps:$4 sm:$0xff]   ;;  %v1402_v35 = vld [vmem:[%s1628_s2] ss:$0 sm:$0xff] }
  0x21   : > { %1085 = vmatprep.subr.bf16.mxu0 %v1190_v7  ;;  %1146 = vmatprep.subr.bf16.mxu1 %v1190_v7  ;;  %v1223_v32 = vld [vmem:[%s1626_s0 + $0x70] ss:$8 sps:$4 sm:$0xff]  }
  0x24   : > { %1086 = vmatpush3.bf16.msra.mxu0 %v1191_v8  ;;  %1154 = vmatpush3.bf16.msra.mxu1 %v1191_v8 }
  0x25   : > { %1087 = vmatprep.subr.bf16.mxu0 %v1192_v9  ;;  %1147 = vmatprep.subr.bf16.mxu1 %v1192_v9 }
  0x28   : > { %1088 = vmatpush3.bf16.msra.mxu0 %v1193_v10  ;;  %1155 = vmatpush3.bf16.msra.mxu1 %v1193_v10 }
  0x29   : > { %1089 = vmatprep.subr.bf16.mxu0 %v1194_v11  ;;  %1148 = vmatprep.subr.bf16.mxu1 %v1194_v11 }
  0x2c   : > { %1090 = vmatpush3.bf16.msra.mxu0 %v1195_v13  ;;  %1156 = vmatpush3.bf16.msra.mxu1 %v1195_v13 }
  0x2d   : > { %1091 = vmatprep.subr.bf16.mxu0 %v1196_v15  ;;  %1149 = vmatprep.subr.bf16.mxu1 %v1196_v15 }
  0x30   : > { %1092 = vmatpush3.bf16.msra.mxu0 %v1197_v16  ;;  %1157 = vmatpush3.bf16.msra.mxu1 %v1197_v16 }
  0x31   : > { %1093 = vmatprep.subr.bf16.mxu0 %v1198_v17  ;;  %1150 = vmatprep.subr.bf16.mxu1 %v1198_v17 }
  0x34   : > { %1094 = vmatpush3.bf16.msra.mxu0 %v1199_v18  ;;  %1158 = vmatpush3.bf16.msra.mxu1 %v1199_v18 }
  0x37   : > { %539 = vmatmul.mubr.bf16.vlgmr.msra.gmra.mrb[0].mxu0 %v1200_v19  ;;  %571 = vmatmul.mubr.bf16.vlgmr.msra.gmra.mrb[0].mxu1 %v1206_v20 }
  0x38   : > { %546 = vmatprep.mubr.bf16.mxu0 %v1203_v21  ;;  %578 = vmatprep.mubr.bf16.mxu1 %v1212_v22 }
  0x3f   : > { %547 = vmatmul.mubr.bf16.gmra.mrb[4].mxu0 %v1205_v23  ;;  %579 = vmatmul.mubr.bf16.gmra.mrb[4].mxu1 %v1214_v24 }
  0x40   : > { %554 = vmatprep.mubr.bf16.mxu0 %v1209_v25  ;;  %586 = vmatprep.mubr.bf16.mxu1 %v1218_v26 }
  0x47   : > { %555 = vmatmul.mubr.bf16.gmra.mrb[8].mxu0 %v1211_v27  ;;  %587 = vmatmul.mubr.bf16.gmra.mrb[8].mxu1 %v1220_v28 }
  0x48   : > { %562 = vmatprep.mubr.bf16.mxu0 %v1215_v29  ;;  %594 = vmatprep.mubr.bf16.mxu1 %v1221_v30 }
  0x4f   : > { %563 = vmatmul.mubr.bf16.gmra.mrb[12].mxu0 %v1217_v31  ;;  %595 = vmatmul.mubr.bf16.gmra.mrb[12].mxu1 %v1223_v32 }
 0x10a   : > { %v1095_v33 = vpop.f32.mrb[0].mxu0  ;;  %v1119_v34 = vpop.f32.mrb[0].mxu1 }
 0x10b   : > { %v1096_v36 = vpop.f32.mrb[1].mxu0  ;;  %v1120_v37 = vpop.f32.mrb[1].mxu1 }
 0x10c   : > { %v1097_v38 = vadd.f32 %v1096_v36, %v1095_v33  ;;  %v1098_v39 = vpop.f32.mrb[2].mxu0  ;;  %v1121_v40 = vadd.f32 %v1120_v37, %v1119_v34  ;;  %v1122_v41 = vpop.f32.mrb[2].mxu1 }
 0x10d   : > { %v1099_v42 = vpop.f32.mrb[3].mxu0  ;;  %v1123_v43 = vpop.f32.mrb[3].mxu1 }
 0x10e   : > { %v541_v44 = vadd.f32 %v1097_v38, %v1402_v35  ;;  %v1100_v45 = vadd.f32 %v1099_v42, %v1098_v39  ;;  %v1406_v46 = vadd.f32 %v1121_v40, %v1402_v35  ;;  %v1124_v47 = vadd.f32 %v1123_v43, %v1122_v41 }
 0x110   : > { %606 = vst.msk [vmem:[#allocation2] sm:$0xff] %vm605_vm1, %v541_v44  ;;  %v664_v48 = vmul.f32 %v541_v44, %v541_v44  ;;  %v544_v49 = vadd.f32 %v1100_v45, %v1402_v35  ;;  %614 = vst.msk [vmem:[#allocation2 + $0x40] sm:$0xff] %vm605_vm1, %v1406_v46  ;;  %v1413_v50 = vadd.f32 %v1124_v47, %v1402_v35  ;;  %v623_v51 = vsel %vm605_vm1, %v541_v44, 0.0 }
 0x112   : > { %607 = vst.msk [vmem:[#allocation2 + $0x8] sm:$0xff] %vm605_vm1, %v544_v49  ;;  %v624_v52 = vsel %vm605_vm1, %v544_v49, 0.0  ;;  %v665_v53 = vmul.f32 %v544_v49, %v544_v49  ;;  %v1101_v54 = vpop.f32.mrb[4].mxu0  ;;  %v1125_v55 = vpop.f32.mrb[4].mxu1  ;;  %615 = vst.msk [vmem:[#allocation2 + $0x48] sm:$0xff] %vm605_vm1, %v1413_v50  ;;  %v680_v59 = vsel %vm605_vm1, %v664_v48, 0.0 }
 0x113   : > { %v625_v56 = vadd.f32 %v624_v52, %v623_v51  ;;  %v1102_v57 = vpop.f32.mrb[5].mxu0  ;;  %v1126_v58 = vpop.f32.mrb[5].mxu1 }
 0x114   : > { %v681_v60 = vsel %vm605_vm1, %v665_v53, 0.0  ;;  %v1103_v61 = vadd.f32 %v1102_v57, %v1101_v54  ;;  %v1104_v62 = vpop.f32.mrb[6].mxu0  ;;  %v1127_v63 = vadd.f32 %v1126_v58, %v1125_v55  ;;  %v1128_v0 = vpop.f32.mrb[6].mxu1 }
 0x115   : > { %v682_v1 = vadd.f32 %v681_v60, %v680_v59  ;;  %v1105_v2 = vpop.f32.mrb[7].mxu0  ;;  %v1129_v3 = vpop.f32.mrb[7].mxu1 }
 0x116   : > { %v549_v4 = vadd.f32 %v1103_v61, %v1402_v35  ;;  %v1106_v5 = vadd.f32 %v1105_v2, %v1104_v62  ;;  %v1424_v6 = vadd.f32 %v1127_v63, %v1402_v35  ;;  %v1130_v7 = vadd.f32 %v1129_v3, %v1128_v0 }
 0x118   : > { %608 = vst.msk [vmem:[#allocation2 + $0x10] sm:$0xff] %vm605_vm1, %v549_v4  ;;  %v626_v8 = vsel %vm605_vm1, %v549_v4, 0.0  ;;  %v666_v9 = vmul.f32 %v549_v4, %v549_v4  ;;  %v552_v10 = vadd.f32 %v1106_v5, %v1402_v35  ;;  %616 = vst.msk [vmem:[#allocation2 + $0x50] sm:$0xff] %vm605_vm1, %v1424_v6  ;;  %v1432_v12 = vadd.f32 %v1130_v7, %v1402_v35 }
 0x119   : > { %v627_v11 = vadd.f32 %v626_v8, %v625_v56  ;;  %v672_v4 = vmul.f32 %v1406_v46, %v1406_v46 }
 0x11a   : > { %v683_v13 = vsel %vm605_vm1, %v666_v9, 0.0  ;;  %609 = vst.msk [vmem:[#allocation2 + $0x18] sm:$0xff] %vm605_vm1, %v552_v10  ;;  %v628_v14 = vsel %vm605_vm1, %v552_v10, 0.0  ;;  %v667_v15 = vmul.f32 %v552_v10, %v552_v10  ;;  %v1107_v16 = vpop.f32.mrb[8].mxu0  ;;  %v1131_v17 = vpop.f32.mrb[8].mxu1  ;;  %617 = vst.msk [vmem:[#allocation2 + $0x58] sm:$0xff] %vm605_vm1, %v1432_v12 }
 0x11b   : > { %v684_v18 = vadd.f32 %v683_v13, %v682_v1  ;;  %v629_v19 = vadd.f32 %v628_v14, %v627_v11  ;;  %v1108_v20 = vpop.f32.mrb[9].mxu0  ;;  %v1132_v21 = vpop.f32.mrb[9].mxu1  ;;  %v638_v11 = vsel %vm605_vm1, %v1406_v46, 0.0  ;;  %v642_v46 = vsel %vm605_vm1, %v1424_v6, 0.0 }
 0x11c   : > { %v685_v22 = vsel %vm605_vm1, %v667_v15, 0.0  ;;  %v1109_v23 = vadd.f32 %v1108_v20, %v1107_v16  ;;  %v1110_v24 = vpop.f32.mrb[10].mxu0  ;;  %v1133_v25 = vadd.f32 %v1132_v21, %v1131_v17  ;;  %v1134_v26 = vpop.f32.mrb[10].mxu1  ;;  %v695_v16 = vsel %vm605_vm1, %v672_v4, 0.0 }
 0x11d   : > { %v686_v27 = vadd.f32 %v685_v22, %v684_v18  ;;  %v1111_v28 = vpop.f32.mrb[11].mxu0  ;;  %v1135_v29 = vpop.f32.mrb[11].mxu1  ;;  %v640_v17 = vsel %vm605_vm1, %v1413_v50, 0.0  ;;  %v674_v18 = vmul.f32 %v1424_v6, %v1424_v6  ;;  %v675_v22 = vmul.f32 %v1432_v12, %v1432_v12 }
 0x11e   : > { %v557_v30 = vadd.f32 %v1109_v23, %v1402_v35  ;;  %v1112_v31 = vadd.f32 %v1111_v28, %v1110_v24  ;;  %v1442_v32 = vadd.f32 %v1133_v25, %v1402_v35  ;;  %v1136_v33 = vadd.f32 %v1135_v29, %v1134_v26 }
 0x11f   : > { %v699_v25 = vsel %vm605_vm1, %v674_v18, 0.0  ;;  %v701_v29 = vsel %vm605_vm1, %v675_v22, 0.0 }
 0x120   : > { %610 = vst.msk [vmem:[#allocation2 + $0x20] sm:$0xff] %vm605_vm1, %v557_v30  ;;  %v630_v34 = vsel %vm605_vm1, %v557_v30, 0.0  ;;  %v668_v36 = vmul.f32 %v557_v30, %v557_v30  ;;  %v560_v37 = vadd.f32 %v1112_v31, %v1402_v35  ;;  %618 = vst.msk [vmem:[#allocation2 + $0x60] sm:$0xff] %vm605_vm1, %v1442_v32  ;;  %v1450_v39 = vadd.f32 %v1136_v33, %v1402_v35 }
 0x121   : > { %v631_v38 = vadd.f32 %v630_v34, %v629_v19  ;;  %v676_v26 = vmul.f32 %v1442_v32, %v1442_v32  ;;  %v646_v6 = vsel %vm605_vm1, %v1442_v32, 0.0 }
 0x122   : > { %v687_v40 = vsel %vm605_vm1, %v668_v36, 0.0  ;;  %611 = vst.msk [vmem:[#allocation2 + $0x28] sm:$0xff] %vm605_vm1, %v560_v37  ;;  %v632_v41 = vsel %vm605_vm1, %v560_v37, 0.0  ;;  %v669_v42 = vmul.f32 %v560_v37, %v560_v37  ;;  %v1113_v43 = vpop.f32.mrb[12].mxu0  ;;  %v1137_v44 = vpop.f32.mrb[12].mxu1  ;;  %619 = vst.msk [vmem:[#allocation2 + $0x68] sm:$0xff] %vm605_vm1, %v1450_v39  ;;  %v677_v30 = vmul.f32 %v1450_v39, %v1450_v39 }
 0x123   : > { %v688_v45 = vadd.f32 %v687_v40, %v686_v27  ;;  %v633_v47 = vadd.f32 %v632_v41, %v631_v38  ;;  %v1114_v48 = vpop.f32.mrb[13].mxu0  ;;  %v1138_v49 = vpop.f32.mrb[13].mxu1  ;;  %v703_v36 = vsel %vm605_vm1, %v676_v26, 0.0 }
 0x124   : > { %v689_v51 = vsel %vm605_vm1, %v669_v42, 0.0  ;;  %v1115_v52 = vadd.f32 %v1114_v48, %v1113_v43  ;;  %v1116_v53 = vpop.f32.mrb[14].mxu0  ;;  %v1139_v54 = vadd.f32 %v1138_v49, %v1137_v44  ;;  %v1140_v55 = vpop.f32.mrb[14].mxu1  ;;  %v705_v41 = vsel %vm605_vm1, %v677_v30, 0.0 }
 0x125   : > { %v690_v56 = vadd.f32 %v689_v51, %v688_v45  ;;  %v1117_v57 = vpop.f32.mrb[15].mxu0  ;;  %v1141_v58 = vpop.f32.mrb[15].mxu1 }
 0x126   : > { %v565_v59 = vadd.f32 %v1115_v52, %v1402_v35  ;;  %v1118_v60 = vadd.f32 %v1117_v57, %v1116_v53  ;;  %v597_v61 = vadd.f32 %v1139_v54, %v1402_v35  ;;  %v1142_v62 = vadd.f32 %v1141_v58, %v1140_v55 }
 0x128   : > { %612 = vst.msk [vmem:[#allocation2 + $0x30] sm:$0xff] %vm605_vm1, %v565_v59  ;;  %v634_v63 = vsel %vm605_vm1, %v565_v59, 0.0  ;;  %v670_v0 = vmul.f32 %v565_v59, %v565_v59  ;;  %v568_v1 = vadd.f32 %v1118_v60, %v1402_v35  ;;  %620 = vst.msk [vmem:[#allocation2 + $0x70] sm:$0xff] %vm605_vm1, %v597_v61  ;;  %v600_v3 = vadd.f32 %v1142_v62, %v1402_v35  ;;  %v622_v60 = vld [vmem:[#allocation3] sm:$0x1] }
 0x129   : > { %v635_v2 = vadd.f32 %v634_v63, %v633_v47  ;;  %v673_v35 = vmul.f32 %v1413_v50, %v1413_v50  ;;  %v644_v50 = vsel %vm605_vm1, %v1432_v12, 0.0  ;;  %v678_v31 = vmul.f32 %v597_v61, %v597_v61  ;;  %v663_v63 = vld [vmem:[#allocation4] sm:$0x1] }
 0x12a   : > { %v691_v5 = vsel %vm605_vm1, %v670_v0, 0.0  ;;  %613 = vst.msk [vmem:[#allocation2 + $0x38] sm:$0xff] %vm605_vm1, %v568_v1  ;;  %v636_v7 = vsel %vm605_vm1, %v568_v1, 0.0  ;;  %v671_v8 = vmul.f32 %v568_v1, %v568_v1  ;;  %621 = vst.msk [vmem:[#allocation2 + $0x78] sm:$0xff] %vm605_vm1, %v600_v3  ;;  %v648_v12 = vsel %vm605_vm1, %v1450_v39, 0.0 }
 0x12b   : > { %v692_v9 = vadd.f32 %v691_v5, %v690_v56  ;;  %v637_v10 = vadd.f32 %v636_v7, %v635_v2  ;;  %v697_v21 = vsel %vm605_vm1, %v673_v35, 0.0  ;;  %v650_v37 = vsel %vm605_vm1, %v597_v61, 0.0 }
 0x12c   : > { %v693_v13 = vsel %vm605_vm1, %v671_v8, 0.0  ;;  %v707_v42 = vsel %vm605_vm1, %v678_v31, 0.0  ;;  %v679_v32 = vmul.f32 %v600_v3, %v600_v3  ;;  %v652_v45 = vsel %vm605_vm1, %v600_v3, 0.0 }
 0x12d   : > { %v639_v14 = vadd.f32 %v638_v11, %v637_v10  ;;  %v694_v15 = vadd.f32 %v693_v13, %v692_v9 }
 0x12e   : > { %v709_v49 = vsel %vm605_vm1, %v679_v32, 0.0 }
 0x12f   : > { %v641_v19 = vadd.f32 %v640_v17, %v639_v14  ;;  %v696_v20 = vadd.f32 %v695_v16, %v694_v15 }
 0x131   : > { %v698_v23 = vadd.f32 %v697_v21, %v696_v20  ;;  %v643_v24 = vadd.f32 %v642_v46, %v641_v19 }
 0x133   : > { %v645_v27 = vadd.f32 %v644_v50, %v643_v24  ;;  %v700_v28 = vadd.f32 %v699_v25, %v698_v23 }
 0x135   : > { %v647_v33 = vadd.f32 %v646_v6, %v645_v27  ;;  %v702_v34 = vadd.f32 %v701_v29, %v700_v28 }
 0x137   : > { %v704_v38 = vadd.f32 %v703_v36, %v702_v34  ;;  %v649_v40 = vadd.f32 %v648_v12, %v647_v33 }
 0x139   : > { %v706_v43 = vadd.f32 %v705_v41, %v704_v38  ;;  %v651_v44 = vadd.f32 %v650_v37, %v649_v40 }
 0x13b   : > { %v708_v47 = vadd.f32 %v707_v42, %v706_v43  ;;  %v653_v48 = vadd.f32 %v652_v45, %v651_v44 }
 0x13d   : > { %v654_v51 = vrot.slane %v653_v48, 4  ;;  %v710_v52 = vadd.f32 %v709_v49, %v708_v47 }
 0x13f   : > { %v655_v39 = vadd.f32 %v654_v51, %v653_v48  ;;  %v711_v53 = vrot.slane %v710_v52, 4 }
 0x141   : > { %v656_v54 = vrot.slane %v655_v39, 2  ;;  %v712_v55 = vadd.f32 %v711_v53, %v710_v52 }
 0x143   : > { %v657_v56 = vadd.f32 %v656_v54, %v655_v39  ;;  %v713_v57 = vrot.slane %v712_v55, 2 }
 0x145   : > { %v658_v58 = vrot.slane %v657_v56, 1  ;;  %v714_v59 = vadd.f32 %v713_v57, %v712_v55 }
 0x147   : > { %v659_v61 = vadd.f32 %v658_v58, %v657_v56  ;;  %v715_v62 = vrot.slane %v714_v59, 1 }
 0x149   : > { %v660_v0 = vadd.f32 %v659_v61, %v622_v60  ;;  %v716_v1 = vadd.f32 %v715_v62, %v714_v59 }
 0x14b   : > { %662 = vst.msk [vmem:[#allocation3] sm:$0x1] %vm661_vm2, %v660_v0  ;;  %v717_v2 = vadd.f32 %v716_v1, %v663_v63 }
 0x14d   : > { %718 = vst.msk [vmem:[#allocation4] sm:$0x1] %vm661_vm2, %v717_v2 }
 0x14e PF: > { %p1041_p6 = scmp.ne.s32.totalorder %s1240_s18, 1 }
 0x14f   : > { %v756_v35 = vlaneseq (!%p1041_p6)  ;;  %v730_v14 = vld [vmem:[%s1629_s3] sm:$0x1] (!%p1041_p6)  ;;  %v740_v20 = vld [vmem:[#allocation2 + $0x8] sm:$0xff] (!%p1041_p6)  ;;  %v741_v21 = vld [vmem:[#allocation2 + $0x10] sm:$0xff] (!%p1041_p6)  ;;  %vm911_vm3 = vcmask (!%p1041_p6), 257024  }
 0x150   : > { %722 = sbr.rel (%p1041_p6) target bundleno = 395 (0x18b), region = 52  ;;  %v734_v18 = vld [vmem:[%s1630_s4] sm:$0x1] (!%p1041_p6)  ;;  %v742_v46 = vld [vmem:[#allocation2 + $0x18] sm:$0xff] (!%p1041_p6)  ;;  %v744_v25 = vld [vmem:[#allocation2 + $0x28] sm:$0xff] (!%p1041_p6) }
 0x151   : > { %v757_v13 = vshrl.u32 (!%p1041_p6), %v756_v35, 7  ;;  %v739_v19 = vld [vmem:[#allocation2] sm:$0xff] (!%p1041_p6)  ;;  %v745_v50 = vld [vmem:[#allocation2 + $0x30] sm:$0xff] (!%p1041_p6)  ;;  %v746_v26 = vld [vmem:[#allocation2 + $0x38] sm:$0xff] (!%p1041_p6) }
 0x152   : > { %v723_v3 = vld [vmem:[#allocation3] sm:$0x1] (!%p1041_p6)  ;;  %v748_v28 = vld [vmem:[#allocation2 + $0x48] sm:$0xff] (!%p1041_p6)  ;;  %v749_v29 = vld [vmem:[#allocation2 + $0x50] sm:$0xff] (!%p1041_p6) }
 0x153   : > { %v724_v5 = vmul.f32 (!%p1041_p6), 0.0078125, %v723_v3  ;;  %v758_v15 = vsub.s32 (!%p1041_p6), 0, %v757_v13  ;;  %v743_v22 = vld [vmem:[#allocation2 + $0x20] sm:$0xff] (!%p1041_p6)  ;;  %v750_v34 = vld [vmem:[#allocation2 + $0x58] sm:$0xff] (!%p1041_p6)  ;;  %v752_v12 = vld [vmem:[#allocation2 + $0x68] sm:$0xff] (!%p1041_p6) }
 0x154   : > { %v725_v4 = vld [vmem:[#allocation4] sm:$0x1] (!%p1041_p6) }
 0x155   : > { %v726_v7 = vmul.f32 (!%p1041_p6), 0.0078125, %v725_v4  ;;  %v727_v8 = vmul.f32 (!%p1041_p6), %v724_v5, %v724_v5  ;;  %v747_v27 = vld [vmem:[#allocation2 + $0x40] sm:$0xff] (!%p1041_p6) }
 0x156   : > { %v751_v36 = vld [vmem:[#allocation2 + $0x60] sm:$0xff] (!%p1041_p6) }
 0x157   : > { %v728_v9 = vsub.f32 %v726_v7, %v727_v8 }
 0x159   : > { %v729_v10 = vmax.f32 %v728_v9, 0.0 }
 0x15b   : > { %v731_v11 = vadd.f32 1e-05, %v729_v10 }
 0x15d   : > { %1224 = vrsqrt.f32 %v731_v11 }
 0x167   : > { %v1225_v16 = vpop.eup %1224 }
 0x168   : > { %v733_v17 = vmul.f32 %v1225_v16, %v730_v14 }
 0x16a   : > { %v735_v23 = vmul.f32 %v733_v17, %v724_v5  ;;  %v1511_v24 = vrot.slane %v733_v17, %v758_v15 }
 0x16c   : > { %v736_v6 = vsub.f32 %v734_v18, %v735_v23  ;;  %v761_v30 = vmul.f32 %v1511_v24, %v739_v19  ;;  %v762_v31 = vmul.f32 %v1511_v24, %v740_v20  ;;  %v763_v33 = vmul.f32 %v1511_v24, %v741_v21 }
 0x16d   : > { %v764_v37 = vmul.f32 %v1511_v24, %v742_v46  ;;  %v765_v38 = vmul.f32 %v1511_v24, %v743_v22  ;;  %v766_v40 = vmul.f32 %v1511_v24, %v744_v25  ;;  %v767_v41 = vmul.f32 %v1511_v24, %v745_v50 }
 0x16e   : > { %v1520_v42 = vrot.slane %v736_v6, %v758_v15  ;;  %v768_v32 = vmul.f32 %v1511_v24, %v746_v26  ;;  %v769_v43 = vmul.f32 %v1511_v24, %v747_v27  ;;  %v770_v44 = vmul.f32 %v1511_v24, %v748_v28  ;;  %v753_v6 = vld [vmem:[#allocation2 + $0x70] sm:$0xff] }
 0x16f   : > { %v771_v45 = vmul.f32 %v1511_v24, %v749_v29  ;;  %v772_v47 = vmul.f32 %v1511_v24, %v750_v34  ;;  %v1528_v48 = vmul.f32 %v1511_v24, %v751_v36  ;;  %v1531_v49 = vmul.f32 %v1511_v24, %v752_v12 }
 0x170   : > { %v783_v51 = vadd.f32 %v1520_v42, %v761_v30  ;;  %v784_v52 = vadd.f32 %v1520_v42, %v762_v31  ;;  %v785_v39 = vadd.f32 %v1520_v42, %v763_v33  ;;  %v786_v53 = vadd.f32 %v1520_v42, %v764_v37  ;;  %v754_v30 = vld [vmem:[#allocation2 + $0x78] sm:$0xff] }
 0x171   : > { %v787_v54 = vadd.f32 %v1520_v42, %v765_v38  ;;  %v788_v55 = vadd.f32 %v1520_v42, %v766_v40  ;;  %v789_v56 = vadd.f32 %v1520_v42, %v767_v41  ;;  %v790_v57 = vadd.f32 %v1520_v42, %v768_v32 }
 0x172   : > { %vm799_vm4 = vcmp.gt.f32.partialorder %v783_v51, 0.0  ;;  %v815_v58 = vmul.f32 0.2, %v783_v51  ;;  %vm800_vm5 = vcmp.gt.f32.partialorder %v784_v52, 0.0  ;;  %v816_v59 = vmul.f32 0.2, %v784_v52 }
 0x173   : > { %vm801_vm6 = vcmp.gt.f32.partialorder %v785_v39, 0.0  ;;  %v817_v60 = vmul.f32 0.2, %v785_v39  ;;  %vm802_vm7 = vcmp.gt.f32.partialorder %v786_v53, 0.0  ;;  %v818_v61 = vmul.f32 0.2, %v786_v53 }
 0x174   : > { %v831_v62 = vsel %vm799_vm4, %v783_v51, %v815_v58  ;;  %v832_v63 = vsel %vm800_vm5, %v784_v52, %v816_v59  ;;  %vm803_vm8 = vcmp.gt.f32.partialorder %v787_v54, 0.0  ;;  %v819_v0 = vmul.f32 0.2, %v787_v54 }
 0x175   : > { %v1063_v1 = vpack.c.bf16 %v831_v62, %v831_v62  ;;  %v1064_v2 = vpack.c.bf16 %v832_v63, %v832_v63  ;;  %v833_v3 = vsel %vm801_vm6, %v785_v39, %v817_v60  ;;  %v834_v4 = vsel %vm802_vm7, %v786_v53, %v818_v61 }
 0x176   : > { %v1065_v5 = vpack.c.bf16 %v833_v3, %v833_v3  ;;  %v1066_v7 = vpack.c.bf16 %v834_v4, %v834_v4  ;;  %v835_v8 = vsel %vm803_vm8, %v787_v54, %v819_v0  ;;  %vm804_vm9 = vcmp.gt.f32.partialorder %v788_v55, 0.0 }
 0x177   : > { %912 = vst.msk [vmem:[%s1631_s5] sm:$0xf] %vm911_vm3, %v1063_v1  ;;  %913 = vst.msk [vmem:[%s1631_s5 + $0x4] sm:$0xf] %vm911_vm3, %v1064_v2  ;;  %v1067_v9 = vpack.c.bf16 %v835_v8, %v835_v8  ;;  %v820_v10 = vmul.f32 0.2, %v788_v55  ;;  %v791_v13 = vadd.f32 %v1520_v42, %v769_v43  ;;  %v792_v14 = vadd.f32 %v1520_v42, %v770_v44 }
 0x178   : > { %vm805_vm10 = vcmp.gt.f32.partialorder %v789_v56, 0.0  ;;  %v821_v11 = vmul.f32 0.2, %v789_v56  ;;  %914 = vst.msk [vmem:[%s1631_s5 + $0x8] sm:$0xf] %vm911_vm3, %v1065_v5  ;;  %vm806_vm11 = vcmp.gt.f32.partialorder %v790_v57, 0.0  ;;  %v793_v17 = vadd.f32 %v1520_v42, %v771_v45 }
 0x179   : > { %915 = vst.msk [vmem:[%s1631_s5 + $0xc] sm:$0xf] %vm911_vm3, %v1066_v7  ;;  %v822_v35 = vmul.f32 0.2, %v790_v57  ;;  %916 = vst.msk [vmem:[%s1631_s5 + $0x10] sm:$0xf] %vm911_vm3, %v1067_v9  ;;  %v836_v15 = vsel %vm804_vm9, %v788_v55, %v820_v10  ;;  %v794_v18 = vadd.f32 %v1520_v42, %v772_v47  ;;  %v795_v28 = vadd.f32 %v1520_v42, %v1528_v48 }
 0x17a   : > { %v837_v16 = vsel %vm805_vm10, %v789_v56, %v821_v11  ;;  %v1068_v19 = vpack.c.bf16 %v836_v15, %v836_v15  ;;  %vm807_vm12 = vcmp.gt.f32.partialorder %v791_v13, 0.0  ;;  %v823_v22 = vmul.f32 0.2, %v791_v13 }
 0x17b   : > { %v1069_v20 = vpack.c.bf16 %v837_v16, %v837_v16  ;;  %v838_v21 = vsel %vm806_vm11, %v790_v57, %v822_v35  ;;  %vm808_vm13 = vcmp.gt.f32.partialorder %v792_v14, 0.0  ;;  %v824_v23 = vmul.f32 0.2, %v792_v14 }
 0x17c   : > { %v1070_v46 = vpack.c.bf16 %v838_v21, %v838_v21  ;;  %917 = vst.msk [vmem:[%s1631_s5 + $0x14] sm:$0xf] %vm911_vm3, %v1068_v19  ;;  %vm809_vm14 = vcmp.gt.f32.partialorder %v793_v17, 0.0  ;;  %v825_v25 = vmul.f32 0.2, %v793_v17  ;;  %vm810_vm15 = vcmp.gt.f32.partialorder %v794_v18, 0.0 }
 0x17d   : > { %918 = vst.msk [vmem:[%s1631_s5 + $0x18] sm:$0xf] %vm911_vm3, %v1069_v20  ;;  %v826_v50 = vmul.f32 0.2, %v794_v18  ;;  %v839_v26 = vsel %vm807_vm12, %v791_v13, %v823_v22  ;;  %v840_v27 = vsel %vm808_vm13, %v792_v14, %v824_v23  ;;  %v796_v29 = vadd.f32 %v1520_v42, %v1531_v49 }
 0x17e   : > { %919 = vst.msk [vmem:[%s1631_s5 + $0x1c] sm:$0xf] %vm911_vm3, %v1070_v46  ;;  %v1071_v31 = vpack.c.bf16 %v839_v26, %v839_v26  ;;  %v1072_v33 = vpack.c.bf16 %v840_v27, %v840_v27  ;;  %v841_v34 = vsel %vm809_vm14, %v793_v17, %v825_v25  ;;  %vm811_vm0 = vcmp.gt.f32.partialorder %v795_v28, 0.0 }
 0x17f   : > { %v842_v36 = vsel %vm810_vm15, %v794_v18, %v826_v50  ;;  %v1073_v12 = vpack.c.bf16 %v841_v34, %v841_v34  ;;  %v827_v38 = vmul.f32 0.2, %v795_v28  ;;  %vm812_vm1 = vcmp.gt.f32.partialorder %v796_v29, 0.0 }
 0x180   : > { %v1074_v37 = vpack.c.bf16 %v842_v36, %v842_v36  ;;  %920 = vst.msk [vmem:[%s1631_s5 + $0x20] sm:$0xf] %vm911_vm3, %v1071_v31  ;;  %921 = vst.msk [vmem:[%s1631_s5 + $0x24] sm:$0xf] %vm911_vm3, %v1072_v33  ;;  %v828_v40 = vmul.f32 0.2, %v796_v29  ;;  %v775_v41 = vmul.f32 %v1511_v24, %v753_v6  ;;  %v776_v32 = vmul.f32 %v1511_v24, %v754_v30 }
 0x181   : > { %922 = vst.msk [vmem:[%s1631_s5 + $0x28] sm:$0xf] %vm911_vm3, %v1073_v12  ;;  %v843_v43 = vsel %vm811_vm0, %v795_v28, %v827_v38 }
 0x182   : > { %923 = vst.msk [vmem:[%s1631_s5 + $0x2c] sm:$0xf] %vm911_vm3, %v1074_v37  ;;  %v1075_v44 = vpack.c.bf16 %v843_v43, %v843_v43  ;;  %v844_v45 = vsel %vm812_vm1, %v796_v29, %v828_v40  ;;  %v797_v47 = vadd.f32 %v1520_v42, %v775_v41  ;;  %v798_v48 = vadd.f32 %v1520_v42, %v776_v32 }
 0x183   : > { %v1076_v49 = vpack.c.bf16 %v844_v45, %v844_v45 }
 0x184   : > { %924 = vst.msk [vmem:[%s1631_s5 + $0x30] sm:$0xf] %vm911_vm3, %v1075_v44  ;;  %vm813_vm2 = vcmp.gt.f32.partialorder %v797_v47, 0.0  ;;  %v829_v24 = vmul.f32 0.2, %v797_v47  ;;  %vm814_vm4 = vcmp.gt.f32.partialorder %v798_v48, 0.0 }
 0x185   : > { %v830_v51 = vmul.f32 0.2, %v798_v48  ;;  %925 = vst.msk [vmem:[%s1631_s5 + $0x34] sm:$0xf] %vm911_vm3, %v1076_v49 }
 0x186   : > { %v845_v52 = vsel %vm813_vm2, %v797_v47, %v829_v24 }
 0x187   : > { %v846_v39 = vsel %vm814_vm4, %v798_v48, %v830_v51  ;;  %v1077_v53 = vpack.c.bf16 %v845_v52, %v845_v52 }
 0x188   : > { %v1078_v54 = vpack.c.bf16 %v846_v39, %v846_v39 }
 0x189   : > { %926 = vst.msk [vmem:[%s1631_s5 + $0x38] sm:$0xf] %vm911_vm3, %v1077_v53 }
 0x18a   : > { %927 = vst.msk [vmem:[%s1631_s5 + $0x3c] sm:$0xf] %vm911_vm3, %v1078_v54 }
 0x18b PF: > { %s15_s20 = sadd.s32 1, %s1248_s20   ;;  %s1632_s18 = smov %s1244_s19 }
 0x18c   : > { %p12_p7 = scmp.ge.s32.totalorder %s15_s20, 4   ;;  %s1633_s19 = smov %s1635_s21 }
 0x18e   :  { %14 = sbr.rel (!%p12_p7) target bundleno = 2 (0x2), region = 84 }

// kernel: discriminator_forward.8
= control target key start
LH: loop header
LB: loop body
LE: loop exit
PB: predicated region body
PF: predicated region fallthrough
CT: control target
= control target key end

     0   :  { %s1122_s18 = smov 0   ;;  %s1124_s19 = smov 0   ;;  %s1307_s0 = inlined_call_operand.vmem [shape: bf16[32,512], index: 0, kind: input, shape index: {}]   ;;  %s1308_s1 = inlined_call_operand.vmem [shape: bf16[512,64], index: 1, kind: input, shape index: {}]   ;;  %s1309_s2 = inlined_call_operand.vmem [shape: f32[1,64], index: 2, kind: input, shape index: {}]   ;;  %s1310_s3 = inlined_call_operand.vmem [shape: f32[1,64], index: 3, kind: input, shape index: {}]   ;;  %s1311_s4 = inlined_call_operand.vmem [shape: f32[1,64], index: 4, kind: input, shape index: {}]   ;;  %s1312_s5 = inlined_call_operand.vmem [shape: bf16[32,64], index: 5, kind: output, shape index: {}]  }
   0x1   :  { %s1126_s20 = smov 0  }
   0x2 LB: > { %s27_s21 = sadd.s32 1, %s1085_s19  ;;  %p882_p0 = scmp.ge.s32.totalorder %s1089_s20, 1  ;;  %s1089_s20 = sphi %s1126_s20, %s15_s20   ;;  %s1085_s19 = sphi %s1124_s19, %s1314_s19   ;;  %s1081_s18 = sphi %s1122_s18, %s1313_s18  }
   0x3   : > { %p29_p1 = scmp.ge.s32.totalorder %s27_s21, 2  ;;  %p211_p2 = scmp.lt.s32.totalorder %s1089_s20, 3 }
   0x5   : > { %s1316_s21 = smov (%p29_p1, %s27_s21), 0  ;;  %p212_p3 = pnand %p882_p0, %p211_p2 }
   0x6   : > { %p263_p4 = scmp.eq.s32.totalorder (!%p212_p3), %s1081_s18, 0 }
   0x7   : > { %215 = sbr.rel (%p212_p3) target bundleno = 348 (0x15c), region = 40 }
   0xe   : > { %268 = sbr.rel (!%p263_p4) target bundleno = 21 (0x15), region = 44  ;;  %vm269_vm0 = vcmask (%p263_p4), 516096   ;;  %v1091_v0 = vmov (%p263_p4), 0.0  }
   0xf   : > { %270 = vst.msk [vmem:[#allocation3] sm:$0x1] (%p263_p4), %vm269_vm0, %v1091_v0  ;;  %271 = vst.msk [vmem:[#allocation4] sm:$0x1] (%p263_p4), %vm269_vm0, %v1091_v0 }
  0x15 PF: > { %p884_p5 = scmp.ne.s32.totalorder %s1081_s18, 0 }
  0x16   : > { %v1021_v1 = vld [vmem:[%s1308_s1 + $0x40] sm:$0xff] (!%p884_p5)   ;;  %v1025_v5 = vld [vmem:[%s1308_s1 + $0x48] sm:$0xff] (!%p884_p5)   ;;  %v1029_v9 = vld [vmem:[%s1308_s1 + $0x50] sm:$0xff] (!%p884_p5)   ;;  %vm686_vm1 = vcmask (!%p884_p5), 523264   ;;  %vm706_vm2 = vcmask (!%p884_p5), 516096  }
  0x17   : > { %274 = sbr.rel (%p884_p5) target bundleno = 305 (0x131), region = 48  ;;  %v1022_v2 = vld [vmem:[%s1308_s1 + $0xc0] sm:$0xff] (!%p884_p5)   ;;  %940 = vmatprep.subr.bf16.mxu0 (!%p884_p5), %v1021_v1  ;;  %v1026_v6 = vld [vmem:[%s1308_s1 + $0xc8] sm:$0xff] (!%p884_p5)   ;;  %v1030_v10 = vld [vmem:[%s1308_s1 + $0xd0] sm:$0xff] (!%p884_p5)  }
  0x18   : > { %v1023_v3 = vld [vmem:[%s1308_s1] sm:$0xff] (!%p884_p5)   ;;  %968 = vmatprep.subr.bf16.mxu1 (!%p884_p5), %v1022_v2  ;;  %v1027_v7 = vld [vmem:[%s1308_s1 + $0x8] sm:$0xff] (!%p884_p5)   ;;  %v1031_v11 = vld [vmem:[%s1308_s1 + $0x10] sm:$0xff] (!%p884_p5)  }
  0x19   : > { %v1024_v4 = vld [vmem:[%s1308_s1 + $0x80] sm:$0xff] (!%p884_p5)   ;;  %941 = vmatpush3.bf16.msra.mxu0 (!%p884_p5), %v1023_v3  ;;  %v1028_v8 = vld [vmem:[%s1308_s1 + $0x88] sm:$0xff] (!%p884_p5)   ;;  %v1032_v12 = vld [vmem:[%s1308_s1 + $0x90] sm:$0xff] (!%p884_p5)  }
  0x1a   : > { %969 = vmatpush3.bf16.msra.mxu1 (!%p884_p5), %v1024_v4  ;;  %942 = vmatprep.subr.bf16.mxu0 (!%p884_p5), %v1025_v5  ;;  %v1033_v13 = vld [vmem:[%s1308_s1 + $0x58] sm:$0xff] (!%p884_p5)   ;;  %v1037_v17 = vld [vmem:[%s1308_s1 + $0x60] sm:$0xff] (!%p884_p5)   ;;  %v1041_v21 = vld [vmem:[%s1308_s1 + $0x68] sm:$0xff] (!%p884_p5)  }
  0x1b   : > { %970 = vmatprep.subr.bf16.mxu1 (!%p884_p5), %v1026_v6  ;;  %v1034_v14 = vld [vmem:[%s1308_s1 + $0xd8] sm:$0xff] (!%p884_p5)   ;;  %v1038_v18 = vld [vmem:[%s1308_s1 + $0xe0] sm:$0xff] (!%p884_p5)   ;;  %v1042_v22 = vld [vmem:[%s1308_s1 + $0xe8] sm:$0xff] (!%p884_p5)  }
  0x1c   : > { %v1035_v15 = vld [vmem:[%s1308_s1 + $0x18] sm:$0xff] (!%p884_p5)   ;;  %v1039_v19 = vld [vmem:[%s1308_s1 + $0x20] sm:$0xff] (!%p884_p5)   ;;  %v1043_v23 = vld [vmem:[%s1308_s1 + $0x28] sm:$0xff] (!%p884_p5)  }
  0x1d   : > { %943 = vmatpush3.bf16.msra.mxu0 (!%p884_p5), %v1027_v7  ;;  %v1036_v16 = vld [vmem:[%s1308_s1 + $0x98] sm:$0xff] (!%p884_p5)   ;;  %v1040_v20 = vld [vmem:[%s1308_s1 + $0xa0] sm:$0xff] (!%p884_p5)   ;;  %v1044_v24 = vld [vmem:[%s1308_s1 + $0xa8] sm:$0xff] (!%p884_p5)  }
  0x1e   : > { %971 = vmatpush3.bf16.msra.mxu1 %v1028_v8  ;;  %944 = vmatprep.subr.bf16.mxu0 %v1029_v9  ;;  %v1045_v25 = vld [vmem:[%s1308_s1 + $0x70] sm:$0xff]   ;;  %v1049_v29 = vld [vmem:[%s1308_s1 + $0x78] sm:$0xff]   ;;  %v885_v43 = vld [vmem:[%s1309_s2] ss:$0 sm:$0xff] }
  0x1f   : > { %972 = vmatprep.subr.bf16.mxu1 %v1030_v10  ;;  %v1046_v26 = vld [vmem:[%s1308_s1 + $0xf0] sm:$0xff]   ;;  %v1050_v30 = vld [vmem:[%s1308_s1 + $0xf8] sm:$0xff]  }
  0x20   : > { %v1047_v27 = vld [vmem:[%s1308_s1 + $0x30] sm:$0xff]   ;;  %v1051_v31 = vld [vmem:[%s1308_s1 + $0x38] sm:$0xff]  }
  0x21   : > { %945 = vmatpush3.bf16.msra.mxu0 %v1031_v11  ;;  %v1048_v28 = vld [vmem:[%s1308_s1 + $0xb0] sm:$0xff]   ;;  %v1052_v32 = vld [vmem:[%s1308_s1 + $0xb8] sm:$0xff]  }
  0x22   : > { %973 = vmatpush3.bf16.msra.mxu1 %v1032_v12  ;;  %946 = vmatprep.subr.bf16.mxu0 %v1033_v13  ;;  %v1053_v33 = vld [vmem:[%s1307_s0] ss:$16 sps:$4 sm:$0xff]   ;;  %v1055_v34 = vld [vmem:[%s1307_s0 + $0x4] ss:$16 sps:$4 sm:$0xff]   ;;  %v1056_v35 = vld [vmem:[%s1307_s0 + $0x8] ss:$16 sps:$4 sm:$0xff]  }
  0x23   : > { %974 = vmatprep.subr.bf16.mxu1 %v1034_v14  ;;  %v1058_v36 = vld [vmem:[%s1307_s0 + $0xc] ss:$16 sps:$4 sm:$0xff]   ;;  %618 = vmatprep.mubr.bf16.mxu0 %v1055_v34  ;;  %v1059_v37 = vld [vmem:[%s1307_s0 + $0x24] ss:$16 sps:$4 sm:$0xff]   ;;  %v1063_v39 = vld [vmem:[%s1307_s0 + $0x20] ss:$16 sps:$4 sm:$0xff]  }
  0x24   : > { %667 = vmatprep.mubr.bf16.mxu1 %v1058_v36  ;;  %v1061_v38 = vld [vmem:[%s1307_s0 + $0x2c] ss:$16 sps:$4 sm:$0xff]   ;;  %v1064_v40 = vld [vmem:[%s1307_s0 + $0x28] ss:$16 sps:$4 sm:$0xff]  }
  0x25   : > { %947 = vmatpush3.bf16.msra.mxu0 %v1035_v15 }
  0x26   : > { %975 = vmatpush3.bf16.msra.mxu1 %v1036_v16  ;;  %948 = vmatprep.subr.bf16.mxu0 %v1037_v17 }
  0x27   : > { %976 = vmatprep.subr.bf16.mxu1 %v1038_v18 }
  0x29   : > { %949 = vmatpush3.bf16.msra.mxu0 %v1039_v19 }
  0x2a   : > { %977 = vmatpush3.bf16.msra.mxu1 %v1040_v20  ;;  %950 = vmatprep.subr.bf16.mxu0 %v1041_v21 }
  0x2b   : > { %978 = vmatprep.subr.bf16.mxu1 %v1042_v22 }
  0x2d   : > { %951 = vmatpush3.bf16.msra.mxu0 %v1043_v23 }
  0x2e   : > { %979 = vmatpush3.bf16.msra.mxu1 %v1044_v24  ;;  %952 = vmatprep.subr.bf16.mxu0 %v1045_v25 }
  0x2f   : > { %980 = vmatprep.subr.bf16.mxu1 %v1046_v26 }
  0x31   : > { %953 = vmatpush3.bf16.msra.mxu0 %v1047_v27 }
  0x32   : > { %981 = vmatpush3.bf16.msra.mxu1 %v1048_v28  ;;  %954 = vmatprep.subr.bf16.mxu0 %v1049_v29 }
  0x33   : > { %982 = vmatprep.subr.bf16.mxu1 %v1050_v30 }
  0x35   : > { %955 = vmatpush3.bf16.msra.mxu0 %v1051_v31 }
  0x36   : > { %983 = vmatpush3.bf16.msra.mxu1 %v1052_v32 }
  0x38   : > { %619 = vmatmul.mubr.bf16.vlgmr.msra.gmra.mrb[0].mxu0 %v1053_v33 }
  0x39   : > { %668 = vmatmul.mubr.bf16.vlgmr.msra.gmra.mrb[0].mxu1 %v1056_v35  ;;  %626 = vmatprep.mubr.bf16.mxu0 %v1059_v37  ;;  %v691_v37 = vld [vmem:[#allocation3] sm:$0x1] }
  0x3a   : > { %675 = vmatprep.mubr.bf16.mxu1 %v1061_v38 }
  0x40   : > { %627 = vmatmul.mubr.bf16.gmra.mrb[4].mxu0 %v1063_v39 }
  0x41   : > { %676 = vmatmul.mubr.bf16.gmra.mrb[4].mxu1 %v1064_v40  ;;  %v708_v40 = vld [vmem:[#allocation4] sm:$0x1] }
 0x10b   : > { %v956_v41 = vpop.f32.mrb[0].mxu0 }
 0x10c   : > { %v984_v42 = vpop.f32.mrb[0].mxu1  ;;  %v957_v44 = vpop.f32.mrb[1].mxu0 }
 0x10d   : > { %v958_v45 = vadd.f32 %v957_v44, %v956_v41  ;;  %v985_v46 = vpop.f32.mrb[1].mxu1  ;;  %v959_v47 = vpop.f32.mrb[2].mxu0 }
 0x10e   : > { %v986_v48 = vadd.f32 %v985_v46, %v984_v42  ;;  %v987_v49 = vpop.f32.mrb[2].mxu1  ;;  %v960_v50 = vpop.f32.mrb[3].mxu0 }
 0x10f   : > { %v621_v51 = vadd.f32 %v958_v45, %v885_v43  ;;  %v961_v52 = vadd.f32 %v960_v50, %v959_v47  ;;  %v988_v53 = vpop.f32.mrb[3].mxu1 }
 0x110   : > { %v989_v54 = vadd.f32 %v988_v53, %v987_v49 }
 0x111   : > { %v670_v55 = vadd.f32 %v986_v48, %v621_v51  ;;  %v624_v56 = vadd.f32 %v961_v52, %v885_v43 }
 0x113   : > { %687 = vst.msk [vmem:[#allocation2] sm:$0xff] %vm686_vm1, %v670_v55  ;;  %v709_v57 = vmul.f32 %v670_v55, %v670_v55  ;;  %v673_v58 = vadd.f32 %v989_v54, %v624_v56  ;;  %v962_v59 = vpop.f32.mrb[4].mxu0  ;;  %v692_v62 = vsel %vm686_vm1, %v670_v55, 0.0 }
 0x114   : > { %v990_v60 = vpop.f32.mrb[4].mxu1  ;;  %v963_v61 = vpop.f32.mrb[5].mxu0 }
 0x115   : > { %688 = vst.msk [vmem:[#allocation2 + $0x8] sm:$0xff] %vm686_vm1, %v673_v58  ;;  %v693_v63 = vsel %vm686_vm1, %v673_v58, 0.0  ;;  %v710_v0 = vmul.f32 %v673_v58, %v673_v58  ;;  %v964_v1 = vadd.f32 %v963_v61, %v962_v59  ;;  %v991_v2 = vpop.f32.mrb[5].mxu1  ;;  %v965_v3 = vpop.f32.mrb[6].mxu0  ;;  %v713_v8 = vsel %vm686_vm1, %v709_v57, 0.0 }
 0x116   : > { %v694_v4 = vadd.f32 %v693_v63, %v692_v62  ;;  %v992_v5 = vadd.f32 %v991_v2, %v990_v60  ;;  %v993_v6 = vpop.f32.mrb[6].mxu1  ;;  %v966_v7 = vpop.f32.mrb[7].mxu0 }
 0x117   : > { %v714_v9 = vsel %vm686_vm1, %v710_v0, 0.0  ;;  %v629_v10 = vadd.f32 %v964_v1, %v885_v43  ;;  %v967_v11 = vadd.f32 %v966_v7, %v965_v3  ;;  %v994_v12 = vpop.f32.mrb[7].mxu1 }
 0x118   : > { %v715_v13 = vadd.f32 %v714_v9, %v713_v8  ;;  %v995_v14 = vadd.f32 %v994_v12, %v993_v6 }
 0x119   : > { %v678_v15 = vadd.f32 %v992_v5, %v629_v10  ;;  %v632_v16 = vadd.f32 %v967_v11, %v885_v43 }
 0x11b   : > { %689 = vst.msk [vmem:[#allocation2 + $0x10] sm:$0xff] %vm686_vm1, %v678_v15  ;;  %v695_v17 = vsel %vm686_vm1, %v678_v15, 0.0  ;;  %v711_v18 = vmul.f32 %v678_v15, %v678_v15  ;;  %v681_v19 = vadd.f32 %v995_v14, %v632_v16 }
 0x11c   : > { %v696_v20 = vadd.f32 %v695_v17, %v694_v4 }
 0x11d   : > { %v716_v21 = vsel %vm686_vm1, %v711_v18, 0.0  ;;  %690 = vst.msk [vmem:[#allocation2 + $0x18] sm:$0xff] %vm686_vm1, %v681_v19  ;;  %v697_v22 = vsel %vm686_vm1, %v681_v19, 0.0  ;;  %v712_v23 = vmul.f32 %v681_v19, %v681_v19 }
 0x11e   : > { %v717_v24 = vadd.f32 %v716_v21, %v715_v13  ;;  %v698_v25 = vadd.f32 %v697_v22, %v696_v20 }
 0x11f   : > { %v718_v26 = vsel %vm686_vm1, %v712_v23, 0.0 }
 0x120   : > { %v699_v27 = vrot.slane %v698_v25, 4  ;;  %v719_v28 = vadd.f32 %v718_v26, %v717_v24 }
 0x122   : > { %v700_v29 = vadd.f32 %v699_v27, %v698_v25  ;;  %v720_v30 = vrot.slane %v719_v28, 4 }
 0x124   : > { %v701_v31 = vrot.slane %v700_v29, 2  ;;  %v721_v32 = vadd.f32 %v720_v30, %v719_v28 }
 0x126   : > { %v702_v33 = vadd.f32 %v701_v31, %v700_v29  ;;  %v722_v34 = vrot.slane %v721_v32, 2 }
 0x128   : > { %v703_v35 = vrot.slane %v702_v33, 1  ;;  %v723_v36 = vadd.f32 %v722_v34, %v721_v32 }
 0x12a   : > { %v704_v38 = vadd.f32 %v703_v35, %v702_v33  ;;  %v724_v39 = vrot.slane %v723_v36, 1 }
 0x12c   : > { %v705_v41 = vadd.f32 %v704_v38, %v691_v37  ;;  %v725_v42 = vadd.f32 %v724_v39, %v723_v36 }
 0x12e   : > { %707 = vst.msk [vmem:[#allocation3] sm:$0x1] %vm706_vm2, %v705_v41  ;;  %v726_v43 = vadd.f32 %v725_v42, %v708_v40 }
 0x130   : > { %727 = vst.msk [vmem:[#allocation4] sm:$0x1] %vm706_vm2, %v726_v43 }
 0x131 PF: > { %p926_p6 = scmp.ne.s32.totalorder %s1081_s18, 1 }
 0x132   : > { %v753_v52 = vlaneseq (!%p926_p6)  ;;  %v739_v54 = vld [vmem:[%s1310_s3] sm:$0x1] (!%p926_p6)  ;;  %v749_v60 = vld [vmem:[#allocation2 + $0x8] sm:$0xff] (!%p926_p6)  ;;  %v750_v61 = vld [vmem:[#allocation2 + $0x10] sm:$0xff] (!%p926_p6)  ;;  %vm800_vm7 = vcmask (!%p926_p6), 519168  }
 0x133   : > { %731 = sbr.rel (%p926_p6) target bundleno = 348 (0x15c), region = 52  ;;  %v743_v58 = vld [vmem:[%s1311_s4] sm:$0x1] (!%p926_p6)  ;;  %v751_v0 = vld [vmem:[#allocation2 + $0x18] sm:$0xff] (!%p926_p6) }
 0x134   : > { %v754_v53 = vshrl.u32 (!%p926_p6), %v753_v52, 7  ;;  %v748_v59 = vld [vmem:[#allocation2] sm:$0xff] (!%p926_p6) }
 0x135   : > { %v732_v44 = vld [vmem:[#allocation3] sm:$0x1] (!%p926_p6) }
 0x136   : > { %v733_v46 = vmul.f32 (!%p926_p6), 0.03125, %v732_v44  ;;  %v755_v55 = vsub.s32 (!%p926_p6), 0, %v754_v53 }
 0x137   : > { %v734_v45 = vld [vmem:[#allocation4] sm:$0x1] (!%p926_p6) }
 0x138   : > { %v735_v47 = vmul.f32 (!%p926_p6), 0.03125, %v734_v45  ;;  %v736_v48 = vmul.f32 (!%p926_p6), %v733_v46, %v733_v46 }
 0x13a   : > { %v737_v49 = vsub.f32 %v735_v47, %v736_v48 }
 0x13c   : > { %v738_v50 = vmax.f32 %v737_v49, 0.0 }
 0x13e   : > { %v740_v51 = vadd.f32 1e-05, %v738_v50 }
 0x140   : > { %1065 = vrsqrt.f32 %v740_v51 }
 0x14a   : > { %v1066_v56 = vpop.eup %1065 }
 0x14b   : > { %v742_v57 = vmul.f32 %v1066_v56, %v739_v54 }
 0x14d   : > { %v744_v62 = vmul.f32 %v742_v57, %v733_v46  ;;  %v756_v63 = vrot.slane %v742_v57, %v755_v55 }
 0x14f   : > { %v745_v1 = vsub.f32 %v743_v58, %v744_v62  ;;  %v758_v2 = vmul.f32 %v756_v63, %v748_v59  ;;  %v759_v3 = vmul.f32 %v756_v63, %v749_v60  ;;  %v760_v4 = vmul.f32 %v756_v63, %v750_v61 }
 0x150   : > { %v761_v5 = vmul.f32 %v756_v63, %v751_v0 }
 0x151   : > { %v766_v6 = vrot.slane %v745_v1, %v755_v55 }
 0x153   : > { %v768_v7 = vadd.f32 %v766_v6, %v758_v2  ;;  %v769_v8 = vadd.f32 %v766_v6, %v759_v3  ;;  %v770_v9 = vadd.f32 %v766_v6, %v760_v4  ;;  %v771_v10 = vadd.f32 %v766_v6, %v761_v5 }
 0x155   : > { %vm772_vm3 = vcmp.gt.f32.partialorder %v768_v7, 0.0  ;;  %v776_v11 = vmul.f32 0.2, %v768_v7  ;;  %vm773_vm4 = vcmp.gt.f32.partialorder %v769_v8, 0.0  ;;  %v777_v12 = vmul.f32 0.2, %v769_v8 }
 0x156   : > { %vm774_vm5 = vcmp.gt.f32.partialorder %v770_v9, 0.0  ;;  %v778_v13 = vmul.f32 0.2, %v770_v9  ;;  %vm775_vm6 = vcmp.gt.f32.partialorder %v771_v10, 0.0  ;;  %v779_v14 = vmul.f32 0.2, %v771_v10 }
 0x157   : > { %v780_v15 = vsel %vm772_vm3, %v768_v7, %v776_v11  ;;  %v781_v16 = vsel %vm773_vm4, %v769_v8, %v777_v12 }
 0x158   : > { %v936_v17 = vpack.c.bf16 %v780_v15, %v780_v15  ;;  %v937_v18 = vpack.c.bf16 %v781_v16, %v781_v16  ;;  %v782_v19 = vsel %vm774_vm5, %v770_v9, %v778_v13  ;;  %v783_v20 = vsel %vm775_vm6, %v771_v10, %v779_v14 }
 0x159   : > { %v938_v21 = vpack.c.bf16 %v782_v19, %v782_v19  ;;  %v939_v22 = vpack.c.bf16 %v783_v20, %v783_v20 }
 0x15a   : > { %801 = vst.msk [vmem:[%s1312_s5] sm:$0xf] %vm800_vm7, %v936_v17  ;;  %802 = vst.msk [vmem:[%s1312_s5 + $0x4] sm:$0xf] %vm800_vm7, %v937_v18 }
 0x15b   : > { %803 = vst.msk [vmem:[%s1312_s5 + $0x8] sm:$0xf] %vm800_vm7, %v938_v21  ;;  %804 = vst.msk [vmem:[%s1312_s5 + $0xc] sm:$0xf] %vm800_vm7, %v939_v22 }
 0x15c PF: > { %s15_s20 = sadd.s32 1, %s1089_s20   ;;  %s1313_s18 = smov %s1085_s19 }
 0x15d   : > { %p12_p7 = scmp.ge.s32.totalorder %s15_s20, 4   ;;  %s1314_s19 = smov %s1316_s21 }
 0x15f   :  { %14 = sbr.rel (!%p12_p7) target bundleno = 2 (0x2), region = 84 }

// kernel: discriminator_forward.9
= control target key start
LH: loop header
LB: loop body
LE: loop exit
PB: predicated region body
PF: predicated region fallthrough
CT: control target
= control target key end

     0   :  { %s3579_s0 = inlined_call_operand.vmem [shape: bf16[2,1024], index: 0, kind: input, shape index: {}]   ;;  %s3580_s1 = inlined_call_operand.vmem [shape: f32[1024,12], index: 1, kind: input, shape index: {}]   ;;  %s3581_s2 = inlined_call_operand.vmem [shape: f32[1,12], index: 2, kind: input, shape index: {}]   ;;  %s3582_s3 = inlined_call_operand.vmem [shape: f32[1024,10], index: 3, kind: input, shape index: {}]   ;;  %s3583_s4 = inlined_call_operand.vmem [shape: f32[1,10], index: 4, kind: input, shape index: {}]   ;;  %s3584_s5 = inlined_call_operand.vmem [shape: f32[1024,1], index: 5, kind: input, shape index: {}]   ;;  %s3585_s6 = inlined_call_operand.<no memory space> [shape: f32[1,1], index: 6, kind: input, shape index: {}]   ;;  %s3586_s7 = inlined_call_operand.hbm [shape: f32[2,12], index: 7, kind: output, shape index: {0}]   ;;  %s3587_s8 = inlined_call_operand.hbm [shape: f32[2,10], index: 8, kind: output, shape index: {1}]   ;;  %s3588_s9 = inlined_call_operand.vmem [shape: f32[2,1], index: 9, kind: output, shape index: {2}]   ;;  %s3589_s10 = inlined_call_operand.vmem [shape: f32[2,1], index: 10, kind: output, shape index: {3}]  }
   0x1   :  { %v16_v0 = vstv %s3585_s6 }
   0x2   :  { %17 = vst [vmem:[#allocation2] sm:$0x1] %v16_v0 }
   0x3   :  { %18 = vsyncpa [#allocation4], 0  ;;  %v53_v1 = vld [vmem:[%s3580_s1 + $0x80] sm:$0xff]  ;;  %v54_v2 = vld [vmem:[%s3580_s1 + $0x88] sm:$0xff]  ;;  %v2271_v52 = vmov 1983009808   ;;  %v178_v54 = vlaneseq }
   0x4   :  { %v37_v3 = vld [vmem:[%s3580_s1] sm:$0xff]  ;;  %v1824_v4 = vpack.c.bf16 %v54_v2, %v53_v1  ;;  %v38_v5 = vld [vmem:[%s3580_s1 + $0x8] sm:$0xff]  ;;  %v55_v12 = vld [vmem:[%s3580_s1 + $0x90] sm:$0xff]  ;;  %v176_v53 = vunpack.c.l.s4 %v2271_v52 }
   0x5   :  { %v85_v6 = vld [vmem:[%s3580_s1 + $0x180] sm:$0xff]  ;;  %v86_v7 = vld [vmem:[%s3580_s1 + $0x188] sm:$0xff]  ;;  %v1826_v8 = vpack.c.bf16 %v38_v5, %v37_v3  ;;  %v56_v14 = vld [vmem:[%s3580_s1 + $0x98] sm:$0xff] }
   0x6   :  { %v1856_v9 = vpack.c.bf16 %v86_v7, %v85_v6  ;;  %v69_v10 = vld [vmem:[%s3580_s1 + $0x100] sm:$0xff]  ;;  %v70_v11 = vld [vmem:[%s3580_s1 + $0x108] sm:$0xff]  ;;  %1825 = vmatprep.subr.bf16.mxu0 %v1824_v4  ;;  %v39_v15 = vld [vmem:[%s3580_s1 + $0x10] sm:$0xff]  ;;  %v1828_v17 = vpack.c.bf16 %v56_v14, %v55_v12  ;;  %v177_v3 = vunpack.c.0.s8 %v176_v53  ;;  %v179_v4 = vshrl.u32 %v178_v54, 7 }
   0x7   :  { %v1858_v13 = vpack.c.bf16 %v70_v11, %v69_v10  ;;  %v40_v16 = vld [vmem:[%s3580_s1 + $0x18] sm:$0xff]  ;;  %1827 = vmatpush3.bf16.msra.mxu0 %v1826_v8  ;;  %v87_v19 = vld [vmem:[%s3580_s1 + $0x190] sm:$0xff]  ;;  %v57_v24 = vld [vmem:[%s3580_s1 + $0xa0] sm:$0xff] }
   0x8   :  { %1857 = vmatprep.subr.bf16.mxu1 %v1856_v9  ;;  %v1830_v18 = vpack.c.bf16 %v40_v16, %v39_v15  ;;  %v88_v20 = vld [vmem:[%s3580_s1 + $0x198] sm:$0xff]  ;;  %v71_v21 = vld [vmem:[%s3580_s1 + $0x110] sm:$0xff]  ;;  %v58_v25 = vld [vmem:[%s3580_s1 + $0xa8] sm:$0xff]  ;;  %1829 = vmatprep.subr.bf16.mxu0 %v1828_v17 }
   0x9   :  { %1859 = vmatpush3.bf16.msra.mxu1 %v1858_v13  ;;  %v1860_v22 = vpack.c.bf16 %v88_v20, %v87_v19  ;;  %v72_v23 = vld [vmem:[%s3580_s1 + $0x118] sm:$0xff]  ;;  %v1832_v27 = vpack.c.bf16 %v58_v25, %v57_v24  ;;  %v41_v28 = vld [vmem:[%s3580_s1 + $0x20] sm:$0xff]  ;;  %v42_v29 = vld [vmem:[%s3580_s1 + $0x28] sm:$0xff] }
   0xa   :  { %v1862_v26 = vpack.c.bf16 %v72_v23, %v71_v21  ;;  %v89_v30 = vld [vmem:[%s3580_s1 + $0x1a0] sm:$0xff]  ;;  %v90_v31 = vld [vmem:[%s3580_s1 + $0x1a8] sm:$0xff]  ;;  %v1834_v34 = vpack.c.bf16 %v42_v29, %v41_v28  ;;  %v59_v36 = vld [vmem:[%s3580_s1 + $0xb0] sm:$0xff] }
   0xb   :  { %1861 = vmatprep.subr.bf16.mxu1 %v1860_v22  ;;  %v73_v32 = vld [vmem:[%s3580_s1 + $0x120] sm:$0xff]  ;;  %v74_v33 = vld [vmem:[%s3580_s1 + $0x128] sm:$0xff]  ;;  %1831 = vmatpush3.bf16.msra.mxu0 %v1830_v18  ;;  %v1864_v35 = vpack.c.bf16 %v90_v31, %v89_v30  ;;  %v60_v37 = vld [vmem:[%s3580_s1 + $0xb8] sm:$0xff]  ;;  %v180_v18 = vsub.s32 %v177_v3, %v179_v4 }
   0xc   :  { %v43_v38 = vld [vmem:[%s3580_s1 + $0x30] sm:$0xff]  ;;  %1833 = vmatprep.subr.bf16.mxu0 %v1832_v27  ;;  %v1866_v39 = vpack.c.bf16 %v74_v33, %v73_v32  ;;  %v1836_v40 = vpack.c.bf16 %v60_v37, %v59_v36  ;;  %v44_v41 = vld [vmem:[%s3580_s1 + $0x38] sm:$0xff]  ;;  %v61_v47 = vld [vmem:[%s3580_s1 + $0xc0] sm:$0xff] }
   0xd   :  { %1863 = vmatpush3.bf16.msra.mxu1 %v1862_v26  ;;  %v91_v42 = vld [vmem:[%s3580_s1 + $0x1b0] sm:$0xff]  ;;  %v92_v43 = vld [vmem:[%s3580_s1 + $0x1b8] sm:$0xff]  ;;  %v62_v48 = vld [vmem:[%s3580_s1 + $0xc8] sm:$0xff]  ;;  %v1838_v49 = vpack.c.bf16 %v44_v41, %v43_v38 }
   0xe   :  { %1865 = vmatprep.subr.bf16.mxu1 %v1864_v35  ;;  %v1868_v44 = vpack.c.bf16 %v92_v43, %v91_v42  ;;  %v75_v45 = vld [vmem:[%s3580_s1 + $0x130] sm:$0xff]  ;;  %v76_v46 = vld [vmem:[%s3580_s1 + $0x138] sm:$0xff]  ;;  %v93_v50 = vld [vmem:[%s3580_s1 + $0x1c0] sm:$0xff]  ;;  %v1840_v56 = vpack.c.bf16 %v62_v48, %v61_v47 }
   0xf   :  { %1835 = vmatpush3.bf16.msra.mxu0 %v1834_v34  ;;  %v94_v51 = vld [vmem:[%s3580_s1 + $0x1c8] sm:$0xff]  ;;  %v1870_v55 = vpack.c.bf16 %v76_v46, %v75_v45  ;;  %v45_v57 = vld [vmem:[%s3580_s1 + $0x40] sm:$0xff]  ;;  %v63_v62 = vld [vmem:[%s3580_s1 + $0xd0] sm:$0xff] }
  0x10   :  { %1837 = vmatprep.subr.bf16.mxu0 %v1836_v40  ;;  %v46_v58 = vld [vmem:[%s3580_s1 + $0x48] sm:$0xff]  ;;  %v77_v59 = vld [vmem:[%s3580_s1 + $0x140] sm:$0xff]  ;;  %v1872_v60 = vpack.c.bf16 %v94_v51, %v93_v50  ;;  %v64_v63 = vld [vmem:[%s3580_s1 + $0xd8] sm:$0xff] }
  0x11   :  { %1867 = vmatpush3.bf16.msra.mxu1 %v1866_v39  ;;  %v78_v61 = vld [vmem:[%s3580_s1 + $0x148] sm:$0xff]  ;;  %v95_v0 = vld [vmem:[%s3580_s1 + $0x1d0] sm:$0xff]  ;;  %v96_v1 = vld [vmem:[%s3580_s1 + $0x1d8] sm:$0xff]  ;;  %v1842_v2 = vpack.c.bf16 %v46_v58, %v45_v57  ;;  %v1844_v6 = vpack.c.bf16 %v64_v63, %v63_v62 }
  0x12   :  { %1869 = vmatprep.subr.bf16.mxu1 %v1868_v44  ;;  %v1874_v5 = vpack.c.bf16 %v78_v61, %v77_v59  ;;  %v47_v7 = vld [vmem:[%s3580_s1 + $0x50] sm:$0xff]  ;;  %v48_v8 = vld [vmem:[%s3580_s1 + $0x58] sm:$0xff]  ;;  %v1876_v10 = vpack.c.bf16 %v96_v1, %v95_v0  ;;  %v65_v12 = vld [vmem:[%s3580_s1 + $0xe0] sm:$0xff] }
  0x13   :  { %1839 = vmatpush3.bf16.msra.mxu0 %v1838_v49  ;;  %v79_v9 = vld [vmem:[%s3580_s1 + $0x150] sm:$0xff]  ;;  %v80_v11 = vld [vmem:[%s3580_s1 + $0x158] sm:$0xff]  ;;  %v66_v13 = vld [vmem:[%s3580_s1 + $0xe8] sm:$0xff]  ;;  %v1846_v16 = vpack.c.bf16 %v48_v8, %v47_v7 }
  0x14   :  { %1841 = vmatprep.subr.bf16.mxu0 %v1840_v56  ;;  %v97_v14 = vld [vmem:[%s3580_s1 + $0x1e0] sm:$0xff]  ;;  %v98_v15 = vld [vmem:[%s3580_s1 + $0x1e8] sm:$0xff]  ;;  %v1878_v19 = vpack.c.bf16 %v80_v11, %v79_v9  ;;  %v1848_v20 = vpack.c.bf16 %v66_v13, %v65_v12  ;;  %v67_v26 = vld [vmem:[%s3580_s1 + $0xf0] sm:$0xff] }
  0x15   :  { %1871 = vmatpush3.bf16.msra.mxu1 %v1870_v55  ;;  %v49_v17 = vld [vmem:[%s3580_s1 + $0x60] sm:$0xff]  ;;  %v50_v21 = vld [vmem:[%s3580_s1 + $0x68] sm:$0xff]  ;;  %v1880_v24 = vpack.c.bf16 %v98_v15, %v97_v14  ;;  %v68_v27 = vld [vmem:[%s3580_s1 + $0xf8] sm:$0xff] }
  0x16   :  { %1873 = vmatprep.subr.bf16.mxu1 %v1872_v60  ;;  %v81_v22 = vld [vmem:[%s3580_s1 + $0x160] sm:$0xff]  ;;  %v82_v25 = vld [vmem:[%s3580_s1 + $0x168] sm:$0xff]  ;;  %v99_v29 = vld [vmem:[%s3580_s1 + $0x1f0] sm:$0xff]  ;;  %v1850_v32 = vpack.c.bf16 %v50_v21, %v49_v17  ;;  %v1852_v36 = vpack.c.bf16 %v68_v27, %v67_v26 }
  0x17   :  { %1843 = vmatpush3.bf16.msra.mxu0 %v1842_v2  ;;  %v34_v23 = vld [vmem:[%s3579_s0] sm:$0xff]  ;;  %v100_v30 = vld [vmem:[%s3580_s1 + $0x1f8] sm:$0xff]  ;;  %v1882_v35 = vpack.c.bf16 %v82_v25, %v81_v22  ;;  %v51_v37 = vld [vmem:[%s3580_s1 + $0x70] sm:$0xff] }
  0x18   :  { %1845 = vmatprep.subr.bf16.mxu0 %v1844_v6  ;;  %v35_v28 = vunpack.c.l.bf16 %v34_v23  ;;  %v36_v31 = vunpack.c.h.bf16 %v34_v23  ;;  %v52_v38 = vld [vmem:[%s3580_s1 + $0x78] sm:$0xff]  ;;  %v83_v39 = vld [vmem:[%s3580_s1 + $0x170] sm:$0xff]  ;;  %v1884_v40 = vpack.c.bf16 %v100_v30, %v99_v29  ;;  %v117_v43 = vld [vmem:[%s3580_s1 + $0x280] sm:$0xff] }
  0x19   :  { %1875 = vmatpush3.bf16.msra.mxu1 %v1874_v5  ;;  %v84_v41 = vld [vmem:[%s3580_s1 + $0x178] sm:$0xff]  ;;  %v118_v44 = vld [vmem:[%s3580_s1 + $0x288] sm:$0xff]  ;;  %v149_v46 = vld [vmem:[%s3580_s1 + $0x380] sm:$0xff]  ;;  %v1854_v49 = vpack.c.bf16 %v52_v38, %v51_v37 }
  0x1a   :  { %1877 = vmatprep.subr.bf16.mxu1 %v1876_v10  ;;  %v2515_v33 = vrot.slane %v35_v28, %v180_v18  ;;  %v174_v34 = vcombine.high %v35_v28, %v35_v28  ;;  %v150_v47 = vld [vmem:[%s3580_s1 + $0x388] sm:$0xff]  ;;  %v191_v48 = vcombine.high %v36_v31, %v36_v31  ;;  %v1886_v51 = vpack.c.bf16 %v84_v41, %v83_v39  ;;  %v101_v53 = vld [vmem:[%s3580_s1 + $0x200] sm:$0xff]  ;;  %v119_v58 = vld [vmem:[%s3580_s1 + $0x290] sm:$0xff] }
  0x1b   :  { %1847 = vmatpush3.bf16.msra.mxu0 %v1846_v16  ;;  %v1888_v52 = vpack.c.bf16 %v118_v44, %v117_v43  ;;  %v102_v54 = vld [vmem:[%s3580_s1 + $0x208] sm:$0xff]  ;;  %v133_v55 = vld [vmem:[%s3580_s1 + $0x300] sm:$0xff]  ;;  %v1920_v56 = vpack.c.bf16 %v150_v47, %v149_v46  ;;  %v120_v59 = vld [vmem:[%s3580_s1 + $0x298] sm:$0xff]  ;;  %v2571_v60 = vrot.slane %v36_v31, %v180_v18 }
  0x1c   :  { %1849 = vmatprep.subr.bf16.mxu0 %v1848_v20  ;;  %v2531_v42 = vcombine.high %v2515_v33, %v2515_v33  ;;  %v2539_v45 = vrot.slane %v174_v34, %v180_v18  ;;  %v134_v57 = vld [vmem:[%s3580_s1 + $0x308] sm:$0xff]  ;;  %v151_v61 = vld [vmem:[%s3580_s1 + $0x390] sm:$0xff]  ;;  %v152_v62 = vld [vmem:[%s3580_s1 + $0x398] sm:$0xff]  ;;  %v2579_v63 = vrot.slane %v191_v48, %v180_v18  ;;  %v1890_v0 = vpack.c.bf16 %v102_v54, %v101_v53 }
  0x1d   :  { %1879 = vmatpush3.bf16.msra.mxu1 %v1878_v19  ;;  %v1922_v1 = vpack.c.bf16 %v134_v57, %v133_v55  ;;  %v1892_v2 = vpack.c.bf16 %v120_v59, %v119_v58  ;;  %v103_v3 = vld [vmem:[%s3580_s1 + $0x210] sm:$0xff]  ;;  %v104_v4 = vld [vmem:[%s3580_s1 + $0x218] sm:$0xff]  ;;  %v1924_v6 = vpack.c.bf16 %v152_v62, %v151_v61  ;;  %v121_v8 = vld [vmem:[%s3580_s1 + $0x2a0] sm:$0xff]  ;;  %v2601_v10 = vcombine.high %v2571_v60, %v2571_v60 }
  0x1e   :  { %1881 = vmatprep.subr.bf16.mxu1 %v1880_v24  ;;  %280 = vmatprep.mubr.f32.mxu0 %v2531_v42  ;;  %v2550_v50 = vcombine.high %v2539_v45, %v2539_v45  ;;  %v135_v5 = vld [vmem:[%s3580_s1 + $0x310] sm:$0xff]  ;;  %v136_v7 = vld [vmem:[%s3580_s1 + $0x318] sm:$0xff]  ;;  %v122_v9 = vld [vmem:[%s3580_s1 + $0x2a8] sm:$0xff]  ;;  %v2612_v13 = vcombine.high %v2579_v63, %v2579_v63  ;;  %v1894_v14 = vpack.c.bf16 %v104_v4, %v103_v3 }
  0x1f   :  { %1851 = vmatpush3.bf16.msra.mxu0 %v1850_v32  ;;  %v153_v11 = vld [vmem:[%s3580_s1 + $0x3a0] sm:$0xff]  ;;  %v154_v12 = vld [vmem:[%s3580_s1 + $0x3a8] sm:$0xff]  ;;  %v1926_v15 = vpack.c.bf16 %v136_v7, %v135_v5  ;;  %v1896_v16 = vpack.c.bf16 %v122_v9, %v121_v8  ;;  %v123_v22 = vld [vmem:[%s3580_s1 + $0x2b0] sm:$0xff] }
  0x20   :  { %1853 = vmatprep.subr.bf16.mxu0 %v1852_v36  ;;  %350 = vmatprep.mubr.f32.mxu1 %v2550_v50  ;;  %v105_v17 = vld [vmem:[%s3580_s1 + $0x220] sm:$0xff]  ;;  %v106_v18 = vld [vmem:[%s3580_s1 + $0x228] sm:$0xff]  ;;  %v1928_v20 = vpack.c.bf16 %v154_v12, %v153_v11  ;;  %v124_v23 = vld [vmem:[%s3580_s1 + $0x2b8] sm:$0xff] }
  0x21   :  { %1883 = vmatpush3.bf16.msra.mxu1 %v1882_v35  ;;  %v137_v19 = vld [vmem:[%s3580_s1 + $0x320] sm:$0xff]  ;;  %v138_v21 = vld [vmem:[%s3580_s1 + $0x328] sm:$0xff]  ;;  %v155_v24 = vld [vmem:[%s3580_s1 + $0x3b0] sm:$0xff]  ;;  %v1898_v26 = vpack.c.bf16 %v106_v18, %v105_v17  ;;  %v1900_v28 = vpack.c.bf16 %v124_v23, %v123_v22 }
  0x22   :  { %1885 = vmatprep.subr.bf16.mxu1 %v1884_v40  ;;  %v156_v25 = vld [vmem:[%s3580_s1 + $0x3b8] sm:$0xff]  ;;  %v1930_v27 = vpack.c.bf16 %v138_v21, %v137_v19  ;;  %v107_v29 = vld [vmem:[%s3580_s1 + $0x230] sm:$0xff]  ;;  %v125_v35 = vld [vmem:[%s3580_s1 + $0x2c0] sm:$0xff] }
  0x23   :  { %1855 = vmatpush3.bf16.msra.mxu0 %v1854_v49  ;;  %v108_v30 = vld [vmem:[%s3580_s1 + $0x238] sm:$0xff]  ;;  %v139_v31 = vld [vmem:[%s3580_s1 + $0x330] sm:$0xff]  ;;  %v1932_v32 = vpack.c.bf16 %v156_v25, %v155_v24  ;;  %v126_v36 = vld [vmem:[%s3580_s1 + $0x2c8] sm:$0xff] }
  0x24   :  { %1889 = vmatprep.subr.bf16.mxu0 %v1888_v52  ;;  %v140_v34 = vld [vmem:[%s3580_s1 + $0x338] sm:$0xff]  ;;  %v157_v37 = vld [vmem:[%s3580_s1 + $0x3c0] sm:$0xff]  ;;  %v158_v38 = vld [vmem:[%s3580_s1 + $0x3c8] sm:$0xff]  ;;  %v1902_v39 = vpack.c.bf16 %v108_v30, %v107_v29  ;;  %v1904_v41 = vpack.c.bf16 %v126_v36, %v125_v35 }
  0x25   :  { %1887 = vmatpush3.bf16.msra.mxu1 %v1886_v51  ;;  %v1934_v40 = vpack.c.bf16 %v140_v34, %v139_v31  ;;  %v109_v43 = vld [vmem:[%s3580_s1 + $0x240] sm:$0xff]  ;;  %v110_v44 = vld [vmem:[%s3580_s1 + $0x248] sm:$0xff]  ;;  %v1936_v47 = vpack.c.bf16 %v158_v38, %v157_v37  ;;  %v127_v49 = vld [vmem:[%s3580_s1 + $0x2d0] sm:$0xff] }
  0x26   :  { %1921 = vmatprep.subr.bf16.mxu1 %v1920_v56  ;;  %281 = vmatmul.mubr.f32.vlgmr.msra.gmra.mrb[0].mxu0 %v2515_v33  ;;  %v141_v46 = vld [vmem:[%s3580_s1 + $0x340] sm:$0xff]  ;;  %v142_v48 = vld [vmem:[%s3580_s1 + $0x348] sm:$0xff]  ;;  %v128_v51 = vld [vmem:[%s3580_s1 + $0x2d8] sm:$0xff]  ;;  %v1906_v54 = vpack.c.bf16 %v110_v44, %v109_v43 }
  0x27   :  { %1891 = vmatpush3.bf16.msra.mxu0 %v1890_v0  ;;  %420 = vmatprep.mubr.f32.mxu0 %v2601_v10  ;;  %v159_v52 = vld [vmem:[%s3580_s1 + $0x3d0] sm:$0xff]  ;;  %v160_v53 = vld [vmem:[%s3580_s1 + $0x3d8] sm:$0xff]  ;;  %v1938_v55 = vpack.c.bf16 %v142_v48, %v141_v46  ;;  %v1908_v56 = vpack.c.bf16 %v128_v51, %v127_v49  ;;  %v129_v0 = vld [vmem:[%s3580_s1 + $0x2e0] sm:$0xff] }
  0x28   :  { %351 = vmatmul.mubr.f32.vlgmr.msra.gmra.mrb[0].mxu1 %v2539_v45  ;;  %1893 = vmatprep.subr.bf16.mxu0 %v1892_v2  ;;  %v111_v57 = vld [vmem:[%s3580_s1 + $0x250] sm:$0xff]  ;;  %v112_v58 = vld [vmem:[%s3580_s1 + $0x258] sm:$0xff]  ;;  %v1940_v61 = vpack.c.bf16 %v160_v53, %v159_v52  ;;  %v161_v2 = vld [vmem:[%s3580_s1 + $0x3e0] sm:$0xff] }
  0x29   :  { %1923 = vmatpush3.bf16.msra.mxu1 %v1922_v1  ;;  %490 = vmatprep.mubr.f32.mxu1 %v2612_v13  ;;  %v143_v59 = vld [vmem:[%s3580_s1 + $0x350] sm:$0xff]  ;;  %v144_v62 = vld [vmem:[%s3580_s1 + $0x358] sm:$0xff]  ;;  %v130_v1 = vld [vmem:[%s3580_s1 + $0x2e8] sm:$0xff]  ;;  %v1910_v4 = vpack.c.bf16 %v112_v58, %v111_v57 }
  0x2a   :  { %1925 = vmatprep.subr.bf16.mxu1 %v1924_v6  ;;  %v162_v3 = vld [vmem:[%s3580_s1 + $0x3e8] sm:$0xff]  ;;  %v1942_v5 = vpack.c.bf16 %v144_v62, %v143_v59  ;;  %v1912_v6 = vpack.c.bf16 %v130_v1, %v129_v0  ;;  %v113_v7 = vld [vmem:[%s3580_s1 + $0x260] sm:$0xff]  ;;  %v164_v17 = vld [vmem:[%s3580_s1 + $0x3f8] sm:$0xff] }
  0x2b   :  { %1895 = vmatpush3.bf16.msra.mxu0 %v1894_v14  ;;  %v114_v8 = vld [vmem:[%s3580_s1 + $0x268] sm:$0xff]  ;;  %v145_v9 = vld [vmem:[%s3580_s1 + $0x360] sm:$0xff]  ;;  %v1944_v11 = vpack.c.bf16 %v162_v3, %v161_v2  ;;  %v131_v14 = vld [vmem:[%s3580_s1 + $0x2f0] sm:$0xff] }
  0x2c   :  { %1897 = vmatprep.subr.bf16.mxu0 %v1896_v16  ;;  %v146_v12 = vld [vmem:[%s3580_s1 + $0x368] sm:$0xff]  ;;  %v163_v16 = vld [vmem:[%s3580_s1 + $0x3f0] sm:$0xff]  ;;  %v1914_v18 = vpack.c.bf16 %v114_v8, %v113_v7  ;;  %v116_v22 = vld [vmem:[%s3580_s1 + $0x278] sm:$0xff] }
  0x2d   :  { %1927 = vmatpush3.bf16.msra.mxu1 %v1926_v15  ;;  %v132_v15 = vld [vmem:[%s3580_s1 + $0x2f8] sm:$0xff]  ;;  %v1946_v19 = vpack.c.bf16 %v146_v12, %v145_v9  ;;  %v115_v21 = vld [vmem:[%s3580_s1 + $0x270] sm:$0xff]  ;;  %v1948_v24 = vpack.c.bf16 %v164_v17, %v163_v16  ;;  %v545_v29 = vld [vmem:[%s3582_s3 + $0x188] sm:$0xff] }
  0x2e   :  { %1929 = vmatprep.subr.bf16.mxu1 %v1928_v20  ;;  %v1916_v20 = vpack.c.bf16 %v132_v15, %v131_v14  ;;  %v147_v23 = vld [vmem:[%s3580_s1 + $0x370] sm:$0xff]  ;;  %v148_v25 = vld [vmem:[%s3580_s1 + $0x378] sm:$0xff]  ;;  %v1918_v30 = vpack.c.bf16 %v116_v22, %v115_v21  ;;  %v496_v34 = vld [vmem:[%s3582_s3] sm:$0xff] }
  0x2f   :  { %1899 = vmatpush3.bf16.msra.mxu0 %v1898_v26  ;;  %v512_v26 = vld [vmem:[%s3582_s3 + $0x80] sm:$0xff]  ;;  %v1950_v31 = vpack.c.bf16 %v148_v25, %v147_v23  ;;  %v497_v35 = vld [vmem:[%s3582_s3 + $0x8] sm:$0xff]  ;;  %v547_v43 = vld [vmem:[%s3582_s3 + $0x198] sm:$0xff] }
  0x30   :  { %1901 = vmatprep.subr.bf16.mxu0 %v1900_v28  ;;  %v544_v28 = vld [vmem:[%s3582_s3 + $0x180] sm:$0xff]  ;;  %v529_v38 = vld [vmem:[%s3582_s3 + $0x108] sm:$0xff]  ;;  %v1954_v44 = vpack.c.bf16 %v497_v35, %v496_v34  ;;  %v498_v48 = vld [vmem:[%s3582_s3 + $0x10] sm:$0xff] }
  0x31   :  { %1931 = vmatpush3.bf16.msra.mxu1 %v1930_v27  ;;  %v513_v27 = vld [vmem:[%s3582_s3 + $0x88] sm:$0xff]  ;;  %v528_v36 = vld [vmem:[%s3582_s3 + $0x100] sm:$0xff]  ;;  %v1984_v37 = vpack.c.bf16 %v545_v29, %v544_v28  ;;  %v499_v49 = vld [vmem:[%s3582_s3 + $0x18] sm:$0xff] }
  0x32   :  { %1933 = vmatprep.subr.bf16.mxu1 %v1932_v32  ;;  %v1952_v32 = vpack.c.bf16 %v513_v27, %v512_v26  ;;  %v1986_v46 = vpack.c.bf16 %v529_v38, %v528_v36  ;;  %v530_v51 = vld [vmem:[%s3582_s3 + $0x110] sm:$0xff]  ;;  %v531_v53 = vld [vmem:[%s3582_s3 + $0x118] sm:$0xff]  ;;  %v549_v57 = vld [vmem:[%s3582_s3 + $0x1a8] sm:$0xff]  ;;  %v1958_v58 = vpack.c.bf16 %v499_v49, %v498_v48 }
  0x33   :  { %1903 = vmatpush3.bf16.msra.mxu0 %v1902_v39  ;;  %v514_v39 = vld [vmem:[%s3582_s3 + $0x90] sm:$0xff]  ;;  %v1990_v59 = vpack.c.bf16 %v531_v53, %v530_v51  ;;  %v500_v62 = vld [vmem:[%s3582_s3 + $0x20] sm:$0xff]  ;;  %v501_v0 = vld [vmem:[%s3582_s3 + $0x28] sm:$0xff] }
  0x34   :  { %1905 = vmatprep.subr.bf16.mxu0 %v1904_v41  ;;  %v546_v41 = vld [vmem:[%s3582_s3 + $0x190] sm:$0xff]  ;;  %v532_v1 = vld [vmem:[%s3582_s3 + $0x120] sm:$0xff]  ;;  %v533_v3 = vld [vmem:[%s3582_s3 + $0x128] sm:$0xff]  ;;  %v1962_v8 = vpack.c.bf16 %v501_v0, %v500_v62 }
  0x35   :  { %1935 = vmatpush3.bf16.msra.mxu1 %v1934_v40  ;;  %v515_v40 = vld [vmem:[%s3582_s3 + $0x98] sm:$0xff]  ;;  %v1988_v52 = vpack.c.bf16 %v547_v43, %v546_v41  ;;  %v1994_v9 = vpack.c.bf16 %v533_v3, %v532_v1  ;;  %v502_v12 = vld [vmem:[%s3582_s3 + $0x30] sm:$0xff]  ;;  %v553_v21 = vld [vmem:[%s3582_s3 + $0x1c8] sm:$0xff] }
  0x36   :  { %1937 = vmatprep.subr.bf16.mxu1 %v1936_v47  ;;  %v1956_v47 = vpack.c.bf16 %v515_v40, %v514_v39  ;;  %v551_v7 = vld [vmem:[%s3582_s3 + $0x1b8] sm:$0xff]  ;;  %v534_v15 = vld [vmem:[%s3582_s3 + $0x130] sm:$0xff]  ;;  %v504_v25 = vld [vmem:[%s3582_s3 + $0x40] sm:$0xff] }
  0x37   :  { %1907 = vmatpush3.bf16.msra.mxu0 %v1906_v54  ;;  %v516_v54 = vld [vmem:[%s3582_s3 + $0xa0] sm:$0xff]  ;;  %v503_v14 = vld [vmem:[%s3582_s3 + $0x38] sm:$0xff]  ;;  %v505_v26 = vld [vmem:[%s3582_s3 + $0x48] sm:$0xff] }
  0x38   :  { %1909 = vmatprep.subr.bf16.mxu0 %v1908_v56  ;;  %v548_v56 = vld [vmem:[%s3582_s3 + $0x1a0] sm:$0xff]  ;;  %v535_v17 = vld [vmem:[%s3582_s3 + $0x138] sm:$0xff]  ;;  %v1966_v22 = vpack.c.bf16 %v503_v14, %v502_v12  ;;  %v537_v29 = vld [vmem:[%s3582_s3 + $0x148] sm:$0xff]  ;;  %v1970_v35 = vpack.c.bf16 %v505_v26, %v504_v25 }
  0x39   :  { %1939 = vmatpush3.bf16.msra.mxu1 %v1938_v55  ;;  %v517_v55 = vld [vmem:[%s3582_s3 + $0xa8] sm:$0xff]  ;;  %v1992_v2 = vpack.c.bf16 %v549_v57, %v548_v56  ;;  %v1998_v23 = vpack.c.bf16 %v535_v17, %v534_v15  ;;  %v536_v27 = vld [vmem:[%s3582_s3 + $0x140] sm:$0xff]  ;;  %v555_v34 = vld [vmem:[%s3582_s3 + $0x1d8] sm:$0xff] }
  0x3a   :  { %1941 = vmatprep.subr.bf16.mxu1 %v1940_v61  ;;  %v1960_v61 = vpack.c.bf16 %v517_v55, %v516_v54  ;;  %v2002_v36 = vpack.c.bf16 %v537_v29, %v536_v27  ;;  %v506_v38 = vld [vmem:[%s3582_s3 + $0x50] sm:$0xff]  ;;  %v507_v39 = vld [vmem:[%s3582_s3 + $0x58] sm:$0xff]  ;;  %v557_v48 = vld [vmem:[%s3582_s3 + $0x1e8] sm:$0xff] }
  0x3b   :  { %1911 = vmatpush3.bf16.msra.mxu0 %v1910_v4  ;;  %v518_v4 = vld [vmem:[%s3582_s3 + $0xb0] sm:$0xff]  ;;  %v539_v43 = vld [vmem:[%s3582_s3 + $0x158] sm:$0xff]  ;;  %v1974_v49 = vpack.c.bf16 %v507_v39, %v506_v38  ;;  %v508_v51 = vld [vmem:[%s3582_s3 + $0x60] sm:$0xff] }
  0x3c   :  { %1913 = vmatprep.subr.bf16.mxu0 %v1912_v6  ;;  %v550_v6 = vld [vmem:[%s3582_s3 + $0x1b0] sm:$0xff]  ;;  %v509_v54 = vld [vmem:[%s3582_s3 + $0x68] sm:$0xff]  ;;  %v540_v55 = vld [vmem:[%s3582_s3 + $0x160] sm:$0xff] }
  0x3d   :  { %1943 = vmatpush3.bf16.msra.mxu1 %v1942_v5  ;;  %v519_v5 = vld [vmem:[%s3582_s3 + $0xb8] sm:$0xff]  ;;  %v1996_v16 = vpack.c.bf16 %v551_v7, %v550_v6  ;;  %v538_v40 = vld [vmem:[%s3582_s3 + $0x150] sm:$0xff] }
  0x3e   :  { %1945 = vmatprep.subr.bf16.mxu1 %v1944_v11  ;;  %v1964_v11 = vpack.c.bf16 %v519_v5, %v518_v4 }
  0x3f   :  { %1915 = vmatpush3.bf16.msra.mxu0 %v1914_v18  ;;  %v520_v18 = vld [vmem:[%s3582_s3 + $0xc0] sm:$0xff] }
  0x40   :  { %1917 = vmatprep.subr.bf16.mxu0 %v1916_v20  ;;  %v552_v20 = vld [vmem:[%s3582_s3 + $0x1c0] sm:$0xff] }
  0x41   :  { %1947 = vmatpush3.bf16.msra.mxu1 %v1946_v19  ;;  %v521_v19 = vld [vmem:[%s3582_s3 + $0xc8] sm:$0xff]  ;;  %v2000_v28 = vpack.c.bf16 %v553_v21, %v552_v20 }
  0x42   :  { %1949 = vmatprep.subr.bf16.mxu1 %v1948_v24  ;;  %v1968_v24 = vpack.c.bf16 %v521_v19, %v520_v18 }
  0x43   :  { %1919 = vmatpush3.bf16.msra.mxu0 %v1918_v30  ;;  %v522_v30 = vld [vmem:[%s3582_s3 + $0xd0] sm:$0xff] }
  0x44   :  { %1953 = vmatprep.subr.bf16.mxu0 %v1952_v32  ;;  %v554_v32 = vld [vmem:[%s3582_s3 + $0x1d0] sm:$0xff] }
  0x45   :  { %1951 = vmatpush3.bf16.msra.mxu1 %v1950_v31  ;;  %v523_v31 = vld [vmem:[%s3582_s3 + $0xd8] sm:$0xff]  ;;  %v2004_v41 = vpack.c.bf16 %v555_v34, %v554_v32 }
  0x46   :  { %1985 = vmatprep.subr.bf16.mxu1 %v1984_v37  ;;  %421 = vmatmul.mubr.f32.vlgmr.msra.gmra.mrb[2].mxu0 %v2571_v60  ;;  %v1972_v37 = vpack.c.bf16 %v523_v31, %v522_v30 }
  0x47   :  { %1955 = vmatpush3.bf16.msra.mxu0 %v1954_v44  ;;  %695 = vmatprep.mubr.f32.mxu0 %v2531_v42  ;;  %v524_v44 = vld [vmem:[%s3582_s3 + $0xe0] sm:$0xff] }
  0x48   :  { %491 = vmatmul.mubr.f32.vlgmr.msra.gmra.mrb[2].mxu1 %v2579_v63  ;;  %1957 = vmatprep.subr.bf16.mxu0 %v1956_v47  ;;  %v556_v47 = vld [vmem:[%s3582_s3 + $0x1e0] sm:$0xff] }
  0x49   :  { %1987 = vmatpush3.bf16.msra.mxu1 %v1986_v46  ;;  %765 = vmatprep.mubr.f32.mxu1 %v2550_v50  ;;  %v525_v46 = vld [vmem:[%s3582_s3 + $0xe8] sm:$0xff] }
  0x4a   :  { %1989 = vmatprep.subr.bf16.mxu1 %v1988_v52  ;;  %v2006_v52 = vpack.c.bf16 %v539_v43, %v538_v40  ;;  %v1976_v53 = vpack.c.bf16 %v525_v46, %v524_v44 }
  0x4b   :  { %1959 = vmatpush3.bf16.msra.mxu0 %v1958_v58 }
  0x4c   :  { %1961 = vmatprep.subr.bf16.mxu0 %v1960_v61 }
  0x4d   :  { %1991 = vmatpush3.bf16.msra.mxu1 %v1990_v59 }
  0x4e   :  { %1993 = vmatprep.subr.bf16.mxu1 %v1992_v2 }
  0x4f   :  { %1963 = vmatpush3.bf16.msra.mxu0 %v1962_v8 }
  0x50   :  { %1965 = vmatprep.subr.bf16.mxu0 %v1964_v11 }
  0x51   :  { %1995 = vmatpush3.bf16.msra.mxu1 %v1994_v9 }
  0x52   :  { %1997 = vmatprep.subr.bf16.mxu1 %v1996_v16 }
  0x53   :  { %1967 = vmatpush3.bf16.msra.mxu0 %v1966_v22 }
  0x54   :  { %1969 = vmatprep.subr.bf16.mxu0 %v1968_v24 }
  0x55   :  { %1999 = vmatpush3.bf16.msra.mxu1 %v1998_v23 }
  0x56   :  { %2001 = vmatprep.subr.bf16.mxu1 %v2000_v28 }
  0x57   :  { %1971 = vmatpush3.bf16.msra.mxu0 %v1970_v35 }
  0x58   :  { %1973 = vmatprep.subr.bf16.mxu0 %v1972_v37 }
  0x59   :  { %2003 = vmatpush3.bf16.msra.mxu1 %v2002_v36 }
  0x5a   :  { %19 = vsyncpa [#allocation6], 0  ;;  %2005 = vmatprep.subr.bf16.mxu1 %v2004_v41  ;;  %v2008_v56 = vpack.c.bf16 %v557_v48, %v556_v47  ;;  %v541_v57 = vld [vmem:[%s3582_s3 + $0x168] sm:$0xff]  ;;  %v526_v58 = vld [vmem:[%s3582_s3 + $0xf0] sm:$0xff]  ;;  %v1978_v0 = vpack.c.bf16 %v509_v54, %v508_v51  ;;  %vm1326_vm0 = vcmask 91136   ;;  %vm1339_vm1 = vcmask 74752  }
  0x5b   :  { %v527_v59 = vld [vmem:[%s3582_s3 + $0xf8] sm:$0xff]  ;;  %v558_v61 = vld [vmem:[%s3582_s3 + $0x1f0] sm:$0xff]  ;;  %1975 = vmatpush3.bf16.msra.mxu0 %v1974_v49  ;;  %v2010_v1 = vpack.c.bf16 %v541_v57, %v540_v55  ;;  %v576_v8 = vld [vmem:[%s3582_s3 + $0x280] sm:$0xff]  ;;  %vm1352_vm2 = vcmask 1024  }
  0x5c   :  { %v559_v62 = vld [vmem:[%s3582_s3 + $0x1f8] sm:$0xff]  ;;  %1977 = vmatprep.subr.bf16.mxu0 %v1976_v53  ;;  %v1980_v2 = vpack.c.bf16 %v527_v59, %v526_v58  ;;  %v510_v3 = vld [vmem:[%s3582_s3 + $0x70] sm:$0xff]  ;;  %v577_v9 = vld [vmem:[%s3582_s3 + $0x288] sm:$0xff] }
  0x5d   :  { %2007 = vmatpush3.bf16.msra.mxu1 %v2006_v52  ;;  %v511_v4 = vld [vmem:[%s3582_s3 + $0x78] sm:$0xff]  ;;  %v542_v5 = vld [vmem:[%s3582_s3 + $0x170] sm:$0xff]  ;;  %v2012_v6 = vpack.c.bf16 %v559_v62, %v558_v61  ;;  %v608_v11 = vld [vmem:[%s3582_s3 + $0x380] sm:$0xff]  ;;  %v2016_v16 = vpack.c.bf16 %v577_v9, %v576_v8 }
  0x5e   :  { %2009 = vmatprep.subr.bf16.mxu1 %v2008_v56  ;;  %v543_v7 = vld [vmem:[%s3582_s3 + $0x178] sm:$0xff]  ;;  %v609_v12 = vld [vmem:[%s3582_s3 + $0x388] sm:$0xff]  ;;  %v1982_v14 = vpack.c.bf16 %v511_v4, %v510_v3  ;;  %v560_v17 = vld [vmem:[%s3582_s3 + $0x200] sm:$0xff] }
  0x5f   :  { %1979 = vmatpush3.bf16.msra.mxu0 %v1978_v0  ;;  %v2014_v15 = vpack.c.bf16 %v543_v7, %v542_v5  ;;  %v561_v18 = vld [vmem:[%s3582_s3 + $0x208] sm:$0xff]  ;;  %v592_v19 = vld [vmem:[%s3582_s3 + $0x300] sm:$0xff]  ;;  %v2048_v20 = vpack.c.bf16 %v609_v12, %v608_v11  ;;  %v578_v22 = vld [vmem:[%s3582_s3 + $0x290] sm:$0xff] }
  0x60   :  { %1981 = vmatprep.subr.bf16.mxu0 %v1980_v2  ;;  %v593_v21 = vld [vmem:[%s3582_s3 + $0x308] sm:$0xff]  ;;  %v579_v23 = vld [vmem:[%s3582_s3 + $0x298] sm:$0xff]  ;;  %v610_v24 = vld [vmem:[%s3582_s3 + $0x390] sm:$0xff]  ;;  %v2018_v26 = vpack.c.bf16 %v561_v18, %v560_v17 }
  0x61   :  { %2011 = vmatpush3.bf16.msra.mxu1 %v2010_v1  ;;  %v611_v25 = vld [vmem:[%s3582_s3 + $0x398] sm:$0xff]  ;;  %v2050_v27 = vpack.c.bf16 %v593_v21, %v592_v19  ;;  %v2020_v28 = vpack.c.bf16 %v579_v23, %v578_v22  ;;  %v562_v29 = vld [vmem:[%s3582_s3 + $0x210] sm:$0xff]  ;;  %v580_v35 = vld [vmem:[%s3582_s3 + $0x2a0] sm:$0xff] }
  0x62   :  { %2013 = vmatprep.subr.bf16.mxu1 %v2012_v6  ;;  %v563_v30 = vld [vmem:[%s3582_s3 + $0x218] sm:$0xff]  ;;  %v594_v31 = vld [vmem:[%s3582_s3 + $0x310] sm:$0xff]  ;;  %v2052_v32 = vpack.c.bf16 %v611_v25, %v610_v24  ;;  %v581_v36 = vld [vmem:[%s3582_s3 + $0x2a8] sm:$0xff] }
  0x63   :  { %1983 = vmatpush3.bf16.msra.mxu0 %v1982_v14  ;;  %v595_v34 = vld [vmem:[%s3582_s3 + $0x318] sm:$0xff]  ;;  %v612_v37 = vld [vmem:[%s3582_s3 + $0x3a0] sm:$0xff]  ;;  %v613_v38 = vld [vmem:[%s3582_s3 + $0x3a8] sm:$0xff]  ;;  %v2022_v39 = vpack.c.bf16 %v563_v30, %v562_v29  ;;  %v2024_v41 = vpack.c.bf16 %v581_v36, %v580_v35 }
  0x64   :  { %2017 = vmatprep.subr.bf16.mxu0 %v2016_v16  ;;  %v2054_v40 = vpack.c.bf16 %v595_v34, %v594_v31  ;;  %v564_v43 = vld [vmem:[%s3582_s3 + $0x220] sm:$0xff]  ;;  %v565_v44 = vld [vmem:[%s3582_s3 + $0x228] sm:$0xff]  ;;  %v2056_v47 = vpack.c.bf16 %v613_v38, %v612_v37  ;;  %v582_v49 = vld [vmem:[%s3582_s3 + $0x2b0] sm:$0xff] }
  0x65   :  { %2015 = vmatpush3.bf16.msra.mxu1 %v2014_v15  ;;  %v596_v46 = vld [vmem:[%s3582_s3 + $0x320] sm:$0xff]  ;;  %v597_v48 = vld [vmem:[%s3582_s3 + $0x328] sm:$0xff]  ;;  %v583_v51 = vld [vmem:[%s3582_s3 + $0x2b8] sm:$0xff]  ;;  %v2026_v54 = vpack.c.bf16 %v565_v44, %v564_v43 }
  0x66   :  { %2049 = vmatprep.subr.bf16.mxu1 %v2048_v20  ;;  %696 = vmatmul.mubr.f32.vlgmr.msra.gmra.mrb[4].mxu0 %v2515_v33  ;;  %v614_v52 = vld [vmem:[%s3582_s3 + $0x3b0] sm:$0xff]  ;;  %v615_v53 = vld [vmem:[%s3582_s3 + $0x3b8] sm:$0xff]  ;;  %v2058_v55 = vpack.c.bf16 %v597_v48, %v596_v46  ;;  %v2028_v56 = vpack.c.bf16 %v583_v51, %v582_v49  ;;  %v584_v0 = vld [vmem:[%s3582_s3 + $0x2c0] sm:$0xff] }
  0x67   :  { %2019 = vmatpush3.bf16.msra.mxu0 %v2018_v26  ;;  %835 = vmatprep.mubr.f32.mxu0 %v2601_v10  ;;  %v566_v57 = vld [vmem:[%s3582_s3 + $0x230] sm:$0xff]  ;;  %v567_v58 = vld [vmem:[%s3582_s3 + $0x238] sm:$0xff]  ;;  %v2060_v61 = vpack.c.bf16 %v615_v53, %v614_v52  ;;  %v585_v1 = vld [vmem:[%s3582_s3 + $0x2c8] sm:$0xff] }
  0x68   :  { %766 = vmatmul.mubr.f32.vlgmr.msra.gmra.mrb[4].mxu1 %v2539_v45  ;;  %2021 = vmatprep.subr.bf16.mxu0 %v2020_v28  ;;  %v598_v59 = vld [vmem:[%s3582_s3 + $0x330] sm:$0xff]  ;;  %v599_v62 = vld [vmem:[%s3582_s3 + $0x338] sm:$0xff]  ;;  %v616_v2 = vld [vmem:[%s3582_s3 + $0x3c0] sm:$0xff]  ;;  %v2030_v4 = vpack.c.bf16 %v567_v58, %v566_v57  ;;  %v2032_v6 = vpack.c.bf16 %v585_v1, %v584_v0 }
  0x69   :  { %2051 = vmatpush3.bf16.msra.mxu1 %v2050_v27  ;;  %905 = vmatprep.mubr.f32.mxu1 %v2612_v13  ;;  %v617_v3 = vld [vmem:[%s3582_s3 + $0x3c8] sm:$0xff]  ;;  %v2062_v5 = vpack.c.bf16 %v599_v62, %v598_v59  ;;  %v568_v7 = vld [vmem:[%s3582_s3 + $0x240] sm:$0xff]  ;;  %v586_v14 = vld [vmem:[%s3582_s3 + $0x2d0] sm:$0xff] }
  0x6a   :  { %2053 = vmatprep.subr.bf16.mxu1 %v2052_v32  ;;  %v569_v8 = vld [vmem:[%s3582_s3 + $0x248] sm:$0xff]  ;;  %v600_v9 = vld [vmem:[%s3582_s3 + $0x340] sm:$0xff]  ;;  %v2064_v11 = vpack.c.bf16 %v617_v3, %v616_v2  ;;  %v587_v15 = vld [vmem:[%s3582_s3 + $0x2d8] sm:$0xff] }
  0x6b   :  { %2023 = vmatpush3.bf16.msra.mxu0 %v2022_v39  ;;  %v601_v12 = vld [vmem:[%s3582_s3 + $0x348] sm:$0xff]  ;;  %v618_v16 = vld [vmem:[%s3582_s3 + $0x3d0] sm:$0xff]  ;;  %v619_v17 = vld [vmem:[%s3582_s3 + $0x3d8] sm:$0xff]  ;;  %v2034_v18 = vpack.c.bf16 %v569_v8, %v568_v7  ;;  %v2036_v20 = vpack.c.bf16 %v587_v15, %v586_v14 }
  0x6c   :  { %2025 = vmatprep.subr.bf16.mxu0 %v2024_v41  ;;  %v2066_v19 = vpack.c.bf16 %v601_v12, %v600_v9  ;;  %v570_v21 = vld [vmem:[%s3582_s3 + $0x250] sm:$0xff]  ;;  %v571_v22 = vld [vmem:[%s3582_s3 + $0x258] sm:$0xff]  ;;  %v2068_v24 = vpack.c.bf16 %v619_v17, %v618_v16  ;;  %v588_v26 = vld [vmem:[%s3582_s3 + $0x2e0] sm:$0xff] }
  0x6d   :  { %2055 = vmatpush3.bf16.msra.mxu1 %v2054_v40  ;;  %v602_v23 = vld [vmem:[%s3582_s3 + $0x350] sm:$0xff]  ;;  %v603_v25 = vld [vmem:[%s3582_s3 + $0x358] sm:$0xff]  ;;  %v589_v27 = vld [vmem:[%s3582_s3 + $0x2e8] sm:$0xff]  ;;  %v2038_v30 = vpack.c.bf16 %v571_v22, %v570_v21 }
  0x6e   :  { %2057 = vmatprep.subr.bf16.mxu1 %v2056_v47  ;;  %v620_v28 = vld [vmem:[%s3582_s3 + $0x3e0] sm:$0xff]  ;;  %v621_v29 = vld [vmem:[%s3582_s3 + $0x3e8] sm:$0xff]  ;;  %v2070_v31 = vpack.c.bf16 %v603_v25, %v602_v23  ;;  %v2040_v32 = vpack.c.bf16 %v589_v27, %v588_v26  ;;  %v590_v39 = vld [vmem:[%s3582_s3 + $0x2f0] sm:$0xff] }
  0x6f   :  { %2027 = vmatpush3.bf16.msra.mxu0 %v2026_v54  ;;  %v572_v34 = vld [vmem:[%s3582_s3 + $0x260] sm:$0xff]  ;;  %v573_v35 = vld [vmem:[%s3582_s3 + $0x268] sm:$0xff]  ;;  %v2072_v37 = vpack.c.bf16 %v621_v29, %v620_v28  ;;  %v591_v40 = vld [vmem:[%s3582_s3 + $0x2f8] sm:$0xff] }
  0x70   :  { %2029 = vmatprep.subr.bf16.mxu0 %v2028_v56  ;;  %v604_v36 = vld [vmem:[%s3582_s3 + $0x360] sm:$0xff]  ;;  %v605_v38 = vld [vmem:[%s3582_s3 + $0x368] sm:$0xff]  ;;  %v622_v41 = vld [vmem:[%s3582_s3 + $0x3f0] sm:$0xff]  ;;  %v2042_v44 = vpack.c.bf16 %v573_v35, %v572_v34  ;;  %v2044_v47 = vpack.c.bf16 %v591_v40, %v590_v39 }
  0x71   :  { %2059 = vmatpush3.bf16.msra.mxu1 %v2058_v55  ;;  %v623_v43 = vld [vmem:[%s3582_s3 + $0x3f8] sm:$0xff]  ;;  %v2074_v46 = vpack.c.bf16 %v605_v38, %v604_v36  ;;  %v574_v48 = vld [vmem:[%s3582_s3 + $0x270] sm:$0xff]  ;;  %v927_v56 = vld [vmem:[%s3584_s5 + $0x80] sm:$0xff] }
  0x72   :  { %2061 = vmatprep.subr.bf16.mxu1 %v2060_v61  ;;  %v575_v49 = vld [vmem:[%s3582_s3 + $0x278] sm:$0xff]  ;;  %v2076_v51 = vpack.c.bf16 %v623_v43, %v622_v41  ;;  %v606_v52 = vld [vmem:[%s3582_s3 + $0x370] sm:$0xff]  ;;  %v928_v57 = vld [vmem:[%s3584_s5 + $0x88] sm:$0xff] }
  0x73   :  { %2031 = vmatpush3.bf16.msra.mxu0 %v2030_v4  ;;  %v607_v53 = vld [vmem:[%s3582_s3 + $0x378] sm:$0xff]  ;;  %v2046_v54 = vpack.c.bf16 %v575_v49, %v574_v48  ;;  %v911_v58 = vld [vmem:[%s3584_s5] sm:$0xff]  ;;  %v2080_v59 = vpack.c.bf16 %v928_v57, %v927_v56  ;;  %v912_v61 = vld [vmem:[%s3584_s5 + $0x8] sm:$0xff] }
  0x74   :  { %2033 = vmatprep.subr.bf16.mxu0 %v2032_v6  ;;  %v2078_v55 = vpack.c.bf16 %v607_v53, %v606_v52  ;;  %v2082_v62 = vpack.c.bf16 %v912_v61, %v911_v58  ;;  %v943_v1 = vld [vmem:[%s3584_s5 + $0x100] sm:$0xff]  ;;  %v944_v2 = vld [vmem:[%s3584_s5 + $0x108] sm:$0xff]  ;;  %v929_v3 = vld [vmem:[%s3584_s5 + $0x90] sm:$0xff] }
  0x75   :  { %2063 = vmatpush3.bf16.msra.mxu1 %v2062_v5  ;;  %v2114_v4 = vpack.c.bf16 %v944_v2, %v943_v1  ;;  %v930_v5 = vld [vmem:[%s3584_s5 + $0x98] sm:$0xff]  ;;  %v913_v6 = vld [vmem:[%s3584_s5 + $0x10] sm:$0xff]  ;;  %v931_v17 = vld [vmem:[%s3584_s5 + $0xa0] sm:$0xff] }
  0x76   :  { %2065 = vmatprep.subr.bf16.mxu1 %v2064_v11  ;;  %v914_v7 = vld [vmem:[%s3584_s5 + $0x18] sm:$0xff]  ;;  %v2084_v8 = vpack.c.bf16 %v930_v5, %v929_v3  ;;  %v961_v11 = vld [vmem:[%s3584_s5 + $0x190] sm:$0xff]  ;;  %v915_v21 = vld [vmem:[%s3584_s5 + $0x20] sm:$0xff] }
  0x77   :  { %2035 = vmatpush3.bf16.msra.mxu0 %v2034_v18  ;;  %v2086_v9 = vpack.c.bf16 %v914_v7, %v913_v6  ;;  %v962_v12 = vld [vmem:[%s3584_s5 + $0x198] sm:$0xff]  ;;  %v945_v14 = vld [vmem:[%s3584_s5 + $0x110] sm:$0xff]  ;;  %v932_v18 = vld [vmem:[%s3584_s5 + $0xa8] sm:$0xff] }
  0x78   :  { %2037 = vmatprep.subr.bf16.mxu0 %v2036_v20  ;;  %v2116_v15 = vpack.c.bf16 %v962_v12, %v961_v11  ;;  %v946_v16 = vld [vmem:[%s3584_s5 + $0x118] sm:$0xff]  ;;  %v2088_v20 = vpack.c.bf16 %v932_v18, %v931_v17  ;;  %v916_v22 = vld [vmem:[%s3584_s5 + $0x28] sm:$0xff]  ;;  %v963_v23 = vld [vmem:[%s3584_s5 + $0x1a0] sm:$0xff] }
  0x79   :  { %2067 = vmatpush3.bf16.msra.mxu1 %v2066_v19  ;;  %v2118_v19 = vpack.c.bf16 %v946_v16, %v945_v14  ;;  %v947_v25 = vld [vmem:[%s3584_s5 + $0x120] sm:$0xff]  ;;  %v948_v26 = vld [vmem:[%s3584_s5 + $0x128] sm:$0xff]  ;;  %v2090_v27 = vpack.c.bf16 %v916_v22, %v915_v21  ;;  %v933_v29 = vld [vmem:[%s3584_s5 + $0xb0] sm:$0xff] }
  0x7a   :  { %2069 = vmatprep.subr.bf16.mxu1 %v2068_v24  ;;  %v964_v24 = vld [vmem:[%s3584_s5 + $0x1a8] sm:$0xff]  ;;  %v918_v35 = vld [vmem:[%s3584_s5 + $0x38] sm:$0xff]  ;;  %v965_v36 = vld [vmem:[%s3584_s5 + $0x1b0] sm:$0xff] }
  0x7b   :  { %2039 = vmatpush3.bf16.msra.mxu0 %v2038_v30  ;;  %v2120_v28 = vpack.c.bf16 %v964_v24, %v963_v23  ;;  %v934_v30 = vld [vmem:[%s3584_s5 + $0xb8] sm:$0xff]  ;;  %v949_v39 = vld [vmem:[%s3584_s5 + $0x130] sm:$0xff]  ;;  %v935_v41 = vld [vmem:[%s3584_s5 + $0xc0] sm:$0xff] }
  0x7c   :  { %2041 = vmatprep.subr.bf16.mxu0 %v2040_v32  ;;  %v2122_v32 = vpack.c.bf16 %v948_v26, %v947_v25  ;;  %v2092_v34 = vpack.c.bf16 %v934_v30, %v933_v29  ;;  %v950_v40 = vld [vmem:[%s3584_s5 + $0x138] sm:$0xff]  ;;  %v936_v43 = vld [vmem:[%s3584_s5 + $0xc8] sm:$0xff]  ;;  %v937_v58 = vld [vmem:[%s3584_s5 + $0xd0] sm:$0xff] }
  0x7d   :  { %2071 = vmatpush3.bf16.msra.mxu1 %v2070_v31  ;;  %v917_v31 = vld [vmem:[%s3584_s5 + $0x30] sm:$0xff]  ;;  %v2126_v48 = vpack.c.bf16 %v950_v40, %v949_v39  ;;  %v2096_v49 = vpack.c.bf16 %v936_v43, %v935_v41  ;;  %v920_v52 = vld [vmem:[%s3584_s5 + $0x48] sm:$0xff]  ;;  %v970_v1 = vld [vmem:[%s3584_s5 + $0x1d8] sm:$0xff] }
  0x7e   :  { %2073 = vmatprep.subr.bf16.mxu1 %v2072_v37  ;;  %v966_v37 = vld [vmem:[%s3584_s5 + $0x1b8] sm:$0xff]  ;;  %v953_v3 = vld [vmem:[%s3584_s5 + $0x150] sm:$0xff]  ;;  %v939_v6 = vld [vmem:[%s3584_s5 + $0xe0] sm:$0xff] }
  0x7f   :  { %2043 = vmatpush3.bf16.msra.mxu0 %v2042_v44  ;;  %v2124_v38 = vpack.c.bf16 %v966_v37, %v965_v36  ;;  %v2094_v44 = vpack.c.bf16 %v918_v35, %v917_v31  ;;  %v940_v7 = vld [vmem:[%s3584_s5 + $0xe8] sm:$0xff]  ;;  %v971_v14 = vld [vmem:[%s3584_s5 + $0x1e0] sm:$0xff]  ;;  %v942_v21 = vld [vmem:[%s3584_s5 + $0xf8] sm:$0xff] }
  0x80   :  { %2045 = vmatprep.subr.bf16.mxu0 %v2044_v47  ;;  %v968_v47 = vld [vmem:[%s3584_s5 + $0x1c8] sm:$0xff]  ;;  %v955_v17 = vld [vmem:[%s3584_s5 + $0x160] sm:$0xff]  ;;  %v925_v23 = vld [vmem:[%s3584_s5 + $0x70] sm:$0xff] }
  0x81   :  { %2075 = vmatpush3.bf16.msra.mxu1 %v2074_v46  ;;  %v967_v46 = vld [vmem:[%s3584_s5 + $0x1c0] sm:$0xff]  ;;  %v924_v11 = vld [vmem:[%s3584_s5 + $0x68] sm:$0xff]  ;;  %v926_v24 = vld [vmem:[%s3584_s5 + $0x78] sm:$0xff] }
  0x82   :  { %2077 = vmatprep.subr.bf16.mxu1 %v2076_v51  ;;  %v919_v51 = vld [vmem:[%s3584_s5 + $0x40] sm:$0xff]  ;;  %v2128_v53 = vpack.c.bf16 %v968_v47, %v967_v46  ;;  %v956_v18 = vld [vmem:[%s3584_s5 + $0x168] sm:$0xff]  ;;  %v973_v25 = vld [vmem:[%s3584_s5 + $0x1f0] sm:$0xff]  ;;  %v2110_v26 = vpack.c.bf16 %v926_v24, %v925_v23 }
  0x83   :  { %2047 = vmatpush3.bf16.msra.mxu0 %v2046_v54  ;;  %v951_v54 = vld [vmem:[%s3584_s5 + $0x140] sm:$0xff]  ;;  %v2098_v56 = vpack.c.bf16 %v920_v52, %v919_v51  ;;  %v958_v29 = vld [vmem:[%s3584_s5 + $0x178] sm:$0xff]  ;;  %v976_v37 = vld [vmem:[%s3584_s5 + $0x208] sm:$0xff] }
  0x84   :  { %2081 = vmatprep.subr.bf16.mxu0 %v2080_v59  ;;  %v938_v59 = vld [vmem:[%s3584_s5 + $0xd8] sm:$0xff]  ;;  %v975_v35 = vld [vmem:[%s3584_s5 + $0x200] sm:$0xff]  ;;  %v1024_v39 = vld [vmem:[%s3584_s5 + $0x388] sm:$0xff] }
  0x85   :  { %2079 = vmatpush3.bf16.msra.mxu1 %v2078_v55  ;;  %v952_v55 = vld [vmem:[%s3584_s5 + $0x148] sm:$0xff]  ;;  %v2100_v61 = vpack.c.bf16 %v938_v59, %v937_v58  ;;  %v2146_v40 = vpack.c.bf16 %v976_v37, %v975_v35  ;;  %v1007_v43 = vld [vmem:[%s3584_s5 + $0x300] sm:$0xff]  ;;  %v993_v46 = vld [vmem:[%s3584_s5 + $0x290] sm:$0xff] }
  0x86   :  { %836 = vmatmul.mubr.f32.vlgmr.msra.gmra.mrb[6].mxu0 %v2571_v60  ;;  %v2130_v57 = vpack.c.bf16 %v952_v55, %v951_v54  ;;  %v978_v51 = vld [vmem:[%s3584_s5 + $0x218] sm:$0xff]  ;;  %v1009_v55 = vld [vmem:[%s3584_s5 + $0x310] sm:$0xff]  ;;  %v995_v58 = vld [vmem:[%s3584_s5 + $0x2a0] sm:$0xff] }
  0x87   :  { %1110 = vmatprep.mubr.f32.mxu0 %v2531_v42  ;;  %v959_v42 = vld [vmem:[%s3584_s5 + $0x180] sm:$0xff]  ;;  %2083 = vmatpush3.bf16.msra.mxu0 %v2082_v62  ;;  %v1026_v54 = vld [vmem:[%s3584_s5 + $0x398] sm:$0xff]  ;;  %v996_v59 = vld [vmem:[%s3584_s5 + $0x2a8] sm:$0xff] }
  0x88   :  { %906 = vmatmul.mubr.f32.vlgmr.msra.gmra.mrb[6].mxu1 %v2579_v63  ;;  %2085 = vmatprep.subr.bf16.mxu0 %v2084_v8  ;;  %v2104_v8 = vpack.c.bf16 %v940_v7, %v939_v6  ;;  %v1030_v6 = vld [vmem:[%s3584_s5 + $0x3b8] sm:$0xff]  ;;  %v984_v23 = vld [vmem:[%s3584_s5 + $0x248] sm:$0xff]  ;;  %v1033_v37 = vld [vmem:[%s3584_s5 + $0x3d0] sm:$0xff] }
  0x89   :  { %1180 = vmatprep.mubr.f32.mxu1 %v2550_v50  ;;  %v960_v50 = vld [vmem:[%s3584_s5 + $0x188] sm:$0xff]  ;;  %v986_v35 = vld [vmem:[%s3584_s5 + $0x258] sm:$0xff] }
  0x8a   :  { %v2112_v0 = vpack.c.bf16 %v960_v50, %v959_v42  ;;  %v921_v42 = vld [vmem:[%s3584_s5 + $0x50] sm:$0xff]  ;;  %v922_v50 = vld [vmem:[%s3584_s5 + $0x58] sm:$0xff] }
  0x8b   :  { %2087 = vmatpush3.bf16.msra.mxu0 %v2086_v9  ;;  %v2102_v62 = vpack.c.bf16 %v922_v50, %v921_v42  ;;  %v923_v9 = vld [vmem:[%s3584_s5 + $0x60] sm:$0xff]  ;;  %v980_v50 = vld [vmem:[%s3584_s5 + $0x228] sm:$0xff] }
  0x8c   :  { %2113 = vmatprep.subr.bf16.mxu1 %v2112_v0  ;;  %2089 = vmatprep.subr.bf16.mxu0 %v2088_v20  ;;  %v969_v0 = vld [vmem:[%s3584_s5 + $0x1d0] sm:$0xff]  ;;  %v2106_v12 = vpack.c.bf16 %v924_v11, %v923_v9  ;;  %v979_v42 = vld [vmem:[%s3584_s5 + $0x220] sm:$0xff]  ;;  %v982_v9 = vld [vmem:[%s3584_s5 + $0x238] sm:$0xff] }
  0x8d   :  { %2115 = vmatpush3.bf16.msra.mxu1 %v2114_v4  ;;  %v2132_v2 = vpack.c.bf16 %v970_v1, %v969_v0  ;;  %v954_v4 = vld [vmem:[%s3584_s5 + $0x158] sm:$0xff]  ;;  %v941_v20 = vld [vmem:[%s3584_s5 + $0xf0] sm:$0xff] }
  0x8e   :  { %2117 = vmatprep.subr.bf16.mxu1 %v2116_v15  ;;  %v2134_v5 = vpack.c.bf16 %v954_v4, %v953_v3  ;;  %v972_v15 = vld [vmem:[%s3584_s5 + $0x1e8] sm:$0xff]  ;;  %v2108_v22 = vpack.c.bf16 %v942_v21, %v941_v20  ;;  %v997_v3 = vld [vmem:[%s3584_s5 + $0x2b0] sm:$0xff]  ;;  %v998_v4 = vld [vmem:[%s3584_s5 + $0x2b8] sm:$0xff] }
  0x8f   :  { %2091 = vmatpush3.bf16.msra.mxu0 %v2090_v27  ;;  %v2136_v16 = vpack.c.bf16 %v972_v15, %v971_v14  ;;  %v974_v27 = vld [vmem:[%s3584_s5 + $0x1f8] sm:$0xff]  ;;  %v2156_v7 = vpack.c.bf16 %v998_v4, %v997_v3  ;;  %v1000_v14 = vld [vmem:[%s3584_s5 + $0x2c8] sm:$0xff]  ;;  %v1401_v4 = vld [vmem:[%s3581_s2] ss:$0 sm:$0xff] }
  0x90   :  { %2093 = vmatprep.subr.bf16.mxu0 %v2092_v34  ;;  %v2140_v30 = vpack.c.bf16 %v974_v27, %v973_v25  ;;  %v992_v34 = vld [vmem:[%s3584_s5 + $0x288] sm:$0xff] }
  0x91   :  { %2119 = vmatpush3.bf16.msra.mxu1 %v2118_v19  ;;  %v2138_v19 = vpack.c.bf16 %v956_v18, %v955_v17  ;;  %v1014_v17 = vld [vmem:[%s3584_s5 + $0x338] sm:$0xff]  ;;  %v1032_v20 = vld [vmem:[%s3584_s5 + $0x3c8] sm:$0xff] }
  0x92   :  { %2121 = vmatprep.subr.bf16.mxu1 %v2120_v28  ;;  %v957_v28 = vld [vmem:[%s3584_s5 + $0x170] sm:$0xff]  ;;  %v1016_v27 = vld [vmem:[%s3584_s5 + $0x348] sm:$0xff] }
  0x93   :  { %2095 = vmatpush3.bf16.msra.mxu0 %v2094_v44  ;;  %v2142_v31 = vpack.c.bf16 %v958_v29, %v957_v28  ;;  %v1008_v44 = vld [vmem:[%s3584_s5 + $0x308] sm:$0xff] }
  0x94   :  { %2097 = vmatprep.subr.bf16.mxu0 %v2096_v49  ;;  %v2178_v47 = vpack.c.bf16 %v1008_v44, %v1007_v43  ;;  %v977_v49 = vld [vmem:[%s3584_s5 + $0x210] sm:$0xff]  ;;  %v1003_v44 = vld [vmem:[%s3584_s5 + $0x2e0] sm:$0xff] }
  0x95   :  { %2123 = vmatpush3.bf16.msra.mxu1 %v2122_v32  ;;  %v991_v32 = vld [vmem:[%s3584_s5 + $0x280] sm:$0xff] }
  0x96   :  { %2125 = vmatprep.subr.bf16.mxu1 %v2124_v38  ;;  %v2144_v36 = vpack.c.bf16 %v992_v34, %v991_v32  ;;  %v1023_v38 = vld [vmem:[%s3584_s5 + $0x380] sm:$0xff]  ;;  %v985_v34 = vld [vmem:[%s3584_s5 + $0x250] sm:$0xff] }
  0x97   :  { %2099 = vmatpush3.bf16.msra.mxu0 %v2098_v56  ;;  %v2176_v41 = vpack.c.bf16 %v1024_v39, %v1023_v38  ;;  %v2150_v56 = vpack.c.bf16 %v978_v51, %v977_v49  ;;  %v1034_v38 = vld [vmem:[%s3584_s5 + $0x3d8] sm:$0xff]  ;;  %v988_v49 = vld [vmem:[%s3584_s5 + $0x268] sm:$0xff] }
  0x98   :  { %2101 = vmatprep.subr.bf16.mxu0 %v2100_v61  ;;  %v2152_v61 = vpack.c.bf16 %v996_v59, %v995_v58  ;;  %v2196_v39 = vpack.c.bf16 %v1034_v38, %v1033_v37  ;;  %v1006_v58 = vld [vmem:[%s3584_s5 + $0x2f8] sm:$0xff]  ;;  %v989_v59 = vld [vmem:[%s3584_s5 + $0x270] sm:$0xff] }
  0x99   :  { %2127 = vmatpush3.bf16.msra.mxu1 %v2126_v48  ;;  %v994_v48 = vld [vmem:[%s3584_s5 + $0x298] sm:$0xff] }
  0x9a   :  { %2129 = vmatprep.subr.bf16.mxu1 %v2128_v53  ;;  %v2148_v52 = vpack.c.bf16 %v994_v48, %v993_v46  ;;  %v1025_v53 = vld [vmem:[%s3584_s5 + $0x390] sm:$0xff]  ;;  %v1004_v46 = vld [vmem:[%s3584_s5 + $0x2e8] sm:$0xff]  ;;  %v987_v48 = vld [vmem:[%s3584_s5 + $0x260] sm:$0xff] }
  0x9b   :  { %2103 = vmatpush3.bf16.msra.mxu0 %v2102_v62  ;;  %v1027_v62 = vld [vmem:[%s3584_s5 + $0x3a0] sm:$0xff]  ;;  %v2170_v51 = vpack.c.bf16 %v988_v49, %v987_v48 }
  0x9c   :  { %2105 = vmatprep.subr.bf16.mxu0 %v2104_v8  ;;  %v981_v8 = vld [vmem:[%s3584_s5 + $0x230] sm:$0xff] }
  0x9d   :  { %2131 = vmatpush3.bf16.msra.mxu1 %v2130_v57  ;;  %v2180_v57 = vpack.c.bf16 %v1026_v54, %v1025_v53  ;;  %v2158_v18 = vpack.c.bf16 %v982_v9, %v981_v8  ;;  %v1036_v53 = vld [vmem:[%s3584_s5 + $0x3e8] sm:$0xff] }
  0x9e   :  { %2133 = vmatprep.subr.bf16.mxu1 %v2132_v2  ;;  %v1012_v2 = vld [vmem:[%s3584_s5 + $0x328] sm:$0xff] }
  0x9f   :  { %2107 = vmatpush3.bf16.msra.mxu0 %v2106_v12  ;;  %v999_v12 = vld [vmem:[%s3584_s5 + $0x2c0] sm:$0xff] }
  0xa0   :  { %2109 = vmatprep.subr.bf16.mxu0 %v2108_v22  ;;  %v2160_v21 = vpack.c.bf16 %v1000_v14, %v999_v12  ;;  %v983_v22 = vld [vmem:[%s3584_s5 + $0x240] sm:$0xff] }
  0xa1   :  { %2135 = vmatpush3.bf16.msra.mxu1 %v2134_v5  ;;  %v2154_v5 = vpack.c.bf16 %v980_v50, %v979_v42  ;;  %v2162_v28 = vpack.c.bf16 %v984_v23, %v983_v22 }
  0xa2   :  { %2137 = vmatprep.subr.bf16.mxu1 %v2136_v16  ;;  %v1013_v16 = vld [vmem:[%s3584_s5 + $0x330] sm:$0xff] }
  0xa3   :  { %2111 = vmatpush3.bf16.msra.mxu0 %v2110_v26  ;;  %v2190_v24 = vpack.c.bf16 %v1014_v17, %v1013_v16  ;;  %v1015_v26 = vld [vmem:[%s3584_s5 + $0x340] sm:$0xff] }
  0xa4   :  { %2145 = vmatprep.subr.bf16.mxu0 %v2144_v36  ;;  %v2194_v29 = vpack.c.bf16 %v1016_v27, %v1015_v26  ;;  %v2166_v36 = vpack.c.bf16 %v986_v35, %v985_v34 }
  0xa5   :  { %2139 = vmatpush3.bf16.msra.mxu1 %v2138_v19  ;;  %v1031_v19 = vld [vmem:[%s3584_s5 + $0x3c0] sm:$0xff] }
  0xa6   :  { %2141 = vmatprep.subr.bf16.mxu1 %v2140_v30  ;;  %1111 = vmatmul.mubr.f32.vlgmr.msra.gmra.mrb[8].mxu0 %v2515_v33  ;;  %v1010_v33 = vld [vmem:[%s3584_s5 + $0x318] sm:$0xff]  ;;  %v2192_v25 = vpack.c.bf16 %v1032_v20, %v1031_v19  ;;  %v1001_v30 = vld [vmem:[%s3584_s5 + $0x2d0] sm:$0xff] }
  0xa7   :  { %2147 = vmatpush3.bf16.msra.mxu0 %v2146_v40  ;;  %1250 = vmatprep.mubr.f32.mxu0 %v2601_v10  ;;  %v2182_v0 = vpack.c.bf16 %v1010_v33, %v1009_v55  ;;  %v1011_v10 = vld [vmem:[%s3584_s5 + $0x320] sm:$0xff]  ;;  %v1017_v40 = vld [vmem:[%s3584_s5 + $0x350] sm:$0xff] }
  0xa8   :  { %2149 = vmatprep.subr.bf16.mxu0 %v2148_v52  ;;  %v2186_v11 = vpack.c.bf16 %v1012_v2, %v1011_v10  ;;  %v1035_v52 = vld [vmem:[%s3584_s5 + $0x3e0] sm:$0xff]  ;;  %v1021_v10 = vld [vmem:[%s3584_s5 + $0x370] sm:$0xff] }
  0xa9   :  { %2143 = vmatpush3.bf16.msra.mxu1 %v2142_v31  ;;  %v1002_v31 = vld [vmem:[%s3584_s5 + $0x2d8] sm:$0xff]  ;;  %v2200_v54 = vpack.c.bf16 %v1036_v53, %v1035_v52  ;;  %v1019_v55 = vld [vmem:[%s3584_s5 + $0x360] sm:$0xff] }
  0xaa   :  { %2177 = vmatprep.subr.bf16.mxu1 %v2176_v41  ;;  %v2164_v32 = vpack.c.bf16 %v1002_v31, %v1001_v30  ;;  %v1018_v41 = vld [vmem:[%s3584_s5 + $0x358] sm:$0xff] }
  0xab   :  { %2151 = vmatpush3.bf16.msra.mxu0 %v2150_v56  ;;  %v2198_v43 = vpack.c.bf16 %v1018_v41, %v1017_v40  ;;  %v1020_v56 = vld [vmem:[%s3584_s5 + $0x368] sm:$0xff]  ;;  %v1403_v40 = vld [vmem:[#allocation2] ss:$0 sm:$0xff] }
  0xac   :  { %1181 = vmatmul.mubr.f32.vlgmr.msra.gmra.mrb[8].mxu1 %v2539_v45  ;;  %v1028_v45 = vld [vmem:[%s3584_s5 + $0x3a8] sm:$0xff]  ;;  %2153 = vmatprep.subr.bf16.mxu0 %v2152_v61  ;;  %v2202_v33 = vpack.c.bf16 %v1020_v56, %v1019_v55  ;;  %v990_v61 = vld [vmem:[%s3584_s5 + $0x278] sm:$0xff] }
  0xad   :  { %2179 = vmatpush3.bf16.msra.mxu1 %v2178_v47  ;;  %1320 = vmatprep.mubr.f32.mxu1 %v2612_v13  ;;  %v2184_v1 = vpack.c.bf16 %v1028_v45, %v1027_v62  ;;  %v1029_v13 = vld [vmem:[%s3584_s5 + $0x3b0] sm:$0xff]  ;;  %v2168_v47 = vpack.c.bf16 %v1004_v46, %v1003_v44  ;;  %v2174_v50 = vpack.c.bf16 %v990_v61, %v989_v59 }
  0xae   :  { %2181 = vmatprep.subr.bf16.mxu1 %v2180_v57  ;;  %v2188_v15 = vpack.c.bf16 %v1030_v6, %v1029_v13  ;;  %v1005_v57 = vld [vmem:[%s3584_s5 + $0x2f0] sm:$0xff] }
  0xaf   :  { %2155 = vmatpush3.bf16.msra.mxu0 %v2154_v5  ;;  %v2172_v42 = vpack.c.bf16 %v1006_v58, %v1005_v57  ;;  %v1037_v62 = vld [vmem:[%s3584_s5 + $0x3f0] sm:$0xff] }
  0xb0   :  { %2157 = vmatprep.subr.bf16.mxu0 %v2156_v7 }
  0xb1   :  { %2183 = vmatpush3.bf16.msra.mxu1 %v2182_v0  ;;  %v1038_v0 = vld [vmem:[%s3584_s5 + $0x3f8] sm:$0xff] }
  0xb2   :  { %2185 = vmatprep.subr.bf16.mxu1 %v2184_v1  ;;  %v2204_v45 = vpack.c.bf16 %v1038_v0, %v1037_v62  ;;  %v1022_v1 = vld [vmem:[%s3584_s5 + $0x378] sm:$0xff] }
  0xb3   :  { %2159 = vmatpush3.bf16.msra.mxu0 %v2158_v18  ;;  %v2206_v2 = vpack.c.bf16 %v1022_v1, %v1021_v10 }
  0xb4   :  { %2161 = vmatprep.subr.bf16.mxu0 %v2160_v21  ;;  %v1402_v21 = vld [vmem:[%s3583_s4] ss:$0 sm:$0xff] }
  0xb5   :  { %2187 = vmatpush3.bf16.msra.mxu1 %v2186_v11 }
  0xb6   :  { %2189 = vmatprep.subr.bf16.mxu1 %v2188_v15 }
  0xb7   :  { %2163 = vmatpush3.bf16.msra.mxu0 %v2162_v28 }
  0xb8   :  { %2165 = vmatprep.subr.bf16.mxu0 %v2164_v32 }
  0xb9   :  { %2191 = vmatpush3.bf16.msra.mxu1 %v2190_v24 }
  0xba   :  { %2193 = vmatprep.subr.bf16.mxu1 %v2192_v25 }
  0xbb   :  { %2167 = vmatpush3.bf16.msra.mxu0 %v2166_v36 }
  0xbc   :  { %2169 = vmatprep.subr.bf16.mxu0 %v2168_v47 }
  0xbd   :  { %2195 = vmatpush3.bf16.msra.mxu1 %v2194_v29 }
  0xbe   :  { %2197 = vmatprep.subr.bf16.mxu1 %v2196_v39 }
  0xbf   :  { %2171 = vmatpush3.bf16.msra.mxu0 %v2170_v51 }
  0xc0   :  { %2173 = vmatprep.subr.bf16.mxu0 %v2172_v42 }
  0xc1   :  { %2199 = vmatpush3.bf16.msra.mxu1 %v2198_v43 }
  0xc2   :  { %2201 = vmatprep.subr.bf16.mxu1 %v2200_v54 }
  0xc3   :  { %2175 = vmatpush3.bf16.msra.mxu0 %v2174_v50 }
  0xc5   :  { %2203 = vmatpush3.bf16.msra.mxu1 %v2202_v33 }
  0xc6   :  { %2205 = vmatprep.subr.bf16.mxu1 %v2204_v45  ;;  %1251 = vmatmul.mubr.f32.vlgmr.msra.gmra.mrb[10].mxu0 %v2571_v60 }
  0xc9   :  { %2207 = vmatpush3.bf16.msra.mxu1 %v2206_v2 }
  0xcc   :  { %1321 = vmatmul.mubr.f32.vlgmr.msra.gmra.mrb[10].mxu1 %v2579_v63 }
  0xf9   :  { %v1436_v3 = vpop.f32.mrb[0].mxu0 }
  0xfa   :  { %v1437_v5 = vpop.f32.mrb[1].mxu0 }
  0xfb   :  { %v1471_v13 = vpop.f32.mrb[0].mxu1  ;;  %v1438_v6 = vadd.f32 %v1437_v5, %v1436_v3 }
  0xfc   :  { %v1472_v7 = vpop.f32.mrb[1].mxu1 }
  0xfd   :  { %v1473_v8 = vadd.f32 %v1472_v7, %v1471_v13  ;;  %v283_v9 = vadd.f32 %v1438_v6, %v1401_v4 }
  0xff   :  { %v353_v11 = vadd.f32 %v1473_v8, %v283_v9 }
 0x119   :  { %v1506_v12 = vpop.f32.mrb[2].mxu0 }
 0x11a   :  { %v1507_v14 = vpop.f32.mrb[3].mxu0 }
 0x11b   :  { %v1541_v15 = vpop.f32.mrb[2].mxu1  ;;  %v1508_v16 = vadd.f32 %v1507_v14, %v1506_v12 }
 0x11c   :  { %v1542_v17 = vpop.f32.mrb[3].mxu1 }
 0x11d   :  { %v1543_v60 = vadd.f32 %v1542_v17, %v1541_v15  ;;  %v423_v18 = vadd.f32 %v1508_v16, %v353_v11 }
 0x11f   :  { %v493_v63 = vadd.f32 %v1543_v60, %v423_v18 }
 0x121   :  { %v1327_v19 = vsel %vm1326_vm0, %v493_v63, -inf }
 0x122   :  { %1328 = vmax.xlane.f32.xlu0 %v1327_v19 }
 0x139   :  { %v1576_v20 = vpop.f32.mrb[4].mxu0 }
 0x13a   :  { %v1577_v22 = vpop.f32.mrb[5].mxu0 }
 0x13b   :  { %v1611_v23 = vpop.f32.mrb[4].mxu1  ;;  %v1578_v24 = vadd.f32 %v1577_v22, %v1576_v20 }
 0x13c   :  { %v1612_v25 = vpop.f32.mrb[5].mxu1 }
 0x13d   :  { %v1613_v26 = vadd.f32 %v1612_v25, %v1611_v23  ;;  %v698_v27 = vadd.f32 %v1578_v24, %v1402_v21 }
 0x13f   :  { %v768_v28 = vadd.f32 %v1613_v26, %v698_v27 }
 0x159   :  { %v1646_v29 = vpop.f32.mrb[6].mxu0 }
 0x15a   :  { %v1647_v30 = vpop.f32.mrb[7].mxu0 }
 0x15b   :  { %v1681_v31 = vpop.f32.mrb[6].mxu1  ;;  %v1648_v32 = vadd.f32 %v1647_v30, %v1646_v29 }
 0x15c   :  { %v1682_v34 = vpop.f32.mrb[7].mxu1 }
 0x15d   :  { %v1683_v35 = vadd.f32 %v1682_v34, %v1681_v31  ;;  %v838_v36 = vadd.f32 %v1648_v32, %v768_v28 }
 0x15f   :  { %v908_v37 = vadd.f32 %v1683_v35, %v838_v36 }
 0x161   :  { %v1340_v38 = vsel %vm1339_vm1, %v908_v37, -inf }
 0x162   :  { %1341 = vmax.xlane.f32.xlu0 %v1340_v38 }
 0x179   :  { %v1716_v39 = vpop.f32.mrb[8].mxu0 }
 0x17a   :  { %v1717_v41 = vpop.f32.mrb[9].mxu0 }
 0x17b   :  { %v1718_v43 = vadd.f32 %v1717_v41, %v1716_v39 }
 0x17d   :  { %v1113_v47 = vadd.f32 %v1718_v43, %v1403_v40 }
 0x17f   :  { %v1751_v44 = vpop.f32.mrb[8].mxu1 }
 0x180   :  { %v1752_v46 = vpop.f32.mrb[9].mxu1 }
 0x181   :  { %v1753_v48 = vadd.f32 %v1752_v46, %v1751_v44 }
 0x183   :  { %v1183_v49 = vadd.f32 %v1753_v48, %v1113_v47 }
 0x199   :  { %v1786_v54 = vpop.f32.mrb[10].mxu0 }
 0x19a   :  { %v1787_v55 = vpop.f32.mrb[11].mxu0 }
 0x19b   :  { %v1788_v56 = vadd.f32 %v1787_v55, %v1786_v54 }
 0x19d   :  { %v1253_v58 = vadd.f32 %v1788_v56, %v1183_v49 }
 0x19f   :  { %v1821_v57 = vpop.f32.mrb[10].mxu1 }
 0x1a0   :  { %v1822_v33 = vpop.f32.mrb[11].mxu1 }
 0x1a1   :  { %v1823_v59 = vadd.f32 %v1822_v33, %v1821_v57 }
 0x1a3   :  { %v1323_v42 = vadd.f32 %v1823_v59, %v1253_v58 }
 0x1a5   :  { %1353 = vst.msk [vmem:[%s3588_s9] sm:$0x3] %vm1352_vm2, %v1323_v42  ;;  %v1354_v62 = vand.u32 2147483647, %v1323_v42  ;;  %vm1361_vm3 = vcmp.ge.f32.partialorder %v1323_v42, 0.0  ;;  %s2272_s9 = smov [#allocation3]  }
 0x1a6   :  { %s1371_s14 = sshll.u32 %s2272_s9, 4  ;;  %s1372_s14 = int_to_ptr.vmem [resolvable:$true] %s1371_s14 }
 0x1a7   :  { %v1355_v0 = vsub.f32 0.0, %v1354_v62  ;;  %s2223_s15 = scalar_lea.vmem %s1372_s14, 32  ;;  %p2228_p1 = scmp.lt.s32.totalorder %s1372_s14, %s1372_s14 }
 0x1a8   :  { %p2224_p0 = scmp.ne.s32.totalorder %s1372_s14, %s2223_s15  ;;  %p2229_p2 = scmp.lt.s32.totalorder %s2223_s15, %s2223_s15 }
 0x1a9   :  { %v1356_v45 = vmul.f32 1.442695, %v1355_v0 }
 0x1aa   :  { %p2230_p3 = por %p2229_p2, %p2228_p1 }
 0x1ac   :  { %p2231_p4 = pnand %p2230_p3, %p2224_p0 }
 0x1af   :  { %v1329_v51 = vpop.xlane.xlu0 %1328 }
 0x1b0   :  { %v1330_v52 = vsub.f32 %v493_v63, %v1329_v51 }
 0x1b2   :  { %v1331_v53 = vmul.f32 1.442695, %v1330_v52 }
 0x1b4   :  { %2211 = vpow2.f32 %v1331_v53 }
 0x1b5   :  { %2213 = vpow2.f32 %v1356_v45 }
 0x1be   :  { %v2212_v61 = vpop.eup %2211 }
 0x1bf   :  { %v1333_v50 = vsel %vm1326_vm0, %v2212_v61, 0.0  ;;  %v2214_v10 = vpop.eup %2213 }
 0x1c0   :  { %1334 = vadd.xlane.f32.xlu1 %v1333_v50  ;;  %v1358_v1 = vadd.f32 1.0, %v2214_v10 }
 0x1c2   :  { %2215 = vrcp.f32 %v1358_v1 }
 0x1cc   :  { %v2216_v2 = vpop.eup %2215 }
 0x1cd   :  { %v1362_v3 = vsub.f32 1.0, %v2216_v2 }
 0x1cf   :  { %v1363_v4 = vsel %vm1361_vm3, %v2216_v2, %v1362_v3 }
 0x1d0   :  { %1364 = vst.msk [vmem:[%s3589_s10] sm:$0x3] %vm1352_vm2, %v1363_v4 }
 0x1ef   :  { %v1342_v5 = vpop.xlane.xlu0 %1341 }
 0x1f0   :  { %v1343_v13 = vsub.f32 %v908_v37, %v1342_v5 }
 0x1f2   :  { %v1344_v6 = vmul.f32 1.442695, %v1343_v13 }
 0x1f4   :  { %2217 = vpow2.f32 %v1344_v6 }
 0x1fe   :  { %v2218_v7 = vpop.eup %2217 }
 0x1ff   :  { %v1346_v8 = vsel %vm1339_vm1, %v2218_v7, 0.0 }
 0x200   :  { %1347 = vadd.xlane.f32.xlu1 %v1346_v8 }
 0x24d   :  { %v1335_v9 = vpop.xlane.xlu1 %1334 }
 0x24e   :  { %2219 = vrcp.f32 %v1335_v9 }
 0x258   :  { %v2220_v11 = vpop.eup %2219 }
 0x259   :  { %v1337_v12 = vmul.f32 %v2220_v11, %v2212_v61 }
 0x25b   :  { %1338 = vst.msk [vmem:[#allocation3] sm:$0x3] %vm1326_vm0, %v1337_v12 }
 0x25c   :  { %2234 = shalt.err (!%p2231_p4)
}
 0x25d   :  { %s2235_s17 = scalar_lea.hbm %s3586_s7, 32 }
 0x25e   :  { %p2236_p5 = scmp.ne.s32.totalorder %s3586_s7, %s2235_s17  ;;  %p2239_p6 = scmp.lt.u32.totalorder %s2235_s17, %s3586_s7 }
 0x260   :  { %p2241_p7 = pnand %p2239_p6, %p2236_p5 }
 0x262   :  { %2244 = shalt.err (!%p2241_p7)
}
 0x263   :  { %1374 = dma.vmem_to_hbm [thread:$0]  %s1372_s14, 32, %s3586_s7, [#allocation4]  }
 0x264   :  { %s2273_s22 = smov [#allocation5]  }
 0x265   :  { %s1381_s6 = sshll.u32 %s2273_s22, 4  ;;  %s1382_s6 = int_to_ptr.vmem [resolvable:$true] %s1381_s6 }
 0x266   :  { %s2245_s23 = scalar_lea.vmem %s1382_s6, 32  ;;  %p2250_p9 = scmp.lt.s32.totalorder %s1382_s6, %s1382_s6 }
 0x267   :  { %p2246_p8 = scmp.ne.s32.totalorder %s1382_s6, %s2245_s23  ;;  %p2251_p10 = scmp.lt.s32.totalorder %s2245_s23, %s2245_s23 }
 0x269   :  { %p2252_p11 = por %p2251_p10, %p2250_p9 }
 0x26b   :  { %p2253_p12 = pnand %p2252_p11, %p2246_p8 }
 0x28d   :  { %v1348_v14 = vpop.xlane.xlu1 %1347 }
 0x28e   :  { %2221 = vrcp.f32 %v1348_v14 }
 0x298   :  { %v2222_v15 = vpop.eup %2221 }
 0x299   :  { %v1350_v16 = vmul.f32 %v2222_v15, %v2218_v7 }
 0x29b   :  { %1351 = vst.msk [vmem:[#allocation5] sm:$0x3] %vm1339_vm1, %v1350_v16 }
 0x29c   :  { %2256 = shalt.err (!%p2253_p12)
}
 0x29d   :  { %s2257_s7 = scalar_lea.hbm %s3587_s8, 32 }
 0x29e   :  { %p2258_p13 = scmp.ne.s32.totalorder %s3587_s8, %s2257_s7  ;;  %p2261_p0 = scmp.lt.u32.totalorder %s2257_s7, %s3587_s8 }
 0x2a0   :  { %p2263_p1 = pnand %p2261_p0, %p2258_p13 }
 0x2a2   :  { %2266 = shalt.err (!%p2263_p1)
}
 0x2a3   :  { %1384 = dma.vmem_to_hbm [thread:$0]  %s1382_s6, 32, %s3587_s8, [#allocation6]  }
 0x2a4   :  { %2267 = dma.done.wait [#allocation4], 32  }
 0x2a5   :  { %2268 = vsyncadd [#allocation4], 4294967264 }
 0x2a6   :  { %2269 = dma.done.wait [#allocation6], 32  }
 0x2a7   :  { %2270 = vsyncadd [#allocation6], 4294967264 }
 0x2a8   :  { %1399 = vsyncpa [#allocation4], 1 }
 0x2a9   :  { %1400 = vsyncpa [#allocation6], 1 }

</bundles_post_ra>
